<compile_context>
chip_gen: v6e
topology: v6e:2x2x1
jax: 0.10.0
libtpu: 0.0.40
codegen_flags: <defaults>
</compile_context>

<pallas_src>
import jax
import jax.numpy as jnp
from jax import lax
from jax.experimental import pallas as pl
from jax.experimental.pallas import tpu as pltpu

FEAT_STRIDE = 16
RATIOS = (0.5, 1.0, 2.0)
ANCHOR_SCALES = (8.0, 16.0, 32.0)
N_ANCHOR = len(RATIOS) * len(ANCHOR_SCALES)   # 9
C_IN = 512
C_MID = 512
N_LOC = N_ANCHOR * 4                          # 36
N_SCORE = N_ANCHOR * 2                        # 18
N_HEAD = 128                                  # [loc | score | zero pad] -> lane dense
TILE_M = 256  # flattened-row tile; 256 suits v6e/v7x 256x256 MXUs, use 128 on v5e.


def _round_up(v, m):
    return ((v + m - 1) // m) * m


# ---------------------------------------------------------------------------
# Pallas kernel: fused RPN head on a tile of TM flattened spatial rows.
#   patch  = im2col tile (built in VMEM scratch, bf16)
#   hidden = relu(patch @ W1 + b1)            (one big MXU matmul, f32 accum)
#   out    = hidden @ [Wloc|Wscore|0] + bias  (lane-dense 128-wide output)
# ---------------------------------------------------------------------------
def _make_rpn_kernel(tm, wq, cin, cmid):
    def kernel(xflat_ref, w1_ref, b1_ref, wh_ref, bh_ref, out_ref, patch_ref):
        # xflat_ref: (r_in, cin) f32   -- whole padded image, VMEM resident
        # w1_ref:    (9*cin, cmid) bf16
        # patch_ref: (tm, 9*cin) bf16 scratch
        r0 = pl.multiple_of(pl.program_id(1) * tm, tm)

        # Tap (ky, kx) of flattened output row r lives at input row
        # r + ky*wq + kx.  Slab loads use an 8-aligned dynamic start; the
        # 0..2 residual shift is a static slice of the slab value.
        for ky in range(3):
            off = ky * wq
            base = (off // 8) * 8           # 8-aligned static part
            s = off - base                  # 0..7 residual
            slab = xflat_ref[pl.ds(r0 + base, tm + 16), :]   # (tm+16, cin) f32
            for kx in range(3):
                k = ky * 3 + kx
                tap = slab[s + kx:s + kx + tm, :]
                patch_ref[:, k * cin:(k + 1) * cin] = tap.astype(jnp.bfloat16)

        hidden = jnp.dot(patch_ref[...], w1_ref[...],
                         preferred_element_type=jnp.float32)
        hidden = jnp.maximum(hidden + b1_ref[...], 0.0)       # bias + ReLU in f32
        out_ref[...] = (jnp.dot(hidden.astype(jnp.bfloat16), wh_ref[...],
                                preferred_element_type=jnp.float32)
                        + bh_ref[...])
    return kernel


def _vmem_budget_bytes(r_in, tm, cin, cmid):
    xflat = 2 * r_in * cin * 4               # f32 resident feature slab, 2 buffers
    w1 = 2 * 9 * cin * cmid * 2              # bf16 conv weight
    wh = 2 * cmid * N_HEAD * 2
    bias = 2 * (cmid + N_HEAD) * 4
    out = 2 * tm * N_HEAD * 4
    patch = tm * 9 * cin * 2                 # im2col scratch
    temps = 2 * (tm + 16) * cin * 4 + 3 * tm * cmid * 4
    total = xflat + w1 + wh + bias + out + patch + temps + (8 << 20)
    # cap at 48 MiB so it also fits v7x's 64 MiB physical VMEM
    return int(min(max(total, 32 << 20), 48 << 20))


# ---------------------------------------------------------------------------
# Plain-JAX glue: anchors + parameter init
# ---------------------------------------------------------------------------
def generate_anchor_base():
    ratios = jnp.asarray(RATIOS, jnp.float32)
    scales = jnp.asarray(ANCHOR_SCALES, jnp.float32)
    py = px = FEAT_STRIDE / 2.0
    h = FEAT_STRIDE * scales[None, :] * jnp.sqrt(ratios[:, None])        # (3,3)
    w = FEAT_STRIDE * scales[None, :] * jnp.sqrt(1.0 / ratios[:, None])  # (3,3)
    h = h.reshape(-1)
    w = w.reshape(-1)
    base = jnp.stack([px - w / 2.0, py - h / 2.0,
                      px + w / 2.0, py + h / 2.0], axis=1)
    return base.astype(jnp.float32)                                      # (9, 4)


def create_anchor_all(anchor_base, feature_h, feature_w):
    shift_y = jnp.arange(0, feature_h * FEAT_STRIDE, FEAT_STRIDE, dtype=jnp.float32)
    shift_x = jnp.arange(0, feature_w * FEAT_STRIDE, FEAT_STRIDE, dtype=jnp.float32)
    sy, sx = jnp.meshgrid(shift_y, shift_x, indexing="ij")   # torch default 'ij'
    shift = jnp.stack([sx.reshape(-1), sy.reshape(-1)], axis=1)
    shift = jnp.tile(shift, (1, 2))                          # (hw, 4) [x,y,x,y]
    anchor = anchor_base[None, :, :] + shift[:, None, :]     # (hw, 9, 4)
    return anchor.reshape(-1, 4)


def init_params(key, c_in=C_IN, c_mid=C_MID):
    # normal_init(conv, 0, 0.01): weights ~ N(0, 0.01), biases zero.
    k1, k2, k3 = jax.random.split(key, 3)
    w1_oihw = 0.01 * jax.random.normal(k1, (c_mid, c_in, 3, 3), jnp.float32)
    # matmul layout: rows ordered (ky, kx, cin), columns = cout
    w1 = jnp.transpose(w1_oihw, (2, 3, 1, 0)).reshape(9 * c_in, c_mid)
    wloc_oi = 0.01 * jax.random.normal(k2, (N_LOC, c_mid), jnp.float32)
    wscore_oi = 0.01 * jax.random.normal(k3, (N_SCORE, c_mid), jnp.float32)
    whead = jnp.concatenate(
        [wloc_oi.T, wscore_oi.T,
         jnp.zeros((c_mid, N_HEAD - N_LOC - N_SCORE), jnp.float32)], axis=1)
    return dict(
        w1=w1,
        b1=jnp.zeros((1, c_mid), jnp.float32),
        whead=whead,                                   # (512, 128) [loc|score|0]
        bhead=jnp.zeros((1, N_HEAD), jnp.float32),
        anchor_base=generate_anchor_base(),
    )


# ---------------------------------------------------------------------------
# Forward pass (mirrors RPN.forward)
# ---------------------------------------------------------------------------
@jax.jit
def rpn_forward(x_nchw, params, img_size, scale=1.0):
    """Returns (rpn_locs, rpn_scores, rpn_fg_scores, anchors)."""
    b, c, h, w = x_nchw.shape
    anchor = create_anchor_all(params["anchor_base"], h, w)         # (h*w*9, 4)

    # layout: NCHW -> zero-padded ("same" conv), spatially flattened NHWC
    wq = w + 2                                   # padded width
    rows = h * wq                                # output rows per image (w-padded raster)
    tm = min(TILE_M, _round_up(rows, 8))
    n_tiles = pl.cdiv(rows, tm)
    r_out = n_tiles * tm
    r_in = _round_up(r_out + 2 * wq + 16, 8)     # halo + slab over-read head-room

    x_nhwc = jnp.transpose(x_nchw, (0, 2, 3, 1)).astype(jnp.float32)
    xz = jnp.pad(x_nhwc, ((0, 0), (1, 1), (1, 1), (0, 0)))          # (b, h+2, wq, c)
    xflat = xz.reshape(b, (h + 2) * wq, c)
    xflat = jnp.pad(xflat, ((0, 0), (0, r_in - (h + 2) * wq), (0, 0)))

    w1 = params["w1"].astype(jnp.bfloat16)        # (9*C, 512)
    wh = params["whead"].astype(jnp.bfloat16)     # (512, 128)
    b1 = params["b1"]                             # (1, 512) f32
    bh = params["bhead"]                          # (1, 128) f32

    out = pl.pallas_call(
        _make_rpn_kernel(tm, wq, c, C_MID),
        grid=(b, n_tiles),
        in_specs=[
            pl.BlockSpec((None, r_in, c), lambda bi, ti: (bi, 0, 0)),   # per-image slab
            pl.BlockSpec((9 * c, C_MID), lambda bi, ti: (0, 0)),        # resident weights
            pl.BlockSpec((1, C_MID), lambda bi, ti: (0, 0)),
            pl.BlockSpec((C_MID, N_HEAD), lambda bi, ti: (0, 0)),
            pl.BlockSpec((1, N_HEAD), lambda bi, ti: (0, 0)),
        ],
        out_specs=pl.BlockSpec((None, tm, N_HEAD), lambda bi, ti: (bi, ti, 0)),
        out_shape=jax.ShapeDtypeStruct((b, r_out, N_HEAD), jnp.float32),
        scratch_shapes=[pltpu.VMEM((tm, 9 * c), jnp.bfloat16)],
        compiler_params=pltpu.CompilerParams(
            dimension_semantics=("parallel", "parallel"),
            vmem_limit_bytes=_vmem_budget_bytes(r_in, tm, c, C_MID)),
    )(xflat, w1, b1, wh, bh)

    # unpack the lane-dense head slab back into torch-style outputs
    out = out[:, :rows, :].reshape(b, h, wq, N_HEAD)[:, :, :w, :]   # (b,h,w,128)
    rpn_locs = out[..., :N_LOC].reshape(b, h * w * N_ANCHOR, 4)
    score_hw = out[..., N_LOC:N_LOC + N_SCORE]                      # (b,h,w,18)
    rpn_scores = score_hw.reshape(b, h * w * N_ANCHOR, 2)
    sm = jax.nn.softmax(score_hw.reshape(b, h, w, N_ANCHOR, 2), axis=4)
    rpn_fg_scores = sm[..., 1].reshape(b, -1)

    # TODO(synk): RoICreator (proposal decode + clip-to-img_size + top-k + NMS)
    # is not defined in the reference source, so `rois` are not produced.
    return rpn_locs, rpn_scores, rpn_fg_scores, anchor


# ---------------------------------------------------------------------------
# Pure-JAX reference (XLA convs) for a numerical cross-check
# ---------------------------------------------------------------------------
def rpn_reference(x_nchw, params):
    b = x_nchw.shape[0]
    w1_hwio = params["w1"].reshape(3, 3, C_IN, C_MID)          # (ky,kx,ci,co)
    hid = lax.conv_general_dilated(
        x_nchw, w1_hwio, window_strides=(1, 1), padding="SAME",
        dimension_numbers=("NCHW", "HWIO", "NCHW"))
    hid = jnp.maximum(hid + params["b1"].reshape(1, C_MID, 1, 1), 0.0)
    wh_hwio = params["whead"].reshape(1, 1, C_MID, N_HEAD)
    head = lax.conv_general_dilated(
        hid, wh_hwio, window_strides=(1, 1), padding="SAME",
        dimension_numbers=("NCHW", "HWIO", "NCHW"))
    head = head + params["bhead"].reshape(1, N_HEAD, 1, 1)
    head = jnp.transpose(head, (0, 2, 3, 1))                   # (b,h,w,128)
    locs = head[..., :N_LOC].reshape(b, -1, 4)
    scores = head[..., N_LOC:N_LOC + N_SCORE].reshape(b, -1, 2)
    return locs, scores


if __name__ == "__main__":
    key = jax.random.PRNGKey(0)
    pkey, xkey = jax.random.split(key)
    params = init_params(pkey)

    # module hardcodes 512 input channels; keep spatial size small
    B, C, H, W = 2, C_IN, 8, 8
    x = jax.random.normal(xkey, (B, C, H, W), jnp.float32)
    img_size = (H * FEAT_STRIDE, W * FEAT_STRIDE)              # (128, 128)

    rpn_locs, rpn_scores, rpn_fg_scores, anchors = rpn_forward(x, params, img_size)
    jax.block_until_ready((rpn_locs, rpn_scores, rpn_fg_scores, anchors))

    assert rpn_locs.shape == (B, H * W * N_ANCHOR, 4)
    assert rpn_scores.shape == (B, H * W * N_ANCHOR, 2)
    assert rpn_fg_scores.shape == (B, H * W * N_ANCHOR)
    assert anchors.shape == (H * W * N_ANCHOR, 4)

    # numerical cross-check vs plain-JAX conv reference (bf16 MXU tolerance)
    ref_locs, ref_scores = rpn_reference(x, params)
    locs_err = float(jnp.max(jnp.abs(rpn_locs - ref_locs)))
    scores_err = float(jnp.max(jnp.abs(rpn_scores - ref_scores)))
    assert locs_err < 2e-2 and scores_err < 2e-2, (locs_err, scores_err)

    print("KERNEL_OK")
</pallas_src>

<mosaic_0001>
module attributes {stable_mosaic.version = 11 : i64} {
  func.func @kernel(%arg0: i32, %arg1: i32, %arg2: memref<1x120x512xf32, #tpu.memory_space<vmem>>, %arg3: memref<4608x512xbf16, #tpu.memory_space<vmem>>, %arg4: memref<1x512xf32, #tpu.memory_space<vmem>>, %arg5: memref<512x128xbf16, #tpu.memory_space<vmem>>, %arg6: memref<1x128xf32, #tpu.memory_space<vmem>>, %arg7: memref<1x80x128xf32, #tpu.memory_space<vmem>>, %arg8: memref<80x4608xbf16, #tpu.memory_space<vmem>>) attributes {dimension_semantics = [#tpu.dimension_semantics<parallel>, #tpu.dimension_semantics<parallel>], iteration_bounds = array<i64: 2, 1>, scalar_prefetch = 0 : i64, scratch_operands = 1 : i64, tpu.core_type = #tpu.core_type<tc>, window_params = [{transform_indices = @transform_0, window_bounds = array<i64: 1, 120, 512>}, {pipeline_mode = #tpu.pipeline_mode<synchronous>, transform_indices = @transform_1, window_bounds = array<i64: 4608, 512>}, {pipeline_mode = #tpu.pipeline_mode<synchronous>, transform_indices = @transform_2, window_bounds = array<i64: 1, 512>}, {pipeline_mode = #tpu.pipeline_mode<synchronous>, transform_indices = @transform_3, window_bounds = array<i64: 512, 128>}, {pipeline_mode = #tpu.pipeline_mode<synchronous>, transform_indices = @transform_4, window_bounds = array<i64: 1, 128>}, {transform_indices = @transform_5, window_bounds = array<i64: 1, 80, 128>}]} {
    %c80_i32 = arith.constant 80 : i32
    %0 = arith.muli %arg1, %c80_i32 : i32
    %1 = tpu.assume_multiple %0, 80 : i32
    %c0_i32 = arith.constant 0 : i32
    %2 = arith.addi %1, %c0_i32 : i32
    %c0 = arith.constant 0 : index
    %3 = arith.index_cast %2 : i32 to index
    %c0_0 = arith.constant 0 : index
    %4 = vector.load %arg2[%c0, %3, %c0_0] : memref<1x120x512xf32, #tpu.memory_space<vmem>>, vector<1x96x512xf32>
    %5 = vector.shape_cast %4 : vector<1x96x512xf32> to vector<96x512xf32>
    %6 = vector.extract_strided_slice %5 {offsets = [0, 0], sizes = [80, 512], strides = [1, 1]} : vector<96x512xf32> to vector<80x512xf32>
    %7 = arith.truncf %6 : vector<80x512xf32> to vector<80x512xbf16>
    %c0_1 = arith.constant 0 : index
    %c0_2 = arith.constant 0 : index
    %8 = vector.load %arg8[%c0_1, %c0_2] : memref<80x4608xbf16, #tpu.memory_space<vmem>>, vector<80x512xbf16>
    tpu.vector_store %arg8[%c0_1, %c0_2], %7 {strides = array<i32>} : memref<80x4608xbf16, #tpu.memory_space<vmem>>, vector<80x512xbf16>,
    %9 = vector.extract_strided_slice %5 {offsets = [1, 0], sizes = [80, 512], strides = [1, 1]} : vector<96x512xf32> to vector<80x512xf32>
    %10 = arith.truncf %9 : vector<80x512xf32> to vector<80x512xbf16>
    %c0_3 = arith.constant 0 : index
    %c512 = arith.constant 512 : index
    %11 = vector.load %arg8[%c0_3, %c512] : memref<80x4608xbf16, #tpu.memory_space<vmem>>, vector<80x512xbf16>
    tpu.vector_store %arg8[%c0_3, %c512], %10 {strides = array<i32>} : memref<80x4608xbf16, #tpu.memory_space<vmem>>, vector<80x512xbf16>,
    %12 = vector.extract_strided_slice %5 {offsets = [2, 0], sizes = [80, 512], strides = [1, 1]} : vector<96x512xf32> to vector<80x512xf32>
    %13 = arith.truncf %12 : vector<80x512xf32> to vector<80x512xbf16>
    %c0_4 = arith.constant 0 : index
    %c1024 = arith.constant 1024 : index
    %14 = vector.load %arg8[%c0_4, %c1024] : memref<80x4608xbf16, #tpu.memory_space<vmem>>, vector<80x512xbf16>
    tpu.vector_store %arg8[%c0_4, %c1024], %13 {strides = array<i32>} : memref<80x4608xbf16, #tpu.memory_space<vmem>>, vector<80x512xbf16>,
    %c8_i32 = arith.constant 8 : i32
    %15 = arith.addi %1, %c8_i32 : i32
    %c0_5 = arith.constant 0 : index
    %16 = arith.index_cast %15 : i32 to index
    %c0_6 = arith.constant 0 : index
    %17 = vector.load %arg2[%c0_5, %16, %c0_6] : memref<1x120x512xf32, #tpu.memory_space<vmem>>, vector<1x96x512xf32>
    %18 = vector.shape_cast %17 : vector<1x96x512xf32> to vector<96x512xf32>
    %19 = vector.extract_strided_slice %18 {offsets = [2, 0], sizes = [80, 512], strides = [1, 1]} : vector<96x512xf32> to vector<80x512xf32>
    %20 = arith.truncf %19 : vector<80x512xf32> to vector<80x512xbf16>
    %c0_7 = arith.constant 0 : index
    %c1536 = arith.constant 1536 : index
    %21 = vector.load %arg8[%c0_7, %c1536] : memref<80x4608xbf16, #tpu.memory_space<vmem>>, vector<80x512xbf16>
    tpu.vector_store %arg8[%c0_7, %c1536], %20 {strides = array<i32>} : memref<80x4608xbf16, #tpu.memory_space<vmem>>, vector<80x512xbf16>,
    %22 = vector.extract_strided_slice %18 {offsets = [3, 0], sizes = [80, 512], strides = [1, 1]} : vector<96x512xf32> to vector<80x512xf32>
    %23 = arith.truncf %22 : vector<80x512xf32> to vector<80x512xbf16>
    %c0_8 = arith.constant 0 : index
    %c2048 = arith.constant 2048 : index
    %24 = vector.load %arg8[%c0_8, %c2048] : memref<80x4608xbf16, #tpu.memory_space<vmem>>, vector<80x512xbf16>
    tpu.vector_store %arg8[%c0_8, %c2048], %23 {strides = array<i32>} : memref<80x4608xbf16, #tpu.memory_space<vmem>>, vector<80x512xbf16>,
    %25 = vector.extract_strided_slice %18 {offsets = [4, 0], sizes = [80, 512], strides = [1, 1]} : vector<96x512xf32> to vector<80x512xf32>
    %26 = arith.truncf %25 : vector<80x512xf32> to vector<80x512xbf16>
    %c0_9 = arith.constant 0 : index
    %c2560 = arith.constant 2560 : index
    %27 = vector.load %arg8[%c0_9, %c2560] : memref<80x4608xbf16, #tpu.memory_space<vmem>>, vector<80x512xbf16>
    tpu.vector_store %arg8[%c0_9, %c2560], %26 {strides = array<i32>} : memref<80x4608xbf16, #tpu.memory_space<vmem>>, vector<80x512xbf16>,
    %c16_i32 = arith.constant 16 : i32
    %28 = arith.addi %1, %c16_i32 : i32
    %c0_10 = arith.constant 0 : index
    %29 = arith.index_cast %28 : i32 to index
    %c0_11 = arith.constant 0 : index
    %30 = vector.load %arg2[%c0_10, %29, %c0_11] : memref<1x120x512xf32, #tpu.memory_space<vmem>>, vector<1x96x512xf32>
    %31 = vector.shape_cast %30 : vector<1x96x512xf32> to vector<96x512xf32>
    %32 = vector.extract_strided_slice %31 {offsets = [4, 0], sizes = [80, 512], strides = [1, 1]} : vector<96x512xf32> to vector<80x512xf32>
    %33 = arith.truncf %32 : vector<80x512xf32> to vector<80x512xbf16>
    %c0_12 = arith.constant 0 : index
    %c3072 = arith.constant 3072 : index
    %34 = vector.load %arg8[%c0_12, %c3072] : memref<80x4608xbf16, #tpu.memory_space<vmem>>, vector<80x512xbf16>
    tpu.vector_store %arg8[%c0_12, %c3072], %33 {strides = array<i32>} : memref<80x4608xbf16, #tpu.memory_space<vmem>>, vector<80x512xbf16>,
    %35 = vector.extract_strided_slice %31 {offsets = [5, 0], sizes = [80, 512], strides = [1, 1]} : vector<96x512xf32> to vector<80x512xf32>
    %36 = arith.truncf %35 : vector<80x512xf32> to vector<80x512xbf16>
    %c0_13 = arith.constant 0 : index
    %c3584 = arith.constant 3584 : index
    %37 = vector.load %arg8[%c0_13, %c3584] : memref<80x4608xbf16, #tpu.memory_space<vmem>>, vector<80x512xbf16>
    tpu.vector_store %arg8[%c0_13, %c3584], %36 {strides = array<i32>} : memref<80x4608xbf16, #tpu.memory_space<vmem>>, vector<80x512xbf16>,
    %38 = vector.extract_strided_slice %31 {offsets = [6, 0], sizes = [80, 512], strides = [1, 1]} : vector<96x512xf32> to vector<80x512xf32>
    %39 = arith.truncf %38 : vector<80x512xf32> to vector<80x512xbf16>
    %c0_14 = arith.constant 0 : index
    %c4096 = arith.constant 4096 : index
    %40 = vector.load %arg8[%c0_14, %c4096] : memref<80x4608xbf16, #tpu.memory_space<vmem>>, vector<80x512xbf16>
    tpu.vector_store %arg8[%c0_14, %c4096], %39 {strides = array<i32>} : memref<80x4608xbf16, #tpu.memory_space<vmem>>, vector<80x512xbf16>,
    %c0_15 = arith.constant 0 : index
    %c0_16 = arith.constant 0 : index
    %41 = vector.load %arg8[%c0_15, %c0_16] : memref<80x4608xbf16, #tpu.memory_space<vmem>>, vector<80x4608xbf16>
    %c0_17 = arith.constant 0 : index
    %c0_18 = arith.constant 0 : index
    %42 = vector.load %arg3[%c0_17, %c0_18] : memref<4608x512xbf16, #tpu.memory_space<vmem>>, vector<4608x512xbf16>
    %cst = arith.constant dense<0.000000e+00> : vector<80x512xf32>
    %43 = tpu.matmul %41, %42, %cst {dimension_numbers = #tpu.dot_dimension_numbers<[1], [0], [0], [1], [0, 0, 1, 1], [], []>} : vector<80x4608xbf16>, vector<4608x512xbf16>, vector<80x512xf32> -> vector<80x512xf32>
    %c0_19 = arith.constant 0 : index
    %c0_20 = arith.constant 0 : index
    %44 = vector.load %arg4[%c0_19, %c0_20] : memref<1x512xf32, #tpu.memory_space<vmem>>, vector<1x512xf32>
    %45 = vector.broadcast %44 : vector<1x512xf32> to vector<80x512xf32>
    %46 = arith.addf %43, %45 : vector<80x512xf32>
    %cst_21 = arith.constant 0.000000e+00 : f32
    %47 = vector.broadcast %cst_21 : f32 to vector<80x512xf32>
    %48 = arith.maximumf %46, %47 : vector<80x512xf32>
    %49 = arith.truncf %48 : vector<80x512xf32> to vector<80x512xbf16>
    %c0_22 = arith.constant 0 : index
    %c0_23 = arith.constant 0 : index
    %50 = vector.load %arg5[%c0_22, %c0_23] : memref<512x128xbf16, #tpu.memory_space<vmem>>, vector<512x128xbf16>
    %cst_24 = arith.constant dense<0.000000e+00> : vector<80x128xf32>
    %51 = tpu.matmul %49, %50, %cst_24 {dimension_numbers = #tpu.dot_dimension_numbers<[1], [0], [0], [1], [0, 0, 1, 1], [], []>} : vector<80x512xbf16>, vector<512x128xbf16>, vector<80x128xf32> -> vector<80x128xf32>
    %c0_25 = arith.constant 0 : index
    %c0_26 = arith.constant 0 : index
    %52 = vector.load %arg6[%c0_25, %c0_26] : memref<1x128xf32, #tpu.memory_space<vmem>>, vector<1x128xf32>
    %53 = vector.broadcast %52 : vector<1x128xf32> to vector<80x128xf32>
    %54 = arith.addf %51, %53 : vector<80x128xf32>
    %c0_27 = arith.constant 0 : index
    %c0_28 = arith.constant 0 : index
    %c0_29 = arith.constant 0 : index
    %55 = vector.load %arg7[%c0_27, %c0_28, %c0_29] : memref<1x80x128xf32, #tpu.memory_space<vmem>>, vector<1x80x128xf32>
    %56 = vector.shape_cast %55 : vector<1x80x128xf32> to vector<80x128xf32>
    %57 = vector.shape_cast %54 : vector<80x128xf32> to vector<1x80x128xf32>
    tpu.vector_store %arg7[%c0_27, %c0_28, %c0_29], %57 {strides = array<i32>} : memref<1x80x128xf32, #tpu.memory_space<vmem>>, vector<1x80x128xf32>,
    return
  }
  func.func @transform_0(%arg0: i32, %arg1: i32) -> (i32, i32, i32) {
    %c0_i32 = arith.constant 0 : i32
    %c0_i32_0 = arith.constant 0 : i32
    %c0_i32_1 = arith.constant 0 : i32
    return %arg0, %c0_i32, %c0_i32_0 : i32, i32, i32
  }
  func.func @transform_1(%arg0: i32, %arg1: i32) -> (i32, i32) {
    %c0_i32 = arith.constant 0 : i32
    %c0_i32_0 = arith.constant 0 : i32
    %c0_i32_1 = arith.constant 0 : i32
    return %c0_i32, %c0_i32_0 : i32, i32
  }
  func.func @transform_2(%arg0: i32, %arg1: i32) -> (i32, i32) {
    %c0_i32 = arith.constant 0 : i32
    %c0_i32_0 = arith.constant 0 : i32
    %c0_i32_1 = arith.constant 0 : i32
    return %c0_i32, %c0_i32_0 : i32, i32
  }
  func.func @transform_3(%arg0: i32, %arg1: i32) -> (i32, i32) {
    %c0_i32 = arith.constant 0 : i32
    %c0_i32_0 = arith.constant 0 : i32
    %c0_i32_1 = arith.constant 0 : i32
    return %c0_i32, %c0_i32_0 : i32, i32
  }
  func.func @transform_4(%arg0: i32, %arg1: i32) -> (i32, i32) {
    %c0_i32 = arith.constant 0 : i32
    %c0_i32_0 = arith.constant 0 : i32
    %c0_i32_1 = arith.constant 0 : i32
    return %c0_i32, %c0_i32_0 : i32, i32
  }
  func.func @transform_5(%arg0: i32, %arg1: i32) -> (i32, i32, i32) {
    %c0_i32 = arith.constant 0 : i32
    %c0_i32_0 = arith.constant 0 : i32
    return %arg0, %arg1, %c0_i32 : i32, i32, i32
  }
}

</mosaic_0001>

<bundles_post_ra>
// kernel: squeeze.1
= control target key start
LH: loop header
LB: loop body
LE: loop exit
PB: predicated region body
PF: predicated region fallthrough
CT: control target
= control target key end

     0   :  { %vm6_vm0 = vcmask 1041409   ;;  %vm22_vm1 = vcmask 15360   ;;  %vm65_vm2 = vcmask 48128   ;;  %vm43_vm3 = vcmask 31744   ;;  %s1002_s24 = smov 126   ;;  %s1003_s6 = smov 122   ;;  %s1556_s0 = inlined_call_operand.vmem [shape: f32[2,8,8,9,1], index: 0, kind: input, shape index: {}]   ;;  %s1557_s1 = inlined_call_operand.hbm [shape: f32[2,576], index: 1, kind: output, shape index: {}]  }
   0x1   :  { %v782_v0 = vld [vmem:[%s1556_s0 + $0xe] sm:$0x1]   ;;  %v790_v6 = vld [vmem:[%s1556_s0 + $0x2a] sm:$0x1]   ;;  %v786_v12 = vld [vmem:[%s1556_s0 + $0x1c] sm:$0x1]  }
   0x2   :  { %v783_v1 = vld [vmem:[%s1556_s0 + $0x4d] sm:$0x2]   ;;  %v791_v7 = vld [vmem:[%s1556_s0 + $0x69] sm:$0x2]   ;;  %v787_v14 = vld [vmem:[%s1556_s0 + $0x5b] sm:$0x2]  }
   0x3   :  { %v15_v2 = vsel %vm6_vm0, %v783_v1, %v782_v0  ;;  %v784_v3 = vld [vmem:[%s1556_s0 + $0xe] sm:$0x1]   ;;  %v792_v8 = vld [vmem:[%s1556_s0 + $0x2a] sm:$0x1]   ;;  %v58_v10 = vsel %vm6_vm0, %v791_v7, %v790_v6  ;;  %v788_v15 = vld [vmem:[%s1556_s0 + $0x1c] sm:$0x1]   ;;  %v36_v18 = vsel %vm6_vm0, %v787_v14, %v786_v12 }
   0x4   :  { %v785_v4 = vld [vmem:[%s1556_s0 + $0x4d] sm:$0x2]   ;;  %v793_v11 = vld [vmem:[%s1556_s0 + $0x69] sm:$0x2]   ;;  %v789_v16 = vld [vmem:[%s1556_s0 + $0x5b] sm:$0x2]  }
   0x5   :  { %v21_v5 = vsel %vm6_vm0, %v785_v4, %v784_v3  ;;  %v64_v13 = vsel %vm6_vm0, %v793_v11, %v792_v8  ;;  %v42_v19 = vsel %vm6_vm0, %v789_v16, %v788_v15  ;;  %v794_v20 = vld [vmem:[%s1556_s0 + $0x38] sm:$0x1]   ;;  %vm87_vm4 = vcmask 64512   ;;  %v798_v27 = vld [vmem:[%s1556_s0 + $0xd] sm:$0x1]   ;;  %s1004_s15 = smov 124  }
   0x6   :  { %v23_v9 = vsel %vm22_vm1, %v21_v5, %v15_v2  ;;  %v66_v17 = vsel %vm65_vm2, %v64_v13, %v58_v10  ;;  %v795_v21 = vld [vmem:[%s1556_s0 + $0x77] sm:$0x2]   ;;  %v44_v22 = vsel %vm43_vm3, %v42_v19, %v36_v18  ;;  %v799_v28 = vld [vmem:[%s1556_s0 + $0x4c] sm:$0x2]   ;;  %v800_v30 = vld [vmem:[%s1556_s0 + $0x1b] sm:$0x1]  }
   0x7   :  { %24 = vrot.lane.b32.xlu0 %v23_v9, %s1002_s24  ;;  %67 = vrot.lane.b32.xlu1 %v66_v17, %s1003_s6  ;;  %v80_v23 = vsel %vm6_vm0, %v795_v21, %v794_v20  ;;  %v796_v24 = vld [vmem:[%s1556_s0 + $0x38] sm:$0x1]   ;;  %v801_v31 = vld [vmem:[%s1556_s0 + $0x5a] sm:$0x2]   ;;  %v102_v32 = vsel %vm6_vm0, %v799_v28, %v798_v27  ;;  %s1005_s20 = smov 120   ;;  %s1006_s25 = smov 117  }
   0x8   :  { %v797_v25 = vld [vmem:[%s1556_s0 + $0x77] sm:$0x2]   ;;  %v802_v33 = vld [vmem:[%s1556_s0 + $0x29] sm:$0x1]   ;;  %v112_v35 = vsel %vm6_vm0, %v801_v31, %v800_v30  ;;  %v804_v36 = vld [vmem:[%s1556_s0 + $0x37] sm:$0x1]  }
   0x9   :  { %v86_v26 = vsel %vm6_vm0, %v797_v25, %v796_v24  ;;  %v803_v34 = vld [vmem:[%s1556_s0 + $0x68] sm:$0x2]   ;;  %v805_v37 = vld [vmem:[%s1556_s0 + $0x76] sm:$0x2]   ;;  %s1007_s30 = smov 115   ;;  %s1008_s6 = smov 113  }
   0xa   :  { %v88_v29 = vsel %vm87_vm4, %v86_v26, %v80_v23  ;;  %v123_v38 = vsel %vm6_vm0, %v803_v34, %v802_v33  ;;  %v806_v39 = vld [vmem:[%s1556_s0 + $0xc] sm:$0x1]   ;;  %v134_v41 = vsel %vm6_vm0, %v805_v37, %v804_v36  ;;  %v808_v42 = vld [vmem:[%s1556_s0 + $0x1a] sm:$0x1]   ;;  %s1009_s11 = smov 111   ;;  %s1010_s16 = smov 108  }
   0xb   :  { %45 = vrot.lane.b32.xlu0 %v44_v22, %s1004_s15  ;;  %89 = vrot.lane.b32.xlu1 %v88_v29, %s1005_s20  ;;  %v807_v40 = vld [vmem:[%s1556_s0 + $0x4b] sm:$0x2]   ;;  %v809_v43 = vld [vmem:[%s1556_s0 + $0x59] sm:$0x2]   ;;  %s1011_s21 = smov 106   ;;  %s1012_s26 = smov 104  }
   0xc   :  { %v145_v44 = vsel %vm6_vm0, %v807_v40, %v806_v39  ;;  %v810_v45 = vld [vmem:[%s1556_s0 + $0x28] sm:$0x1]   ;;  %v155_v47 = vsel %vm6_vm0, %v809_v43, %v808_v42  ;;  %v812_v48 = vld [vmem:[%s1556_s0 + $0x36] sm:$0x1]   ;;  %v814_v51 = vld [vmem:[%s1556_s0 + $0xb] sm:$0x1]  }
   0xd   :  { %v811_v46 = vld [vmem:[%s1556_s0 + $0x67] sm:$0x2]   ;;  %v813_v49 = vld [vmem:[%s1556_s0 + $0x75] sm:$0x2]   ;;  %v815_v52 = vld [vmem:[%s1556_s0 + $0x4a] sm:$0x2]  }
   0xe   :  { %v166_v50 = vsel %vm6_vm0, %v811_v46, %v810_v45  ;;  %v177_v53 = vsel %vm6_vm0, %v813_v49, %v812_v48  ;;  %v816_v54 = vld [vmem:[%s1556_s0 + $0x19] sm:$0x1]   ;;  %v188_v56 = vsel %vm6_vm0, %v815_v52, %v814_v51  ;;  %s1013_s2 = smov 102   ;;  %v818_v57 = vld [vmem:[%s1556_s0 + $0x27] sm:$0x1]   ;;  %s1014_s7 = smov 99  }
   0xf   :  { %103 = vrot.lane.b32.xlu0 %v102_v32, %s1006_s25  ;;  %113 = vrot.lane.b32.xlu1 %v112_v35, %s1007_s30  ;;  %v817_v55 = vld [vmem:[%s1556_s0 + $0x58] sm:$0x2]   ;;  %v819_v58 = vld [vmem:[%s1556_s0 + $0x66] sm:$0x2]   ;;  %s1015_s12 = smov 97   ;;  %s1016_s17 = smov 95  }
  0x10   :  { %v198_v59 = vsel %vm6_vm0, %v817_v55, %v816_v54  ;;  %v820_v60 = vld [vmem:[%s1556_s0 + $0x35] sm:$0x1]   ;;  %v209_v62 = vsel %vm6_vm0, %v819_v58, %v818_v57  ;;  %v822_v63 = vld [vmem:[%s1556_s0 + $0xa] sm:$0x1]   ;;  %v824_v2 = vld [vmem:[%s1556_s0 + $0x18] sm:$0x1]  }
  0x11   :  { %v821_v61 = vld [vmem:[%s1556_s0 + $0x74] sm:$0x2]   ;;  %v823_v0 = vld [vmem:[%s1556_s0 + $0x49] sm:$0x2]   ;;  %v825_v3 = vld [vmem:[%s1556_s0 + $0x57] sm:$0x2]  }
  0x12   :  { %v220_v1 = vsel %vm6_vm0, %v821_v61, %v820_v60  ;;  %v231_v4 = vsel %vm6_vm0, %v823_v0, %v822_v63  ;;  %s1017_s22 = smov 93   ;;  %v826_v5 = vld [vmem:[%s1556_s0 + $0x26] sm:$0x1]   ;;  %v241_v7 = vsel %vm6_vm0, %v825_v3, %v824_v2  ;;  %s1018_s27 = smov 90   ;;  %v828_v8 = vld [vmem:[%s1556_s0 + $0x34] sm:$0x1]  }
  0x13   :  { %124 = vrot.lane.b32.xlu0 %v123_v38, %s1008_s6  ;;  %135 = vrot.lane.b32.xlu1 %v134_v41, %s1009_s11  ;;  %v827_v6 = vld [vmem:[%s1556_s0 + $0x65] sm:$0x2]   ;;  %v829_v9 = vld [vmem:[%s1556_s0 + $0x73] sm:$0x2]   ;;  %s1019_s3 = smov 88   ;;  %s1020_s8 = smov 86  }
  0x14   :  { %v252_v10 = vsel %vm6_vm0, %v827_v6, %v826_v5  ;;  %v830_v11 = vld [vmem:[%s1556_s0 + $0x9] sm:$0x1]   ;;  %v263_v13 = vsel %vm6_vm0, %v829_v9, %v828_v8  ;;  %v832_v14 = vld [vmem:[%s1556_s0 + $0x17] sm:$0x1]   ;;  %s1021_s13 = smov 84   ;;  %s1022_s18 = smov 81  }
  0x15   :  { %v831_v12 = vld [vmem:[%s1556_s0 + $0x48] sm:$0x2]   ;;  %v833_v15 = vld [vmem:[%s1556_s0 + $0x56] sm:$0x2]   ;;  %v834_v17 = vld [vmem:[%s1556_s0 + $0x25] sm:$0x1]  }
  0x16   :  { %v274_v16 = vsel %vm6_vm0, %v831_v12, %v830_v11  ;;  %v835_v18 = vld [vmem:[%s1556_s0 + $0x64] sm:$0x2]   ;;  %v284_v19 = vsel %vm6_vm0, %v833_v15, %v832_v14  ;;  %v836_v20 = vld [vmem:[%s1556_s0 + $0x33] sm:$0x1]   ;;  %s1023_s23 = smov 79   ;;  %s1024_s28 = smov 77  }
  0x17   :  { %146 = vrot.lane.b32.xlu0 %v145_v44, %s1010_s16  ;;  %156 = vrot.lane.b32.xlu1 %v155_v47, %s1011_s21  ;;  %v837_v21 = vld [vmem:[%s1556_s0 + $0x72] sm:$0x2]   ;;  %v295_v22 = vsel %vm6_vm0, %v835_v18, %v834_v17  ;;  %v838_v23 = vld [vmem:[%s1556_s0 + $0x8] sm:$0x1]   ;;  %s1025_s4 = smov 75   ;;  %vm8_vm5 = vcmask 72704  }
  0x18   :  { %v839_v24 = vld [vmem:[%s1556_s0 + $0x47] sm:$0x2]   ;;  %v306_v25 = vsel %vm6_vm0, %v837_v21, %v836_v20  ;;  %v840_v26 = vld [vmem:[%s1556_s0 + $0x16] sm:$0x1]   ;;  %v842_v29 = vld [vmem:[%s1556_s0 + $0x24] sm:$0x1]  }
  0x19   :  { %v841_v27 = vld [vmem:[%s1556_s0 + $0x55] sm:$0x2]   ;;  %v317_v28 = vsel %vm6_vm0, %v839_v24, %v838_v23  ;;  %v843_v30 = vld [vmem:[%s1556_s0 + $0x63] sm:$0x2]   ;;  %v3_v32 = vld [vmem:[%s1556_s0] sm:$0x1]  }
  0x1a   :  { %v327_v31 = vsel %vm6_vm0, %v841_v27, %v840_v26  ;;  %s1026_s11 = smov 72   ;;  %v844_v33 = vld [vmem:[%s1556_s0 + $0x32] sm:$0x1]   ;;  %v781_v35 = vld [vmem:[%s1556_s0 + $0x3f] sm:$0x2]   ;;  %v338_v36 = vsel %vm6_vm0, %v843_v30, %v842_v29 }
  0x1b   :  { %167 = vrot.lane.b32.xlu0 %v166_v50, %s1012_s26  ;;  %178 = vrot.lane.b32.xlu1 %v177_v53, %s1013_s2  ;;  %v845_v34 = vld [vmem:[%s1556_s0 + $0x71] sm:$0x2]   ;;  %v7_v37 = vsel %vm6_vm0, %v781_v35, %v3_v32  ;;  %v846_v38 = vld [vmem:[%s1556_s0 + $0x7] sm:$0x1]  }
  0x1c   :  { %v847_v39 = vld [vmem:[%s1556_s0 + $0x46] sm:$0x2]   ;;  %9 = vst.msk [vmem:[#allocation2] sm:$0x3] %vm8_vm5, %v7_v37   ;;  %v349_v40 = vsel %vm6_vm0, %v845_v34, %v844_v33  ;;  %v848_v41 = vld [vmem:[%s1556_s0 + $0x15] sm:$0x1]  }
  0x1d   :  { %v849_v42 = vld [vmem:[%s1556_s0 + $0x54] sm:$0x2]   ;;  %v360_v43 = vsel %vm6_vm0, %v847_v39, %v846_v38  ;;  %v850_v44 = vld [vmem:[%s1556_s0 + $0x23] sm:$0x1]  }
  0x1e   :  { %v851_v45 = vld [vmem:[%s1556_s0 + $0x62] sm:$0x2]   ;;  %v370_v46 = vsel %vm6_vm0, %v849_v42, %v848_v41 }
  0x1f   :  { %189 = vrot.lane.b32.xlu0 %v188_v56, %s1014_s7  ;;  %199 = vrot.lane.b32.xlu1 %v198_v59, %s1015_s12 }
  0x23   :  { %210 = vrot.lane.b32.xlu0 %v209_v62, %s1016_s17  ;;  %221 = vrot.lane.b32.xlu1 %v220_v1, %s1017_s22 }
  0x27   :  { %232 = vrot.lane.b32.xlu0 %v231_v4, %s1018_s27  ;;  %242 = vrot.lane.b32.xlu1 %v241_v7, %s1019_s3 }
  0x2b   :  { %253 = vrot.lane.b32.xlu0 %v252_v10, %s1020_s8  ;;  %264 = vrot.lane.b32.xlu1 %v263_v13, %s1021_s13 }
  0x2f   :  { %275 = vrot.lane.b32.xlu0 %v274_v16, %s1022_s18  ;;  %285 = vrot.lane.b32.xlu1 %v284_v19, %s1023_s23  ;;  %s1027_s18 = smov 70   ;;  %s1028_s23 = smov 68  }
  0x33   :  { %296 = vrot.lane.b32.xlu0 %v295_v22, %s1024_s28  ;;  %307 = vrot.lane.b32.xlu1 %v306_v25, %s1025_s4  ;;  %s1029_s28 = smov 66  }
  0x37   :  { %318 = vrot.lane.b32.xlu0 %v317_v28, %s1026_s11  ;;  %328 = vrot.lane.b32.xlu1 %v327_v31, %s1027_s18 }
  0x3b   :  { %339 = vrot.lane.b32.xlu0 %v338_v36, %s1028_s23  ;;  %350 = vrot.lane.b32.xlu1 %v349_v40, %s1029_s28 }
  0x3c   :  { %2 = vsyncpa [#allocation1], 0  ;;  %s1030_s4 = smov 63   ;;  %v852_v47 = vld [vmem:[%s1556_s0 + $0x31] sm:$0x1]   ;;  %v381_v49 = vsel %vm6_vm0, %v851_v45, %v850_v44  ;;  %s1031_s9 = smov 61  }
  0x3d   :  { %v853_v48 = vld [vmem:[%s1556_s0 + $0x70] sm:$0x2]   ;;  %v854_v50 = vld [vmem:[%s1556_s0 + $0x3f] sm:$0x1]   ;;  %s1032_s14 = smov 59   ;;  %s1033_s19 = smov 57  }
  0x3e   :  { %v855_v51 = vld [vmem:[%s1556_s0 + $0x7e] sm:$0x2]   ;;  %v392_v52 = vsel %vm6_vm0, %v853_v48, %v852_v47  ;;  %v856_v53 = vld [vmem:[%s1556_s0 + $0x6] sm:$0x1]   ;;  %v858_v56 = vld [vmem:[%s1556_s0 + $0x14] sm:$0x1]  }
  0x3f   :  { %361 = vrot.lane.b32.xlu0 %v360_v43, %s1030_s4  ;;  %371 = vrot.lane.b32.xlu1 %v370_v46, %s1031_s9  ;;  %v857_v54 = vld [vmem:[%s1556_s0 + $0x45] sm:$0x2]   ;;  %v403_v55 = vsel %vm6_vm0, %v855_v51, %v854_v50  ;;  %v859_v57 = vld [vmem:[%s1556_s0 + $0x53] sm:$0x2]   ;;  %s1034_s24 = smov 55   ;;  %s1035_s29 = smov 54  }
  0x40   :  { %v414_v58 = vsel %vm6_vm0, %v857_v54, %v856_v53  ;;  %v860_v59 = vld [vmem:[%s1556_s0 + $0x22] sm:$0x1]   ;;  %v424_v61 = vsel %vm6_vm0, %v859_v57, %v858_v56  ;;  %v862_v62 = vld [vmem:[%s1556_s0 + $0x30] sm:$0x1]   ;;  %s1036_s5 = smov 52   ;;  %s1037_s10 = smov 50  }
  0x41   :  { %v861_v60 = vld [vmem:[%s1556_s0 + $0x61] sm:$0x2]   ;;  %v863_v63 = vld [vmem:[%s1556_s0 + $0x6f] sm:$0x2]   ;;  %v864_v1 = vld [vmem:[%s1556_s0 + $0x3e] sm:$0x1]  }
  0x42   :  { %v435_v0 = vsel %vm6_vm0, %v861_v60, %v860_v59  ;;  %v865_v2 = vld [vmem:[%s1556_s0 + $0x7d] sm:$0x2]   ;;  %v446_v3 = vsel %vm6_vm0, %v863_v63, %v862_v62  ;;  %v866_v4 = vld [vmem:[%s1556_s0 + $0x5] sm:$0x1]   ;;  %s1038_s15 = smov 48   ;;  %s1039_s20 = smov 46  }
  0x43   :  { %382 = vrot.lane.b32.xlu0 %v381_v49, %s1032_s14  ;;  %393 = vrot.lane.b32.xlu1 %v392_v52, %s1033_s19  ;;  %v867_v5 = vld [vmem:[%s1556_s0 + $0x44] sm:$0x2]   ;;  %v457_v6 = vsel %vm6_vm0, %v865_v2, %v864_v1  ;;  %v868_v7 = vld [vmem:[%s1556_s0 + $0x13] sm:$0x1]   ;;  %s1040_s25 = smov 45   ;;  %s1041_s30 = smov 43  }
  0x44   :  { %v869_v8 = vld [vmem:[%s1556_s0 + $0x52] sm:$0x2]   ;;  %v468_v9 = vsel %vm6_vm0, %v867_v5, %v866_v4  ;;  %v870_v10 = vld [vmem:[%s1556_s0 + $0x21] sm:$0x1]   ;;  %v872_v13 = vld [vmem:[%s1556_s0 + $0x2f] sm:$0x1]  }
  0x45   :  { %v871_v11 = vld [vmem:[%s1556_s0 + $0x60] sm:$0x2]   ;;  %v478_v12 = vsel %vm6_vm0, %v869_v8, %v868_v7  ;;  %v873_v14 = vld [vmem:[%s1556_s0 + $0x6e] sm:$0x2]   ;;  %v874_v16 = vld [vmem:[%s1556_s0 + $0x3d] sm:$0x1]  }
  0x46   :  { %v489_v15 = vsel %vm6_vm0, %v871_v11, %v870_v10  ;;  %v875_v17 = vld [vmem:[%s1556_s0 + $0x7c] sm:$0x2]   ;;  %v500_v18 = vsel %vm6_vm0, %v873_v14, %v872_v13  ;;  %s1042_s6 = smov 41   ;;  %v876_v19 = vld [vmem:[%s1556_s0 + $0x4] sm:$0x1]   ;;  %s1043_s11 = smov 39  }
  0x47   :  { %404 = vrot.lane.b32.xlu0 %v403_v55, %s1034_s24  ;;  %415 = vrot.lane.b32.xlu1 %v414_v58, %s1035_s29  ;;  %v877_v20 = vld [vmem:[%s1556_s0 + $0x43] sm:$0x2]   ;;  %v511_v21 = vsel %vm6_vm0, %v875_v17, %v874_v16  ;;  %v878_v22 = vld [vmem:[%s1556_s0 + $0x12] sm:$0x1]   ;;  %s1044_s16 = smov 37   ;;  %s1045_s21 = smov 36  }
  0x48   :  { %v879_v23 = vld [vmem:[%s1556_s0 + $0x51] sm:$0x2]   ;;  %v522_v24 = vsel %vm6_vm0, %v877_v20, %v876_v19  ;;  %v880_v25 = vld [vmem:[%s1556_s0 + $0x20] sm:$0x1]   ;;  %v882_v28 = vld [vmem:[%s1556_s0 + $0x2e] sm:$0x1]  }
  0x49   :  { %v881_v26 = vld [vmem:[%s1556_s0 + $0x5f] sm:$0x2]   ;;  %v532_v27 = vsel %vm6_vm0, %v879_v23, %v878_v22  ;;  %v883_v29 = vld [vmem:[%s1556_s0 + $0x6d] sm:$0x2]   ;;  %s1046_s26 = smov 34   ;;  %s1047_s2 = smov 32  }
  0x4a   :  { %v543_v30 = vsel %vm6_vm0, %v881_v26, %v880_v25  ;;  %v884_v31 = vld [vmem:[%s1556_s0 + $0x3c] sm:$0x1]   ;;  %v554_v33 = vsel %vm6_vm0, %v883_v29, %v882_v28  ;;  %v886_v34 = vld [vmem:[%s1556_s0 + $0x3] sm:$0x1]   ;;  %s1048_s7 = smov 30   ;;  %s1049_s12 = smov 28  }
  0x4b   :  { %425 = vrot.lane.b32.xlu0 %v424_v61, %s1036_s5  ;;  %436 = vrot.lane.b32.xlu1 %v435_v0, %s1037_s10  ;;  %v885_v32 = vld [vmem:[%s1556_s0 + $0x7b] sm:$0x2]   ;;  %v887_v35 = vld [vmem:[%s1556_s0 + $0x42] sm:$0x2]   ;;  %s1050_s17 = smov 27   ;;  %s1051_s22 = smov 25  }
  0x4c   :  { %v565_v36 = vsel %vm6_vm0, %v885_v32, %v884_v31  ;;  %v888_v37 = vld [vmem:[%s1556_s0 + $0x11] sm:$0x1]   ;;  %v576_v39 = vsel %vm6_vm0, %v887_v35, %v886_v34  ;;  %v890_v40 = vld [vmem:[%s1556_s0 + $0x1f] sm:$0x1]   ;;  %v892_v43 = vld [vmem:[%s1556_s0 + $0x2d] sm:$0x1]  }
  0x4d   :  { %v889_v38 = vld [vmem:[%s1556_s0 + $0x50] sm:$0x2]   ;;  %v891_v41 = vld [vmem:[%s1556_s0 + $0x5e] sm:$0x2]   ;;  %v893_v44 = vld [vmem:[%s1556_s0 + $0x6c] sm:$0x2]  }
  0x4e   :  { %v586_v42 = vsel %vm6_vm0, %v889_v38, %v888_v37  ;;  %v597_v45 = vsel %vm6_vm0, %v891_v41, %v890_v40  ;;  %v894_v46 = vld [vmem:[%s1556_s0 + $0x3b] sm:$0x1]   ;;  %v608_v48 = vsel %vm6_vm0, %v893_v44, %v892_v43  ;;  %s1052_s27 = smov 23   ;;  %v896_v49 = vld [vmem:[%s1556_s0 + $0x2] sm:$0x1]   ;;  %s1053_s3 = smov 21  }
  0x4f   :  { %447 = vrot.lane.b32.xlu0 %v446_v3, %s1038_s15  ;;  %458 = vrot.lane.b32.xlu1 %v457_v6, %s1039_s20  ;;  %v895_v47 = vld [vmem:[%s1556_s0 + $0x7a] sm:$0x2]   ;;  %v897_v50 = vld [vmem:[%s1556_s0 + $0x41] sm:$0x2]   ;;  %s1054_s8 = smov 19   ;;  %s1055_s13 = smov 18  }
  0x50   :  { %v619_v51 = vsel %vm6_vm0, %v895_v47, %v894_v46  ;;  %v898_v52 = vld [vmem:[%s1556_s0 + $0x10] sm:$0x1]   ;;  %v630_v54 = vsel %vm6_vm0, %v897_v50, %v896_v49  ;;  %v900_v55 = vld [vmem:[%s1556_s0 + $0x1e] sm:$0x1]   ;;  %v902_v58 = vld [vmem:[%s1556_s0 + $0x2c] sm:$0x1]  }
  0x51   :  { %v899_v53 = vld [vmem:[%s1556_s0 + $0x4f] sm:$0x2]   ;;  %v901_v56 = vld [vmem:[%s1556_s0 + $0x5d] sm:$0x2]   ;;  %v903_v59 = vld [vmem:[%s1556_s0 + $0x6b] sm:$0x2]  }
  0x52   :  { %v640_v57 = vsel %vm6_vm0, %v899_v53, %v898_v52  ;;  %v651_v60 = vsel %vm6_vm0, %v901_v56, %v900_v55  ;;  %s1056_s18 = smov 16   ;;  %v904_v61 = vld [vmem:[%s1556_s0 + $0x3a] sm:$0x1]   ;;  %v662_v63 = vsel %vm6_vm0, %v903_v59, %v902_v58  ;;  %s1057_s23 = smov 14   ;;  %v906_v0 = vld [vmem:[%s1556_s0 + $0x1] sm:$0x1]  }
  0x53   :  { %469 = vrot.lane.b32.xlu0 %v468_v9, %s1040_s25  ;;  %479 = vrot.lane.b32.xlu1 %v478_v12, %s1041_s30  ;;  %v905_v62 = vld [vmem:[%s1556_s0 + $0x79] sm:$0x2]   ;;  %v907_v1 = vld [vmem:[%s1556_s0 + $0x40] sm:$0x2]   ;;  %s1058_s28 = smov 12   ;;  %vm26_vm6 = vcmask 56320  }
  0x54   :  { %v673_v2 = vsel %vm6_vm0, %v905_v62, %v904_v61  ;;  %vm29_vm7 = vcmask 1048560   ;;  %v908_v3 = vld [vmem:[%s1556_s0 + $0xf] sm:$0x1]   ;;  %v684_v5 = vsel %vm6_vm0, %v907_v1, %v906_v0  ;;  %s1059_s4 = smov 10   ;;  %vm69_vm8 = vcmask 23552   ;;  %s1060_s9 = smov 9  }
  0x55   :  { %v909_v4 = vld [vmem:[%s1556_s0 + $0x4e] sm:$0x2]   ;;  %v910_v7 = vld [vmem:[%s1556_s0 + $0x1d] sm:$0x1]   ;;  %vm47_vm9 = vcmask 39936   ;;  %vm50_vm10 = vcmask 1048544  }
  0x56   :  { %v911_v8 = vld [vmem:[%s1556_s0 + $0x5c] sm:$0x2]   ;;  %v694_v9 = vsel %vm6_vm0, %v909_v4, %v908_v3  ;;  %v912_v11 = vld [vmem:[%s1556_s0 + $0x2b] sm:$0x1]   ;;  %vm72_vm11 = vcmask 1048528   ;;  %s1061_s14 = smov 7  }
  0x57   :  { %490 = vrot.lane.b32.xlu0 %v489_v15, %s1042_s6  ;;  %501 = vrot.lane.b32.xlu1 %v500_v18, %s1043_s11  ;;  %v913_v12 = vld [vmem:[%s1556_s0 + $0x6a] sm:$0x2]   ;;  %v705_v13 = vsel %vm6_vm0, %v911_v8, %v910_v7  ;;  %vm91_vm12 = vcmask 7168   ;;  %vm94_vm13 = vcmask 1048512   ;;  %v914_v15 = vld [vmem:[%s1556_s0 + $0x39] sm:$0x1]  }
  0x58   :  { %v915_v16 = vld [vmem:[%s1556_s0 + $0x78] sm:$0x2]   ;;  %v716_v17 = vsel %vm6_vm0, %v913_v12, %v912_v11  ;;  %s1062_s0 = smov 5   ;;  %vm105_vm14 = vcmask 1032104   ;;  %s1063_s19 = smov 3   ;;  %vm115_vm15 = vcmask 1015704  }
  0x59   :  { %v727_v19 = vsel %vm6_vm0, %v915_v16, %v914_v15  ;;  %s1064_s20 = smov 1   ;;  %vm126_vm0 = vcmask 999304   ;;  %vm137_vm1 = vcmask 982904   ;;  %vm148_vm2 = vcmask 958304  }
  0x5a   :  { %vm158_vm3 = vcmask 941904   ;;  %vm169_vm4 = vcmask 925504   ;;  %vm180_vm5 = vcmask 909104  }
  0x5b   :  { %512 = vrot.lane.b32.xlu0 %v511_v21, %s1044_s16  ;;  %523 = vrot.lane.b32.xlu1 %v522_v24, %s1045_s21  ;;  %s1065_s21 = smov [#allocation0]  }
  0x5f   :  { %533 = vrot.lane.b32.xlu0 %v532_v27, %s1046_s26  ;;  %544 = vrot.lane.b32.xlu1 %v543_v30, %s1047_s2 }
  0x63   :  { %555 = vrot.lane.b32.xlu0 %v554_v33, %s1048_s7  ;;  %566 = vrot.lane.b32.xlu1 %v565_v36, %s1049_s12 }
  0x67   :  { %577 = vrot.lane.b32.xlu0 %v576_v39, %s1050_s17  ;;  %587 = vrot.lane.b32.xlu1 %v586_v42, %s1051_s22  ;;  %s772_s22 = sshll.u32 %s1065_s21, 4  ;;  %s773_s22 = int_to_ptr.vmem [resolvable:$true] %s772_s22 }
  0x68   :  { %p985_p1 = scmp.lt.s32.totalorder %s773_s22, %s773_s22 }
  0x6b   :  { %598 = vrot.lane.b32.xlu0 %v597_v45, %s1052_s27  ;;  %609 = vrot.lane.b32.xlu1 %v608_v48, %s1053_s3 }
  0x6f   :  { %620 = vrot.lane.b32.xlu0 %v619_v51, %s1054_s8  ;;  %631 = vrot.lane.b32.xlu1 %v630_v54, %s1055_s13 }
  0x73   :  { %641 = vrot.lane.b32.xlu0 %v640_v57, %s1056_s18  ;;  %652 = vrot.lane.b32.xlu1 %v651_v60, %s1057_s23  ;;  %s980_s23 = scalar_lea.vmem %s773_s22, 160 }
  0x74   :  { %p981_p0 = scmp.ne.s32.totalorder %s773_s22, %s980_s23  ;;  %p986_p2 = scmp.lt.s32.totalorder %s980_s23, %s980_s23 }
  0x76   :  { %p987_p3 = por %p986_p2, %p985_p1 }
  0x77   :  { %663 = vrot.lane.b32.xlu0 %v662_v63, %s1058_s28  ;;  %674 = vrot.lane.b32.xlu1 %v673_v2, %s1059_s4 }
  0x78   :  { %p988_p4 = pnand %p987_p3, %p981_p0 }
  0x79   :  { %v25_v6 = vpop.permute.xlu0 %24   ;;  %v68_v10 = vpop.permute.xlu1 %67  }
  0x7a   :  { %28 = vst.msk [vmem:[#allocation2 + $0x8] sm:$0x3] %vm26_vm6, %v25_v6   ;;  %vm191_vm6 = vcmask 884504  }
  0x7b   :  { %30 = vst.msk [vmem:[#allocation2] sm:$0x3] %vm29_vm7, %v25_v6   ;;  %685 = vrot.lane.b32.xlu0 %v684_v5, %s1060_s9  ;;  %695 = vrot.lane.b32.xlu1 %v694_v9, %s1061_s14  ;;  %vm201_vm7 = vcmask 868104  }
  0x7c   :  { %71 = vst.msk [vmem:[#allocation2 + $0x18] sm:$0x3] %vm69_vm8, %v68_v10   ;;  %vm212_vm8 = vcmask 851704  }
  0x7d   :  { %v46_v14 = vpop.permute.xlu0 %45   ;;  %v90_v18 = vpop.permute.xlu1 %89  }
  0x7e   :  { %49 = vst.msk [vmem:[#allocation2 + $0x10] sm:$0x3] %vm47_vm9, %v46_v14   ;;  %vm223_vm9 = vcmask 835304  }
  0x7f   :  { %52 = vst.msk [vmem:[#allocation2 + $0x8] sm:$0x3] %vm50_vm10, %v46_v14   ;;  %706 = vrot.lane.b32.xlu0 %v705_v13, %s1062_s0  ;;  %717 = vrot.lane.b32.xlu1 %v716_v17, %s1063_s19  ;;  %vm234_vm10 = vcmask 810704  }
  0x80   :  { %74 = vst.msk [vmem:[#allocation2 + $0x10] sm:$0x3] %vm72_vm11, %v68_v10   ;;  %vm244_vm11 = vcmask 794304  }
  0x81   :  { %93 = vst.msk [vmem:[#allocation2 + $0x20] sm:$0x3] %vm91_vm12, %v90_v18   ;;  %v104_v20 = vpop.permute.xlu0 %103   ;;  %v114_v21 = vpop.permute.xlu1 %113   ;;  %vm255_vm12 = vcmask 777904  }
  0x82   :  { %96 = vst.msk [vmem:[#allocation2 + $0x18] sm:$0x3] %vm94_vm13, %v90_v18   ;;  %vm266_vm13 = vcmask 761504  }
  0x83   :  { %106 = vst.msk [vmem:[#allocation2] sm:$0x3] %vm105_vm14, %v104_v20   ;;  %728 = vrot.lane.b32.xlu0 %v727_v19, %s1064_s20  ;;  %vm277_vm14 = vcmask 736904  }
  0x84   :  { %117 = vst.msk [vmem:[#allocation2 + $0x8] sm:$0x3] %vm115_vm15, %v114_v21   ;;  %vm287_vm15 = vcmask 720504  }
  0x85   :  { %v125_v22 = vpop.permute.xlu0 %124   ;;  %v136_v23 = vpop.permute.xlu1 %135  }
  0x86   :  { %128 = vst.msk [vmem:[#allocation2 + $0x10] sm:$0x3] %vm126_vm0, %v125_v22   ;;  %vm298_vm0 = vcmask 704104  }
  0x87   :  { %139 = vst.msk [vmem:[#allocation2 + $0x18] sm:$0x3] %vm137_vm1, %v136_v23   ;;  %vm309_vm1 = vcmask 687704  }
  0x89   :  { %v147_v24 = vpop.permute.xlu0 %146   ;;  %v157_v25 = vpop.permute.xlu1 %156  }
  0x8a   :  { %149 = vst.msk [vmem:[#allocation2] sm:$0x3] %vm148_vm2, %v147_v24   ;;  %vm320_vm2 = vcmask 663104  }
  0x8b   :  { %160 = vst.msk [vmem:[#allocation2 + $0x8] sm:$0x3] %vm158_vm3, %v157_v25   ;;  %vm330_vm3 = vcmask 646704  }
  0x8d   :  { %v168_v26 = vpop.permute.xlu0 %167   ;;  %v179_v27 = vpop.permute.xlu1 %178  }
  0x8e   :  { %171 = vst.msk [vmem:[#allocation2 + $0x10] sm:$0x3] %vm169_vm4, %v168_v26   ;;  %vm341_vm4 = vcmask 630304  }
  0x8f   :  { %182 = vst.msk [vmem:[#allocation2 + $0x18] sm:$0x3] %vm180_vm5, %v179_v27   ;;  %vm352_vm5 = vcmask 613904  }
  0x91   :  { %v190_v28 = vpop.permute.xlu0 %189   ;;  %v200_v29 = vpop.permute.xlu1 %199  }
  0x92   :  { %192 = vst.msk [vmem:[#allocation2] sm:$0x3] %vm191_vm6, %v190_v28   ;;  %vm363_vm6 = vcmask 589304  }
  0x93   :  { %203 = vst.msk [vmem:[#allocation2 + $0x8] sm:$0x3] %vm201_vm7, %v200_v29   ;;  %vm373_vm7 = vcmask 572904  }
  0x95   :  { %v211_v30 = vpop.permute.xlu0 %210   ;;  %v222_v31 = vpop.permute.xlu1 %221  }
  0x96   :  { %214 = vst.msk [vmem:[#allocation2 + $0x10] sm:$0x3] %vm212_vm8, %v211_v30   ;;  %vm384_vm8 = vcmask 556504  }
  0x97   :  { %225 = vst.msk [vmem:[#allocation2 + $0x18] sm:$0x3] %vm223_vm9, %v222_v31   ;;  %vm395_vm9 = vcmask 540104  }
  0x99   :  { %v233_v32 = vpop.permute.xlu0 %232   ;;  %v243_v33 = vpop.permute.xlu1 %242  }
  0x9a   :  { %235 = vst.msk [vmem:[#allocation2] sm:$0x3] %vm234_vm10, %v233_v32   ;;  %vm406_vm10 = vcmask 523704  }
  0x9b   :  { %246 = vst.msk [vmem:[#allocation2 + $0x8] sm:$0x3] %vm244_vm11, %v243_v33   ;;  %vm417_vm11 = vcmask 515504  }
  0x9d   :  { %v254_v34 = vpop.permute.xlu0 %253   ;;  %v265_v35 = vpop.permute.xlu1 %264  }
  0x9e   :  { %257 = vst.msk [vmem:[#allocation2 + $0x10] sm:$0x3] %vm255_vm12, %v254_v34   ;;  %vm427_vm12 = vcmask 499104  }
  0x9f   :  { %268 = vst.msk [vmem:[#allocation2 + $0x18] sm:$0x3] %vm266_vm13, %v265_v35   ;;  %vm438_vm13 = vcmask 482704  }
  0xa1   :  { %v276_v36 = vpop.permute.xlu0 %275   ;;  %v286_v37 = vpop.permute.xlu1 %285  }
  0xa2   :  { %278 = vst.msk [vmem:[#allocation2] sm:$0x3] %vm277_vm14, %v276_v36   ;;  %vm449_vm14 = vcmask 466304  }
  0xa3   :  { %289 = vst.msk [vmem:[#allocation2 + $0x8] sm:$0x3] %vm287_vm15, %v286_v37   ;;  %vm460_vm15 = vcmask 449904  }
  0xa5   :  { %v297_v38 = vpop.permute.xlu0 %296   ;;  %v308_v39 = vpop.permute.xlu1 %307  }
  0xa6   :  { %300 = vst.msk [vmem:[#allocation2 + $0x10] sm:$0x3] %vm298_vm0, %v297_v38   ;;  %vm471_vm0 = vcmask 441704  }
  0xa7   :  { %311 = vst.msk [vmem:[#allocation2 + $0x18] sm:$0x3] %vm309_vm1, %v308_v39   ;;  %vm481_vm1 = vcmask 425304  }
  0xa9   :  { %v319_v40 = vpop.permute.xlu0 %318   ;;  %v329_v41 = vpop.permute.xlu1 %328  }
  0xaa   :  { %321 = vst.msk [vmem:[#allocation2] sm:$0x3] %vm320_vm2, %v319_v40   ;;  %vm492_vm2 = vcmask 408904  }
  0xab   :  { %332 = vst.msk [vmem:[#allocation2 + $0x8] sm:$0x3] %vm330_vm3, %v329_v41   ;;  %vm503_vm3 = vcmask 392504  }
  0xad   :  { %v340_v42 = vpop.permute.xlu0 %339   ;;  %v351_v43 = vpop.permute.xlu1 %350  }
  0xae   :  { %343 = vst.msk [vmem:[#allocation2 + $0x10] sm:$0x3] %vm341_vm4, %v340_v42   ;;  %vm514_vm4 = vcmask 376104  }
  0xaf   :  { %354 = vst.msk [vmem:[#allocation2 + $0x18] sm:$0x3] %vm352_vm5, %v351_v43   ;;  %vm525_vm5 = vcmask 367904  }
  0xb1   :  { %v362_v44 = vpop.permute.xlu0 %361   ;;  %v372_v45 = vpop.permute.xlu1 %371  }
  0xb2   :  { %364 = vst.msk [vmem:[#allocation2] sm:$0x3] %vm363_vm6, %v362_v44   ;;  %vm535_vm6 = vcmask 351504  }
  0xb3   :  { %375 = vst.msk [vmem:[#allocation2 + $0x8] sm:$0x3] %vm373_vm7, %v372_v45   ;;  %vm546_vm7 = vcmask 335104  }
  0xb5   :  { %v383_v46 = vpop.permute.xlu0 %382   ;;  %v394_v47 = vpop.permute.xlu1 %393  }
  0xb6   :  { %386 = vst.msk [vmem:[#allocation2 + $0x10] sm:$0x3] %vm384_vm8, %v383_v46   ;;  %vm557_vm8 = vcmask 318704  }
  0xb7   :  { %397 = vst.msk [vmem:[#allocation2 + $0x18] sm:$0x3] %vm395_vm9, %v394_v47   ;;  %vm568_vm9 = vcmask 302304  }
  0xb9   :  { %v405_v48 = vpop.permute.xlu0 %404   ;;  %v416_v49 = vpop.permute.xlu1 %415  }
  0xba   :  { %408 = vst.msk [vmem:[#allocation2 + $0x20] sm:$0x3] %vm406_vm10, %v405_v48   ;;  %vm579_vm10 = vcmask 294104  }
  0xbb   :  { %418 = vst.msk [vmem:[#allocation2] sm:$0x3] %vm417_vm11, %v416_v49   ;;  %vm589_vm11 = vcmask 277704  }
  0xbd   :  { %v426_v50 = vpop.permute.xlu0 %425   ;;  %v437_v51 = vpop.permute.xlu1 %436  }
  0xbe   :  { %429 = vst.msk [vmem:[#allocation2 + $0x8] sm:$0x3] %vm427_vm12, %v426_v50   ;;  %vm600_vm12 = vcmask 261304  }
  0xbf   :  { %440 = vst.msk [vmem:[#allocation2 + $0x10] sm:$0x3] %vm438_vm13, %v437_v51   ;;  %vm611_vm13 = vcmask 244904  }
  0xc1   :  { %v448_v52 = vpop.permute.xlu0 %447   ;;  %v459_v53 = vpop.permute.xlu1 %458  }
  0xc2   :  { %451 = vst.msk [vmem:[#allocation2 + $0x18] sm:$0x3] %vm449_vm14, %v448_v52   ;;  %vm622_vm14 = vcmask 228504  }
  0xc3   :  { %462 = vst.msk [vmem:[#allocation2 + $0x20] sm:$0x3] %vm460_vm15, %v459_v53   ;;  %vm633_vm15 = vcmask 220304  }
  0xc5   :  { %v470_v54 = vpop.permute.xlu0 %469   ;;  %v480_v55 = vpop.permute.xlu1 %479  }
  0xc6   :  { %472 = vst.msk [vmem:[#allocation2] sm:$0x3] %vm471_vm0, %v470_v54   ;;  %vm643_vm0 = vcmask 203904  }
  0xc7   :  { %483 = vst.msk [vmem:[#allocation2 + $0x8] sm:$0x3] %vm481_vm1, %v480_v55   ;;  %vm654_vm1 = vcmask 187504  }
  0xc9   :  { %v491_v56 = vpop.permute.xlu0 %490   ;;  %v502_v57 = vpop.permute.xlu1 %501  }
  0xca   :  { %494 = vst.msk [vmem:[#allocation2 + $0x10] sm:$0x3] %vm492_vm2, %v491_v56   ;;  %vm665_vm2 = vcmask 171104  }
  0xcb   :  { %505 = vst.msk [vmem:[#allocation2 + $0x18] sm:$0x3] %vm503_vm3, %v502_v57   ;;  %vm676_vm3 = vcmask 154704  }
  0xcd   :  { %v513_v58 = vpop.permute.xlu0 %512   ;;  %v524_v59 = vpop.permute.xlu1 %523  }
  0xce   :  { %516 = vst.msk [vmem:[#allocation2 + $0x20] sm:$0x3] %vm514_vm4, %v513_v58   ;;  %vm687_vm4 = vcmask 146504  }
  0xcf   :  { %526 = vst.msk [vmem:[#allocation2] sm:$0x3] %vm525_vm5, %v524_v59   ;;  %vm697_vm5 = vcmask 130104  }
  0xd1   :  { %v534_v60 = vpop.permute.xlu0 %533   ;;  %v545_v61 = vpop.permute.xlu1 %544  }
  0xd2   :  { %537 = vst.msk [vmem:[#allocation2 + $0x8] sm:$0x3] %vm535_vm6, %v534_v60   ;;  %vm708_vm6 = vcmask 113704  }
  0xd3   :  { %548 = vst.msk [vmem:[#allocation2 + $0x10] sm:$0x3] %vm546_vm7, %v545_v61   ;;  %vm719_vm7 = vcmask 97304  }
  0xd5   :  { %v556_v62 = vpop.permute.xlu0 %555   ;;  %v567_v63 = vpop.permute.xlu1 %566  }
  0xd6   :  { %559 = vst.msk [vmem:[#allocation2 + $0x18] sm:$0x3] %vm557_vm8, %v556_v62   ;;  %vm730_vm8 = vcmask 80904  }
  0xd7   :  { %570 = vst.msk [vmem:[#allocation2 + $0x20] sm:$0x3] %vm568_vm9, %v567_v63  }
  0xd9   :  { %v578_v0 = vpop.permute.xlu0 %577   ;;  %v588_v1 = vpop.permute.xlu1 %587  }
  0xda   :  { %580 = vst.msk [vmem:[#allocation2] sm:$0x3] %vm579_vm10, %v578_v0  }
  0xdb   :  { %591 = vst.msk [vmem:[#allocation2 + $0x8] sm:$0x3] %vm589_vm11, %v588_v1  }
  0xdd   :  { %v599_v2 = vpop.permute.xlu0 %598   ;;  %v610_v3 = vpop.permute.xlu1 %609  }
  0xde   :  { %602 = vst.msk [vmem:[#allocation2 + $0x10] sm:$0x3] %vm600_vm12, %v599_v2  }
  0xdf   :  { %613 = vst.msk [vmem:[#allocation2 + $0x18] sm:$0x3] %vm611_vm13, %v610_v3  }
  0xe1   :  { %v621_v4 = vpop.permute.xlu0 %620   ;;  %v632_v5 = vpop.permute.xlu1 %631  }
  0xe2   :  { %624 = vst.msk [vmem:[#allocation2 + $0x20] sm:$0x3] %vm622_vm14, %v621_v4  }
  0xe3   :  { %634 = vst.msk [vmem:[#allocation2] sm:$0x3] %vm633_vm15, %v632_v5  }
  0xe5   :  { %v642_v6 = vpop.permute.xlu0 %641   ;;  %v653_v7 = vpop.permute.xlu1 %652  }
  0xe6   :  { %645 = vst.msk [vmem:[#allocation2 + $0x8] sm:$0x3] %vm643_vm0, %v642_v6  }
  0xe7   :  { %656 = vst.msk [vmem:[#allocation2 + $0x10] sm:$0x3] %vm654_vm1, %v653_v7  }
  0xe9   :  { %v664_v8 = vpop.permute.xlu0 %663   ;;  %v675_v9 = vpop.permute.xlu1 %674  }
  0xea   :  { %667 = vst.msk [vmem:[#allocation2 + $0x18] sm:$0x3] %vm665_vm2, %v664_v8  }
  0xeb   :  { %678 = vst.msk [vmem:[#allocation2 + $0x20] sm:$0x3] %vm676_vm3, %v675_v9  }
  0xed   :  { %v686_v10 = vpop.permute.xlu0 %685   ;;  %v696_v11 = vpop.permute.xlu1 %695  }
  0xee   :  { %688 = vst.msk [vmem:[#allocation2] sm:$0x3] %vm687_vm4, %v686_v10  }
  0xef   :  { %699 = vst.msk [vmem:[#allocation2 + $0x8] sm:$0x3] %vm697_vm5, %v696_v11  }
  0xf1   :  { %v707_v12 = vpop.permute.xlu0 %706   ;;  %v718_v13 = vpop.permute.xlu1 %717  }
  0xf2   :  { %710 = vst.msk [vmem:[#allocation2 + $0x10] sm:$0x3] %vm708_vm6, %v707_v12  }
  0xf3   :  { %721 = vst.msk [vmem:[#allocation2 + $0x18] sm:$0x3] %vm719_vm7, %v718_v13  }
  0xf5   :  { %v737_v14 = vld [vmem:[#allocation2] sm:$0x3]  ;;  %v729_v15 = vpop.permute.xlu0 %728  }
  0xf6   :  { %740 = vst [vmem:[#allocation0] sm:$0x3] %v737_v14  ;;  %732 = vst.msk [vmem:[#allocation2 + $0x20] sm:$0x3] %vm730_vm8, %v729_v15   ;;  %v742_v16 = vld [vmem:[#allocation2 + $0x8] sm:$0x3] }
  0xf7   :  { %746 = vst [vmem:[#allocation0 + $0x2] sm:$0x3] %v742_v16 }
  0xf9   :  { %v748_v17 = vld [vmem:[#allocation2 + $0x10] sm:$0x3] }
  0xfa   :  { %753 = vst [vmem:[#allocation0 + $0x4] sm:$0x3] %v748_v17  ;;  %v755_v18 = vld [vmem:[#allocation2 + $0x18] sm:$0x3] }
  0xfb   :  { %760 = vst [vmem:[#allocation0 + $0x6] sm:$0x3] %v755_v18 }
  0xfd   :  { %v762_v19 = vld [vmem:[#allocation2 + $0x20] sm:$0x3] }
  0xfe   :  { %767 = vst [vmem:[#allocation0 + $0x8] sm:$0x3] %v762_v19 }
  0xff   :  { %991 = shalt.err (!%p988_p4)
}
 0x100   :  { %775 = dma.vmem_to_hbm [thread:$0]  %s773_s22, 160, %s1557_s1, [#allocation1]  }
 0x101   :  { %1000 = dma.done.wait [#allocation1], 160  }
 0x102   :  { %1001 = vsyncadd [#allocation1], 4294967136 }
 0x103   :  { %777 = vsyncpa [#allocation1], 1 }

// kernel: rpn_forward.1
= control target key start
LH: loop header
LB: loop body
LE: loop exit
PB: predicated region body
PF: predicated region fallthrough
CT: control target
= control target key end

     0   :  { %s17194_s18 = smov 0   ;;  %s17196_s19 = smov 0   ;;  %s24296_s0 = inlined_call_operand.vmem [shape: f32[2,120,512], index: 0, kind: input, shape index: {}]   ;;  %s24297_s1 = inlined_call_operand.vmem [shape: bf16[4608,512], index: 1, kind: input, shape index: {}]   ;;  %s24298_s2 = inlined_call_operand.vmem [shape: f32[1,512], index: 2, kind: input, shape index: {}]   ;;  %s24299_s3 = inlined_call_operand.vmem [shape: bf16[512,128], index: 3, kind: input, shape index: {}]   ;;  %s24300_s4 = inlined_call_operand.vmem [shape: f32[1,128], index: 4, kind: input, shape index: {}]   ;;  %s24301_s5 = inlined_call_operand.vmem [shape: f32[2,80,128], index: 5, kind: output, shape index: {}]  }
   0x1   :  { %s17198_s20 = smov 0  }
   0x2 LB: > { %s27_s21 = sadd.s32 1, %s17158_s19  ;;  %p13641_p0 = scmp.ge.s32.totalorder %s17162_s20, 1  ;;  %s17162_s20 = sphi %s17198_s20, %s15_s20   ;;  %s17158_s19 = sphi %s17196_s19, %s25264_s19   ;;  %s17154_s18 = sphi %s17194_s18, %s25263_s18  }
   0x3   : > { %p29_p1 = scmp.ge.s32.totalorder %s27_s21, 2  ;;  %p201_p2 = scmp.lt.s32.totalorder %s17162_s20, 3 }
   0x5   : > { %s25266_s21 = smov (%p29_p1, %s27_s21), 0  ;;  %p202_p3 = pnand %p13641_p0, %p201_p2 }
   0x7   : > { %205 = sbr.rel (%p202_p3) target bundleno = 1611 (0x64b), region = 40 }
   0xc   : > { %v15379_v0 = vld [vmem:[%s24297_s1 + $0xe4] ss:$16 sps:$4 sm:$0xff]   ;;  %v15383_v2 = vld [vmem:[%s24297_s1 + $0xe0] ss:$16 sps:$4 sm:$0xff]   ;;  %p233_p4 = scmp.lt.s32.totalorder %s17154_s18, 1  ;;  %vm704_vm3 = vcmask 1042432  }
   0xd   : > { %v15381_v1 = vld [vmem:[%s24297_s1 + $0x2e4] ss:$16 sps:$4 sm:$0xff]   ;;  %10083 = vmatprep.subr.bf16.mxu0 %v15379_v0  ;;  %v15384_v3 = vld [vmem:[%s24297_s1 + $0x2e0] ss:$16 sps:$4 sm:$0xff]   ;;  %vm453_vm0 = vsmask.f32 3328 }
   0xe   : > { %10166 = vmatprep.subr.bf16.mxu1 %v15381_v1  ;;  %v15385_v4 = vld [vmem:[%s24297_s1 + $0xc4] ss:$16 sps:$4 sm:$0xff]   ;;  %10084 = vmatpush1.bf16.msra.mxu0 %v15383_v2  ;;  %v15389_v6 = vld [vmem:[%s24297_s1 + $0xc0] ss:$16 sps:$4 sm:$0xff]   ;;  %s25268_s18 = smov (!%p233_p4, %s17154_s18), 1  ;;  %vm705_vm4 = vcmask 1046532  }
   0xf   : > { %10167 = vmatpush1.bf16.msra.mxu1 %v15384_v3  ;;  %v15387_v5 = vld [vmem:[%s24297_s1 + $0x2c4] ss:$16 sps:$4 sm:$0xff]   ;;  %10085 = vmatprep.subr.bf16.mxu0 %v15385_v4  ;;  %v15390_v7 = vld [vmem:[%s24297_s1 + $0x2c0] ss:$16 sps:$4 sm:$0xff]   ;;  %s15353_s16 = smul.u32 480, %s25268_s18  ;;  %vm18270_vm5 = vmor %vm704_vm3, %vm705_vm4  ;;  %vm1334_vm9 = vcmask 1041408  }
  0x10   : > { %10168 = vmatprep.subr.bf16.mxu1 %v15387_v5  ;;  %v15391_v8 = vld [vmem:[%s24297_s1 + $0xa4] ss:$16 sps:$4 sm:$0xff]   ;;  %v15395_v10 = vld [vmem:[%s24297_s1 + $0xa0] ss:$16 sps:$4 sm:$0xff]   ;;  %vm454_vm1 = vsmask.f32 7440 }
  0x11   : > { %v15393_v9 = vld [vmem:[%s24297_s1 + $0x2a4] ss:$16 sps:$4 sm:$0xff]   ;;  %v15396_v11 = vld [vmem:[%s24297_s1 + $0x2a0] ss:$16 sps:$4 sm:$0xff]   ;;  %s17357_s6 = scalar_lea.vmem %s24296_s0, %s15353_s16  ;;  %vm17681_vm2 = vmor %vm453_vm0, %vm454_vm1  ;;  %vm1075_vm6 = vsmask.f32 2304 }
  0x12   : > { %10086 = vmatpush1.bf16.msra.mxu0 %v15389_v6  ;;  %v15397_v12 = vld [vmem:[%s24297_s1 + $0x84] ss:$16 sps:$4 sm:$0xff]   ;;  %v15401_v14 = vld [vmem:[%s24297_s1 + $0x80] ss:$16 sps:$4 sm:$0xff]   ;;  %v17363_v46 = vld [vmem:[%s17357_s6 + $0x8] sm:$0xff]  ;;  %vm1335_vm10 = vcmask 1045508  }
  0x13   : > { %10169 = vmatpush1.bf16.msra.mxu1 %v15390_v7  ;;  %10087 = vmatprep.subr.bf16.mxu0 %v15391_v8  ;;  %v15399_v13 = vld [vmem:[%s24297_s1 + $0x284] ss:$16 sps:$4 sm:$0xff]   ;;  %v15402_v15 = vld [vmem:[%s24297_s1 + $0x280] ss:$16 sps:$4 sm:$0xff]   ;;  %v17366_v47 = vld [vmem:[%s17357_s6 + $0x28] sm:$0xff]  ;;  %vm1964_vm15 = vcmask 1040384  }
  0x14   : > { %10170 = vmatprep.subr.bf16.mxu1 %v15393_v9  ;;  %v15403_v16 = vld [vmem:[%s24297_s1 + $0x64] ss:$16 sps:$4 sm:$0xff]   ;;  %v15407_v18 = vld [vmem:[%s24297_s1 + $0x60] ss:$16 sps:$4 sm:$0xff]   ;;  %v17379_v51 = vpack.c.bf16 %v17366_v47, %v17363_v46  ;;  %v17389_v54 = vld [vmem:[%s17357_s6 + $0x18] sm:$0xff]  ;;  %vm1965_vm0 = vcmask 1044484  }
  0x15   : > { %v15405_v17 = vld [vmem:[%s24297_s1 + $0x264] ss:$16 sps:$4 sm:$0xff]   ;;  %v15408_v19 = vld [vmem:[%s24297_s1 + $0x260] ss:$16 sps:$4 sm:$0xff]   ;;  %v17392_v55 = vld [vmem:[%s17357_s6 + $0x38] sm:$0xff]  ;;  %s15354_s25 = smul.u32 80, %s25268_s18 }
  0x16   : > { %10088 = vmatpush1.bf16.msra.mxu0 %v15395_v10  ;;  %v15409_v20 = vld [vmem:[%s24297_s1 + $0x44] ss:$16 sps:$4 sm:$0xff]   ;;  %v15413_v22 = vld [vmem:[%s24297_s1 + $0x40] ss:$16 sps:$4 sm:$0xff]   ;;  %24537 = vst [vmem:[#allocation3_spill] sm:$0xff] %v17379_v51  ;;  %10115 = vmatprep.mubr.bf16.mxu0 %v17379_v51  ;;  %v17405_v59 = vpack.c.bf16 %v17392_v55, %v17389_v54  ;;  %vm19638_vm11 = vmor %vm1334_vm9, %vm1335_vm10 }
  0x17   : > { %10171 = vmatpush1.bf16.msra.mxu1 %v15396_v11  ;;  %10089 = vmatprep.subr.bf16.mxu0 %v15397_v12  ;;  %v15411_v21 = vld [vmem:[%s24297_s1 + $0x244] ss:$16 sps:$4 sm:$0xff]   ;;  %v15414_v23 = vld [vmem:[%s24297_s1 + $0x240] ss:$16 sps:$4 sm:$0xff]   ;;  %vm1076_vm7 = vsmask.f32 6416  ;;  %vm21026_vm1 = vmor %vm1964_vm15, %vm1965_vm0  ;;  %s24266_s28 = scalar_lea.vmem %s24301_s5, %s15354_s25 }
  0x18   : > { %10172 = vmatprep.subr.bf16.mxu1 %v15399_v13  ;;  %v15415_v24 = vld [vmem:[%s24297_s1 + $0x24] ss:$16 sps:$4 sm:$0xff]   ;;  %v15419_v26 = vld [vmem:[%s24297_s1 + $0x20] ss:$16 sps:$4 sm:$0xff]   ;;  %24538 = vst [vmem:[#allocation4_spill] sm:$0xff] %v17405_v59  ;;  %10198 = vmatprep.mubr.bf16.mxu1 %v17405_v59  ;;  %vm19171_vm8 = vmor %vm1075_vm6, %vm1076_vm7 }
  0x19   : > { %v15417_v25 = vld [vmem:[%s24297_s1 + $0x224] ss:$16 sps:$4 sm:$0xff]   ;;  %v15420_v27 = vld [vmem:[%s24297_s1 + $0x220] ss:$16 sps:$4 sm:$0xff]   ;;  %vm1705_vm12 = vsmask.f32 1280 }
  0x1a   : > { %10090 = vmatpush1.bf16.msra.mxu0 %v15401_v14  ;;  %v15421_v28 = vld [vmem:[%s24297_s1 + $0x4] ss:$16 sps:$4 sm:$0xff]   ;;  %v15425_v30 = vld [vmem:[%s24297_s1] ss:$16 sps:$4 sm:$0xff]   ;;  %vm1706_vm13 = vsmask.f32 5392 }
  0x1b   : > { %10173 = vmatpush1.bf16.msra.mxu1 %v15402_v15  ;;  %10091 = vmatprep.subr.bf16.mxu0 %v15403_v16  ;;  %v15423_v29 = vld [vmem:[%s24297_s1 + $0x204] ss:$16 sps:$4 sm:$0xff]   ;;  %v15426_v31 = vld [vmem:[%s24297_s1 + $0x200] ss:$16 sps:$4 sm:$0xff]   ;;  %vm20565_vm14 = vmor %vm1705_vm12, %vm1706_vm13 }
  0x1c   : > { %10174 = vmatprep.subr.bf16.mxu1 %v15405_v17  ;;  %v15427_v32 = vld [vmem:[%s24297_s1 + $0x1e4] ss:$16 sps:$4 sm:$0xff]   ;;  %v15431_v34 = vld [vmem:[%s24297_s1 + $0x1e0] ss:$16 sps:$4 sm:$0xff]  }
  0x1d   : > { %v15429_v33 = vld [vmem:[%s24297_s1 + $0x3e4] ss:$16 sps:$4 sm:$0xff]   ;;  %v15432_v35 = vld [vmem:[%s24297_s1 + $0x3e0] ss:$16 sps:$4 sm:$0xff]  }
  0x1e   : > { %10092 = vmatpush1.bf16.msra.mxu0 %v15407_v18  ;;  %v15433_v36 = vld [vmem:[%s24297_s1 + $0x1c4] ss:$16 sps:$4 sm:$0xff]   ;;  %v15437_v38 = vld [vmem:[%s24297_s1 + $0x1c0] ss:$16 sps:$4 sm:$0xff]  }
  0x1f   : > { %10175 = vmatpush1.bf16.msra.mxu1 %v15408_v19  ;;  %10093 = vmatprep.subr.bf16.mxu0 %v15409_v20  ;;  %v15435_v37 = vld [vmem:[%s24297_s1 + $0x3c4] ss:$16 sps:$4 sm:$0xff]   ;;  %v15438_v39 = vld [vmem:[%s24297_s1 + $0x3c0] ss:$16 sps:$4 sm:$0xff]   ;;  %v17471_v20 = vld [vmem:[%s17357_s6 + $0x48] sm:$0xff] }
  0x20   : > { %10176 = vmatprep.subr.bf16.mxu1 %v15411_v21  ;;  %v15439_v40 = vld [vmem:[%s24297_s1 + $0x1a4] ss:$16 sps:$4 sm:$0xff]   ;;  %v15443_v42 = vld [vmem:[%s24297_s1 + $0x1a0] ss:$16 sps:$4 sm:$0xff]   ;;  %v17474_v21 = vld [vmem:[%s17357_s6 + $0x68] sm:$0xff] }
  0x21   : > { %v15441_v41 = vld [vmem:[%s24297_s1 + $0x3a4] ss:$16 sps:$4 sm:$0xff]   ;;  %v15444_v43 = vld [vmem:[%s24297_s1 + $0x3a0] ss:$16 sps:$4 sm:$0xff]  }
  0x22   : > { %10094 = vmatpush1.bf16.msra.mxu0 %v15413_v22  ;;  %v15445_v44 = vld [vmem:[%s24297_s1 + $0x184] ss:$16 sps:$4 sm:$0xff]   ;;  %v15449_v48 = vld [vmem:[%s24297_s1 + $0x180] ss:$16 sps:$4 sm:$0xff]   ;;  %v17480_v22 = vpack.c.bf16 %v17474_v21, %v17471_v20 }
  0x23   : > { %10177 = vmatpush1.bf16.msra.mxu1 %v15414_v23  ;;  %10095 = vmatprep.subr.bf16.mxu0 %v15415_v24  ;;  %v15447_v45 = vld [vmem:[%s24297_s1 + $0x384] ss:$16 sps:$4 sm:$0xff]   ;;  %v15450_v49 = vld [vmem:[%s24297_s1 + $0x380] ss:$16 sps:$4 sm:$0xff]  }
  0x24   : > { %10178 = vmatprep.subr.bf16.mxu1 %v15417_v25  ;;  %v15451_v50 = vld [vmem:[%s24297_s1 + $0x164] ss:$16 sps:$4 sm:$0xff]   ;;  %v15455_v53 = vld [vmem:[%s24297_s1 + $0x160] ss:$16 sps:$4 sm:$0xff]   ;;  %24541 = vst [vmem:[#allocation7_spill] sm:$0xff] %v17480_v22  ;;  %v17489_v25 = vld [vmem:[%s17357_s6 + $0x58] sm:$0xff] }
  0x25   : > { %v15453_v52 = vld [vmem:[%s24297_s1 + $0x364] ss:$16 sps:$4 sm:$0xff]   ;;  %v15456_v56 = vld [vmem:[%s24297_s1 + $0x360] ss:$16 sps:$4 sm:$0xff]  }
  0x26   : > { %10096 = vmatpush1.bf16.msra.mxu0 %v15419_v26  ;;  %v15457_v57 = vld [vmem:[%s24297_s1 + $0x144] ss:$16 sps:$4 sm:$0xff]   ;;  %v15461_v60 = vld [vmem:[%s24297_s1 + $0x140] ss:$16 sps:$4 sm:$0xff]   ;;  %v17492_v26 = vld [vmem:[%s17357_s6 + $0x78] sm:$0xff] }
  0x27   : > { %10179 = vmatpush1.bf16.msra.mxu1 %v15420_v27  ;;  %10097 = vmatprep.subr.bf16.mxu0 %v15421_v28  ;;  %v15459_v58 = vld [vmem:[%s24297_s1 + $0x344] ss:$16 sps:$4 sm:$0xff]   ;;  %v15462_v61 = vld [vmem:[%s24297_s1 + $0x340] ss:$16 sps:$4 sm:$0xff]  }
  0x28   : > { %10180 = vmatprep.subr.bf16.mxu1 %v15423_v29  ;;  %v15463_v62 = vld [vmem:[%s24297_s1 + $0x124] ss:$16 sps:$4 sm:$0xff]   ;;  %v15467_v0 = vld [vmem:[%s24297_s1 + $0x120] ss:$16 sps:$4 sm:$0xff]   ;;  %v17502_v29 = vpack.c.bf16 %v17492_v26, %v17489_v25 }
  0x29   : > { %v15465_v63 = vld [vmem:[%s24297_s1 + $0x324] ss:$16 sps:$4 sm:$0xff]   ;;  %v15468_v1 = vld [vmem:[%s24297_s1 + $0x320] ss:$16 sps:$4 sm:$0xff]  }
  0x2a   : > { %10098 = vmatpush1.bf16.msra.mxu0 %v15425_v30  ;;  %v15469_v2 = vld [vmem:[%s24297_s1 + $0x104] ss:$16 sps:$4 sm:$0xff]   ;;  %v15473_v4 = vld [vmem:[%s24297_s1 + $0x100] ss:$16 sps:$4 sm:$0xff]   ;;  %24542 = vst [vmem:[#allocation8_spill] sm:$0xff] %v17502_v29 }
  0x2b   : > { %10181 = vmatpush1.bf16.msra.mxu1 %v15426_v31  ;;  %10099 = vmatprep.subr.bf16.mxu0 %v15427_v32  ;;  %v15471_v3 = vld [vmem:[%s24297_s1 + $0x304] ss:$16 sps:$4 sm:$0xff]   ;;  %v15474_v5 = vld [vmem:[%s24297_s1 + $0x300] ss:$16 sps:$4 sm:$0xff]  }
  0x2c   : > { %10182 = vmatprep.subr.bf16.mxu1 %v15429_v33  ;;  %v255_v6 = vld [vmem:[%s17357_s6] sm:$0xff]  ;;  %v257_v8 = vld [vmem:[%s17357_s6 + $0x10] sm:$0xff] }
  0x2d   : > { %v259_v7 = vld [vmem:[%s17357_s6 + $0x20] sm:$0xff]  ;;  %v261_v9 = vld [vmem:[%s17357_s6 + $0x30] sm:$0xff]  ;;  %v17505_v30 = vpack.c.bf16 %v17363_v46, %v255_v6  ;;  %v17555_v46 = vld [vmem:[%s17357_s6 + $0xa8] sm:$0xff] }
  0x2e   : > { %10100 = vmatpush2.bf16.msra.mxu0 %v15431_v34  ;;  %v15477_v10 = vld [vmem:[%s24297_s1 + $0x4e4] ss:$16 sps:$4 sm:$0xff]   ;;  %v17448_v12 = vpack.c.bf16 %v259_v7, %v255_v6  ;;  %v17450_v13 = vpack.c.bf16 %v261_v9, %v257_v8  ;;  %v15475_v14 = vld [vmem:[%s24297_s1 + $0x4e0] ss:$16 sps:$4 sm:$0xff]  }
  0x2f   : > { %10183 = vmatpush2.bf16.msra.mxu1 %v15432_v35  ;;  %10101 = vmatprep.subr.bf16.mxu0 %v15433_v36  ;;  %v15480_v11 = vld [vmem:[%s24297_s1 + $0x6e4] ss:$16 sps:$4 sm:$0xff]   ;;  %v15478_v15 = vld [vmem:[%s24297_s1 + $0x6e0] ss:$16 sps:$4 sm:$0xff]   ;;  %24543 = vst [vmem:[#allocation9_spill] sm:$0xff] %v17505_v30  ;;  %v17523_v35 = vpack.c.bf16 %v17366_v47, %v259_v7  ;;  %v460_v47 = vshll.u32 %v17505_v30, 16 }
  0x30   : > { %10184 = vmatprep.subr.bf16.mxu1 %v15435_v37  ;;  %24539 = vst [vmem:[#allocation5_spill] sm:$0xff] %v17448_v12  ;;  %24540 = vst [vmem:[#allocation6_spill] sm:$0xff] %v17450_v13  ;;  %v15483_v16 = vld [vmem:[%s24297_s1 + $0x4c4] ss:$16 sps:$4 sm:$0xff]   ;;  %v15481_v18 = vld [vmem:[%s24297_s1 + $0x4c0] ss:$16 sps:$4 sm:$0xff]  }
  0x31   : > { %v15486_v17 = vld [vmem:[%s24297_s1 + $0x6c4] ss:$16 sps:$4 sm:$0xff]   ;;  %v15484_v19 = vld [vmem:[%s24297_s1 + $0x6c0] ss:$16 sps:$4 sm:$0xff]   ;;  %24545 = vst [vmem:[#allocation11_spill] sm:$0xff] %v17523_v35 }
  0x32   : > { %10102 = vmatpush2.bf16.msra.mxu0 %v15437_v38  ;;  %v17483_v23 = vld [vmem:[%s17357_s6 + $0x40] sm:$0xff]  ;;  %v17509_v31 = vld [vmem:[%s17357_s6 + $0x50] sm:$0xff]  ;;  %v17533_v38 = vpack.c.bf16 %v17389_v54, %v257_v8  ;;  %v484_v54 = vshrl.u32 %v17523_v35, 16 }
  0x33   : > { %10185 = vmatpush2.bf16.msra.mxu1 %v15438_v39  ;;  %10103 = vmatprep.subr.bf16.mxu0 %v15439_v40  ;;  %v17486_v24 = vld [vmem:[%s17357_s6 + $0x60] sm:$0xff]  ;;  %v17520_v34 = vld [vmem:[%s17357_s6 + $0x70] sm:$0xff] }
  0x34   : > { %10186 = vmatprep.subr.bf16.mxu1 %v15441_v41  ;;  %v15489_v27 = vld [vmem:[%s24297_s1 + $0x4a4] ss:$16 sps:$4 sm:$0xff]   ;;  %v15487_v32 = vld [vmem:[%s24297_s1 + $0x4a0] ss:$16 sps:$4 sm:$0xff]   ;;  %v17516_v33 = vpack.c.bf16 %v17486_v24, %v17483_v23  ;;  %v17530_v37 = vpack.c.bf16 %v17520_v34, %v17509_v31  ;;  %24547 = vst [vmem:[#allocation13_spill] sm:$0xff] %v17533_v38  ;;  %v457_v41 = vshrl.u32 %v17505_v30, 16 }
  0x35   : > { %v15492_v28 = vld [vmem:[%s24297_s1 + $0x6a4] ss:$16 sps:$4 sm:$0xff]   ;;  %v15490_v36 = vld [vmem:[%s24297_s1 + $0x6a0] ss:$16 sps:$4 sm:$0xff]   ;;  %v486_v7 = vrot.slane %v484_v54, 4 }
  0x36   : > { %10104 = vmatpush2.bf16.msra.mxu0 %v15443_v42  ;;  %24544 = vst [vmem:[#allocation10_spill] sm:$0xff] %v17516_v33  ;;  %24546 = vst [vmem:[#allocation12_spill] sm:$0xff] %v17530_v37  ;;  %v15495_v39 = vld [vmem:[%s24297_s1 + $0x484] ss:$16 sps:$4 sm:$0xff]   ;;  %v17543_v42 = vpack.c.bf16 %v17392_v55, %v261_v9  ;;  %v17576_v55 = vld [vmem:[%s17357_s6 + $0xb8] sm:$0xff] }
  0x37   : > { %10187 = vmatpush2.bf16.msra.mxu1 %v15444_v43  ;;  %10105 = vmatprep.subr.bf16.mxu0 %v15445_v44  ;;  %v15498_v40 = vld [vmem:[%s24297_s1 + $0x684] ss:$16 sps:$4 sm:$0xff]   ;;  %v15493_v43 = vld [vmem:[%s24297_s1 + $0x480] ss:$16 sps:$4 sm:$0xff]  }
  0x38   : > { %10188 = vmatprep.subr.bf16.mxu1 %v15447_v45  ;;  %v15496_v44 = vld [vmem:[%s24297_s1 + $0x680] ss:$16 sps:$4 sm:$0xff]   ;;  %v17552_v45 = vld [vmem:[%s17357_s6 + $0x88] sm:$0xff] }
  0x39   : > { %v15502_v8 = vld [vmem:[%s24297_s1 + $0x660] ss:$16 sps:$4 sm:$0xff]  }
  0x3a   : > { %10106 = vmatpush2.bf16.msra.mxu0 %v15449_v48  ;;  %v17562_v48 = vpack.c.bf16 %v17555_v46, %v17552_v45  ;;  %v15571_v51 = vld [vmem:[%s24297_s1 + $0x8e0] ss:$16 sps:$4 sm:$0xff]  }
  0x3b   : > { %10189 = vmatpush2.bf16.msra.mxu1 %v15450_v49  ;;  %10107 = vmatprep.subr.bf16.mxu0 %v15451_v50  ;;  %v17565_v49 = vld [vmem:[%s17357_s6 + $0x80] sm:$0xff] }
  0x3c   : > { %10190 = vmatprep.subr.bf16.mxu1 %v15453_v52  ;;  %24548 = vst [vmem:[#allocation14_spill] sm:$0xff] %v17562_v48  ;;  %v17568_v50 = vld [vmem:[%s17357_s6 + $0xa0] sm:$0xff]  ;;  %v17571_v52 = vld [vmem:[%s17357_s6 + $0x98] sm:$0xff] }
  0x3e   : > { %10108 = vmatpush2.bf16.msra.mxu0 %v15455_v53  ;;  %v466_v53 = vshll.u32 %v17523_v35, 16 }
  0x3f   : > { %10191 = vmatpush2.bf16.msra.mxu1 %v15456_v56  ;;  %10109 = vmatprep.subr.bf16.mxu0 %v15457_v57  ;;  %v471_v56 = vshrl.u32 %v17533_v38, 16  ;;  %v15501_v57 = vld [vmem:[%s24297_s1 + $0x464] ss:$16 sps:$4 sm:$0xff]  }
  0x40   : > { %10192 = vmatprep.subr.bf16.mxu1 %v15459_v58  ;;  %v15504_v58 = vld [vmem:[%s24297_s1 + $0x664] ss:$16 sps:$4 sm:$0xff]   ;;  %v17609_v6 = vrot.slane %v466_v53, 5 }
  0x41   : > { %v24588_v53 = vld [vmem:[#allocation11_spill] sm:$0xff] }
  0x42   : > { %10110 = vmatpush2.bf16.msra.mxu0 %v15461_v60  ;;  %v17587_v60 = vpack.c.bf16 %v17576_v55, %v17571_v52  ;;  %v487_v54 = vor.u32 %v486_v7, %v17609_v6  ;;  %v15519_v7 = vld [vmem:[%s24297_s1 + $0x404] ss:$16 sps:$4 sm:$0xff]  }
  0x43   : > { %10193 = vmatpush2.bf16.msra.mxu1 %v15462_v61  ;;  %10111 = vmatprep.subr.bf16.mxu0 %v15463_v62  ;;  %v17589_v61 = vrot.slane %v457_v41, 4  ;;  %v474_v62 = vshll.u32 %v17533_v38, 16  ;;  %v17656_v41 = vld [vmem:[%s17357_s6 + $0xe0] sm:$0xff] }
  0x44   : > { %10194 = vmatprep.subr.bf16.mxu1 %v15465_v63  ;;  %24549 = vst [vmem:[#allocation15_spill] sm:$0xff] %v17587_v60  ;;  %v480_v63 = vshll.u32 %v17543_v42, 16 }
  0x46   : > { %10112 = vmatpush2.bf16.msra.mxu0 %v15467_v0  ;;  %v17595_v0 = vld [vmem:[%s17357_s6 + $0x90] sm:$0xff] }
  0x47   : > { %10195 = vmatpush2.bf16.msra.mxu1 %v15468_v1  ;;  %10113 = vmatprep.subr.bf16.mxu0 %v15469_v2  ;;  %v462_v1 = vrot.slane %v460_v47, 5  ;;  %v494_v2 = vshrl.u32 %v17543_v42, 16  ;;  %v17677_v47 = vld [vmem:[%s17357_s6 + $0xd0] sm:$0xff] }
  0x48   : > { %10196 = vmatprep.subr.bf16.mxu1 %v15471_v3  ;;  %v15499_v3 = vld [vmem:[%s24297_s1 + $0x460] ss:$16 sps:$4 sm:$0xff]  }
  0x4a   : > { %10114 = vmatpush2.bf16.msra.mxu0 %v15473_v4  ;;  %v17603_v4 = vpack.c.bf16 %v17568_v50, %v17565_v49 }
  0x4b   : > { %10197 = vmatpush2.bf16.msra.mxu1 %v15474_v5  ;;  %10249 = vmatprep.subr.bf16.mxu0 %v15477_v10  ;;  %v17607_v5 = vld [vmem:[%s17357_s6 + $0xb0] sm:$0xff]  ;;  %v473_v10 = vrot.slane %v471_v56, 4 }
  0x4c   : > { %10332 = vmatprep.subr.bf16.mxu1 %v15480_v11  ;;  %24550 = vst [vmem:[#allocation16_spill] sm:$0xff] %v17603_v4  ;;  %v17616_v9 = vpack.c.bf16 %v17607_v5, %v17595_v0  ;;  %v15507_v11 = vld [vmem:[%s24297_s1 + $0x444] ss:$16 sps:$4 sm:$0xff]  }
  0x4d   : > { %10116 = vmatmul.mubr.bf16.vlgmr.msra.gmra.mxu0 %v17448_v12 }
  0x4e   : > { %10199 = vmatmul.mubr.bf16.vlgmr.msra.gmra.mxu1 %v17450_v13  ;;  %10250 = vmatpush1.bf16.msra.mxu0 %v15475_v14  ;;  %24551 = vst [vmem:[#allocation17_spill] sm:$0xff] %v17616_v9  ;;  %v15510_v14 = vld [vmem:[%s24297_s1 + $0x644] ss:$16 sps:$4 sm:$0xff]  }
  0x4f   : > { %10333 = vmatpush1.bf16.msra.mxu1 %v15478_v15  ;;  %10251 = vmatprep.subr.bf16.mxu0 %v15483_v16  ;;  %v476_v15 = vrot.slane %v474_v62, 5  ;;  %v17624_v16 = vrot.slane %v480_v63, 5 }
  0x50   : > { %10334 = vmatprep.subr.bf16.mxu1 %v15486_v17  ;;  %10125 = vmatprep.mubr.bf16.mxu0 %v17480_v22  ;;  %v15505_v17 = vld [vmem:[%s24297_s1 + $0x440] ss:$16 sps:$4 sm:$0xff]  }
  0x51   : > { %10208 = vmatprep.mubr.bf16.mxu1 %v17502_v29  ;;  %v477_v56 = vor.u32 %v476_v15, %v473_v10  ;;  %v15520_v15 = vld [vmem:[%s24297_s1 + $0x600] ss:$16 sps:$4 sm:$0xff]  }
  0x52   : > { %10252 = vmatpush1.bf16.msra.mxu0 %v15481_v18  ;;  %v15508_v18 = vld [vmem:[%s24297_s1 + $0x640] ss:$16 sps:$4 sm:$0xff]  }
  0x53   : > { %10335 = vmatpush1.bf16.msra.mxu1 %v15484_v19  ;;  %10253 = vmatprep.subr.bf16.mxu0 %v15489_v27  ;;  %v17633_v19 = vld [vmem:[%s17357_s6 + $0xc8] sm:$0xff] }
  0x54   : > { %10336 = vmatprep.subr.bf16.mxu1 %v15492_v28  ;;  %v17636_v27 = vld [vmem:[%s17357_s6 + $0xe8] sm:$0xff]  ;;  %v496_v28 = vrot.slane %v494_v2, 4  ;;  %v15514_v2 = vld [vmem:[%s24297_s1 + $0x620] ss:$16 sps:$4 sm:$0xff]  }
  0x55   : > { %10126 = vmatmul.mubr.bf16.gmra.mxu0 %v17516_v33 }
  0x56   : > { %10209 = vmatmul.mubr.bf16.gmra.mxu1 %v17530_v37  ;;  %10254 = vmatpush1.bf16.msra.mxu0 %v15487_v32  ;;  %v17640_v32 = vpack.c.bf16 %v17471_v20, %v17483_v23  ;;  %v17662_v20 = vld [vmem:[%s17357_s6 + $0xf8] sm:$0xff]  ;;  %v15513_v23 = vld [vmem:[%s24297_s1 + $0x424] ss:$16 sps:$4 sm:$0xff]   ;;  %v497_v63 = vor.u32 %v496_v28, %v17624_v16  ;;  %v488_v28 = vrot.slane %v487_v54, 4  ;;  %v15532_v37 = vld [vmem:[%s24297_s1 + $0x7c0] ss:$16 sps:$4 sm:$0xff]  }
  0x57   : > { %10337 = vmatpush1.bf16.msra.mxu1 %v15490_v36  ;;  %10255 = vmatprep.subr.bf16.mxu0 %v15495_v39  ;;  %v17644_v36 = vpack.c.bf16 %v17489_v25, %v17509_v31  ;;  %v17650_v39 = vpack.c.bf16 %v17636_v27, %v17633_v19  ;;  %v15516_v25 = vld [vmem:[%s24297_s1 + $0x624] ss:$16 sps:$4 sm:$0xff]  }
  0x58   : > { %10338 = vmatprep.subr.bf16.mxu1 %v15498_v40  ;;  %10135 = vmatprep.mubr.bf16.mxu0 %v17562_v48  ;;  %v17653_v40 = vld [vmem:[%s17357_s6 + $0xc0] sm:$0xff]  ;;  %v490_v62 = vshll.u32 %v17640_v32, 16  ;;  %v17840_v48 = vpack.c.bf16 %v17555_v46, %v17568_v50 }
  0x59   : > { %10218 = vmatprep.mubr.bf16.mxu1 %v17587_v60  ;;  %24552 = vst [vmem:[#allocation18_spill] sm:$0xff] %v17650_v39  ;;  %v15529_v60 = vld [vmem:[%s24297_s1 + $0x5c0] ss:$16 sps:$4 sm:$0xff]  }
  0x5a   : > { %10256 = vmatpush1.bf16.msra.mxu0 %v15493_v43  ;;  %v17659_v43 = vld [vmem:[%s17357_s6 + $0xd8] sm:$0xff]  ;;  %v564_v50 = vshrl.u32 %v17840_v48, 16 }
  0x5b   : > { %10339 = vmatpush1.bf16.msra.mxu1 %v15496_v44  ;;  %10257 = vmatprep.subr.bf16.mxu0 %v15501_v57  ;;  %v17672_v31 = vpack.c.bf16 %v17662_v20, %v17659_v43  ;;  %v463_v44 = vor.u32 %v462_v1, %v17589_v61  ;;  %v15511_v57 = vld [vmem:[%s24297_s1 + $0x420] ss:$16 sps:$4 sm:$0xff]   ;;  %v500_v1 = vshll.u32 %v17644_v36, 16 }
  0x5c   : > { %10340 = vmatprep.subr.bf16.mxu1 %v15504_v58  ;;  %v17691_v58 = vpack.c.bf16 %v17656_v41, %v17653_v40  ;;  %v17695_v61 = vld [vmem:[%s17357_s6 + $0xf0] sm:$0xff] }
  0x5d   : > { %10136 = vmatmul.mubr.bf16.gmra.mxu0 %v17603_v4  ;;  %24553 = vst [vmem:[#allocation19_spill] sm:$0xff] %v17672_v31  ;;  %v464_v10 = vrot.slane %v463_v44, 4  ;;  %v17742_v44 = vld [vmem:[%s17357_s6 + $0x118] sm:$0xff]  ;;  %v17746_v54 = vrot.slane %v500_v1, 5  ;;  %v17765_v1 = vld [vmem:[%s17357_s6 + $0x110] sm:$0xff] }
  0x5e   : > { %10219 = vmatmul.mubr.bf16.gmra.mxu1 %v17616_v9  ;;  %10258 = vmatpush1.bf16.msra.mxu0 %v15499_v3  ;;  %24556 = vst [vmem:[#allocation20_spill] sm:$0xff] %v17691_v58  ;;  %v17705_v3 = vpack.c.bf16 %v17695_v61, %v17677_v47  ;;  %v17780_v9 = vpack.c.bf16 %v17492_v26, %v17520_v34  ;;  %v15526_v34 = vld [vmem:[%s24297_s1 + $0x7e0] ss:$16 sps:$4 sm:$0xff]  }
  0x5f   : > { %10341 = vmatpush1.bf16.msra.mxu1 %v15502_v8  ;;  %10259 = vmatprep.subr.bf16.mxu0 %v15507_v11  ;;  %v15522_v8 = vld [vmem:[%s24297_s1 + $0x604] ss:$16 sps:$4 sm:$0xff]   ;;  %v17715_v11 = vpack.c.bf16 %v17474_v21, %v17486_v24 }
  0x60   : > { %10342 = vmatprep.subr.bf16.mxu1 %v15510_v14  ;;  %10145 = vmatprep.mubr.bf16.mxu0 %v17650_v39  ;;  %24557 = vst [vmem:[#allocation21_spill] sm:$0xff] %v17705_v3  ;;  %v15517_v14 = vld [vmem:[%s24297_s1 + $0x400] ss:$16 sps:$4 sm:$0xff]   ;;  %v498_v39 = vrot.slane %v497_v63, 4 }
  0x61   : > { %10228 = vmatprep.mubr.bf16.mxu1 %v17672_v31  ;;  %v17736_v24 = vld [vmem:[%s17357_s6 + $0x100] sm:$0xff]  ;;  %v17744_v31 = vrot.slane %v490_v62, 5 }
  0x62   : > { %10260 = vmatpush1.bf16.msra.mxu0 %v15505_v17  ;;  %v17724_v17 = vld [vmem:[%s17357_s6 + $0x108] sm:$0xff]  ;;  %v15528_v62 = vld [vmem:[%s24297_s1 + $0x7e4] ss:$16 sps:$4 sm:$0xff]   ;;  %v17801_v26 = vsel %vm17681_vm2, %v498_v39, %v17746_v54 }
  0x63   : > { %10343 = vmatpush1.bf16.msra.mxu1 %v15508_v18  ;;  %10261 = vmatprep.subr.bf16.mxu0 %v15513_v23  ;;  %v17727_v18 = vld [vmem:[%s17357_s6 + $0x128] sm:$0xff]  ;;  %v478_v23 = vrot.slane %v477_v56, 4  ;;  %v17749_v56 = vld [vmem:[%s17357_s6 + $0x138] sm:$0xff]  ;;  %v15534_v39 = vld [vmem:[%s24297_s1 + $0x7c4] ss:$16 sps:$4 sm:$0xff]   ;;  %v17962_v33 = vpack.c.bf16 %v17724_v17, %v17736_v24 }
  0x64   : > { %10344 = vmatprep.subr.bf16.mxu1 %v15516_v25  ;;  %v17733_v21 = vpack.c.bf16 %v17727_v18, %v17724_v17  ;;  %v17739_v25 = vld [vmem:[%s17357_s6 + $0x120] sm:$0xff]  ;;  %v17760_v63 = vpack.c.bf16 %v17749_v56, %v17742_v44 }
  0x65   : > { %10146 = vmatmul.mubr.bf16.gmra.mxu0 %v17691_v58  ;;  %v15525_v58 = vld [vmem:[%s24297_s1 + $0x5e4] ss:$16 sps:$4 sm:$0xff]   ;;  %v17787_v4 = vpack.c.bf16 %v17739_v25, %v17736_v24 }
  0x66   : > { %10229 = vmatmul.mubr.bf16.gmra.mxu1 %v17705_v3  ;;  %24558 = vst [vmem:[#allocation22_spill] sm:$0xff] %v17733_v21  ;;  %10262 = vmatpush1.bf16.msra.mxu0 %v15511_v57  ;;  %v504_v3 = vshrl.u32 %v17640_v32, 16  ;;  %24559 = vst [vmem:[#allocation23_spill] sm:$0xff] %v17760_v63  ;;  %v524_v57 = vshrl.u32 %v17715_v11, 16  ;;  %v15561_v17 = vld [vmem:[%s24297_s1 + $0x524] ss:$16 sps:$4 sm:$0xff]  }
  0x67   : > { %10345 = vmatpush1.bf16.msra.mxu1 %v15514_v2  ;;  %10263 = vmatprep.subr.bf16.mxu0 %v15519_v7  ;;  %v17770_v2 = vsel %vm17681_vm2, %v464_v10, %v17609_v6  ;;  %v17775_v7 = vsel %vm17681_vm2, %v478_v23, %v17624_v16  ;;  %24560 = vst [vmem:[#allocation24_spill] sm:$0xff] %v17787_v4  ;;  %v17791_v6 = vld [vmem:[%s17357_s6 + $0x130] sm:$0xff] }
  0x68   : > { %10346 = vmatprep.subr.bf16.mxu1 %v15522_v8  ;;  %10155 = vmatprep.mubr.bf16.mxu0 %v17733_v21  ;;  %v510_v8 = vshll.u32 %v17715_v11, 16  ;;  %v15523_v21 = vld [vmem:[%s24297_s1 + $0x5e0] ss:$16 sps:$4 sm:$0xff]   ;;  %v17796_v16 = vsel %vm17681_vm2, %v488_v28, %v17744_v31  ;;  %v17808_v10 = vpack.c.bf16 %v17791_v6, %v17765_v1  ;;  %v506_v23 = vrot.slane %v504_v3, 4  ;;  %v15531_v28 = vld [vmem:[%s24297_s1 + $0x5c4] ss:$16 sps:$4 sm:$0xff]  }
  0x69   : > { %10238 = vmatprep.mubr.bf16.mxu1 %v17760_v63  ;;  %v17819_v63 = vcombine.high %v17770_v2, %v17796_v16  ;;  %v17823_v3 = vcombine.high %v17775_v7, %v17801_v26 }
  0x6a   : > { %10264 = vmatpush1.bf16.msra.mxu0 %v15517_v14  ;;  %24561 = vst [vmem:[#allocation25_spill] sm:$0xff] %v17808_v10  ;;  %v17836_v14 = vpack.c.bf16 %v17552_v45, %v17565_v49  ;;  %v15540_v45 = vld [vmem:[%s24297_s1 + $0x7a4] ss:$16 sps:$4 sm:$0xff]   ;;  %v507_v49 = vor.u32 %v506_v23, %v17744_v31  ;;  %v17866_v31 = vpack.c.bf16 %v17576_v55, %v17607_v5  ;;  %v15535_v23 = vld [vmem:[%s24297_s1 + $0x5a0] ss:$16 sps:$4 sm:$0xff]  }
  0x6b   : > { %10347 = vmatpush1.bf16.msra.mxu1 %v15520_v15  ;;  %10265 = vmatprep.subr.bf16.mxu0 %v15525_v58  ;;  %v526_v15 = vrot.slane %v524_v57, 4  ;;  %24562 = vst [vmem:[#allocation26_spill] sm:$0xff] %v17819_v63  ;;  %24563 = vst [vmem:[#allocation27_spill] sm:$0xff] %v17823_v3  ;;  %v514_v58 = vshrl.u32 %v17644_v36, 16  ;;  %v17832_v57 = vrot.slane %v510_v8, 5  ;;  %v17885_v5 = vpack.c.bf16 %v17636_v27, %v17656_v41 }
  0x6c   : > { %10348 = vmatprep.subr.bf16.mxu1 %v15528_v62  ;;  %v534_v62 = vshrl.u32 %v17780_v9, 16  ;;  %v15543_v55 = vld [vmem:[%s24297_s1 + $0x584] ss:$16 sps:$4 sm:$0xff]   ;;  %v574_v27 = vshrl.u32 %v17866_v31, 16  ;;  %v15541_v41 = vld [vmem:[%s24297_s1 + $0x580] ss:$16 sps:$4 sm:$0xff]  }
  0x6d   : > { %10156 = vmatmul.mubr.bf16.gmra.mxu0 %v17787_v4  ;;  %v527_v46 = vor.u32 %v526_v15, %v17832_v57 }
  0x6e   : > { %10239 = vmatmul.mubr.bf16.gmra.mxu1 %v17808_v10  ;;  %10266 = vmatpush2.bf16.msra.mxu0 %v15523_v21  ;;  %v15537_v10 = vld [vmem:[%s24297_s1 + $0x5a4] ss:$16 sps:$4 sm:$0xff]   ;;  %v544_v21 = vshrl.u32 %v17836_v14, 16  ;;  %v17862_v8 = vrot.slane %v534_v62, 4  ;;  %v17896_v62 = vpack.c.bf16 %v17633_v19, %v17653_v40  ;;  %v15544_v40 = vld [vmem:[%s24297_s1 + $0x780] ss:$16 sps:$4 sm:$0xff]  }
  0x6f   : > { %10349 = vmatpush2.bf16.msra.mxu1 %v15526_v34  ;;  %10267 = vmatprep.subr.bf16.mxu0 %v15531_v28  ;;  %v24564_v34 = vrot.slane %v17523_v35, 5 }
  0x70   : > { %10350 = vmatprep.subr.bf16.mxu1 %v15534_v39  ;;  %10281 = vmatprep.mubr.bf16.mxu0 %v17819_v63  ;;  %v516_v39 = vrot.slane %v514_v58, 4  ;;  %v15538_v58 = vld [vmem:[%s24297_s1 + $0x7a0] ss:$16 sps:$4 sm:$0xff]   ;;  %v584_v19 = vshrl.u32 %v17896_v62, 16 }
  0x71   : > { %10364 = vmatprep.mubr.bf16.mxu1 %v17823_v3  ;;  %v17860_v28 = vrot.slane %v24564_v34, 4  ;;  %v17875_v3 = vpack.c.bf16 %v17571_v52, %v17595_v0  ;;  %v15546_v52 = vld [vmem:[%s24297_s1 + $0x784] ss:$16 sps:$4 sm:$0xff]   ;;  %v17891_v0 = vrot.slane %v544_v21, 4  ;;  %v17914_v34 = vpack.c.bf16 %v17659_v43, %v17677_v47 }
  0x72   : > { %10268 = vmatpush2.bf16.msra.mxu0 %v15529_v60  ;;  %v508_v60 = vrot.slane %v507_v49, 4  ;;  %v528_v49 = vrot.slane %v527_v46, 4  ;;  %v517_v21 = vor.u32 %v516_v39, %v17746_v54  ;;  %v15552_v54 = vld [vmem:[%s24297_s1 + $0x764] ss:$16 sps:$4 sm:$0xff]   ;;  %v17923_v39 = vrot.slane %v564_v50, 4 }
  0x73   : > { %24565 = vst [vmem:[#allocation28_spill] sm:$0xff] %v17860_v28  ;;  %10351 = vmatpush2.bf16.msra.mxu1 %v15532_v37  ;;  %10269 = vmatprep.subr.bf16.mxu0 %v15537_v10  ;;  %v530_v37 = vshll.u32 %v17836_v14, 16  ;;  %v554_v15 = vshrl.u32 %v17875_v3, 16  ;;  %v520_v10 = vshll.u32 %v17780_v9, 16  ;;  %v594_v43 = vshrl.u32 %v17914_v34, 16  ;;  %v298_v28 = vld [vmem:[%s17357_s6 + $0x158] sm:$0xff] }
  0x74   : > { %10352 = vmatprep.subr.bf16.mxu1 %v15540_v45  ;;  %v17905_v45 = vpack.c.bf16 %v17662_v20, %v17695_v61  ;;  %v15549_v20 = vld [vmem:[%s24297_s1 + $0x564] ss:$16 sps:$4 sm:$0xff]   ;;  %v604_v61 = vshrl.u32 %v17885_v5, 16  ;;  %v17934_v4 = vrot.slane %v584_v19, 4  ;;  %v15550_v50 = vld [vmem:[%s24297_s1 + $0x760] ss:$16 sps:$4 sm:$0xff]  }
  0x75   : > { %v532_v46 = vrot.slane %v530_v37, 5  ;;  %v522_v47 = vrot.slane %v520_v10, 5  ;;  %v15555_v37 = vld [vmem:[%s24297_s1 + $0x544] ss:$16 sps:$4 sm:$0xff]   ;;  %v17953_v19 = vrot.slane %v594_v43, 4 }
  0x76   : > { %10270 = vmatpush2.bf16.msra.mxu0 %v15535_v23  ;;  %v17925_v23 = vrot.slane %v554_v15, 4  ;;  %v614_v63 = vshrl.u32 %v17905_v45, 16  ;;  %v17942_v15 = vrot.slane %v604_v61, 4  ;;  %v15558_v10 = vld [vmem:[%s24297_s1 + $0x744] ss:$16 sps:$4 sm:$0xff]   ;;  %v560_v61 = vshll.u32 %v17866_v31, 16 }
  0x77   : > { %10353 = vmatpush2.bf16.msra.mxu1 %v15538_v58  ;;  %10271 = vmatprep.subr.bf16.mxu0 %v15543_v55  ;;  %v17928_v58 = vrot.slane %v574_v27, 4  ;;  %v15547_v55 = vld [vmem:[%s24297_s1 + $0x560] ss:$16 sps:$4 sm:$0xff]   ;;  %v513_v27 = vsel %vm17681_vm2, %v508_v60, %v17832_v57  ;;  %v17966_v57 = vpack.c.bf16 %v17727_v18, %v17739_v25  ;;  %v17980_v18 = vcombine.low %v17770_v2, %v17796_v16  ;;  %v15564_v43 = vld [vmem:[%s24297_s1 + $0x724] ss:$16 sps:$4 sm:$0xff]  }
  0x78   : > { %10354 = vmatprep.subr.bf16.mxu1 %v15546_v52  ;;  %v518_v52 = vrot.slane %v517_v21, 4  ;;  %v550_v21 = vshll.u32 %v17840_v48, 16  ;;  %v15553_v60 = vld [vmem:[%s24297_s1 + $0x540] ss:$16 sps:$4 sm:$0xff]   ;;  %v547_v24 = vor.u32 %v17891_v0, %v532_v46  ;;  %v590_v25 = vshll.u32 %v17885_v5, 16 }
  0x79   : > { %24566 = vst [vmem:[#allocation29_spill] sm:$0xff] %v17980_v18  ;;  %v600_v29 = vshll.u32 %v17905_v45, 16  ;;  %v630_v13 = vshll.u32 %v17966_v57, 16 }
  0x7a   : > { %10272 = vmatpush2.bf16.msra.mxu0 %v15541_v41  ;;  %v533_v41 = vsel %vm17681_vm2, %v528_v49, %v532_v46  ;;  %v624_v49 = vshrl.u32 %v17962_v33, 16  ;;  %v17994_v2 = vrot.slane %v550_v21, 5  ;;  %v17996_v46 = vrot.slane %v560_v61, 5 }
  0x7b   : > { %10355 = vmatpush2.bf16.msra.mxu1 %v15544_v40  ;;  %10273 = vmatprep.subr.bf16.mxu0 %v15549_v20  ;;  %v537_v40 = vor.u32 %v17862_v8, %v522_v47  ;;  %v540_v20 = vshll.u32 %v17875_v3, 16  ;;  %v570_v8 = vshll.u32 %v17896_v62, 16  ;;  %v18010_v21 = vcombine.low %v513_v27, %v533_v41 }
  0x7c   : > { %10356 = vmatprep.subr.bf16.mxu1 %v15552_v54  ;;  %v17958_v54 = vrot.slane %v614_v63, 4  ;;  %v15556_v63 = vld [vmem:[%s24297_s1 + $0x740] ss:$16 sps:$4 sm:$0xff]   ;;  %v580_v61 = vshll.u32 %v17914_v34, 16  ;;  %v18024_v22 = vrot.slane %v590_v25, 5  ;;  %v18085_v35 = vrot.slane %v630_v13, 5 }
  0x7d   : > { %v538_v16 = vrot.slane %v537_v40, 4  ;;  %v542_v0 = vrot.slane %v540_v20, 5  ;;  %24570 = vst [vmem:[#allocation33_spill] sm:$0xff] %v18010_v21  ;;  %v18014_v40 = vsel %vm17681_vm2, %v518_v52, %v522_v47  ;;  %v18018_v20 = vpack.c.bf16 %v17742_v44, %v17765_v1  ;;  %v15570_v44 = vld [vmem:[%s24297_s1 + $0x704] ss:$16 sps:$4 sm:$0xff]  }
  0x7e   : > { %10274 = vmatpush2.bf16.msra.mxu0 %v15547_v55  ;;  %v17990_v55 = vcombine.low %v17775_v7, %v17801_v26  ;;  %v15559_v7 = vld [vmem:[%s24297_s1 + $0x520] ss:$16 sps:$4 sm:$0xff]   ;;  %v567_v1 = vor.u32 %v17923_v39, %v17994_v2  ;;  %v572_v47 = vrot.slane %v570_v8, 5  ;;  %v577_v39 = vor.u32 %v17928_v58, %v17996_v46  ;;  %v15573_v25 = vld [vmem:[%s24297_s1 + $0x8e4] ss:$16 sps:$4 sm:$0xff]  }
  0x7f   : > { %10357 = vmatpush2.bf16.msra.mxu1 %v15550_v50  ;;  %10275 = vmatprep.subr.bf16.mxu0 %v15555_v37  ;;  %v17992_v50 = vcombine.high %v513_v27, %v533_v41  ;;  %v644_v37 = vshrl.u32 %v17966_v57, 16  ;;  %v15562_v26 = vld [vmem:[%s24297_s1 + $0x720] ss:$16 sps:$4 sm:$0xff]   ;;  %v18026_v27 = vrot.slane %v624_v49, 4  ;;  %v557_v52 = vor.u32 %v17925_v23, %v542_v0 }
  0x80   : > { %10358 = vmatprep.subr.bf16.mxu1 %v15558_v10  ;;  %24567 = vst [vmem:[#allocation30_spill] sm:$0xff] %v17990_v55  ;;  %v18002_v10 = vpack.c.bf16 %v17749_v56, %v17791_v6  ;;  %v15567_v56 = vld [vmem:[%s24297_s1 + $0x504] ss:$16 sps:$4 sm:$0xff]   ;;  %v548_v6 = vrot.slane %v547_v24, 4  ;;  %v634_v41 = vshrl.u32 %v18018_v20, 16  ;;  %v18045_v8 = vrot.slane %v600_v29, 5 }
  0x81   : > { %24568 = vst [vmem:[#allocation31_spill] sm:$0xff] %v17992_v50  ;;  %v18047_v23 = vrot.slane %v644_v37, 4  ;;  %v587_v49 = vor.u32 %v17934_v4, %v572_v47  ;;  %v607_v29 = vor.u32 %v17942_v15, %v18024_v22  ;;  %v610_v58 = vshll.u32 %v17962_v33, 16  ;;  %v15576_v4 = vld [vmem:[%s24297_s1 + $0xae4] ss:$16 sps:$4 sm:$0xff]  }
  0x82   : > { %24569 = vst [vmem:[#allocation32_spill] sm:$0xff] %v18002_v10  ;;  %10276 = vmatpush2.bf16.msra.mxu0 %v15553_v60  ;;  %v15565_v60 = vld [vmem:[%s24297_s1 + $0x500] ss:$16 sps:$4 sm:$0xff]   ;;  %v654_v24 = vshrl.u32 %v18002_v10, 16  ;;  %v640_v37 = vshll.u32 %v18002_v10, 16  ;;  %v18069_v59 = vrot.slane %v634_v41, 4  ;;  %v617_v38 = vor.u32 %v17958_v54, %v18045_v8 }
  0x83   : > { %10359 = vmatpush2.bf16.msra.mxu1 %v15556_v63  ;;  %10277 = vmatprep.subr.bf16.mxu0 %v15561_v17  ;;  %v15568_v63 = vld [vmem:[%s24297_s1 + $0x700] ss:$16 sps:$4 sm:$0xff]   ;;  %v543_v17 = vsel %vm17681_vm2, %v538_v16, %v542_v0  ;;  %v582_v16 = vrot.slane %v580_v61, 5  ;;  %v296_v0 = vld [vmem:[%s17357_s6 + $0x148] sm:$0xff]  ;;  %v620_v61 = vshll.u32 %v18018_v20, 16  ;;  %v612_v54 = vrot.slane %v610_v58, 5 }
  0x84   : > { %10360 = vmatprep.subr.bf16.mxu1 %v15564_v43  ;;  %v295_v43 = vld [vmem:[%s17357_s6 + $0x140] sm:$0xff]  ;;  %v18065_v12 = vcombine.high %v18014_v40, %v543_v17  ;;  %v297_v15 = vld [vmem:[%s17357_s6 + $0x150] sm:$0xff]  ;;  %v18078_v30 = vrot.slane %v654_v24, 4  ;;  %v18092_v24 = vrot.slane %v640_v37, 5  ;;  %v553_v13 = vsel %vm17681_vm2, %v548_v6, %v17994_v2 }
  0x85   : > { %v18083_v41 = vpack.c.bf16 %v296_v0, %v295_v43  ;;  %v18090_v10 = vpack.c.bf16 %v298_v28, %v297_v15  ;;  %v627_v58 = vor.u32 %v18026_v27, %v612_v54  ;;  %v15577_v2 = vld [vmem:[%s24297_s1 + $0x8c0] ss:$16 sps:$4 sm:$0xff]   ;;  %v18114_v6 = vcombine.low %v18014_v40, %v543_v17 }
  0x86   : > { %10278 = vmatpush2.bf16.msra.mxu0 %v15559_v7  ;;  %24571 = vst [vmem:[#allocation34_spill] sm:$0xff] %v18065_v12  ;;  %v568_v7 = vrot.slane %v567_v1, 4  ;;  %v15574_v1 = vld [vmem:[%s24297_s1 + $0xae0] ss:$16 sps:$4 sm:$0xff]  }
  0x87   : > { %10361 = vmatpush2.bf16.msra.mxu1 %v15562_v26  ;;  %10279 = vmatprep.subr.bf16.mxu0 %v15567_v56  ;;  %v558_v26 = vrot.slane %v557_v52, 4  ;;  %v578_v56 = vrot.slane %v577_v39, 4  ;;  %v588_v52 = vrot.slane %v587_v49, 4  ;;  %v608_v39 = vrot.slane %v607_v29, 4  ;;  %v15582_v49 = vld [vmem:[%s24297_s1 + $0xac4] ss:$16 sps:$4 sm:$0xff]  }
  0x88   : > { %10362 = vmatprep.subr.bf16.mxu1 %v15570_v44  ;;  %v597_v44 = vor.u32 %v17953_v19, %v582_v16  ;;  %v15579_v19 = vld [vmem:[%s24297_s1 + $0x8c4] ss:$16 sps:$4 sm:$0xff]   ;;  %v618_v29 = vrot.slane %v617_v38, 4  ;;  %24572 = vst [vmem:[#allocation35_spill] sm:$0xff] %v18114_v6  ;;  %v15580_v27 = vld [vmem:[%s24297_s1 + $0xac0] ss:$16 sps:$4 sm:$0xff]  }
  0x89   : > { %v563_v28 = vsel %vm17681_vm2, %v558_v26, %v17996_v46  ;;  %v647_v46 = vor.u32 %v18047_v23, %v18085_v35  ;;  %v593_v40 = vsel %vm17681_vm2, %v588_v52, %v18024_v22  ;;  %v613_v17 = vsel %vm17681_vm2, %v608_v39, %v612_v54  ;;  %v15588_v23 = vld [vmem:[%s24297_s1 + $0xaa4] ss:$16 sps:$4 sm:$0xff]   ;;  %v15586_v26 = vld [vmem:[%s24297_s1 + $0xaa0] ss:$16 sps:$4 sm:$0xff]  }
  0x8a   : > { %10280 = vmatpush2.bf16.msra.mxu0 %v15565_v60  ;;  %v573_v60 = vsel %vm17681_vm2, %v568_v7, %v572_v47  ;;  %v598_v43 = vrot.slane %v597_v44, 4  ;;  %v650_v47 = vshll.u32 %v18083_v41, 16  ;;  %v24576_v22 = vrot.slane %v17543_v42, 5 }
  0x8b   : > { %10363 = vmatpush2.bf16.msra.mxu1 %v15568_v63  ;;  %10415 = vmatprep.subr.bf16.mxu0 %v15573_v25  ;;  %v622_v63 = vrot.slane %v620_v61, 5  ;;  %v583_v25 = vsel %vm17681_vm2, %v578_v56, %v582_v16  ;;  %v15585_v16 = vld [vmem:[%s24297_s1 + $0x8a4] ss:$16 sps:$4 sm:$0xff]   ;;  %v18137_v0 = vcombine.high %v553_v13, %v573_v60  ;;  %v18139_v37 = vcombine.low %v553_v13, %v573_v60 }
  0x8c   : > { %10498 = vmatprep.subr.bf16.mxu1 %v15576_v4  ;;  %v18141_v4 = vcombine.high %v563_v28, %v583_v25  ;;  %v18145_v7 = vrot.slane %v24576_v22, 4  ;;  %v18155_v61 = vcombine.low %v563_v28, %v583_v25  ;;  %v603_v15 = vsel %vm17681_vm2, %v598_v43, %v18045_v8  ;;  %v15594_v8 = vld [vmem:[%s24297_s1 + $0xa84] ss:$16 sps:$4 sm:$0xff]  }
  0x8d   : > { %10282 = vmatmul.mubr.bf16.vlgmr.msra.gmra.mxu0 %v17980_v18  ;;  %v637_v38 = vor.u32 %v18069_v59, %v622_v63  ;;  %v657_v59 = vor.u32 %v18078_v30, %v18092_v24  ;;  %24573 = vst [vmem:[#allocation36_spill] sm:$0xff] %v18137_v0  ;;  %24574 = vst [vmem:[#allocation37_spill] sm:$0xff] %v18139_v37  ;;  %v15583_v30 = vld [vmem:[%s24297_s1 + $0x8a0] ss:$16 sps:$4 sm:$0xff]   ;;  %v623_v56 = vsel %vm17681_vm2, %v618_v29, %v622_v63 }
  0x8e   : > { %10365 = vmatmul.mubr.bf16.vlgmr.msra.gmra.mxu1 %v17990_v55  ;;  %10416 = vmatpush1.bf16.msra.mxu0 %v15571_v51  ;;  %v660_v51 = vshll.u32 %v18090_v10, 16  ;;  %24575 = vst [vmem:[#allocation38_spill] sm:$0xff] %v18141_v4  ;;  %24577 = vst [vmem:[#allocation39_spill] sm:$0xff] %v18155_v61  ;;  %v628_v44 = vrot.slane %v627_v58, 4  ;;  %v18165_v52 = vcombine.high %v593_v40, %v613_v17  ;;  %v652_v39 = vrot.slane %v650_v47, 5 }
  0x8f   : > { %10499 = vmatpush1.bf16.msra.mxu1 %v15574_v1  ;;  %10417 = vmatprep.subr.bf16.mxu0 %v15579_v19  ;;  %v15591_v1 = vld [vmem:[%s24297_s1 + $0x884] ss:$16 sps:$4 sm:$0xff]   ;;  %v648_v19 = vrot.slane %v647_v46, 4  ;;  %v638_v54 = vrot.slane %v637_v38, 4  ;;  %v658_v13 = vrot.slane %v657_v59, 4  ;;  %v716_v28 = vrot.slane %v17640_v32, 5 }
  0x90   : > { %10500 = vmatprep.subr.bf16.mxu1 %v15582_v49  ;;  %10291 = vmatprep.mubr.bf16.mxu0 %v17992_v50  ;;  %24578 = vst [vmem:[#allocation40_spill] sm:$0xff] %v18165_v52  ;;  %v18170_v49 = vcombine.low %v593_v40, %v613_v17  ;;  %v662_v60 = vrot.slane %v660_v51, 5  ;;  %v18173_v63 = vcombine.high %v603_v15, %v623_v56  ;;  %v719_v25 = vrot.slane %v17644_v36, 5  ;;  %v15589_v58 = vld [vmem:[%s24297_s1 + $0x880] ss:$16 sps:$4 sm:$0xff]  }
  0x91   : > { %10374 = vmatprep.mubr.bf16.mxu1 %v18065_v12  ;;  %v24332_v43 = vrot.slane %v17715_v11, 5  ;;  %v24330_v29 = vrot.slane %v17780_v9, 5  ;;  %v18184_v46 = vcombine.low %v603_v15, %v623_v56  ;;  %v18189_v32 = vsel %vm17681_vm2, %v628_v44, %v18085_v35  ;;  %v15597_v38 = vld [vmem:[%s24297_s1 + $0x864] ss:$16 sps:$4 sm:$0xff]   ;;  %v15595_v15 = vld [vmem:[%s24297_s1 + $0x860] ss:$16 sps:$4 sm:$0xff]  }
  0x92   : > { %10418 = vmatpush1.bf16.msra.mxu0 %v15577_v2  ;;  %24579 = vst [vmem:[#allocation41_spill] sm:$0xff] %v18170_v49  ;;  %24580 = vst [vmem:[#allocation42_spill] sm:$0xff] %v18173_v63  ;;  %v15592_v2 = vld [vmem:[%s24297_s1 + $0xa80] ss:$16 sps:$4 sm:$0xff]   ;;  %v18191_v36 = vrot.slane %v716_v28, 4  ;;  %v24331_v47 = vrot.slane %v17836_v14, 5  ;;  %v18206_v35 = vsel %vm17681_vm2, %v638_v54, %v18092_v24  ;;  %v18216_v59 = vsel %vm17681_vm2, %v658_v13, %v662_v60 }
  0x93   : > { %10501 = vmatpush1.bf16.msra.mxu1 %v15580_v27  ;;  %10419 = vmatprep.subr.bf16.mxu0 %v15585_v16  ;;  %24581 = vst [vmem:[#allocation43_spill] sm:$0xff] %v18184_v46  ;;  %v18201_v27 = vsel %vm17681_vm2, %v648_v19, %v652_v39  ;;  %v18208_v16 = vrot.slane %v719_v25, 4  ;;  %v24333_v40 = vrot.slane %v17840_v48, 5  ;;  %v15600_v17 = vld [vmem:[%s24297_s1 + $0xa64] ss:$16 sps:$4 sm:$0xff]   ;;  %v24329_v51 = vrot.slane %v17875_v3, 5 }
  0x94   : > { %10502 = vmatprep.subr.bf16.mxu1 %v15588_v23  ;;  %v24336_v23 = vrot.slane %v17866_v31, 5  ;;  %v24334_v24 = vrot.slane %v17885_v5, 5  ;;  %v727_v22 = vrot.slane %v24332_v43, 4  ;;  %v15598_v56 = vld [vmem:[%s24297_s1 + $0xa60] ss:$16 sps:$4 sm:$0xff]   ;;  %v18237_v44 = vcombine.high %v18189_v32, %v18201_v27 }
  0x95   : > { %10292 = vmatmul.mubr.bf16.gmra.mxu0 %v18010_v21  ;;  %v24335_v19 = vrot.slane %v17914_v34, 5  ;;  %v15603_v39 = vld [vmem:[%s24297_s1 + $0x844] ss:$16 sps:$4 sm:$0xff]   ;;  %v739_v13 = vrot.slane %v24333_v40, 4  ;;  %v24592_v21 = vld [vmem:[#allocation28_spill] sm:$0xff] }
  0x96   : > { %10375 = vmatmul.mubr.bf16.gmra.mxu1 %v18114_v6  ;;  %10420 = vmatpush1.bf16.msra.mxu0 %v15583_v30  ;;  %v730_v30 = vrot.slane %v24330_v29, 4  ;;  %24582 = vst [vmem:[#allocation44_spill] sm:$0xff] %v18237_v44  ;;  %v15606_v54 = vld [vmem:[%s24297_s1 + $0xa44] ss:$16 sps:$4 sm:$0xff]   ;;  %v742_v29 = vrot.slane %v24336_v23, 4  ;;  %v24587_v23 = vld [vmem:[#allocation32_spill] sm:$0xff]  ;;  %v717_v12 = vsel %vm18270_vm5, %v24592_v21, %v716_v28 }
  0x97   : > { %10503 = vmatpush1.bf16.msra.mxu1 %v15586_v26  ;;  %10421 = vmatprep.subr.bf16.mxu0 %v15591_v1  ;;  %v740_v26 = vrot.slane %v17896_v62, 5  ;;  %v733_v62 = vrot.slane %v24331_v47, 4  ;;  %v18243_v1 = vrot.slane %v24329_v51, 4  ;;  %v24343_v51 = vrot.slane %v17962_v33, 5  ;;  %v24594_v50 = vld [vmem:[#allocation13_spill] sm:$0xff] }
  0x98   : > { %10504 = vmatprep.subr.bf16.mxu1 %v15594_v8  ;;  %10301 = vmatprep.mubr.bf16.mxu0 %v18137_v0  ;;  %v18254_v8 = vcombine.high %v18206_v35, %v18216_v59  ;;  %v751_v47 = vrot.slane %v24334_v24, 4  ;;  %v18265_v43 = vrot.slane %v24335_v19, 4  ;;  %v15807_v40 = vld [vmem:[%s24297_s1 + $0x1004] ss:$16 sps:$4 sm:$0xff]  }
  0x99   : > { %10384 = vmatprep.mubr.bf16.mxu1 %v18141_v4  ;;  %v745_v60 = vrot.slane %v740_v26, 4  ;;  %v18278_v24 = vrot.slane %v24343_v51, 4  ;;  %v761_v4 = vrot.slane %v24587_v23, 5  ;;  %v24595_v51 = vrot.slane %v24594_v50, 9 }
  0x9a   : > { %24583 = vst [vmem:[#allocation45_spill] sm:$0xff] %v18254_v8  ;;  %10422 = vmatpush1.bf16.msra.mxu0 %v15589_v58  ;;  %v24586_v58 = vrot.slane %v17905_v45, 5  ;;  %v18457_v23 = vcombine.low %v18189_v32, %v18201_v27  ;;  %v15630_v32 = vld [vmem:[%s24297_s1 + $0xbc4] ss:$16 sps:$4 sm:$0xff]   ;;  %v15625_v27 = vld [vmem:[%s24297_s1 + $0x9c0] ss:$16 sps:$4 sm:$0xff]  }
  0x9b   : > { %10505 = vmatpush1.bf16.msra.mxu1 %v15592_v2  ;;  %10423 = vmatprep.subr.bf16.mxu0 %v15597_v38  ;;  %v24589_v38 = vrot.slane %v24588_v53, 5  ;;  %v720_v53 = vsel %vm18270_vm5, %v18145_v7, %v719_v25  ;;  %v764_v7 = vrot.slane %v18083_v41, 5  ;;  %v15609_v25 = vld [vmem:[%s24297_s1 + $0x824] ss:$16 sps:$4 sm:$0xff]   ;;  %v24602_v41 = vrot.slane %v18018_v20, 5 }
  0x9c   : > { %10506 = vmatprep.subr.bf16.mxu1 %v15600_v17  ;;  %v754_v2 = vrot.slane %v24586_v58, 4  ;;  %v24590_v17 = vld [vmem:[#allocation9_spill] sm:$0xff]  ;;  %v24593_v58 = vrot.slane %v17543_v42, 5  ;;  %24630 = vst [vmem:[#allocation61_spill] sm:$0xff] %v18457_v23 }
  0x9d   : > { %v24591_v0 = vrot.slane %v24590_v17, 9  ;;  %10302 = vmatmul.mubr.bf16.gmra.mxu0 %v18139_v37  ;;  %v15604_v42 = vld [vmem:[%s24297_s1 + $0xa40] ss:$16 sps:$4 sm:$0xff]  }
  0x9e   : > { %v714_v19 = vsel %vm18270_vm5, %v24595_v51, %v24593_v58  ;;  %10385 = vmatmul.mubr.bf16.gmra.mxu1 %v18155_v61  ;;  %10424 = vmatpush1.bf16.msra.mxu0 %v15595_v15  ;;  %v760_v15 = vrot.slane %v24602_v41, 4  ;;  %v24614_v41 = vrot.slane %v17914_v34, 5  ;;  %v24618_v34 = vrot.slane %v17962_v33, 5  ;;  %v15613_v33 = vld [vmem:[%s24297_s1 + $0x800] ss:$16 sps:$4 sm:$0xff]  }
  0x9f   : > { %v710_v6 = vsel %vm18270_vm5, %v24591_v0, %v24589_v38  ;;  %v15601_v0 = vld [vmem:[%s24297_s1 + $0x840] ss:$16 sps:$4 sm:$0xff]   ;;  %v18312_v28 = vcombine.low %v714_v19, %v720_v53  ;;  %10507 = vmatpush1.bf16.msra.mxu1 %v15598_v56  ;;  %v18318_v51 = vcombine.high %v714_v19, %v720_v53  ;;  %v24600_v38 = vrot.slane %v17715_v11, 5  ;;  %10425 = vmatprep.subr.bf16.mxu0 %v15603_v39  ;;  %v15612_v56 = vld [vmem:[%s24297_s1 + $0xa24] ss:$16 sps:$4 sm:$0xff]  }
  0xa0   : > { %v18308_v50 = vcombine.low %v710_v6, %v717_v12  ;;  %v18310_v21 = vcombine.high %v710_v6, %v717_v12  ;;  %v24601_v12 = vrot.slane %v17836_v14, 5  ;;  %10508 = vmatprep.subr.bf16.mxu1 %v15606_v54  ;;  %10311 = vmatprep.mubr.bf16.mxu0 %v18165_v52  ;;  %v24607_v39 = vrot.slane %v17875_v3, 5  ;;  %v15610_v3 = vld [vmem:[%s24297_s1 + $0xa20] ss:$16 sps:$4 sm:$0xff]   ;;  %v13711_v52 = vld [vmem:[%s17357_s6 + $0x178] sm:$0xff] }
  0xa1   : > { %24598 = vst [vmem:[#allocation9_spill] sm:$0xff] %v18312_v28  ;;  %24599 = vst [vmem:[#allocation28_spill] sm:$0xff] %v18318_v51  ;;  %v723_v17 = vsel %vm18270_vm5, %v18191_v36, %v24600_v38  ;;  %v24605_v36 = vrot.slane %v17780_v9, 5  ;;  %10394 = vmatprep.mubr.bf16.mxu1 %v18173_v63  ;;  %v24608_v53 = vrot.slane %v17840_v48, 5  ;;  %v766_v38 = vrot.slane %v761_v4, 4  ;;  %v13707_v63 = vld [vmem:[%s17357_s6 + $0x158] sm:$0xff] }
  0xa2   : > { %24596 = vst [vmem:[#allocation32_spill] sm:$0xff] %v18308_v50  ;;  %24597 = vst [vmem:[#allocation11_spill] sm:$0xff] %v18310_v21  ;;  %v729_v6 = vsel %vm18270_vm5, %v727_v22, %v24601_v12  ;;  %v24606_v22 = vrot.slane %v17966_v57, 5  ;;  %v732_v54 = vsel %vm18270_vm5, %v730_v30, %v24607_v39  ;;  %10426 = vmatpush1.bf16.msra.mxu0 %v15601_v0 }
  0xa3   : > { %v18334_v19 = vcombine.high %v723_v17, %v729_v6  ;;  %v18336_v11 = vcombine.low %v723_v17, %v729_v6  ;;  %v726_v14 = vsel %vm18270_vm5, %v18208_v16, %v24605_v36  ;;  %v735_v9 = vsel %vm18270_vm5, %v733_v62, %v24608_v53  ;;  %v15607_v17 = vld [vmem:[%s24297_s1 + $0x820] ss:$16 sps:$4 sm:$0xff]   ;;  %10509 = vmatpush1.bf16.msra.mxu1 %v15604_v42 }
  0xa4   : > { %v763_v58 = vrot.slane %v24606_v22, 4  ;;  %v741_v16 = vsel %vm18270_vm5, %v739_v13, %v740_v26  ;;  %v18365_v30 = vcombine.high %v726_v14, %v732_v54  ;;  %v18367_v48 = vcombine.low %v726_v14, %v732_v54  ;;  %v15615_v26 = vld [vmem:[%s24297_s1 + $0x804] ss:$16 sps:$4 sm:$0xff]   ;;  %10427 = vmatprep.subr.bf16.mxu0 %v15609_v25  ;;  %10510 = vmatprep.subr.bf16.mxu1 %v15612_v56 }
  0xa5   : > { %24603 = vst [vmem:[#allocation13_spill] sm:$0xff] %v18334_v19  ;;  %24604 = vst [vmem:[#allocation46_spill] sm:$0xff] %v18336_v11  ;;  %v18369_v12 = vcombine.high %v735_v9, %v741_v16  ;;  %v18371_v62 = vcombine.low %v735_v9, %v741_v16  ;;  %v24613_v13 = vrot.slane %v17866_v31, 5  ;;  %v744_v36 = vsel %vm18270_vm5, %v742_v29, %v24614_v41  ;;  %v15618_v31 = vld [vmem:[%s24297_s1 + $0xa04] ss:$16 sps:$4 sm:$0xff]  }
  0xa6   : > { %24609 = vst [vmem:[#allocation47_spill] sm:$0xff] %v18365_v30  ;;  %24610 = vst [vmem:[#allocation48_spill] sm:$0xff] %v18367_v48  ;;  %v24615_v14 = vrot.slane %v17885_v5, 5  ;;  %v767_v42 = vrot.slane %v18090_v10, 5  ;;  %v753_v5 = vsel %vm18270_vm5, %v751_v47, %v24618_v34  ;;  %v24621_v10 = vrot.slane %v17905_v45, 5  ;;  %10312 = vmatmul.mubr.bf16.gmra.mxu0 %v18170_v49  ;;  %10395 = vmatmul.mubr.bf16.gmra.mxu1 %v18184_v46  ;;  %v13706_v49 = vld [vmem:[%s17357_s6 + $0x150] sm:$0xff] }
  0xa7   : > { %24611 = vst [vmem:[#allocation49_spill] sm:$0xff] %v18369_v12  ;;  %24612 = vst [vmem:[#allocation50_spill] sm:$0xff] %v18371_v62  ;;  %v738_v6 = vsel %vm18270_vm5, %v18243_v1, %v24613_v13  ;;  %v24622_v56 = vrot.slane %v18018_v20, 5  ;;  %v15616_v45 = vld [vmem:[%s24297_s1 + $0xa00] ss:$16 sps:$4 sm:$0xff]   ;;  %v24625_v20 = vrot.slane %v17966_v57, 5  ;;  %10428 = vmatpush1.bf16.msra.mxu0 %v15607_v17  ;;  %10511 = vmatpush1.bf16.msra.mxu1 %v15610_v3 }
  0xa8   : > { %v747_v0 = vsel %vm18270_vm5, %v745_v60, %v24615_v14  ;;  %v18393_v22 = vcombine.high %v738_v6, %v744_v36  ;;  %v18395_v1 = vcombine.low %v738_v6, %v744_v36  ;;  %v750_v25 = vsel %vm18270_vm5, %v18265_v43, %v24621_v10  ;;  %v15621_v54 = vld [vmem:[%s24297_s1 + $0x9e4] ss:$16 sps:$4 sm:$0xff]   ;;  %10429 = vmatprep.subr.bf16.mxu0 %v15615_v26  ;;  %v15631_v13 = vld [vmem:[%s24297_s1 + $0x9a0] ss:$16 sps:$4 sm:$0xff]  }
  0xa9   : > { %v18401_v29 = vcombine.high %v747_v0, %v753_v5  ;;  %v18403_v60 = vcombine.low %v747_v0, %v753_v5  ;;  %v756_v39 = vsel %vm18270_vm5, %v754_v2, %v24622_v56  ;;  %v759_v2 = vsel %vm18270_vm5, %v18278_v24, %v24625_v20  ;;  %10512 = vmatprep.subr.bf16.mxu1 %v15618_v31  ;;  %v15624_v24 = vld [vmem:[%s24297_s1 + $0xbe4] ss:$16 sps:$4 sm:$0xff]   ;;  %v15634_v6 = vld [vmem:[%s24297_s1 + $0xba0] ss:$16 sps:$4 sm:$0xff]  }
  0xaa   : > { %24616 = vst [vmem:[#allocation51_spill] sm:$0xff] %v18393_v22  ;;  %24617 = vst [vmem:[#allocation52_spill] sm:$0xff] %v18395_v1  ;;  %v18422_v47 = vcombine.high %v750_v25, %v756_v39  ;;  %v18424_v43 = vcombine.low %v750_v25, %v756_v39  ;;  %v765_v53 = vsel %vm18270_vm5, %v763_v58, %v764_v7  ;;  %10321 = vmatprep.mubr.bf16.mxu0 %v18237_v44  ;;  %v15619_v7 = vld [vmem:[%s24297_s1 + $0x9e0] ss:$16 sps:$4 sm:$0xff]   ;;  %v15636_v26 = vld [vmem:[%s24297_s1 + $0xba4] ss:$16 sps:$4 sm:$0xff]  }
  0xab   : > { %24619 = vst [vmem:[#allocation53_spill] sm:$0xff] %v18401_v29  ;;  %24620 = vst [vmem:[#allocation54_spill] sm:$0xff] %v18403_v60  ;;  %v762_v9 = vsel %vm18270_vm5, %v760_v15, %v761_v4  ;;  %v768_v57 = vsel %vm18270_vm5, %v766_v38, %v767_v42  ;;  %v18445_v16 = vcombine.high %v759_v2, %v765_v53  ;;  %10404 = vmatprep.mubr.bf16.mxu1 %v18254_v8  ;;  %v15622_v15 = vld [vmem:[%s24297_s1 + $0xbe0] ss:$16 sps:$4 sm:$0xff]   ;;  %v15627_v38 = vld [vmem:[%s24297_s1 + $0x9c4] ss:$16 sps:$4 sm:$0xff]  }
  0xac   : > { %24623 = vst [vmem:[#allocation55_spill] sm:$0xff] %v18422_v47  ;;  %24624 = vst [vmem:[#allocation56_spill] sm:$0xff] %v18424_v43  ;;  %v18447_v17 = vcombine.low %v759_v2, %v765_v53  ;;  %v18449_v3 = vcombine.high %v762_v9, %v768_v57  ;;  %v18453_v4 = vcombine.low %v762_v9, %v768_v57  ;;  %10430 = vmatpush1.bf16.msra.mxu0 %v15613_v33  ;;  %v15639_v41 = vld [vmem:[%s24297_s1 + $0x984] ss:$16 sps:$4 sm:$0xff]   ;;  %v15637_v14 = vld [vmem:[%s24297_s1 + $0x980] ss:$16 sps:$4 sm:$0xff]  }
  0xad   : > { %24626 = vst [vmem:[#allocation57_spill] sm:$0xff] %v18445_v16  ;;  %v18467_v58 = vcombine.low %v18206_v35, %v18216_v59  ;;  %10513 = vmatpush1.bf16.msra.mxu1 %v15616_v45  ;;  %10431 = vmatprep.subr.bf16.mxu0 %v15621_v54  ;;  %v15628_v35 = vld [vmem:[%s24297_s1 + $0xbc0] ss:$16 sps:$4 sm:$0xff]   ;;  %v15633_v59 = vld [vmem:[%s24297_s1 + $0x9a4] ss:$16 sps:$4 sm:$0xff]   ;;  %v13703_v8 = vld [vmem:[%s17357_s6 + $0x138] sm:$0xff]  ;;  %v19033_v61 = vpack.c.bf16 %v13707_v63, %v13706_v49 }
  0xae   : > { %24627 = vst [vmem:[#allocation58_spill] sm:$0xff] %v18447_v17  ;;  %24628 = vst [vmem:[#allocation59_spill] sm:$0xff] %v18449_v3  ;;  %10514 = vmatprep.subr.bf16.mxu1 %v15624_v24  ;;  %10322 = vmatmul.mubr.bf16.gmra.mxu0 %v18457_v23  ;;  %v15642_v36 = vld [vmem:[%s24297_s1 + $0xb84] ss:$16 sps:$4 sm:$0xff]   ;;  %v15640_v0 = vld [vmem:[%s24297_s1 + $0xb80] ss:$16 sps:$4 sm:$0xff]  }
  0xaf   : > { %24629 = vst [vmem:[#allocation60_spill] sm:$0xff] %v18453_v4  ;;  %24631 = vst [vmem:[#allocation62_spill] sm:$0xff] %v18467_v58  ;;  %10405 = vmatmul.mubr.bf16.gmra.mxu1 %v18467_v58  ;;  %10447 = vmatprep.mubr.bf16.mxu0 %v18310_v21  ;;  %v15645_v42 = vld [vmem:[%s24297_s1 + $0x964] ss:$16 sps:$4 sm:$0xff]   ;;  %v15643_v34 = vld [vmem:[%s24297_s1 + $0x960] ss:$16 sps:$4 sm:$0xff]  }
  0xb0   : > { %10432 = vmatpush2.bf16.msra.mxu0 %v15619_v7  ;;  %10530 = vmatprep.mubr.bf16.mxu1 %v18318_v51  ;;  %v15648_v31 = vld [vmem:[%s24297_s1 + $0xb64] ss:$16 sps:$4 sm:$0xff]   ;;  %v15646_v5 = vld [vmem:[%s24297_s1 + $0xb60] ss:$16 sps:$4 sm:$0xff]  }
  0xb1   : > { %10515 = vmatpush2.bf16.msra.mxu1 %v15622_v15  ;;  %10433 = vmatprep.subr.bf16.mxu0 %v15627_v38  ;;  %v15651_v10 = vld [vmem:[%s24297_s1 + $0x944] ss:$16 sps:$4 sm:$0xff]   ;;  %v15649_v56 = vld [vmem:[%s24297_s1 + $0x940] ss:$16 sps:$4 sm:$0xff]  }
  0xb2   : > { %10516 = vmatprep.subr.bf16.mxu1 %v15630_v32  ;;  %v15654_v25 = vld [vmem:[%s24297_s1 + $0xb44] ss:$16 sps:$4 sm:$0xff]   ;;  %v15652_v39 = vld [vmem:[%s24297_s1 + $0xb40] ss:$16 sps:$4 sm:$0xff]  }
  0xb3   : > { %v15657_v33 = vld [vmem:[%s24297_s1 + $0x924] ss:$16 sps:$4 sm:$0xff]   ;;  %v15655_v20 = vld [vmem:[%s24297_s1 + $0x920] ss:$16 sps:$4 sm:$0xff]  }
  0xb4   : > { %10434 = vmatpush2.bf16.msra.mxu0 %v15625_v27  ;;  %v15660_v45 = vld [vmem:[%s24297_s1 + $0xb24] ss:$16 sps:$4 sm:$0xff]   ;;  %v15658_v2 = vld [vmem:[%s24297_s1 + $0xb20] ss:$16 sps:$4 sm:$0xff]  }
  0xb5   : > { %10517 = vmatpush2.bf16.msra.mxu1 %v15628_v35  ;;  %10435 = vmatprep.subr.bf16.mxu0 %v15633_v59  ;;  %v15663_v54 = vld [vmem:[%s24297_s1 + $0x904] ss:$16 sps:$4 sm:$0xff]   ;;  %v15661_v9 = vld [vmem:[%s24297_s1 + $0x900] ss:$16 sps:$4 sm:$0xff]  }
  0xb6   : > { %10518 = vmatprep.subr.bf16.mxu1 %v15636_v26  ;;  %v15666_v53 = vld [vmem:[%s24297_s1 + $0xb04] ss:$16 sps:$4 sm:$0xff]   ;;  %v15664_v57 = vld [vmem:[%s24297_s1 + $0xb00] ss:$16 sps:$4 sm:$0xff]  }
  0xb7   : > { %v15669_v24 = vld [vmem:[%s24297_s1 + $0xce4] ss:$16 sps:$4 sm:$0xff]   ;;  %v15667_v15 = vld [vmem:[%s24297_s1 + $0xce0] ss:$16 sps:$4 sm:$0xff]  }
  0xb8   : > { %10436 = vmatpush2.bf16.msra.mxu0 %v15631_v13  ;;  %v15672_v7 = vld [vmem:[%s24297_s1 + $0xee4] ss:$16 sps:$4 sm:$0xff]   ;;  %v15670_v38 = vld [vmem:[%s24297_s1 + $0xee0] ss:$16 sps:$4 sm:$0xff]  }
  0xb9   : > { %10519 = vmatpush2.bf16.msra.mxu1 %v15634_v6  ;;  %10437 = vmatprep.subr.bf16.mxu0 %v15639_v41  ;;  %v15675_v32 = vld [vmem:[%s24297_s1 + $0xcc4] ss:$16 sps:$4 sm:$0xff]   ;;  %v15673_v35 = vld [vmem:[%s24297_s1 + $0xcc0] ss:$16 sps:$4 sm:$0xff]  }
  0xba   : > { %10520 = vmatprep.subr.bf16.mxu1 %v15642_v36  ;;  %v15678_v27 = vld [vmem:[%s24297_s1 + $0xec4] ss:$16 sps:$4 sm:$0xff]   ;;  %v15676_v59 = vld [vmem:[%s24297_s1 + $0xec0] ss:$16 sps:$4 sm:$0xff]  }
  0xbb   : > { %v15681_v26 = vld [vmem:[%s24297_s1 + $0xca4] ss:$16 sps:$4 sm:$0xff]   ;;  %v15679_v6 = vld [vmem:[%s24297_s1 + $0xca0] ss:$16 sps:$4 sm:$0xff]  }
  0xbc   : > { %10438 = vmatpush2.bf16.msra.mxu0 %v15637_v14  ;;  %v15684_v13 = vld [vmem:[%s24297_s1 + $0xea4] ss:$16 sps:$4 sm:$0xff]   ;;  %v15682_v41 = vld [vmem:[%s24297_s1 + $0xea0] ss:$16 sps:$4 sm:$0xff]  }
  0xbd   : > { %10521 = vmatpush2.bf16.msra.mxu1 %v15640_v0  ;;  %10439 = vmatprep.subr.bf16.mxu0 %v15645_v42  ;;  %v15687_v36 = vld [vmem:[%s24297_s1 + $0xc84] ss:$16 sps:$4 sm:$0xff]   ;;  %v15685_v0 = vld [vmem:[%s24297_s1 + $0xc80] ss:$16 sps:$4 sm:$0xff]  }
  0xbe   : > { %10522 = vmatprep.subr.bf16.mxu1 %v15648_v31  ;;  %v15690_v14 = vld [vmem:[%s24297_s1 + $0xe84] ss:$16 sps:$4 sm:$0xff]   ;;  %v15688_v42 = vld [vmem:[%s24297_s1 + $0xe80] ss:$16 sps:$4 sm:$0xff]  }
  0xbf   : > { %v15693_v31 = vld [vmem:[%s24297_s1 + $0xc64] ss:$16 sps:$4 sm:$0xff]  }
  0xc0   : > { %10440 = vmatpush2.bf16.msra.mxu0 %v15643_v34  ;;  %v15696_v34 = vld [vmem:[%s24297_s1 + $0xe64] ss:$16 sps:$4 sm:$0xff]  }
  0xc1   : > { %10523 = vmatpush2.bf16.msra.mxu1 %v15646_v5  ;;  %10441 = vmatprep.subr.bf16.mxu0 %v15651_v10  ;;  %v15691_v5 = vld [vmem:[%s24297_s1 + $0xc60] ss:$16 sps:$4 sm:$0xff]   ;;  %v15792_v49 = vld [vmem:[%s24297_s1 + $0x1264] ss:$16 sps:$4 sm:$0xff]  }
  0xc2   : > { %10524 = vmatprep.subr.bf16.mxu1 %v15654_v25  ;;  %v15694_v10 = vld [vmem:[%s24297_s1 + $0xe60] ss:$16 sps:$4 sm:$0xff]  }
  0xc3   : > { %v13672_v25 = vld [vmem:[%s17357_s6 + $0x40] sm:$0xff] }
  0xc4   : > { %10442 = vmatpush2.bf16.msra.mxu0 %v15649_v56  ;;  %v15699_v56 = vld [vmem:[%s24297_s1 + $0xc44] ss:$16 sps:$4 sm:$0xff]  }
  0xc5   : > { %10525 = vmatpush2.bf16.msra.mxu1 %v15652_v39  ;;  %10443 = vmatprep.subr.bf16.mxu0 %v15657_v33  ;;  %v15702_v39 = vld [vmem:[%s24297_s1 + $0xe44] ss:$16 sps:$4 sm:$0xff]   ;;  %v13673_v33 = vld [vmem:[%s17357_s6 + $0x48] sm:$0xff] }
  0xc6   : > { %10526 = vmatprep.subr.bf16.mxu1 %v15660_v45  ;;  %v13674_v45 = vld [vmem:[%s17357_s6 + $0x50] sm:$0xff] }
  0xc8   : > { %10444 = vmatpush2.bf16.msra.mxu0 %v15655_v20  ;;  %v13675_v20 = vld [vmem:[%s17357_s6 + $0x58] sm:$0xff] }
  0xc9   : > { %10527 = vmatpush2.bf16.msra.mxu1 %v15658_v2  ;;  %10445 = vmatprep.subr.bf16.mxu0 %v15663_v54  ;;  %v13668_v2 = vld [vmem:[%s17357_s6 + $0x20] sm:$0xff]  ;;  %v13669_v54 = vld [vmem:[%s17357_s6 + $0x28] sm:$0xff] }
  0xca   : > { %10528 = vmatprep.subr.bf16.mxu1 %v15666_v53  ;;  %v15697_v53 = vld [vmem:[%s24297_s1 + $0xc40] ss:$16 sps:$4 sm:$0xff]  }
  0xcc   : > { %10446 = vmatpush2.bf16.msra.mxu0 %v15661_v9  ;;  %v15700_v9 = vld [vmem:[%s24297_s1 + $0xe40] ss:$16 sps:$4 sm:$0xff]  }
  0xcd   : > { %10529 = vmatpush2.bf16.msra.mxu1 %v15664_v57  ;;  %10581 = vmatprep.subr.bf16.mxu0 %v15669_v24  ;;  %v13676_v57 = vld [vmem:[%s17357_s6 + $0x60] sm:$0xff]  ;;  %v13677_v24 = vld [vmem:[%s17357_s6 + $0x68] sm:$0xff] }
  0xce   : > { %10664 = vmatprep.subr.bf16.mxu1 %v15672_v7  ;;  %v13670_v7 = vld [vmem:[%s17357_s6 + $0x30] sm:$0xff] }
  0xcf   : > { %10448 = vmatmul.mubr.bf16.vlgmr.msra.gmra.mxu0 %v18308_v50 }
  0xd0   : > { %10531 = vmatmul.mubr.bf16.vlgmr.msra.gmra.mxu1 %v18312_v28  ;;  %10582 = vmatpush1.bf16.msra.mxu0 %v15667_v15  ;;  %v18648_v15 = vpack.c.bf16 %v13673_v33, %v13672_v25 }
  0xd1   : > { %10665 = vmatpush1.bf16.msra.mxu1 %v15670_v38  ;;  %10583 = vmatprep.subr.bf16.mxu0 %v15675_v32  ;;  %v13671_v38 = vld [vmem:[%s17357_s6 + $0x38] sm:$0xff]  ;;  %v18651_v32 = vpack.c.bf16 %v13675_v20, %v13674_v45  ;;  %v15709_v20 = vld [vmem:[%s24297_s1 + $0xc00] ss:$16 sps:$4 sm:$0xff]  }
  0xd2   : > { %10666 = vmatprep.subr.bf16.mxu1 %v15678_v27  ;;  %10457 = vmatprep.mubr.bf16.mxu0 %v18334_v19  ;;  %v13678_v27 = vld [vmem:[%s17357_s6 + $0x70] sm:$0xff] }
  0xd3   : > { %10540 = vmatprep.mubr.bf16.mxu1 %v18365_v30  ;;  %24632 = vst [vmem:[#allocation63_spill] sm:$0xff] %v18651_v32  ;;  %v1091_v30 = vshll.u32 %v18648_v15, 16 }
  0xd4   : > { %10584 = vmatpush1.bf16.msra.mxu0 %v15673_v35  ;;  %v13679_v35 = vld [vmem:[%s17357_s6 + $0x78] sm:$0xff] }
  0xd5   : > { %10667 = vmatpush1.bf16.msra.mxu1 %v15676_v59  ;;  %10585 = vmatprep.subr.bf16.mxu0 %v15681_v26  ;;  %v15705_v59 = vld [vmem:[%s24297_s1 + $0xc24] ss:$16 sps:$4 sm:$0xff]   ;;  %v1093_v51 = vrot.slane %v1091_v30, 6  ;;  %v15772_v30 = vld [vmem:[%s24297_s1 + $0x12c0] ss:$16 sps:$4 sm:$0xff]  }
  0xd6   : > { %10668 = vmatprep.subr.bf16.mxu1 %v15684_v13  ;;  %v15708_v26 = vld [vmem:[%s24297_s1 + $0xe24] ss:$16 sps:$4 sm:$0xff]   ;;  %v18663_v13 = vpack.c.bf16 %v13669_v54, %v13668_v2  ;;  %v15712_v2 = vld [vmem:[%s24297_s1 + $0xe00] ss:$16 sps:$4 sm:$0xff]  }
  0xd7   : > { %10458 = vmatmul.mubr.bf16.gmra.mxu0 %v18336_v11  ;;  %v15717_v54 = vld [vmem:[%s24297_s1 + $0xde4] ss:$16 sps:$4 sm:$0xff]   ;;  %v1088_v11 = vshrl.u32 %v18648_v15, 16 }
  0xd8   : > { %10541 = vmatmul.mubr.bf16.gmra.mxu1 %v18367_v48  ;;  %10586 = vmatpush1.bf16.msra.mxu0 %v15679_v6  ;;  %24633 = vst [vmem:[#allocation64_spill] sm:$0xff] %v18663_v13  ;;  %v18665_v6 = vpack.c.bf16 %v13677_v24, %v13676_v57  ;;  %v13695_v48 = vld [vmem:[%s17357_s6 + $0xf8] sm:$0xff] }
  0xd9   : > { %10669 = vmatpush1.bf16.msra.mxu1 %v15682_v41  ;;  %10587 = vmatprep.subr.bf16.mxu0 %v15687_v36  ;;  %v975_v41 = vrot.slane %v18648_v15, 5  ;;  %v18668_v36 = vpack.c.bf16 %v13671_v38, %v13670_v7  ;;  %v15715_v38 = vld [vmem:[%s24297_s1 + $0xde0] ss:$16 sps:$4 sm:$0xff]   ;;  %v1090_v50 = vrot.slane %v1088_v11, 5 }
  0xda   : > { %10670 = vmatprep.subr.bf16.mxu1 %v15690_v14  ;;  %10467 = vmatprep.mubr.bf16.mxu0 %v18369_v12  ;;  %v18670_v14 = vpack.c.bf16 %v13679_v35, %v13678_v27  ;;  %v24345_v25 = vrot.slane %v18665_v6, 5  ;;  %v15718_v27 = vld [vmem:[%s24297_s1 + $0xfe0] ss:$16 sps:$4 sm:$0xff]   ;;  %v15723_v35 = vld [vmem:[%s24297_s1 + $0xdc4] ss:$16 sps:$4 sm:$0xff]  }
  0xdb   : > { %10550 = vmatprep.mubr.bf16.mxu1 %v18393_v22  ;;  %24634 = vst [vmem:[#allocation65_spill] sm:$0xff] %v18668_v36  ;;  %v13693_v22 = vld [vmem:[%s17357_s6 + $0xe8] sm:$0xff]  ;;  %v15769_v11 = vld [vmem:[%s24297_s1 + $0x10c0] ss:$16 sps:$4 sm:$0xff]   ;;  %v18958_v44 = vor.u32 %v1093_v51, %v1090_v50 }
  0xdc   : > { %10588 = vmatpush1.bf16.msra.mxu0 %v15685_v0  ;;  %24635 = vst [vmem:[#allocation66_spill] sm:$0xff] %v18670_v14  ;;  %v979_v0 = vrot.slane %v18651_v32, 5  ;;  %v24344_v45 = vrot.slane %v18670_v14, 5  ;;  %v13704_v50 = vld [vmem:[%s17357_s6 + $0x140] sm:$0xff] }
  0xdd   : > { %10671 = vmatpush1.bf16.msra.mxu1 %v15688_v42  ;;  %10589 = vmatprep.subr.bf16.mxu0 %v15693_v31  ;;  %v15703_v42 = vld [vmem:[%s24297_s1 + $0xc20] ss:$16 sps:$4 sm:$0xff]  }
  0xde   : > { %10672 = vmatprep.subr.bf16.mxu1 %v15696_v34  ;;  %v15706_v31 = vld [vmem:[%s24297_s1 + $0xe20] ss:$16 sps:$4 sm:$0xff]   ;;  %v15711_v34 = vld [vmem:[%s24297_s1 + $0xc04] ss:$16 sps:$4 sm:$0xff]   ;;  %v984_v33 = vrot.slane %v979_v0, 4 }
  0xdf   : > { %10468 = vmatmul.mubr.bf16.gmra.mxu0 %v18371_v62 }
  0xe0   : > { %10551 = vmatmul.mubr.bf16.gmra.mxu1 %v18395_v1  ;;  %10590 = vmatpush1.bf16.msra.mxu0 %v15691_v5  ;;  %v15714_v5 = vld [vmem:[%s24297_s1 + $0xe04] ss:$16 sps:$4 sm:$0xff]   ;;  %v18723_v7 = vsel %vm18270_vm5, %v984_v33, %v24344_v45  ;;  %v15733_v33 = vld [vmem:[%s24297_s1 + $0xd80] ss:$16 sps:$4 sm:$0xff]  }
  0xe1   : > { %10673 = vmatpush1.bf16.msra.mxu1 %v15694_v10  ;;  %10591 = vmatprep.subr.bf16.mxu0 %v15699_v56  ;;  %v13734_v10 = vrot.slane %v18663_v13, 9  ;;  %v981_v56 = vrot.slane %v975_v41, 4  ;;  %v15753_v45 = vld [vmem:[%s24297_s1 + $0xd24] ss:$16 sps:$4 sm:$0xff]  }
  0xe2   : > { %10674 = vmatprep.subr.bf16.mxu1 %v15702_v39  ;;  %10477 = vmatprep.mubr.bf16.mxu0 %v18401_v29  ;;  %v13735_v39 = vrot.slane %v18668_v36, 9  ;;  %v24645_v29 = vrot.slane %v18670_v14, 5 }
  0xe3   : > { %10560 = vmatprep.mubr.bf16.mxu1 %v18422_v47  ;;  %v18713_v57 = vsel %vm18270_vm5, %v981_v56, %v24345_v25  ;;  %v15735_v56 = vld [vmem:[%s24297_s1 + $0xd84] ss:$16 sps:$4 sm:$0xff]  }
  0xe4   : > { %10592 = vmatpush1.bf16.msra.mxu0 %v15697_v53  ;;  %v15720_v53 = vld [vmem:[%s24297_s1 + $0xfe4] ss:$16 sps:$4 sm:$0xff]   ;;  %v18717_v24 = vsel %vm18270_vm5, %v13735_v39, %v979_v0  ;;  %v15721_v0 = vld [vmem:[%s24297_s1 + $0xdc0] ss:$16 sps:$4 sm:$0xff]   ;;  %v990_v1 = vrot.slane %v24645_v29, 4 }
  0xe5   : > { %10675 = vmatpush1.bf16.msra.mxu1 %v15700_v9  ;;  %10593 = vmatprep.subr.bf16.mxu0 %v15705_v59  ;;  %v18707_v9 = vsel %vm18270_vm5, %v13734_v10, %v975_v41  ;;  %v15726_v59 = vld [vmem:[%s24297_s1 + $0xfc4] ss:$16 sps:$4 sm:$0xff]   ;;  %v18743_v41 = vcombine.high %v18717_v24, %v18723_v7  ;;  %v15730_v10 = vld [vmem:[%s24297_s1 + $0xfa0] ss:$16 sps:$4 sm:$0xff]  }
  0xe6   : > { %10676 = vmatprep.subr.bf16.mxu1 %v15708_v26  ;;  %v18739_v26 = vcombine.high %v18707_v9, %v18713_v57  ;;  %v15738_v39 = vld [vmem:[%s24297_s1 + $0xf84] ss:$16 sps:$4 sm:$0xff]   ;;  %v18879_v29 = vcombine.low %v18707_v9, %v18713_v57  ;;  %v15766_v9 = vld [vmem:[%s24297_s1 + $0x12e0] ss:$16 sps:$4 sm:$0xff]  }
  0xe7   : > { %10478 = vmatmul.mubr.bf16.gmra.mxu0 %v18403_v60  ;;  %24637 = vst [vmem:[#allocation68_spill] sm:$0xff] %v18743_v41  ;;  %v3401_v60 = vld [vmem:[%s24298_s2] sm:$0xf]  ;;  %v15765_v47 = vld [vmem:[%s24297_s1 + $0x10e4] ss:$16 sps:$4 sm:$0xff]  }
  0xe8   : > { %10561 = vmatmul.mubr.bf16.gmra.mxu1 %v18424_v43  ;;  %10594 = vmatpush1.bf16.msra.mxu0 %v15703_v42  ;;  %24636 = vst [vmem:[#allocation67_spill] sm:$0xff] %v18739_v26  ;;  %v15724_v42 = vld [vmem:[%s24297_s1 + $0xfc0] ss:$16 sps:$4 sm:$0xff]   ;;  %24647 = vst [vmem:[#allocation76_spill] sm:$0xff] %v18879_v29 }
  0xe9   : > { %10677 = vmatpush1.bf16.msra.mxu1 %v15706_v31  ;;  %10595 = vmatprep.subr.bf16.mxu0 %v15711_v34  ;;  %v15729_v31 = vld [vmem:[%s24297_s1 + $0xda4] ss:$16 sps:$4 sm:$0xff]  }
  0xea   : > { %10678 = vmatprep.subr.bf16.mxu1 %v15714_v5  ;;  %10487 = vmatprep.mubr.bf16.mxu0 %v18445_v16  ;;  %v15732_v34 = vld [vmem:[%s24297_s1 + $0xfa4] ss:$16 sps:$4 sm:$0xff]   ;;  %v15727_v5 = vld [vmem:[%s24297_s1 + $0xda0] ss:$16 sps:$4 sm:$0xff]  }
  0xeb   : > { %10570 = vmatprep.mubr.bf16.mxu1 %v18449_v3  ;;  %v13692_v16 = vld [vmem:[%s17357_s6 + $0xe0] sm:$0xff] }
  0xec   : > { %10596 = vmatpush1.bf16.msra.mxu0 %v15709_v20  ;;  %v15736_v20 = vld [vmem:[%s24297_s1 + $0xf80] ss:$16 sps:$4 sm:$0xff]  }
  0xed   : > { %10679 = vmatpush1.bf16.msra.mxu1 %v15712_v2  ;;  %10597 = vmatprep.subr.bf16.mxu0 %v15717_v54  ;;  %v15741_v2 = vld [vmem:[%s24297_s1 + $0xd64] ss:$16 sps:$4 sm:$0xff]  }
  0xee   : > { %10680 = vmatprep.subr.bf16.mxu1 %v15720_v53  ;;  %v15744_v54 = vld [vmem:[%s24297_s1 + $0xf64] ss:$16 sps:$4 sm:$0xff]   ;;  %v15739_v53 = vld [vmem:[%s24297_s1 + $0xd60] ss:$16 sps:$4 sm:$0xff]  }
  0xef   : > { %10488 = vmatmul.mubr.bf16.gmra.mxu0 %v18447_v17 }
  0xf0   : > { %10571 = vmatmul.mubr.bf16.gmra.mxu1 %v18453_v4  ;;  %10598 = vmatpush2.bf16.msra.mxu0 %v15715_v38  ;;  %v15742_v38 = vld [vmem:[%s24297_s1 + $0xf60] ss:$16 sps:$4 sm:$0xff]   ;;  %v13691_v4 = vld [vmem:[%s17357_s6 + $0xd8] sm:$0xff] }
  0xf1   : > { %10681 = vmatpush2.bf16.msra.mxu1 %v15718_v27  ;;  %10599 = vmatprep.subr.bf16.mxu0 %v15723_v35  ;;  %v13680_v27 = vld [vmem:[%s17357_s6 + $0x80] sm:$0xff]  ;;  %v13681_v35 = vld [vmem:[%s17357_s6 + $0x88] sm:$0xff] }
  0xf2   : > { %10682 = vmatprep.subr.bf16.mxu1 %v15726_v59  ;;  %10613 = vmatprep.mubr.bf16.mxu0 %v18739_v26  ;;  %v13682_v59 = vld [vmem:[%s17357_s6 + $0x90] sm:$0xff] }
  0xf3   : > { %10696 = vmatprep.mubr.bf16.mxu1 %v18743_v41  ;;  %v13689_v41 = vld [vmem:[%s17357_s6 + $0xc8] sm:$0xff]  ;;  %v13690_v26 = vld [vmem:[%s17357_s6 + $0xd0] sm:$0xff] }
  0xf4   : > { %10600 = vmatpush2.bf16.msra.mxu0 %v15721_v0  ;;  %v13683_v0 = vld [vmem:[%s17357_s6 + $0x98] sm:$0xff]  ;;  %v18870_v12 = vpack.c.bf16 %v13691_v4, %v13690_v26  ;;  %v18883_v4 = vcombine.low %v18717_v24, %v18723_v7  ;;  %v15768_v26 = vld [vmem:[%s24297_s1 + $0x12e4] ss:$16 sps:$4 sm:$0xff]   ;;  %v18903_v7 = vpack.c.bf16 %v13693_v22, %v13692_v16 }
  0xf5   : > { %10683 = vmatpush2.bf16.msra.mxu1 %v15724_v42  ;;  %10601 = vmatprep.subr.bf16.mxu0 %v15729_v31  ;;  %v15747_v42 = vld [vmem:[%s24297_s1 + $0xd44] ss:$16 sps:$4 sm:$0xff]  }
  0xf6   : > { %10684 = vmatprep.subr.bf16.mxu1 %v15732_v34  ;;  %v15750_v31 = vld [vmem:[%s24297_s1 + $0xf44] ss:$16 sps:$4 sm:$0xff]   ;;  %v3403_v34 = vlaneseq  ;;  %24646 = vst [vmem:[#allocation75_spill] sm:$0xff] %v18870_v12  ;;  %24648 = vst [vmem:[#allocation77_spill] sm:$0xff] %v18883_v4 }
  0xf7   : > { %24649 = vst [vmem:[#allocation78_spill] sm:$0xff] %v18903_v7  ;;  %v13698_v16 = vld [vmem:[%s17357_s6 + $0x110] sm:$0xff] }
  0xf8   : > { %10602 = vmatpush2.bf16.msra.mxu0 %v15727_v5  ;;  %v15745_v5 = vld [vmem:[%s24297_s1 + $0xd40] ss:$16 sps:$4 sm:$0xff]  }
  0xf9   : > { %10685 = vmatpush2.bf16.msra.mxu1 %v15730_v10  ;;  %10603 = vmatprep.subr.bf16.mxu0 %v15735_v56  ;;  %v15748_v10 = vld [vmem:[%s24297_s1 + $0xf40] ss:$16 sps:$4 sm:$0xff]  }
  0xfa   : > { %10686 = vmatprep.subr.bf16.mxu1 %v15738_v39  ;;  %v13684_v56 = vld [vmem:[%s17357_s6 + $0xa0] sm:$0xff]  ;;  %v18808_v39 = vpack.c.bf16 %v13681_v35, %v13680_v27  ;;  %v18821_v35 = vshrl.u32 %v3403_v34, 7 }
  0xfb   : > { %v15756_v27 = vld [vmem:[%s24297_s1 + $0xf24] ss:$16 sps:$4 sm:$0xff]  }
  0xfc   : > { %10604 = vmatpush2.bf16.msra.mxu0 %v15733_v33  ;;  %24638 = vst [vmem:[#allocation69_spill] sm:$0xff] %v18808_v39  ;;  %v13685_v33 = vld [vmem:[%s17357_s6 + $0xa8] sm:$0xff]  ;;  %24640 = vst [vmem:[#allocation71_spill] sm:$0xff] %v18821_v35 }
  0xfd   : > { %10687 = vmatpush2.bf16.msra.mxu1 %v15736_v20  ;;  %10605 = vmatprep.subr.bf16.mxu0 %v15741_v2  ;;  %v18811_v20 = vpack.c.bf16 %v13683_v0, %v13682_v59  ;;  %v13686_v2 = vld [vmem:[%s17357_s6 + $0xb0] sm:$0xff]  ;;  %v18829_v59 = vpack.c.bf16 %v13685_v33, %v13684_v56  ;;  %v988_v0 = vrot.slane %v18808_v39, 5  ;;  %v3405_v33 = vsub.s32 0, %v18821_v35 }
  0xfe   : > { %10688 = vmatprep.subr.bf16.mxu1 %v15744_v54  ;;  %v13687_v54 = vld [vmem:[%s17357_s6 + $0xb8] sm:$0xff]  ;;  %v15762_v56 = vld [vmem:[%s24297_s1 + $0xf04] ss:$16 sps:$4 sm:$0xff]  }
  0xff   : > { %24639 = vst [vmem:[#allocation70_spill] sm:$0xff] %v18811_v20  ;;  %24641 = vst [vmem:[#allocation72_spill] sm:$0xff] %v18829_v59  ;;  %v18836_v25 = vpack.c.bf16 %v13687_v54, %v13686_v2  ;;  %v991_v34 = vrot.slane %v18811_v20, 5  ;;  %v1079_v2 = vshrl.u32 %v18663_v13, 16  ;;  %v1082_v54 = vshll.u32 %v18663_v13, 16 }
 0x100   : > { %10606 = vmatpush2.bf16.msra.mxu0 %v15739_v53  ;;  %v15751_v53 = vld [vmem:[%s24297_s1 + $0xd20] ss:$16 sps:$4 sm:$0xff]   ;;  %v993_v17 = vrot.slane %v988_v0, 4  ;;  %v994_v3 = vrot.slane %v18829_v59, 5  ;;  %v18917_v22 = vrot.slane %v3401_v60, %v3405_v33 }
 0x101   : > { %10689 = vmatpush2.bf16.msra.mxu1 %v15742_v38  ;;  %10607 = vmatprep.subr.bf16.mxu0 %v15747_v42  ;;  %v15754_v38 = vld [vmem:[%s24297_s1 + $0xf20] ss:$16 sps:$4 sm:$0xff]   ;;  %24642 = vst [vmem:[#allocation73_spill] sm:$0xff] %v18836_v25  ;;  %v996_v62 = vrot.slane %v991_v34, 4  ;;  %v992_v19 = vsel %vm18270_vm5, %v990_v1, %v991_v34 }
 0x102   : > { %10690 = vmatprep.subr.bf16.mxu1 %v15750_v31  ;;  %v13688_v42 = vld [vmem:[%s17357_s6 + $0xc0] sm:$0xff]  ;;  %v995_v24 = vsel %vm18270_vm5, %v993_v17, %v994_v3  ;;  %v1003_v17 = vrot.slane %v18870_v12, 5 }
 0x103   : > { %v15759_v31 = vld [vmem:[%s24297_s1 + $0xd04] ss:$16 sps:$4 sm:$0xff]   ;;  %v18858_v43 = vpack.c.bf16 %v13689_v41, %v13688_v42  ;;  %v3409_v41 = vsub.s32 1, %v18821_v35  ;;  %v18891_v35 = vrot.slane %v1082_v54, 6 }
 0x104   : > { %10608 = vmatpush2.bf16.msra.mxu0 %v15745_v5  ;;  %v15757_v5 = vld [vmem:[%s24297_s1 + $0xd00] ss:$16 sps:$4 sm:$0xff]   ;;  %v15771_v54 = vld [vmem:[%s24297_s1 + $0x10c4] ss:$16 sps:$4 sm:$0xff]   ;;  %v1008_v33 = vrot.slane %v1003_v17, 4 }
 0x105   : > { %10691 = vmatpush2.bf16.msra.mxu1 %v15748_v10  ;;  %10609 = vmatprep.subr.bf16.mxu0 %v15753_v45  ;;  %v15760_v45 = vld [vmem:[%s24297_s1 + $0xf00] ss:$16 sps:$4 sm:$0xff]   ;;  %v24643_v10 = vrot.slane %v18665_v6, 5  ;;  %24644 = vst [vmem:[#allocation74_spill] sm:$0xff] %v18858_v43  ;;  %v18921_v1 = vrot.slane %v3401_v60, %v3409_v41 }
 0x106   : > { %10692 = vmatprep.subr.bf16.mxu1 %v15756_v27  ;;  %v13694_v42 = vld [vmem:[%s17357_s6 + $0xf0] sm:$0xff]  ;;  %v13700_v34 = vld [vmem:[%s17357_s6 + $0x120] sm:$0xff] }
 0x107   : > { %v987_v27 = vrot.slane %v24643_v10, 4  ;;  %v997_v10 = vrot.slane %v18836_v25, 5  ;;  %24650 = vst [vmem:[#allocation79_spill] sm:$0xff] %v18921_v1 }
 0x108   : > { %10610 = vmatpush2.bf16.msra.mxu0 %v15751_v53  ;;  %v13696_v53 = vld [vmem:[%s17357_s6 + $0x100] sm:$0xff] }
 0x109   : > { %10693 = vmatpush2.bf16.msra.mxu1 %v15754_v38  ;;  %10611 = vmatprep.subr.bf16.mxu0 %v15759_v31  ;;  %v18889_v38 = vrot.slane %v1079_v2, 5  ;;  %v15763_v31 = vld [vmem:[%s24297_s1 + $0x10e0] ss:$16 sps:$4 sm:$0xff]   ;;  %v989_v57 = vsel %vm18270_vm5, %v987_v27, %v988_v0  ;;  %v13697_v2 = vld [vmem:[%s17357_s6 + $0x108] sm:$0xff]  ;;  %v998_v28 = vsel %vm18270_vm5, %v996_v62, %v997_v10  ;;  %v18914_v0 = vpack.c.bf16 %v13695_v48, %v13694_v42  ;;  %v13699_v27 = vld [vmem:[%s17357_s6 + $0x118] sm:$0xff] }
 0x10a   : > { %10694 = vmatprep.subr.bf16.mxu1 %v15762_v56  ;;  %v1000_v56 = vrot.slane %v18858_v43, 5  ;;  %v15774_v48 = vld [vmem:[%s24297_s1 + $0x12c4] ss:$16 sps:$4 sm:$0xff]   ;;  %v999_v62 = vrot.slane %v994_v3, 4  ;;  %v18927_v42 = vpack.c.bf16 %v13697_v2, %v13696_v53  ;;  %v18937_v60 = vcombine.high %v989_v57, %v995_v24 }
 0x10b   : > { %v1006_v3 = vrot.slane %v18903_v7, 5  ;;  %v15777_v53 = vld [vmem:[%s24297_s1 + $0x10a4] ss:$16 sps:$4 sm:$0xff]   ;;  %v1002_v2 = vrot.slane %v997_v10, 4  ;;  %v1009_v21 = vrot.slane %v18914_v0, 5  ;;  %v18951_v58 = vpack.c.bf16 %v13699_v27, %v13698_v16 }
 0x10c   : > { %10612 = vmatpush2.bf16.msra.mxu0 %v15757_v5  ;;  %24651 = vst [vmem:[#allocation80_spill] sm:$0xff] %v18937_v60  ;;  %v1005_v5 = vrot.slane %v1000_v56, 4  ;;  %v15780_v16 = vld [vmem:[%s24297_s1 + $0x12a4] ss:$16 sps:$4 sm:$0xff]   ;;  %v18963_v27 = vcombine.low %v992_v19, %v998_v28 }
 0x10d   : > { %10695 = vmatpush2.bf16.msra.mxu1 %v15760_v45  ;;  %10747 = vmatprep.subr.bf16.mxu0 %v15765_v47  ;;  %v18939_v47 = vcombine.high %v992_v19, %v998_v28  ;;  %v13701_v45 = vld [vmem:[%s17357_s6 + $0x128] sm:$0xff]  ;;  %v10117_v41 = vpop.f32.mrf.mxu0  ;;  %v15778_v28 = vld [vmem:[%s24297_s1 + $0x12a0] ss:$16 sps:$4 sm:$0xff]  }
 0x10e   : > { %10830 = vmatprep.subr.bf16.mxu1 %v15768_v26  ;;  %v10200_v26 = vpop.f32.mrf.mxu1  ;;  %v10118_v23 = vadd.f32 %v10117_v41, %v18917_v22  ;;  %24654 = vst [vmem:[#allocation83_spill] sm:$0xff] %v18963_v27  ;;  %v1007_v19 = vsel %vm18270_vm5, %v1005_v5, %v1006_v3  ;;  %v1004_v5 = vsel %vm18270_vm5, %v1002_v2, %v1003_v17  ;;  %v1097_v17 = vshrl.u32 %v18668_v36, 16 }
 0x10f   : > { %24652 = vst [vmem:[#allocation81_spill] sm:$0xff] %v18939_v47  ;;  %10614 = vmatmul.mubr.bf16.vlgmr.msra.gmra.mxu0 %v18879_v29  ;;  %v18954_v29 = vcombine.low %v989_v57, %v995_v24  ;;  %v10119_v46 = vpop.f32.mrf.mxu0  ;;  %v1012_v57 = vrot.slane %v18927_v42, 5 }
 0x110   : > { %10697 = vmatmul.mubr.bf16.vlgmr.msra.gmra.mxu1 %v18883_v4  ;;  %10748 = vmatpush1.bf16.msra.mxu0 %v15763_v31  ;;  %v13702_v4 = vld [vmem:[%s17357_s6 + $0x130] sm:$0xff]  ;;  %v10202_v10 = vpop.f32.mrf.mxu1  ;;  %v1001_v31 = vsel %vm18270_vm5, %v999_v62, %v1000_v56  ;;  %v18971_v51 = vadd.f32 %v10200_v26, %v10118_v23  ;;  %v10120_v24 = vadd.f32 %v10119_v46, %v18921_v1  ;;  %v13705_v23 = vld [vmem:[%s17357_s6 + $0x148] sm:$0xff]  ;;  %v1015_v26 = vrot.slane %v18951_v58, 5 }
 0x111   : > { %10831 = vmatpush1.bf16.msra.mxu1 %v15766_v9  ;;  %24653 = vst [vmem:[#allocation82_spill] sm:$0xff] %v18954_v29  ;;  %10749 = vmatprep.subr.bf16.mxu0 %v15771_v54  ;;  %v18967_v9 = vpack.c.bf16 %v13701_v45, %v13700_v34  ;;  %v15775_v54 = vld [vmem:[%s24297_s1 + $0x10a0] ss:$16 sps:$4 sm:$0xff]   ;;  %v10121_v56 = vpop.f32.mrf.mxu0  ;;  %v15783_v62 = vld [vmem:[%s24297_s1 + $0x1084] ss:$16 sps:$4 sm:$0xff]   ;;  %v1010_v45 = vsel %vm18270_vm5, %v1008_v33, %v1009_v21  ;;  %v19046_v37 = vrot.slane %v1097_v17, 5 }
 0x112   : > { %10832 = vmatprep.subr.bf16.mxu1 %v15774_v48  ;;  %10623 = vmatprep.mubr.bf16.mxu0 %v18937_v60  ;;  %v10204_v48 = vpop.f32.mrf.mxu1  ;;  %v15786_v34 = vld [vmem:[%s24297_s1 + $0x1284] ss:$16 sps:$4 sm:$0xff]   ;;  %v18998_v41 = vpack.c.bf16 %v13703_v8, %v13702_v4  ;;  %v19001_v46 = vadd.f32 %v10202_v10, %v10120_v24  ;;  %v1011_v60 = vrot.slane %v1006_v3, 4  ;;  %v1017_v4 = vrot.slane %v1012_v57, 4  ;;  %v13709_v24 = vld [vmem:[%s17357_s6 + $0x168] sm:$0xff] }
 0x113   : > { %10706 = vmatprep.mubr.bf16.mxu1 %v18939_v47  ;;  %v10122_v47 = vadd.f32 %v10121_v56, %v18917_v22  ;;  %v19007_v2 = vpop.f32.mrf.mxu0  ;;  %v1018_v33 = vrot.slane %v18967_v9, 5  ;;  %v13708_v10 = vld [vmem:[%s17357_s6 + $0x160] sm:$0xff] }
 0x114   : > { %10750 = vmatpush1.bf16.msra.mxu0 %v15769_v11  ;;  %24655 = vst [vmem:[#allocation84_spill] sm:$0xff] %v19007_v2  ;;  %v19009_v8 = vpop.f32.mrf.mxu1  ;;  %v19014_v11 = vpack.c.bf16 %v13705_v23, %v13704_v50  ;;  %v15781_v56 = vld [vmem:[%s24297_s1 + $0x1080] ss:$16 sps:$4 sm:$0xff]   ;;  %v19022_v2 = vcombine.high %v1001_v31, %v1007_v19  ;;  %v1014_v50 = vrot.slane %v1009_v21, 4  ;;  %v1020_v23 = vrot.slane %v1015_v26, 4 }
 0x115   : > { %10833 = vmatpush1.bf16.msra.mxu1 %v15772_v30  ;;  %24656 = vst [vmem:[#allocation85_spill] sm:$0xff] %v19009_v8  ;;  %10751 = vmatprep.subr.bf16.mxu0 %v15777_v53  ;;  %v19017_v3 = vadd.f32 %v10204_v48, %v10122_v47  ;;  %v19024_v53 = vcombine.low %v1001_v31, %v1007_v19  ;;  %v13710_v8 = vld [vmem:[%s17357_s6 + $0x170] sm:$0xff]  ;;  %v1021_v47 = vrot.slane %v18998_v41, 5  ;;  %v10127_v48 = vpop.f32.mrf.mxu0 }
 0x116   : > { %10834 = vmatprep.subr.bf16.mxu1 %v15780_v16  ;;  %24657 = vst [vmem:[#allocation86_spill] sm:$0xff] %v19022_v2  ;;  %v19026_v16 = vcombine.high %v1004_v5, %v1010_v45  ;;  %v10210_v30 = vpop.f32.mrf.mxu1  ;;  %v15784_v31 = vld [vmem:[%s24297_s1 + $0x1280] ss:$16 sps:$4 sm:$0xff]   ;;  %v15789_v19 = vld [vmem:[%s24297_s1 + $0x1064] ss:$16 sps:$4 sm:$0xff]   ;;  %v1013_v21 = vsel %vm18270_vm5, %v1011_v60, %v1012_v57  ;;  %v1019_v63 = vsel %vm18270_vm5, %v1017_v4, %v1018_v33  ;;  %v1100_v60 = vshll.u32 %v18668_v36, 16 }
 0x117   : > { %24658 = vst [vmem:[#allocation87_spill] sm:$0xff] %v19024_v53  ;;  %10624 = vmatmul.mubr.bf16.gmra.mxu0 %v18954_v29  ;;  %v10128_v29 = vadd.f32 %v10127_v48, %v18917_v22  ;;  %v15787_v57 = vld [vmem:[%s24297_s1 + $0x1060] ss:$16 sps:$4 sm:$0xff]   ;;  %v19065_v17 = vpack.c.bf16 %v13711_v52, %v13710_v8  ;;  %v1106_v4 = vshrl.u32 %v18651_v32, 16  ;;  %v1022_v48 = vsel %vm18270_vm5, %v1020_v23, %v1021_v47 }
 0x118   : > { %24659 = vst [vmem:[#allocation88_spill] sm:$0xff] %v19026_v16  ;;  %10707 = vmatmul.mubr.bf16.gmra.mxu1 %v18963_v27  ;;  %10752 = vmatpush1.bf16.msra.mxu0 %v15775_v54  ;;  %v19041_v27 = vcombine.low %v1004_v5, %v1010_v45  ;;  %v10129_v54 = vpop.f32.mrf.mxu0  ;;  %v19053_v5 = vpack.c.bf16 %v13709_v24, %v13708_v10  ;;  %v1024_v45 = vrot.slane %v19014_v11, 5  ;;  %v15790_v10 = vld [vmem:[%s24297_s1 + $0x1260] ss:$16 sps:$4 sm:$0xff]   ;;  %v1109_v52 = vshll.u32 %v18651_v32, 16 }
 0x119   : > { %10835 = vmatpush1.bf16.msra.mxu1 %v15778_v28  ;;  %10753 = vmatprep.subr.bf16.mxu0 %v15783_v62  ;;  %v10212_v28 = vpop.f32.mrf.mxu1  ;;  %v10130_v62 = vadd.f32 %v10129_v54, %v18921_v1  ;;  %v1016_v24 = vsel %vm18270_vm5, %v1014_v50, %v1015_v26  ;;  %v1027_v54 = vrot.slane %v19033_v61, 5  ;;  %v15798_v26 = vld [vmem:[%s24297_s1 + $0x1244] ss:$16 sps:$4 sm:$0xff]   ;;  %v19083_v8 = vcombine.high %v1013_v21, %v1019_v63  ;;  %v15793_v32 = vld [vmem:[%s24297_s1 + $0x1040] ss:$16 sps:$4 sm:$0xff]  }
 0x11a   : > { %24660 = vst [vmem:[#allocation89_spill] sm:$0xff] %v19041_v27  ;;  %10836 = vmatprep.subr.bf16.mxu1 %v15786_v34  ;;  %10633 = vmatprep.mubr.bf16.mxu0 %v19022_v2  ;;  %v19063_v34 = vadd.f32 %v10210_v30, %v10128_v29  ;;  %v10131_v2 = vpop.f32.mrf.mxu0  ;;  %v15795_v29 = vld [vmem:[%s24297_s1 + $0x1044] ss:$16 sps:$4 sm:$0xff]   ;;  %v1023_v23 = vrot.slane %v1018_v33, 4  ;;  %v1029_v55 = vrot.slane %v1024_v45, 4  ;;  %v1026_v18 = vrot.slane %v1021_v47, 4 }
 0x11b   : > { %10716 = vmatprep.mubr.bf16.mxu1 %v19026_v16  ;;  %v10214_v16 = vpop.f32.mrf.mxu1  ;;  %24661 = vst [vmem:[#allocation90_spill] sm:$0xff] %v19083_v8  ;;  %v10132_v30 = vadd.f32 %v10131_v2, %v18917_v22  ;;  %v19086_v50 = vadd.f32 %v10212_v28, %v10130_v62  ;;  %v19093_v13 = vrot.slane %v1100_v60, 6  ;;  %v19098_v2 = vcombine.high %v1016_v24, %v1022_v48 }
 0x11c   : > { %10754 = vmatpush1.bf16.msra.mxu0 %v15781_v56  ;;  %v1030_v56 = vrot.slane %v19053_v5, 5  ;;  %v1033_v33 = vrot.slane %v19065_v17, 5  ;;  %v1032_v47 = vrot.slane %v1027_v54, 4  ;;  %v1111_v60 = vrot.slane %v1109_v52, 6  ;;  %v15801_v52 = vld [vmem:[%s24297_s1 + $0x1024] ss:$16 sps:$4 sm:$0xff]  }
 0x11d   : > { %10837 = vmatpush1.bf16.msra.mxu1 %v15784_v31  ;;  %10755 = vmatprep.subr.bf16.mxu0 %v15789_v19  ;;  %v19089_v31 = vpop.f32.mrf.mxu0  ;;  %v19091_v36 = vpop.f32.mrf.mxu1  ;;  %24664 = vst [vmem:[#allocation93_spill] sm:$0xff] %v19098_v2  ;;  %v19100_v28 = vadd.f32 %v10214_v16, %v10132_v30  ;;  %v1108_v19 = vrot.slane %v1106_v4, 5  ;;  %v15796_v16 = vld [vmem:[%s24297_s1 + $0x1240] ss:$16 sps:$4 sm:$0xff]   ;;  %v19110_v30 = vcombine.low %v1013_v21, %v1019_v63 }
 0x11e   : > { %10838 = vmatprep.subr.bf16.mxu1 %v15792_v49  ;;  %24662 = vst [vmem:[#allocation91_spill] sm:$0xff] %v19089_v31  ;;  %24663 = vst [vmem:[#allocation92_spill] sm:$0xff] %v19091_v36  ;;  %v1126_v36 = vshrl.u32 %v18670_v14, 16  ;;  %v1129_v31 = vshll.u32 %v18670_v14, 16  ;;  %v19112_v4 = vcombine.low %v1016_v24, %v1022_v48  ;;  %v1031_v21 = vsel %vm18270_vm5, %v1029_v55, %v1030_v56 }
 0x11f   : > { %10634 = vmatmul.mubr.bf16.gmra.mxu0 %v19024_v53  ;;  %v10137_v49 = vpop.f32.mrf.mxu0  ;;  %v10220_v62 = vpop.f32.mrf.mxu1  ;;  %24665 = vst [vmem:[#allocation94_spill] sm:$0xff] %v19110_v30  ;;  %v24667_v48 = vshrl.u32 %v18665_v6, 16  ;;  %v24668_v55 = vshll.u32 %v18665_v6, 16 }
 0x120   : > { %10717 = vmatmul.mubr.bf16.gmra.mxu1 %v19041_v27  ;;  %10756 = vmatpush1.bf16.msra.mxu0 %v15787_v57  ;;  %24666 = vst [vmem:[#allocation95_spill] sm:$0xff] %v19112_v4  ;;  %v10138_v27 = vadd.f32 %v10137_v49, %v18917_v22  ;;  %v15804_v57 = vld [vmem:[%s24297_s1 + $0x1224] ss:$16 sps:$4 sm:$0xff]   ;;  %v1028_v49 = vsel %vm18270_vm5, %v1026_v18, %v1027_v54  ;;  %v15799_v18 = vld [vmem:[%s24297_s1 + $0x1020] ss:$16 sps:$4 sm:$0xff]  }
 0x121   : > { %10839 = vmatpush1.bf16.msra.mxu1 %v15790_v10  ;;  %10757 = vmatprep.subr.bf16.mxu0 %v15795_v29  ;;  %v1025_v10 = vsel %vm18270_vm5, %v1023_v23, %v1024_v45  ;;  %v10139_v63 = vpop.f32.mrf.mxu0  ;;  %v10222_v24 = vpop.f32.mrf.mxu1  ;;  %v1118_v29 = vrot.slane %v24667_v48, 5  ;;  %v1121_v56 = vrot.slane %v24668_v55, 6  ;;  %v1034_v48 = vsel %vm18270_vm5, %v1032_v47, %v1033_v33 }
 0x122   : > { %10840 = vmatprep.subr.bf16.mxu1 %v15798_v26  ;;  %v1103_v26 = vor.u32 %v19093_v13, %v19046_v37  ;;  %10643 = vmatprep.mubr.bf16.mxu0 %v19083_v8  ;;  %v10140_v45 = vadd.f32 %v10139_v63, %v18921_v1  ;;  %v19134_v23 = vadd.f32 %v10220_v62, %v10138_v27  ;;  %v1128_v13 = vrot.slane %v1126_v36, 5  ;;  %v15802_v27 = vld [vmem:[%s24297_s1 + $0x1220] ss:$16 sps:$4 sm:$0xff]  }
 0x123   : > { %10726 = vmatprep.mubr.bf16.mxu1 %v19098_v2  ;;  %v10141_v53 = vpop.f32.mrf.mxu0  ;;  %v10224_v14 = vpop.f32.mrf.mxu1  ;;  %v1112_v37 = vor.u32 %v1111_v60, %v1108_v19  ;;  %v1131_v8 = vrot.slane %v1129_v31, 6  ;;  %v24671_v19 = vor.u32 %v18891_v35, %v18889_v38  ;;  %v1114_v62 = vrot.slane %v18958_v44, 4  ;;  %v15805_v35 = vld [vmem:[%s24297_s1 + $0x1000] ss:$16 sps:$4 sm:$0xff]  }
 0x124   : > { %10758 = vmatpush1.bf16.msra.mxu0 %v15793_v32  ;;  %v10142_v54 = vadd.f32 %v10141_v53, %v18917_v22  ;;  %v19150_v33 = vadd.f32 %v10222_v24, %v10140_v45  ;;  %v15810_v32 = vld [vmem:[%s24297_s1 + $0x1204] ss:$16 sps:$4 sm:$0xff]   ;;  %v19163_v60 = vcombine.high %v1025_v10, %v1031_v21  ;;  %v19165_v53 = vcombine.high %v1028_v49, %v1034_v48 }
 0x125   : > { %10841 = vmatpush1.bf16.msra.mxu1 %v15796_v16  ;;  %10759 = vmatprep.subr.bf16.mxu0 %v15801_v52  ;;  %v19155_v36 = vpop.f32.mrf.mxu0  ;;  %v19157_v31 = vpop.f32.mrf.mxu1  ;;  %v1086_v47 = vrot.slane %v24671_v19, 4  ;;  %v1104_v24 = vrot.slane %v1103_v26, 4  ;;  %v1124_v45 = vrot.slane %v1112_v37, 4  ;;  %v19185_v55 = vor.u32 %v1131_v8, %v1128_v13 }
 0x126   : > { %10842 = vmatprep.subr.bf16.mxu1 %v15804_v57  ;;  %24669 = vst [vmem:[#allocation96_spill] sm:$0xff] %v19155_v36  ;;  %24670 = vst [vmem:[#allocation97_spill] sm:$0xff] %v19157_v31  ;;  %v19167_v16 = vadd.f32 %v10224_v14, %v10142_v54  ;;  %v19175_v57 = vor.u32 %v1121_v56, %v1118_v29  ;;  %v15808_v14 = vld [vmem:[%s24297_s1 + $0x1200] ss:$16 sps:$4 sm:$0xff]   ;;  %v15813_v29 = vld [vmem:[%s24297_s1 + $0x11e4] ss:$16 sps:$4 sm:$0xff]  }
 0x127   : > { %24672 = vst [vmem:[#allocation98_spill] sm:$0xff] %v19163_v60  ;;  %24673 = vst [vmem:[#allocation99_spill] sm:$0xff] %v19165_v53  ;;  %10644 = vmatmul.mubr.bf16.gmra.mxu0 %v19110_v30  ;;  %v10147_v38 = vpop.f32.mrf.mxu0  ;;  %v10230_v63 = vpop.f32.mrf.mxu1  ;;  %v15816_v54 = vld [vmem:[%s24297_s1 + $0x13e4] ss:$16 sps:$4 sm:$0xff]   ;;  %v19197_v8 = vsel %vm19171_vm8, %v1086_v47, %v18958_v44  ;;  %v15811_v44 = vld [vmem:[%s24297_s1 + $0x11e0] ss:$16 sps:$4 sm:$0xff]  }
 0x128   : > { %10727 = vmatmul.mubr.bf16.gmra.mxu1 %v19112_v4  ;;  %10760 = vmatpush1.bf16.msra.mxu0 %v15799_v18  ;;  %v10148_v56 = vadd.f32 %v10147_v38, %v18917_v22  ;;  %v19207_v18 = vsel %vm19171_vm8, %v1114_v62, %v19175_v57  ;;  %v1136_v36 = vshrl.u32 %v18808_v39, 16  ;;  %v1169_v4 = vshll.u32 %v18836_v25, 16 }
 0x129   : > { %10843 = vmatpush1.bf16.msra.mxu1 %v15802_v27  ;;  %10761 = vmatprep.subr.bf16.mxu0 %v15807_v40  ;;  %v10149_v19 = vpop.f32.mrf.mxu0  ;;  %v10232_v31 = vpop.f32.mrf.mxu1  ;;  %v19209_v27 = vcombine.low %v1025_v10, %v1031_v21  ;;  %v15814_v40 = vld [vmem:[%s24297_s1 + $0x13e0] ss:$16 sps:$4 sm:$0xff]   ;;  %v19226_v10 = vsel %vm19171_vm8, %v1124_v45, %v19185_v55  ;;  %v15819_v21 = vld [vmem:[%s24297_s1 + $0x11c4] ss:$16 sps:$4 sm:$0xff]   ;;  %v1199_v2 = vshll.u32 %v18903_v7, 16 }
 0x12a   : > { %10844 = vmatprep.subr.bf16.mxu1 %v15810_v32  ;;  %10653 = vmatprep.mubr.bf16.mxu0 %v19163_v60  ;;  %v10150_v26 = vadd.f32 %v10149_v19, %v18921_v1  ;;  %v19202_v13 = vadd.f32 %v10230_v63, %v10148_v56  ;;  %v19217_v32 = vcombine.low %v1028_v49, %v1034_v48  ;;  %v15817_v45 = vld [vmem:[%s24297_s1 + $0x11c0] ss:$16 sps:$4 sm:$0xff]  }
 0x12b   : > { %10736 = vmatprep.mubr.bf16.mxu1 %v19165_v53  ;;  %24676 = vst [vmem:[#allocation100_spill] sm:$0xff] %v19209_v27  ;;  %v10151_v47 = vpop.f32.mrf.mxu0  ;;  %v10234_v38 = vpop.f32.mrf.mxu1  ;;  %v19221_v63 = vsel %vm19171_vm8, %v1104_v24, %v1112_v37  ;;  %v15822_v37 = vld [vmem:[%s24297_s1 + $0x13c4] ss:$16 sps:$4 sm:$0xff]   ;;  %v15841_v53 = vld [vmem:[%s24297_s1 + $0x1140] ss:$16 sps:$4 sm:$0xff]  }
 0x12c   : > { %24677 = vst [vmem:[#allocation101_spill] sm:$0xff] %v19217_v32  ;;  %10762 = vmatpush1.bf16.msra.mxu0 %v15805_v35  ;;  %v10152_v49 = vadd.f32 %v10151_v47, %v18917_v22  ;;  %v19232_v48 = vadd.f32 %v10232_v31, %v10150_v26  ;;  %v19249_v31 = vcombine.high %v19221_v63, %v19226_v10  ;;  %v15825_v26 = vld [vmem:[%s24297_s1 + $0x11a4] ss:$16 sps:$4 sm:$0xff]  }
 0x12d   : > { %10845 = vmatpush1.bf16.msra.mxu1 %v15808_v14  ;;  %10763 = vmatprep.subr.bf16.mxu0 %v15813_v29  ;;  %v19237_v62 = vpop.f32.mrf.mxu0  ;;  %v19239_v24 = vpop.f32.mrf.mxu1  ;;  %v19245_v14 = vcombine.high %v19197_v8, %v19207_v18  ;;  %v15828_v47 = vld [vmem:[%s24297_s1 + $0x13a4] ss:$16 sps:$4 sm:$0xff]  }
 0x12e   : > { %10846 = vmatprep.subr.bf16.mxu1 %v15816_v54  ;;  %24678 = vst [vmem:[#allocation102_spill] sm:$0xff] %v19237_v62  ;;  %24679 = vst [vmem:[#allocation103_spill] sm:$0xff] %v19239_v24  ;;  %v19241_v35 = vadd.f32 %v10234_v38, %v10152_v49  ;;  %v15820_v54 = vld [vmem:[%s24297_s1 + $0x13c0] ss:$16 sps:$4 sm:$0xff]  }
 0x12f   : > { %24680 = vst [vmem:[#allocation104_spill] sm:$0xff] %v19245_v14  ;;  %24681 = vst [vmem:[#allocation105_spill] sm:$0xff] %v19249_v31  ;;  %10654 = vmatmul.mubr.bf16.gmra.mxu0 %v19209_v27  ;;  %v10157_v29 = vpop.f32.mrf.mxu0  ;;  %v10240_v56 = vpop.f32.mrf.mxu1 }
 0x130   : > { %10737 = vmatmul.mubr.bf16.gmra.mxu1 %v19217_v32  ;;  %10764 = vmatpush2.bf16.msra.mxu0 %v15811_v44  ;;  %v10158_v19 = vadd.f32 %v10157_v29, %v18917_v22  ;;  %v15823_v44 = vld [vmem:[%s24297_s1 + $0x11a0] ss:$16 sps:$4 sm:$0xff]   ;;  %v15831_v29 = vld [vmem:[%s24297_s1 + $0x1184] ss:$16 sps:$4 sm:$0xff]  }
 0x131   : > { %10847 = vmatpush2.bf16.msra.mxu1 %v15814_v40  ;;  %10765 = vmatprep.subr.bf16.mxu0 %v15819_v21  ;;  %v10159_v38 = vpop.f32.mrf.mxu0  ;;  %v10242_v49 = vpop.f32.mrf.mxu1  ;;  %v15826_v21 = vld [vmem:[%s24297_s1 + $0x13a0] ss:$16 sps:$4 sm:$0xff]  }
 0x132   : > { %10848 = vmatprep.subr.bf16.mxu1 %v15822_v37  ;;  %v10160_v40 = vadd.f32 %v10159_v38, %v18921_v1  ;;  %v19270_v24 = vadd.f32 %v10240_v56, %v10158_v19  ;;  %10779 = vmatprep.mubr.bf16.mxu0 %v19245_v14  ;;  %v15834_v56 = vld [vmem:[%s24297_s1 + $0x1384] ss:$16 sps:$4 sm:$0xff]   ;;  %v1156_v1 = vshrl.u32 %v18829_v59, 16 }
 0x133   : > { %10862 = vmatprep.mubr.bf16.mxu1 %v19249_v31  ;;  %v10161_v37 = vpop.f32.mrf.mxu0  ;;  %v10244_v19 = vpop.f32.mrf.mxu1  ;;  %v1159_v31 = vshll.u32 %v18829_v59, 16 }
 0x134   : > { %10766 = vmatpush2.bf16.msra.mxu0 %v15817_v45  ;;  %v10162_v62 = vadd.f32 %v10161_v37, %v18917_v22  ;;  %v19281_v38 = vadd.f32 %v10242_v49, %v10160_v40  ;;  %v1139_v45 = vshll.u32 %v18808_v39, 16  ;;  %v15832_v22 = vld [vmem:[%s24297_s1 + $0x1380] ss:$16 sps:$4 sm:$0xff]   ;;  %v1138_v40 = vrot.slane %v1136_v36, 5 }
 0x135   : > { %10849 = vmatpush2.bf16.msra.mxu1 %v15820_v54  ;;  %10767 = vmatprep.subr.bf16.mxu0 %v15825_v26  ;;  %v15829_v54 = vld [vmem:[%s24297_s1 + $0x1180] ss:$16 sps:$4 sm:$0xff]   ;;  %v15837_v26 = vld [vmem:[%s24297_s1 + $0x1164] ss:$16 sps:$4 sm:$0xff]   ;;  %v1179_v36 = vshll.u32 %v18858_v43, 16  ;;  %v1158_v32 = vrot.slane %v1156_v1, 5 }
 0x136   : > { %10850 = vmatprep.subr.bf16.mxu1 %v15828_v47  ;;  %v19294_v49 = vadd.f32 %v10244_v19, %v10162_v62  ;;  %v15840_v47 = vld [vmem:[%s24297_s1 + $0x1364] ss:$16 sps:$4 sm:$0xff]   ;;  %v1141_v37 = vrot.slane %v1139_v45, 6  ;;  %v15835_v62 = vld [vmem:[%s24297_s1 + $0x1160] ss:$16 sps:$4 sm:$0xff]   ;;  %v1146_v19 = vshrl.u32 %v18811_v20, 16 }
 0x137   : > { %v15846_v45 = vld [vmem:[%s24297_s1 + $0x1344] ss:$16 sps:$4 sm:$0xff]   ;;  %v1161_v27 = vrot.slane %v1159_v31, 6  ;;  %v15844_v1 = vld [vmem:[%s24297_s1 + $0x1340] ss:$16 sps:$4 sm:$0xff]   ;;  %v1186_v31 = vshrl.u32 %v18870_v12, 16 }
 0x138   : > { %10768 = vmatpush2.bf16.msra.mxu0 %v15823_v44  ;;  %v1149_v44 = vshll.u32 %v18811_v20, 16  ;;  %v1142_v14 = vor.u32 %v1141_v37, %v1138_v40  ;;  %v1148_v60 = vrot.slane %v1146_v19, 5  ;;  %v1189_v40 = vshll.u32 %v18870_v12, 16  ;;  %v15849_v37 = vld [vmem:[%s24297_s1 + $0x1124] ss:$16 sps:$4 sm:$0xff]  }
 0x139   : > { %10851 = vmatpush2.bf16.msra.mxu1 %v15826_v21  ;;  %10769 = vmatprep.subr.bf16.mxu0 %v15831_v29  ;;  %v15838_v21 = vld [vmem:[%s24297_s1 + $0x1360] ss:$16 sps:$4 sm:$0xff]   ;;  %v1176_v29 = vshrl.u32 %v18858_v43, 16  ;;  %v15852_v19 = vld [vmem:[%s24297_s1 + $0x1324] ss:$16 sps:$4 sm:$0xff]   ;;  %v1188_v59 = vrot.slane %v1186_v31, 5 }
 0x13a   : > { %10852 = vmatprep.subr.bf16.mxu1 %v15834_v56  ;;  %v15843_v56 = vld [vmem:[%s24297_s1 + $0x1144] ss:$16 sps:$4 sm:$0xff]   ;;  %v1206_v20 = vshrl.u32 %v18914_v0, 16  ;;  %v1209_v39 = vshll.u32 %v18914_v0, 16 }
 0x13b   : > { %v1178_v30 = vrot.slane %v1176_v29, 5  ;;  %v1154_v29 = vrot.slane %v1142_v14, 4 }
 0x13c   : > { %10770 = vmatpush2.bf16.msra.mxu0 %v15829_v54  ;;  %v1151_v54 = vrot.slane %v1149_v44, 6  ;;  %v15847_v44 = vld [vmem:[%s24297_s1 + $0x1120] ss:$16 sps:$4 sm:$0xff]  }
 0x13d   : > { %10853 = vmatpush2.bf16.msra.mxu1 %v15832_v22  ;;  %10771 = vmatprep.subr.bf16.mxu0 %v15837_v26  ;;  %v1166_v22 = vshrl.u32 %v18836_v25, 16  ;;  %v1181_v26 = vrot.slane %v1179_v36, 6  ;;  %v1162_v36 = vor.u32 %v1161_v27, %v1158_v32  ;;  %v1201_v25 = vrot.slane %v1199_v2, 6  ;;  %v15855_v27 = vld [vmem:[%s24297_s1 + $0x1104] ss:$16 sps:$4 sm:$0xff]  }
 0x13e   : > { %10854 = vmatprep.subr.bf16.mxu1 %v15840_v47  ;;  %v1196_v47 = vshrl.u32 %v18903_v7, 16  ;;  %v1171_v7 = vrot.slane %v1169_v4, 6  ;;  %v15853_v2 = vld [vmem:[%s24297_s1 + $0x1100] ss:$16 sps:$4 sm:$0xff]  }
 0x13f   : > { %v1182_v12 = vor.u32 %v1181_v26, %v1178_v30  ;;  %v15858_v30 = vld [vmem:[%s24297_s1 + $0x1304] ss:$16 sps:$4 sm:$0xff]   ;;  %v1174_v32 = vrot.slane %v1162_v36, 4 }
 0x140   : > { %10772 = vmatpush2.bf16.msra.mxu0 %v15835_v62  ;;  %v1134_v62 = vrot.slane %v19175_v57, 4  ;;  %v1198_v43 = vrot.slane %v1196_v47, 5  ;;  %v1191_v57 = vrot.slane %v1189_v40, 6  ;;  %v1208_v40 = vrot.slane %v1206_v20, 5  ;;  %v15862_v20 = vld [vmem:[%s24297_s1 + $0x16e0] ss:$16 sps:$4 sm:$0xff]  }
 0x141   : > { %10855 = vmatpush2.bf16.msra.mxu1 %v15838_v21  ;;  %10773 = vmatprep.subr.bf16.mxu0 %v15843_v56  ;;  %v15850_v21 = vld [vmem:[%s24297_s1 + $0x1320] ss:$16 sps:$4 sm:$0xff]   ;;  %v1152_v56 = vor.u32 %v1151_v54, %v1148_v60  ;;  %v1163_v60 = vsel %vm19171_vm8, %v1154_v29, %v1162_v36  ;;  %v1194_v47 = vrot.slane %v1182_v12, 4 }
 0x142   : > { %10856 = vmatprep.subr.bf16.mxu1 %v15846_v45  ;;  %v1168_v45 = vrot.slane %v1166_v22, 5  ;;  %v1143_v4 = vsel %vm19171_vm8, %v1134_v62, %v1142_v14  ;;  %v15856_v54 = vld [vmem:[%s24297_s1 + $0x1300] ss:$16 sps:$4 sm:$0xff]   ;;  %v15861_v14 = vld [vmem:[%s24297_s1 + $0x14e4] ss:$16 sps:$4 sm:$0xff]   ;;  %v1192_v31 = vor.u32 %v1191_v57, %v1188_v59  ;;  %v1219_v59 = vshll.u32 %v18927_v42, 16 }
 0x143   : > { %v1164_v22 = vrot.slane %v1152_v56, 4  ;;  %v15870_v62 = vld [vmem:[%s24297_s1 + $0x16c4] ss:$16 sps:$4 sm:$0xff]   ;;  %v1236_v57 = vshrl.u32 %v18967_v9, 16 }
 0x144   : > { %10774 = vmatpush2.bf16.msra.mxu0 %v15841_v53  ;;  %v1144_v53 = vrot.slane %v19185_v55, 4  ;;  %v1172_v26 = vor.u32 %v1171_v7, %v1168_v45  ;;  %v19371_v55 = vcombine.low %v19197_v8, %v19207_v18  ;;  %v19375_v7 = vcombine.low %v19221_v63, %v19226_v10 }
 0x145   : > { %10857 = vmatpush2.bf16.msra.mxu1 %v15844_v1  ;;  %10775 = vmatprep.subr.bf16.mxu0 %v15849_v37  ;;  %v19364_v1 = vor.u32 %v1201_v25, %v1198_v43  ;;  %v1211_v37 = vrot.slane %v1209_v39, 6  ;;  %v15864_v43 = vld [vmem:[%s24297_s1 + $0x16e4] ss:$16 sps:$4 sm:$0xff]   ;;  %v1216_v25 = vshrl.u32 %v18927_v42, 16  ;;  %v15859_v39 = vld [vmem:[%s24297_s1 + $0x14e0] ss:$16 sps:$4 sm:$0xff]   ;;  %v19388_v8 = vcombine.high %v1143_v4, %v1163_v60 }
 0x146   : > { %10858 = vmatprep.subr.bf16.mxu1 %v15852_v19  ;;  %24682 = vst [vmem:[#allocation106_spill] sm:$0xff] %v19371_v55  ;;  %24683 = vst [vmem:[#allocation107_spill] sm:$0xff] %v19375_v7  ;;  %v1153_v18 = vsel %vm19171_vm8, %v1144_v53, %v1152_v56  ;;  %v1226_v63 = vshrl.u32 %v18951_v58, 16  ;;  %v1229_v10 = vshll.u32 %v18951_v58, 16  ;;  %v15867_v19 = vld [vmem:[%s24297_s1 + $0x14c4] ss:$16 sps:$4 sm:$0xff]   ;;  %v19417_v53 = vpop.f32.mrf.mxu1 }
 0x147   : > { %24684 = vst [vmem:[#allocation108_spill] sm:$0xff] %v19388_v8  ;;  %v19409_v29 = vsel %vm19171_vm8, %v1194_v47, %v19364_v1  ;;  %v1184_v36 = vrot.slane %v1172_v26, 4  ;;  %v1204_v56 = vrot.slane %v1192_v31, 4  ;;  %v19411_v45 = vor.u32 %v1211_v37, %v1208_v40  ;;  %24686 = vst [vmem:[#allocation110_spill] sm:$0xff] %v19417_v53 }
 0x148   : > { %10776 = vmatpush2.bf16.msra.mxu0 %v15847_v44  ;;  %v1173_v44 = vsel %vm19171_vm8, %v1164_v22, %v1172_v26  ;;  %v1246_v22 = vshrl.u32 %v18998_v41, 16  ;;  %v19424_v26 = vcombine.low %v1143_v4, %v1163_v60  ;;  %v1228_v40 = vrot.slane %v1226_v63, 5 }
 0x149   : > { %10859 = vmatpush2.bf16.msra.mxu1 %v15850_v21  ;;  %10777 = vmatprep.subr.bf16.mxu0 %v15855_v27  ;;  %v19404_v21 = vsel %vm19171_vm8, %v1174_v32, %v1182_v12  ;;  %v1239_v27 = vshll.u32 %v18967_v9, 16  ;;  %v1218_v12 = vrot.slane %v1216_v25, 5  ;;  %v1221_v32 = vrot.slane %v1219_v59, 6  ;;  %v15873_v59 = vld [vmem:[%s24297_s1 + $0x14a4] ss:$16 sps:$4 sm:$0xff]  }
 0x14a   : > { %10860 = vmatprep.subr.bf16.mxu1 %v15858_v30  ;;  %v19415_v30 = vpop.f32.mrf.mxu0  ;;  %24687 = vst [vmem:[#allocation111_spill] sm:$0xff] %v19424_v26  ;;  %v19426_v47 = vcombine.high %v1153_v18, %v1173_v44  ;;  %v1231_v37 = vrot.slane %v1229_v10, 6  ;;  %v19437_v4 = vcombine.high %v19404_v21, %v19409_v29  ;;  %v19441_v60 = vsel %vm19171_vm8, %v1184_v36, %v1192_v31 }
 0x14b   : > { %24685 = vst [vmem:[#allocation109_spill] sm:$0xff] %v19415_v30  ;;  %v1238_v63 = vrot.slane %v1236_v57, 5  ;;  %v1241_v10 = vrot.slane %v1239_v27, 6  ;;  %v1222_v31 = vor.u32 %v1221_v32, %v1218_v12  ;;  %v1256_v36 = vshrl.u32 %v19014_v11, 16 }
 0x14c   : > { %10778 = vmatpush2.bf16.msra.mxu0 %v15853_v2  ;;  %v1249_v2 = vshll.u32 %v18998_v41, 16  ;;  %24688 = vst [vmem:[#allocation112_spill] sm:$0xff] %v19426_v47  ;;  %24690 = vst [vmem:[#allocation114_spill] sm:$0xff] %v19437_v4  ;;  %v1259_v57 = vshll.u32 %v19014_v11, 16  ;;  %v1214_v12 = vrot.slane %v19364_v1, 4  ;;  %v1266_v32 = vshrl.u32 %v19033_v61, 16 }
 0x14d   : > { %10861 = vmatpush2.bf16.msra.mxu1 %v15856_v54  ;;  %10913 = vmatprep.subr.bf16.mxu0 %v15861_v14  ;;  %v15865_v54 = vld [vmem:[%s24297_s1 + $0x14c0] ss:$16 sps:$4 sm:$0xff]   ;;  %v10283_v30 = vpop.f32.mrf.mxu0 }
 0x14e   : > { %10996 = vmatprep.subr.bf16.mxu1 %v15864_v43  ;;  %v10366_v53 = vpop.f32.mrf.mxu1  ;;  %v15868_v14 = vld [vmem:[%s24297_s1 + $0x16c0] ss:$16 sps:$4 sm:$0xff]   ;;  %v19433_v43 = vcombine.low %v1153_v18, %v1173_v44  ;;  %v10284_v25 = vadd.f32 %v10283_v30, %v18971_v51  ;;  %v1213_v18 = vsel %vm19171_vm8, %v1204_v56, %v19411_v45  ;;  %v15876_v51 = vld [vmem:[%s24297_s1 + $0x16a4] ss:$16 sps:$4 sm:$0xff]   ;;  %v19465_v56 = vor.u32 %v1231_v37, %v1228_v40 }
 0x14f   : > { %10780 = vmatmul.mubr.bf16.vlgmr.msra.gmra.mxu0 %v19371_v55  ;;  %v10285_v44 = vpop.f32.mrf.mxu0  ;;  %v15879_v40 = vld [vmem:[%s24297_s1 + $0x1484] ss:$16 sps:$4 sm:$0xff]   ;;  %v19480_v37 = vor.u32 %v1241_v10, %v1238_v63 }
 0x150   : > { %10863 = vmatmul.mubr.bf16.vlgmr.msra.gmra.mxu1 %v19375_v7  ;;  %24689 = vst [vmem:[#allocation113_spill] sm:$0xff] %v19433_v43  ;;  %10914 = vmatpush1.bf16.msra.mxu0 %v15859_v39  ;;  %v10368_v7 = vpop.f32.mrf.mxu1  ;;  %v1248_v39 = vrot.slane %v1246_v22, 5  ;;  %v19454_v30 = vadd.f32 %v10366_v53, %v10284_v25  ;;  %v10286_v55 = vadd.f32 %v10285_v44, %v19001_v46  ;;  %v1269_v22 = vshll.u32 %v19033_v61, 16 }
 0x151   : > { %10997 = vmatpush1.bf16.msra.mxu1 %v15862_v20  ;;  %10915 = vmatprep.subr.bf16.mxu0 %v15867_v19  ;;  %v1251_v20 = vrot.slane %v1249_v2, 6  ;;  %v15871_v19 = vld [vmem:[%s24297_s1 + $0x14a0] ss:$16 sps:$4 sm:$0xff]   ;;  %v10287_v27 = vpop.f32.mrf.mxu0  ;;  %v19469_v46 = vcombine.high %v19441_v60, %v1213_v18  ;;  %v1224_v44 = vrot.slane %v19411_v45, 4  ;;  %v1244_v10 = vrot.slane %v19465_v56, 4 }
 0x152   : > { %10998 = vmatprep.subr.bf16.mxu1 %v15870_v62  ;;  %10789 = vmatprep.mubr.bf16.mxu0 %v19388_v8  ;;  %v15874_v62 = vld [vmem:[%s24297_s1 + $0x16a0] ss:$16 sps:$4 sm:$0xff]   ;;  %v10370_v53 = vpop.f32.mrf.mxu1  ;;  %v19474_v2 = vadd.f32 %v10368_v7, %v10286_v55  ;;  %v10288_v25 = vadd.f32 %v10287_v27, %v19017_v3  ;;  %v15882_v3 = vld [vmem:[%s24297_s1 + $0x1684] ss:$16 sps:$4 sm:$0xff]   ;;  %v1234_v55 = vrot.slane %v1222_v31, 4 }
 0x153   : > { %10872 = vmatprep.mubr.bf16.mxu1 %v19426_v47  ;;  %24691 = vst [vmem:[#allocation115_spill] sm:$0xff] %v19469_v46  ;;  %v19483_v47 = vpop.f32.mrf.mxu0  ;;  %v19490_v7 = vor.u32 %v1251_v20, %v1248_v39  ;;  %v15877_v45 = vld [vmem:[%s24297_s1 + $0x1480] ss:$16 sps:$4 sm:$0xff]   ;;  %v1268_v39 = vrot.slane %v1266_v32, 5  ;;  %v1271_v20 = vrot.slane %v1269_v22, 6 }
 0x154   : > { %10916 = vmatpush1.bf16.msra.mxu0 %v15865_v54  ;;  %24692 = vst [vmem:[#allocation116_spill] sm:$0xff] %v19483_v47  ;;  %v19485_v1 = vpop.f32.mrf.mxu1  ;;  %v1258_v54 = vrot.slane %v1256_v36, 5  ;;  %v19493_v63 = vadd.f32 %v10370_v53, %v10288_v25  ;;  %v1286_v36 = vshrl.u32 %v19065_v17, 16  ;;  %v1289_v53 = vshll.u32 %v19065_v17, 16 }
 0x155   : > { %10999 = vmatpush1.bf16.msra.mxu1 %v15868_v14  ;;  %24693 = vst [vmem:[#allocation117_spill] sm:$0xff] %v19485_v1  ;;  %10917 = vmatprep.subr.bf16.mxu0 %v15873_v59  ;;  %v1276_v14 = vshrl.u32 %v19053_v5, 16  ;;  %v1261_v59 = vrot.slane %v1259_v57, 6  ;;  %v10293_v27 = vpop.f32.mrf.mxu0  ;;  %v15880_v57 = vld [vmem:[%s24297_s1 + $0x1680] ss:$16 sps:$4 sm:$0xff]   ;;  %v19510_v47 = vcombine.low %v19404_v21, %v19409_v29  ;;  %v1243_v21 = vsel %vm19171_vm8, %v1234_v55, %v19480_v37 }
 0x156   : > { %11000 = vmatprep.subr.bf16.mxu1 %v15876_v51  ;;  %v1279_v51 = vshll.u32 %v19053_v5, 16  ;;  %v10376_v1 = vpop.f32.mrf.mxu1  ;;  %v10294_v25 = vadd.f32 %v10293_v27, %v19063_v34  ;;  %v15885_v34 = vld [vmem:[%s24297_s1 + $0x1464] ss:$16 sps:$4 sm:$0xff]   ;;  %v1233_v29 = vsel %vm19171_vm8, %v1224_v44, %v19465_v56  ;;  %v1253_v55 = vsel %vm19171_vm8, %v1244_v10, %v19490_v7 }
 0x157   : > { %10790 = vmatmul.mubr.bf16.gmra.mxu0 %v19424_v26  ;;  %24694 = vst [vmem:[#allocation118_spill] sm:$0xff] %v19510_v47  ;;  %v10295_v32 = vpop.f32.mrf.mxu0  ;;  %v1272_v26 = vor.u32 %v1271_v20, %v1268_v39  ;;  %v1288_v8 = vrot.slane %v1286_v36, 5  ;;  %v1291_v56 = vrot.slane %v1289_v53, 6  ;;  %v19561_v20 = vcombine.high %v1233_v29, %v1253_v55 }
 0x158   : > { %10873 = vmatmul.mubr.bf16.gmra.mxu1 %v19433_v43  ;;  %10918 = vmatpush1.bf16.msra.mxu0 %v15871_v19  ;;  %v19513_v43 = vcombine.low %v19441_v60, %v1213_v18  ;;  %v10378_v22 = vpop.f32.mrf.mxu1  ;;  %v15888_v19 = vld [vmem:[%s24297_s1 + $0x1664] ss:$16 sps:$4 sm:$0xff]   ;;  %v1278_v60 = vrot.slane %v1276_v14, 5  ;;  %v10296_v18 = vadd.f32 %v10295_v32, %v19086_v50  ;;  %v1281_v27 = vrot.slane %v1279_v51, 6  ;;  %v15889_v32 = vld [vmem:[%s24297_s1 + $0x1440] ss:$16 sps:$4 sm:$0xff]  }
 0x159   : > { %11001 = vmatpush1.bf16.msra.mxu1 %v15874_v62  ;;  %10919 = vmatprep.subr.bf16.mxu0 %v15879_v40  ;;  %v1223_v62 = vsel %vm19171_vm8, %v1214_v12, %v1222_v31  ;;  %v19530_v40 = vadd.f32 %v10376_v1, %v10294_v25  ;;  %v10297_v31 = vpop.f32.mrf.mxu0  ;;  %v15883_v1 = vld [vmem:[%s24297_s1 + $0x1460] ss:$16 sps:$4 sm:$0xff]   ;;  %v1254_v51 = vrot.slane %v19480_v37, 4  ;;  %24699 = vst [vmem:[#allocation123_spill] sm:$0xff] %v19561_v20 }
 0x15a   : > { %24695 = vst [vmem:[#allocation119_spill] sm:$0xff] %v19513_v43  ;;  %11002 = vmatprep.subr.bf16.mxu1 %v15882_v3  ;;  %10799 = vmatprep.mubr.bf16.mxu0 %v19437_v4  ;;  %v1262_v3 = vor.u32 %v1261_v59, %v1258_v54  ;;  %v10380_v12 = vpop.f32.mrf.mxu1  ;;  %v10298_v44 = vadd.f32 %v10297_v31, %v19100_v28  ;;  %v15886_v54 = vld [vmem:[%s24297_s1 + $0x1660] ss:$16 sps:$4 sm:$0xff]   ;;  %v15891_v28 = vld [vmem:[%s24297_s1 + $0x1444] ss:$16 sps:$4 sm:$0xff]   ;;  %v13773_v4 = vld [vmem:[%s17357_s6 + $0x158] sm:$0xff] }
 0x15b   : > { %10882 = vmatprep.mubr.bf16.mxu1 %v19469_v46  ;;  %v19538_v50 = vadd.f32 %v10378_v22, %v10296_v18  ;;  %v19546_v14 = vpop.f32.mrf.mxu0  ;;  %v19556_v59 = vcombine.high %v1223_v62, %v1243_v21  ;;  %v1282_v53 = vor.u32 %v1281_v27, %v1278_v60  ;;  %v1264_v22 = vrot.slane %v19490_v7, 4  ;;  %v15892_v60 = vld [vmem:[%s24297_s1 + $0x1640] ss:$16 sps:$4 sm:$0xff]   ;;  %v15897_v7 = vld [vmem:[%s24297_s1 + $0x1424] ss:$16 sps:$4 sm:$0xff]  }
 0x15c   : > { %10920 = vmatpush1.bf16.msra.mxu0 %v15877_v45  ;;  %24696 = vst [vmem:[#allocation120_spill] sm:$0xff] %v19546_v14  ;;  %v19548_v10 = vpop.f32.mrf.mxu1  ;;  %v15894_v45 = vld [vmem:[%s24297_s1 + $0x1644] ss:$16 sps:$4 sm:$0xff]   ;;  %v19559_v39 = vadd.f32 %v10380_v12, %v10298_v44  ;;  %v1274_v36 = vrot.slane %v1262_v3, 4  ;;  %v1292_v37 = vor.u32 %v1291_v56, %v1288_v8  ;;  %v19573_v31 = vcombine.low %v1223_v62, %v1243_v21 }
 0x15d   : > { %11003 = vmatpush1.bf16.msra.mxu1 %v15880_v57  ;;  %24697 = vst [vmem:[#allocation121_spill] sm:$0xff] %v19548_v10  ;;  %10921 = vmatprep.subr.bf16.mxu0 %v15885_v34  ;;  %24698 = vst [vmem:[#allocation122_spill] sm:$0xff] %v19556_v59  ;;  %v10303_v25 = vpop.f32.mrf.mxu0  ;;  %v1284_v34 = vrot.slane %v1272_v26, 4  ;;  %v19581_v8 = vcombine.low %v1233_v29, %v1253_v55  ;;  %v1263_v12 = vsel %vm19171_vm8, %v1254_v51, %v1262_v3  ;;  %v15895_v51 = vld [vmem:[%s24297_s1 + $0x1420] ss:$16 sps:$4 sm:$0xff]  }
 0x15e   : > { %11004 = vmatprep.subr.bf16.mxu1 %v15888_v19  ;;  %v10386_v57 = vpop.f32.mrf.mxu1  ;;  %v10304_v19 = vadd.f32 %v10303_v25, %v19134_v23  ;;  %24700 = vst [vmem:[#allocation124_spill] sm:$0xff] %v19573_v31  ;;  %v15900_v23 = vld [vmem:[%s24297_s1 + $0x1624] ss:$16 sps:$4 sm:$0xff]   ;;  %v1283_v62 = vsel %vm19171_vm8, %v1274_v36, %v1282_v53  ;;  %v1273_v29 = vsel %vm19171_vm8, %v1264_v22, %v1272_v26  ;;  %v1339_v3 = vrot.slane %v18648_v15, 6  ;;  %v15898_v26 = vld [vmem:[%s24297_s1 + $0x1620] ss:$16 sps:$4 sm:$0xff]  }
 0x15f   : > { %10800 = vmatmul.mubr.bf16.gmra.mxu0 %v19510_v47  ;;  %v10305_v18 = vpop.f32.mrf.mxu0  ;;  %24701 = vst [vmem:[#allocation125_spill] sm:$0xff] %v19581_v8  ;;  %v1293_v55 = vsel %vm19171_vm8, %v1284_v34, %v1292_v37  ;;  %v15903_v15 = vld [vmem:[%s24297_s1 + $0x1404] ss:$16 sps:$4 sm:$0xff]   ;;  %v19617_v53 = vcombine.high %v1263_v12, %v1283_v62  ;;  %v24422_v34 = vrot.slane %v18665_v6, 6 }
 0x160   : > { %10883 = vmatmul.mubr.bf16.gmra.mxu1 %v19513_v43  ;;  %10922 = vmatpush1.bf16.msra.mxu0 %v15883_v1  ;;  %v10388_v27 = vpop.f32.mrf.mxu1  ;;  %v10306_v56 = vadd.f32 %v10305_v18, %v19150_v33  ;;  %v19586_v44 = vadd.f32 %v10386_v57, %v10304_v19  ;;  %v24702_v33 = vld [vmem:[#allocation63_spill] sm:$0xff]  ;;  %v19621_v57 = vcombine.high %v1273_v29, %v1293_v55  ;;  %v24708_v18 = vld [vmem:[#allocation65_spill] sm:$0xff] }
 0x161   : > { %11005 = vmatpush1.bf16.msra.mxu1 %v15886_v54  ;;  %10923 = vmatprep.subr.bf16.mxu0 %v15891_v28  ;;  %v10307_v21 = vpop.f32.mrf.mxu0  ;;  %v1343_v54 = vrot.slane %v24702_v33, 6  ;;  %24705 = vst [vmem:[#allocation127_spill] sm:$0xff] %v19617_v53  ;;  %v15904_v33 = vld [vmem:[%s24297_s1 + $0x1600] ss:$16 sps:$4 sm:$0xff]  }
 0x162   : > { %11006 = vmatprep.subr.bf16.mxu1 %v15894_v45  ;;  %10809 = vmatprep.mubr.bf16.mxu0 %v19556_v59  ;;  %v10390_v1 = vpop.f32.mrf.mxu1  ;;  %v10308_v28 = vadd.f32 %v10307_v21, %v19167_v16  ;;  %v19599_v45 = vadd.f32 %v10388_v27, %v10306_v56  ;;  %v15906_v16 = vld [vmem:[%s24297_s1 + $0x1604] ss:$16 sps:$4 sm:$0xff]   ;;  %24706 = vst [vmem:[#allocation128_spill] sm:$0xff] %v19621_v57  ;;  %v13737_v27 = vrot.slane %v24708_v18, 10 }
 0x163   : > { %10892 = vmatprep.mubr.bf16.mxu1 %v19561_v20  ;;  %v19607_v52 = vpop.f32.mrf.mxu0  ;;  %v13770_v20 = vld [vmem:[%s17357_s6 + $0x140] sm:$0xff] }
 0x164   : > { %10924 = vmatpush1.bf16.msra.mxu0 %v15889_v32  ;;  %24703 = vst [vmem:[#allocation63_spill] sm:$0xff] %v19607_v52  ;;  %v19609_v36 = vpop.f32.mrf.mxu1  ;;  %v19619_v25 = vadd.f32 %v10390_v1, %v10308_v28  ;;  %v24707_v32 = vld [vmem:[#allocation64_spill] sm:$0xff]  ;;  %v15901_v1 = vld [vmem:[%s24297_s1 + $0x1400] ss:$16 sps:$4 sm:$0xff]  }
 0x165   : > { %11007 = vmatpush1.bf16.msra.mxu1 %v15892_v60  ;;  %24704 = vst [vmem:[#allocation126_spill] sm:$0xff] %v19609_v36  ;;  %10925 = vmatprep.subr.bf16.mxu0 %v15897_v7  ;;  %v13736_v22 = vrot.slane %v24707_v32, 10  ;;  %v1345_v60 = vrot.slane %v1339_v3, 4  ;;  %v1348_v7 = vrot.slane %v1343_v54, 4  ;;  %v16087_v28 = vld [vmem:[%s24297_s1 + $0x1c20] ss:$16 sps:$4 sm:$0xff]  }
 0x166   : > { %11008 = vmatprep.subr.bf16.mxu1 %v15900_v23  ;;  %v10313_v37 = vpop.f32.mrf.mxu0  ;;  %v10396_v19 = vpop.f32.mrf.mxu1  ;;  %v24709_v23 = vld [vmem:[#allocation66_spill] sm:$0xff] }
 0x167   : > { %10810 = vmatmul.mubr.bf16.gmra.mxu0 %v19573_v31  ;;  %v10314_v21 = vadd.f32 %v10313_v37, %v19202_v13  ;;  %v19642_v13 = vcombine.low %v1263_v12, %v1283_v62  ;;  %v19665_v36 = vsel %vm19638_vm11, %v1345_v60, %v24422_v34  ;;  %v15919_v34 = vld [vmem:[%s24297_s1 + $0x15a0] ss:$16 sps:$4 sm:$0xff]  }
 0x168   : > { %10893 = vmatmul.mubr.bf16.gmra.mxu1 %v19581_v8  ;;  %10926 = vmatpush1.bf16.msra.mxu0 %v15895_v51  ;;  %v10315_v32 = vpop.f32.mrf.mxu0  ;;  %v10398_v18 = vpop.f32.mrf.mxu1  ;;  %v15909_v51 = vld [vmem:[%s24297_s1 + $0x15e4] ss:$16 sps:$4 sm:$0xff]  }
 0x169   : > { %11009 = vmatpush1.bf16.msra.mxu1 %v15898_v26  ;;  %10927 = vmatprep.subr.bf16.mxu0 %v15903_v15  ;;  %24712 = vst [vmem:[#allocation64_spill] sm:$0xff] %v19642_v13  ;;  %v15912_v26 = vld [vmem:[%s24297_s1 + $0x17e4] ss:$16 sps:$4 sm:$0xff]   ;;  %v10316_v37 = vadd.f32 %v10315_v32, %v19232_v48  ;;  %v19651_v56 = vadd.f32 %v10396_v19, %v10314_v21  ;;  %v24714_v19 = vrot.slane %v24709_v23, 6 }
 0x16a   : > { %11010 = vmatprep.subr.bf16.mxu1 %v15906_v16  ;;  %10819 = vmatprep.mubr.bf16.mxu0 %v19617_v53  ;;  %v19655_v15 = vcombine.low %v1273_v29, %v1293_v55  ;;  %v10317_v12 = vpop.f32.mrf.mxu0  ;;  %v10400_v62 = vpop.f32.mrf.mxu1  ;;  %v19659_v16 = vsel %vm19638_vm11, %v13736_v22, %v1339_v3  ;;  %v19669_v48 = vsel %vm19638_vm11, %v13737_v27, %v1343_v54  ;;  %v15907_v22 = vld [vmem:[%s24297_s1 + $0x15e0] ss:$16 sps:$4 sm:$0xff]   ;;  %v13749_v53 = vld [vmem:[%s17357_s6 + $0x98] sm:$0xff] }
 0x16b   : > { %10902 = vmatprep.mubr.bf16.mxu1 %v19621_v57  ;;  %v19675_v29 = vsel %vm19638_vm11, %v1348_v7, %v24714_v19  ;;  %v10318_v55 = vadd.f32 %v10317_v12, %v19241_v35  ;;  %v19678_v3 = vadd.f32 %v10398_v18, %v10316_v37  ;;  %v15910_v54 = vld [vmem:[%s24297_s1 + $0x17e0] ss:$16 sps:$4 sm:$0xff]   ;;  %v15915_v35 = vld [vmem:[%s24297_s1 + $0x15c4] ss:$16 sps:$4 sm:$0xff]  }
 0x16c   : > { %24713 = vst [vmem:[#allocation65_spill] sm:$0xff] %v19655_v15  ;;  %10928 = vmatpush1.bf16.msra.mxu0 %v15901_v1  ;;  %v19686_v60 = vpop.f32.mrf.mxu0  ;;  %v19688_v27 = vpop.f32.mrf.mxu1  ;;  %v15918_v7 = vld [vmem:[%s24297_s1 + $0x17c4] ss:$16 sps:$4 sm:$0xff]   ;;  %v19700_v1 = vcombine.high %v19659_v16, %v19665_v36  ;;  %v15916_v37 = vld [vmem:[%s24297_s1 + $0x17c0] ss:$16 sps:$4 sm:$0xff]  }
 0x16d   : > { %11011 = vmatpush1.bf16.msra.mxu1 %v15904_v33  ;;  %24715 = vst [vmem:[#allocation66_spill] sm:$0xff] %v19686_v60  ;;  %24716 = vst [vmem:[#allocation129_spill] sm:$0xff] %v19688_v27  ;;  %10929 = vmatprep.subr.bf16.mxu0 %v15909_v51  ;;  %v19696_v21 = vadd.f32 %v10400_v62, %v10318_v55  ;;  %v19704_v33 = vcombine.high %v19669_v48, %v19675_v29  ;;  %v15921_v19 = vld [vmem:[%s24297_s1 + $0x15a4] ss:$16 sps:$4 sm:$0xff]   ;;  %v24723_v27 = vrot.slane %v24709_v23, 6 }
 0x16e   : > { %11012 = vmatprep.subr.bf16.mxu1 %v15912_v26  ;;  %24717 = vst [vmem:[#allocation130_spill] sm:$0xff] %v19700_v1  ;;  %v10323_v32 = vpop.f32.mrf.mxu0  ;;  %v15913_v26 = vld [vmem:[%s24297_s1 + $0x15c0] ss:$16 sps:$4 sm:$0xff]   ;;  %v15960_v23 = vld [vmem:[%s24297_s1 + $0x1ae4] ss:$16 sps:$4 sm:$0xff]  }
 0x16f   : > { %24718 = vst [vmem:[#allocation131_spill] sm:$0xff] %v19704_v33  ;;  %10820 = vmatmul.mubr.bf16.gmra.mxu0 %v19642_v13  ;;  %v10406_v18 = vpop.f32.mrf.mxu1  ;;  %v10324_v51 = vadd.f32 %v10323_v32, %v19270_v24  ;;  %v15924_v24 = vld [vmem:[%s24297_s1 + $0x17a4] ss:$16 sps:$4 sm:$0xff]   ;;  %v1354_v60 = vrot.slane %v24723_v27, 4  ;;  %v19813_v27 = vcombine.low %v19659_v16, %v19665_v36  ;;  %v24727_v16 = vld [vmem:[#allocation74_spill] sm:$0xff] }
 0x170   : > { %10903 = vmatmul.mubr.bf16.gmra.mxu1 %v19655_v15  ;;  %10930 = vmatpush2.bf16.msra.mxu0 %v15907_v22  ;;  %v10325_v12 = vpop.f32.mrf.mxu0 }
 0x171   : > { %11013 = vmatpush2.bf16.msra.mxu1 %v15910_v54  ;;  %v10408_v62 = vpop.f32.mrf.mxu1  ;;  %10931 = vmatprep.subr.bf16.mxu0 %v15915_v35  ;;  %v10326_v55 = vadd.f32 %v10325_v12, %v19281_v38  ;;  %v19722_v22 = vadd.f32 %v10406_v18, %v10324_v51  ;;  %v15922_v38 = vld [vmem:[%s24297_s1 + $0x17a0] ss:$16 sps:$4 sm:$0xff]   ;;  %v15927_v18 = vld [vmem:[%s24297_s1 + $0x1584] ss:$16 sps:$4 sm:$0xff]  }
 0x172   : > { %11014 = vmatprep.subr.bf16.mxu1 %v15918_v7  ;;  %10945 = vmatprep.mubr.bf16.mxu0 %v19700_v1  ;;  %v10327_v54 = vpop.f32.mrf.mxu0  ;;  %v15933_v12 = vld [vmem:[%s24297_s1 + $0x1564] ss:$16 sps:$4 sm:$0xff]  }
 0x173   : > { %11028 = vmatprep.mubr.bf16.mxu1 %v19704_v33  ;;  %v10410_v32 = vpop.f32.mrf.mxu1  ;;  %v10328_v35 = vadd.f32 %v10327_v54, %v19294_v49  ;;  %v19727_v7 = vadd.f32 %v10408_v62, %v10326_v55  ;;  %v15930_v49 = vld [vmem:[%s24297_s1 + $0x1784] ss:$16 sps:$4 sm:$0xff]   ;;  %v15937_v54 = vld [vmem:[%s24297_s1 + $0x1540] ss:$16 sps:$4 sm:$0xff]   ;;  %v1373_v33 = vrot.slane %v18914_v0, 6 }
 0x174   : > { %10932 = vmatpush2.bf16.msra.mxu0 %v15913_v26  ;;  %v15925_v26 = vld [vmem:[%s24297_s1 + $0x1580] ss:$16 sps:$4 sm:$0xff]   ;;  %v15936_v62 = vld [vmem:[%s24297_s1 + $0x1764] ss:$16 sps:$4 sm:$0xff]  }
 0x175   : > { %11015 = vmatpush2.bf16.msra.mxu1 %v15916_v37  ;;  %10933 = vmatprep.subr.bf16.mxu0 %v15921_v19  ;;  %v19741_v51 = vadd.f32 %v10410_v32, %v10328_v35  ;;  %v15928_v37 = vld [vmem:[%s24297_s1 + $0x1780] ss:$16 sps:$4 sm:$0xff]   ;;  %v15942_v55 = vld [vmem:[%s24297_s1 + $0x1744] ss:$16 sps:$4 sm:$0xff]  }
 0x176   : > { %11016 = vmatprep.subr.bf16.mxu1 %v15924_v24  ;;  %v15934_v19 = vld [vmem:[%s24297_s1 + $0x1760] ss:$16 sps:$4 sm:$0xff]   ;;  %v15939_v24 = vld [vmem:[%s24297_s1 + $0x1544] ss:$16 sps:$4 sm:$0xff]  }
 0x177   : > { %v15940_v32 = vld [vmem:[%s24297_s1 + $0x1740] ss:$16 sps:$4 sm:$0xff]   ;;  %v15945_v35 = vld [vmem:[%s24297_s1 + $0x1524] ss:$16 sps:$4 sm:$0xff]  }
 0x178   : > { %10934 = vmatpush2.bf16.msra.mxu0 %v15919_v34  ;;  %v15931_v34 = vld [vmem:[%s24297_s1 + $0x1560] ss:$16 sps:$4 sm:$0xff]   ;;  %v15972_v0 = vld [vmem:[%s24297_s1 + $0x1aa4] ss:$16 sps:$4 sm:$0xff]  }
 0x179   : > { %11017 = vmatpush2.bf16.msra.mxu1 %v15922_v38  ;;  %10935 = vmatprep.subr.bf16.mxu0 %v15927_v18  ;;  %v15948_v38 = vld [vmem:[%s24297_s1 + $0x1724] ss:$16 sps:$4 sm:$0xff]  }
 0x17a   : > { %11018 = vmatprep.subr.bf16.mxu1 %v15930_v49  ;;  %v24719_v18 = vld [vmem:[#allocation69_spill] sm:$0xff] }
 0x17b   : > { %v1352_v49 = vrot.slane %v24719_v18, 6  ;;  %24725 = vst [vmem:[#allocation69_spill] sm:$0xff] %v19813_v27 }
 0x17c   : > { %10936 = vmatpush2.bf16.msra.mxu0 %v15925_v26  ;;  %v24720_v26 = vld [vmem:[#allocation70_spill] sm:$0xff] }
 0x17d   : > { %11019 = vmatpush2.bf16.msra.mxu1 %v15928_v37  ;;  %10937 = vmatprep.subr.bf16.mxu0 %v15933_v12  ;;  %v1355_v37 = vrot.slane %v24720_v26, 6  ;;  %v15943_v12 = vld [vmem:[%s24297_s1 + $0x1520] ss:$16 sps:$4 sm:$0xff]  }
 0x17e   : > { %11020 = vmatprep.subr.bf16.mxu1 %v15936_v62  ;;  %v15946_v62 = vld [vmem:[%s24297_s1 + $0x1720] ss:$16 sps:$4 sm:$0xff]  }
 0x17f   : > { %v15949_v26 = vld [vmem:[%s24297_s1 + $0x1500] ss:$16 sps:$4 sm:$0xff]   ;;  %v1360_v52 = vrot.slane %v1355_v37, 4 }
 0x180   : > { %10938 = vmatpush2.bf16.msra.mxu0 %v15931_v34  ;;  %v15951_v34 = vld [vmem:[%s24297_s1 + $0x1504] ss:$16 sps:$4 sm:$0xff]  }
 0x181   : > { %11021 = vmatpush2.bf16.msra.mxu1 %v15934_v19  ;;  %10939 = vmatprep.subr.bf16.mxu0 %v15939_v24  ;;  %v15954_v19 = vld [vmem:[%s24297_s1 + $0x1704] ss:$16 sps:$4 sm:$0xff]   ;;  %v24721_v24 = vrot.slane %v18665_v6, 6  ;;  %v15952_v6 = vld [vmem:[%s24297_s1 + $0x1700] ss:$16 sps:$4 sm:$0xff]  }
 0x182   : > { %11022 = vmatprep.subr.bf16.mxu1 %v15942_v55 }
 0x183   : > { %v1351_v55 = vrot.slane %v24721_v24, 4  ;;  %v15957_v24 = vld [vmem:[%s24297_s1 + $0x18e4] ss:$16 sps:$4 sm:$0xff]  }
 0x184   : > { %10940 = vmatpush2.bf16.msra.mxu0 %v15937_v54  ;;  %v1357_v54 = vrot.slane %v1352_v49, 4 }
 0x185   : > { %11023 = vmatpush2.bf16.msra.mxu1 %v15940_v32  ;;  %10941 = vmatprep.subr.bf16.mxu0 %v15945_v35  ;;  %v24722_v32 = vld [vmem:[#allocation72_spill] sm:$0xff]  ;;  %v24724_v35 = vld [vmem:[#allocation73_spill] sm:$0xff] }
 0x186   : > { %11024 = vmatprep.subr.bf16.mxu1 %v15948_v38  ;;  %v1358_v18 = vrot.slane %v24722_v32, 6  ;;  %v1361_v38 = vrot.slane %v24724_v35, 6  ;;  %v1364_v35 = vrot.slane %v24727_v16, 6 }
 0x188   : > { %10942 = vmatpush2.bf16.msra.mxu0 %v15943_v12  ;;  %v19817_v12 = vcombine.low %v19669_v48, %v19675_v29  ;;  %v1359_v32 = vsel %vm19638_vm11, %v1357_v54, %v1358_v18  ;;  %v1362_v36 = vsel %vm19638_vm11, %v1360_v52, %v1361_v38  ;;  %v24728_v48 = vld [vmem:[#allocation75_spill] sm:$0xff]  ;;  %v19838_v54 = vpop.f32.mrf.mxu0  ;;  %v1363_v16 = vrot.slane %v1358_v18, 4 }
 0x189   : > { %11025 = vmatpush2.bf16.msra.mxu1 %v15946_v62  ;;  %10943 = vmatprep.subr.bf16.mxu0 %v15951_v34  ;;  %v1353_v62 = vsel %vm19638_vm11, %v1351_v55, %v1352_v49  ;;  %v15955_v34 = vld [vmem:[%s24297_s1 + $0x18e0] ss:$16 sps:$4 sm:$0xff]   ;;  %v1367_v29 = vrot.slane %v24728_v48, 6  ;;  %v15963_v55 = vld [vmem:[%s24297_s1 + $0x18c4] ss:$16 sps:$4 sm:$0xff]   ;;  %24729 = vst [vmem:[#allocation72_spill] sm:$0xff] %v19838_v54 }
 0x18a   : > { %11026 = vmatprep.subr.bf16.mxu1 %v15954_v19  ;;  %24726 = vst [vmem:[#allocation70_spill] sm:$0xff] %v19817_v12  ;;  %v1356_v19 = vsel %vm19638_vm11, %v1354_v60, %v1355_v37  ;;  %v15958_v49 = vld [vmem:[%s24297_s1 + $0x1ae0] ss:$16 sps:$4 sm:$0xff]   ;;  %v19840_v60 = vpop.f32.mrf.mxu1  ;;  %v15966_v52 = vld [vmem:[%s24297_s1 + $0x1ac4] ss:$16 sps:$4 sm:$0xff]   ;;  %v24733_v48 = vld [vmem:[#allocation78_spill] sm:$0xff] }
 0x18b   : > { %24730 = vst [vmem:[#allocation73_spill] sm:$0xff] %v19840_v60  ;;  %v15961_v37 = vld [vmem:[%s24297_s1 + $0x18c0] ss:$16 sps:$4 sm:$0xff]   ;;  %v1370_v10 = vrot.slane %v24733_v48, 6  ;;  %v1372_v60 = vrot.slane %v1367_v29, 4 }
 0x18c   : > { %10944 = vmatpush2.bf16.msra.mxu0 %v15949_v26  ;;  %v19848_v26 = vcombine.high %v1353_v62, %v1359_v32  ;;  %v15964_v18 = vld [vmem:[%s24297_s1 + $0x1ac0] ss:$16 sps:$4 sm:$0xff]   ;;  %v15969_v48 = vld [vmem:[%s24297_s1 + $0x18a4] ss:$16 sps:$4 sm:$0xff]  }
 0x18d   : > { %11027 = vmatpush2.bf16.msra.mxu1 %v15952_v6  ;;  %11079 = vmatprep.subr.bf16.mxu0 %v15957_v24  ;;  %v19850_v6 = vcombine.high %v1356_v19, %v1362_v36  ;;  %v1369_v24 = vrot.slane %v1364_v35, 4 }
 0x18e   : > { %11162 = vmatprep.subr.bf16.mxu1 %v15960_v23  ;;  %24731 = vst [vmem:[#allocation74_spill] sm:$0xff] %v19848_v26  ;;  %v1366_v23 = vrot.slane %v1361_v38, 4  ;;  %v19863_v38 = vcombine.low %v1353_v62, %v1359_v32  ;;  %v1376_v62 = vrot.slane %v18927_v42, 6 }
 0x18f   : > { %24732 = vst [vmem:[#allocation75_spill] sm:$0xff] %v19850_v6  ;;  %v10449_v54 = vpop.f32.mrf.mxu0  ;;  %10946 = vmatmul.mubr.bf16.vlgmr.msra.gmra.mxu0 %v19813_v27 }
 0x190   : > { %v10532_v14 = vpop.f32.mrf.mxu1  ;;  %11029 = vmatmul.mubr.bf16.vlgmr.msra.gmra.mxu1 %v19817_v12  ;;  %v10450_v1 = vadd.f32 %v10449_v54, %v19454_v30  ;;  %11080 = vmatpush1.bf16.msra.mxu0 %v15955_v34  ;;  %24734 = vst [vmem:[#allocation78_spill] sm:$0xff] %v19863_v38  ;;  %v19868_v30 = vcombine.low %v1356_v19, %v1362_v36  ;;  %v15967_v19 = vld [vmem:[%s24297_s1 + $0x18a0] ss:$16 sps:$4 sm:$0xff]  }
 0x191   : > { %11163 = vmatpush1.bf16.msra.mxu1 %v15958_v49  ;;  %v10451_v27 = vpop.f32.mrf.mxu0  ;;  %11081 = vmatprep.subr.bf16.mxu0 %v15963_v55  ;;  %v1365_v55 = vsel %vm19638_vm11, %v1363_v16, %v1364_v35  ;;  %v15970_v35 = vld [vmem:[%s24297_s1 + $0x1aa0] ss:$16 sps:$4 sm:$0xff]  }
 0x192   : > { %v10534_v15 = vpop.f32.mrf.mxu1  ;;  %11164 = vmatprep.subr.bf16.mxu1 %v15966_v52  ;;  %24735 = vst [vmem:[#allocation132_spill] sm:$0xff] %v19868_v30  ;;  %v19870_v34 = vadd.f32 %v10532_v14, %v10450_v1  ;;  %v10452_v49 = vadd.f32 %v10451_v27, %v19474_v2  ;;  %10955 = vmatprep.mubr.bf16.mxu0 %v19848_v26  ;;  %v1379_v27 = vrot.slane %v18951_v58, 6  ;;  %v15975_v52 = vld [vmem:[%s24297_s1 + $0x1884] ss:$16 sps:$4 sm:$0xff]  }
 0x193   : > { %11038 = vmatprep.mubr.bf16.mxu1 %v19850_v6  ;;  %v10453_v32 = vpop.f32.mrf.mxu0  ;;  %v1371_v14 = vsel %vm19638_vm11, %v1369_v24, %v1370_v10  ;;  %v1368_v2 = vsel %vm19638_vm11, %v1366_v23, %v1367_v29  ;;  %v1374_v1 = vsel %vm19638_vm11, %v1372_v60, %v1373_v33  ;;  %v15978_v58 = vld [vmem:[%s24297_s1 + $0x1a84] ss:$16 sps:$4 sm:$0xff]   ;;  %v15973_v60 = vld [vmem:[%s24297_s1 + $0x1880] ss:$16 sps:$4 sm:$0xff]  }
 0x194   : > { %v10536_v54 = vpop.f32.mrf.mxu1  ;;  %v19888_v36 = vadd.f32 %v10534_v15, %v10452_v49  ;;  %v10454_v42 = vadd.f32 %v10453_v32, %v19493_v63  ;;  %11082 = vmatpush1.bf16.msra.mxu0 %v15961_v37  ;;  %v1375_v63 = vrot.slane %v1370_v10, 4  ;;  %v15976_v37 = vld [vmem:[%s24297_s1 + $0x1a80] ss:$16 sps:$4 sm:$0xff]   ;;  %v19912_v24 = vcombine.high %v1365_v55, %v1371_v14 }
 0x195   : > { %11165 = vmatpush1.bf16.msra.mxu1 %v15964_v18  ;;  %v19897_v29 = vpop.f32.mrf.mxu0  ;;  %11083 = vmatprep.subr.bf16.mxu0 %v15969_v48  ;;  %v19914_v23 = vcombine.high %v1368_v2, %v1374_v1  ;;  %v1381_v18 = vrot.slane %v1376_v62, 4  ;;  %v1382_v10 = vrot.slane %v18967_v9, 6  ;;  %v1378_v49 = vrot.slane %v1373_v33, 4  ;;  %v15984_v9 = vld [vmem:[%s24297_s1 + $0x1a64] ss:$16 sps:$4 sm:$0xff]  }
 0x196   : > { %24736 = vst [vmem:[#allocation133_spill] sm:$0xff] %v19897_v29  ;;  %v19899_v16 = vpop.f32.mrf.mxu1  ;;  %11166 = vmatprep.subr.bf16.mxu1 %v15972_v0  ;;  %v19904_v15 = vadd.f32 %v10536_v54, %v10454_v42  ;;  %24738 = vst [vmem:[#allocation135_spill] sm:$0xff] %v19912_v24  ;;  %v1384_v32 = vrot.slane %v1379_v27, 4  ;;  %v1385_v54 = vrot.slane %v18998_v41, 6  ;;  %v1377_v41 = vsel %vm19638_vm11, %v1375_v63, %v1376_v62  ;;  %v15982_v62 = vld [vmem:[%s24297_s1 + $0x1a60] ss:$16 sps:$4 sm:$0xff]  }
 0x197   : > { %24737 = vst [vmem:[#allocation134_spill] sm:$0xff] %v19899_v16  ;;  %24739 = vst [vmem:[#allocation136_spill] sm:$0xff] %v19914_v23  ;;  %v10459_v48 = vpop.f32.mrf.mxu0  ;;  %10956 = vmatmul.mubr.bf16.gmra.mxu0 %v19863_v38  ;;  %v15981_v16 = vld [vmem:[%s24297_s1 + $0x1864] ss:$16 sps:$4 sm:$0xff]   ;;  %v1391_v33 = vrot.slane %v19033_v61, 6  ;;  %v1387_v63 = vrot.slane %v1382_v10, 4 }
 0x198   : > { %v10542_v0 = vpop.f32.mrf.mxu1  ;;  %11039 = vmatmul.mubr.bf16.gmra.mxu1 %v19868_v30  ;;  %v10460_v42 = vadd.f32 %v10459_v48, %v19530_v40  ;;  %11084 = vmatpush1.bf16.msra.mxu0 %v15967_v19  ;;  %v19924_v30 = vcombine.low %v1365_v55, %v1371_v14  ;;  %v1388_v40 = vrot.slane %v19014_v11, 6  ;;  %v15979_v55 = vld [vmem:[%s24297_s1 + $0x1860] ss:$16 sps:$4 sm:$0xff]   ;;  %v19944_v11 = vcombine.low %v1368_v2, %v1374_v1  ;;  %v13743_v48 = vld [vmem:[%s17357_s6 + $0x68] sm:$0xff] }
 0x199   : > { %11167 = vmatpush1.bf16.msra.mxu1 %v15970_v35  ;;  %v10461_v29 = vpop.f32.mrf.mxu0  ;;  %11085 = vmatprep.subr.bf16.mxu0 %v15975_v52  ;;  %v13742_v61 = vld [vmem:[%s17357_s6 + $0x60] sm:$0xff]  ;;  %v1380_v2 = vsel %vm19638_vm11, %v1378_v49, %v1379_v27  ;;  %v1386_v1 = vsel %vm19638_vm11, %v1384_v32, %v1385_v54  ;;  %v13745_v27 = vld [vmem:[%s17357_s6 + $0x78] sm:$0xff] }
 0x19a   : > { %v10544_v38 = vpop.f32.mrf.mxu1  ;;  %11168 = vmatprep.subr.bf16.mxu1 %v15978_v58  ;;  %24740 = vst [vmem:[#allocation137_spill] sm:$0xff] %v19924_v30  ;;  %v10462_v19 = vadd.f32 %v10461_v29, %v19538_v50  ;;  %v19934_v35 = vadd.f32 %v10542_v0, %v10460_v42  ;;  %10965 = vmatprep.mubr.bf16.mxu0 %v19912_v24  ;;  %24741 = vst [vmem:[#allocation138_spill] sm:$0xff] %v19944_v11  ;;  %v15987_v52 = vld [vmem:[%s24297_s1 + $0x1844] ss:$16 sps:$4 sm:$0xff]   ;;  %v1390_v24 = vrot.slane %v1385_v54, 4 }
 0x19b   : > { %11048 = vmatprep.mubr.bf16.mxu1 %v19914_v23  ;;  %v10463_v50 = vpop.f32.mrf.mxu0  ;;  %v15990_v29 = vld [vmem:[%s24297_s1 + $0x1a44] ss:$16 sps:$4 sm:$0xff]   ;;  %v1383_v58 = vsel %vm19638_vm11, %v1381_v18, %v1382_v10  ;;  %v1394_v18 = vrot.slane %v19053_v5, 6  ;;  %v1393_v32 = vrot.slane %v1388_v40, 4  ;;  %v19995_v26 = vcombine.low %v1380_v2, %v1386_v1 }
 0x19c   : > { %v10546_v14 = vpop.f32.mrf.mxu1  ;;  %v13744_v0 = vld [vmem:[%s17357_s6 + $0x70] sm:$0xff]  ;;  %v10464_v42 = vadd.f32 %v10463_v50, %v19559_v39  ;;  %v19962_v23 = vadd.f32 %v10544_v38, %v10462_v19  ;;  %11086 = vmatpush1.bf16.msra.mxu0 %v15973_v60  ;;  %v13738_v6 = vld [vmem:[%s17357_s6 + $0x40] sm:$0xff]  ;;  %v1396_v39 = vrot.slane %v1391_v33, 4  ;;  %v1397_v38 = vrot.slane %v19065_v17, 6  ;;  %v13739_v19 = vld [vmem:[%s17357_s6 + $0x48] sm:$0xff] }
 0x19d   : > { %11169 = vmatpush1.bf16.msra.mxu1 %v15976_v37  ;;  %v19967_v49 = vpop.f32.mrf.mxu0  ;;  %11087 = vmatprep.subr.bf16.mxu0 %v15981_v16  ;;  %v13746_v50 = vld [vmem:[%s17357_s6 + $0x80] sm:$0xff]  ;;  %v13747_v60 = vld [vmem:[%s17357_s6 + $0x88] sm:$0xff]  ;;  %v19983_v54 = vcombine.low %v1377_v41, %v1383_v58  ;;  %v19987_v17 = vcombine.high %v1380_v2, %v1386_v1  ;;  %24747 = vst [vmem:[#allocation144_spill] sm:$0xff] %v19995_v26 }
 0x19e   : > { %24742 = vst [vmem:[#allocation139_spill] sm:$0xff] %v19967_v49  ;;  %v19969_v10 = vpop.f32.mrf.mxu1  ;;  %11170 = vmatprep.subr.bf16.mxu1 %v15984_v9  ;;  %v19975_v5 = vadd.f32 %v10546_v14, %v10464_v42  ;;  %v15985_v37 = vld [vmem:[%s24297_s1 + $0x1840] ss:$16 sps:$4 sm:$0xff]   ;;  %v19985_v9 = vcombine.high %v1377_v41, %v1383_v58  ;;  %v15993_v42 = vld [vmem:[%s24297_s1 + $0x1824] ss:$16 sps:$4 sm:$0xff]   ;;  %v19997_v12 = vpack.c.bf16 %v13743_v48, %v13742_v61  ;;  %v13741_v41 = vld [vmem:[%s17357_s6 + $0x58] sm:$0xff] }
 0x19f   : > { %24743 = vst [vmem:[#allocation140_spill] sm:$0xff] %v19969_v10  ;;  %v15988_v16 = vld [vmem:[%s24297_s1 + $0x1a40] ss:$16 sps:$4 sm:$0xff]   ;;  %24744 = vst [vmem:[#allocation141_spill] sm:$0xff] %v19983_v54  ;;  %v10469_v49 = vpop.f32.mrf.mxu0  ;;  %10966 = vmatmul.mubr.bf16.gmra.mxu0 %v19924_v30  ;;  %v20001_v13 = vpack.c.bf16 %v13745_v27, %v13744_v0  ;;  %v1389_v30 = vsel %vm19638_vm11, %v1387_v63, %v1388_v40  ;;  %v15996_v61 = vld [vmem:[%s24297_s1 + $0x1a24] ss:$16 sps:$4 sm:$0xff]  }
 0x1a0   : > { %24745 = vst [vmem:[#allocation142_spill] sm:$0xff] %v19985_v9  ;;  %24746 = vst [vmem:[#allocation143_spill] sm:$0xff] %v19987_v17  ;;  %v13740_v10 = vld [vmem:[%s17357_s6 + $0x50] sm:$0xff]  ;;  %v10552_v14 = vpop.f32.mrf.mxu1  ;;  %11049 = vmatmul.mubr.bf16.gmra.mxu1 %v19944_v11  ;;  %v10470_v57 = vadd.f32 %v10469_v49, %v19586_v44  ;;  %11088 = vmatpush1.bf16.msra.mxu0 %v15979_v55  ;;  %v1392_v11 = vsel %vm19638_vm11, %v1390_v24, %v1391_v33  ;;  %v1605_v63 = vrot.slane %v19997_v12, 6 }
 0x1a1   : > { %24748 = vst [vmem:[#allocation145_spill] sm:$0xff] %v19997_v12  ;;  %v13748_v58 = vld [vmem:[%s17357_s6 + $0x90] sm:$0xff]  ;;  %24749 = vst [vmem:[#allocation146_spill] sm:$0xff] %v20001_v13  ;;  %11171 = vmatpush1.bf16.msra.mxu1 %v15982_v62  ;;  %v10471_v8 = vpop.f32.mrf.mxu0  ;;  %11089 = vmatprep.subr.bf16.mxu0 %v15987_v52  ;;  %v1395_v44 = vsel %vm19638_vm11, %v1393_v32, %v1394_v18  ;;  %v1398_v55 = vsel %vm19638_vm11, %v1396_v39, %v1397_v38 }
 0x1a2   : > { %v10554_v2 = vpop.f32.mrf.mxu1  ;;  %11172 = vmatprep.subr.bf16.mxu1 %v15990_v29  ;;  %v20016_v62 = vpack.c.bf16 %v13739_v19, %v13738_v6  ;;  %v10472_v40 = vadd.f32 %v10471_v8, %v19599_v45  ;;  %v20019_v24 = vadd.f32 %v10552_v14, %v10470_v57  ;;  %10975 = vmatprep.mubr.bf16.mxu0 %v19985_v9  ;;  %v15991_v1 = vld [vmem:[%s24297_s1 + $0x1820] ss:$16 sps:$4 sm:$0xff]   ;;  %v1609_v8 = vrot.slane %v20001_v13, 6 }
 0x1a3   : > { %11058 = vmatprep.mubr.bf16.mxu1 %v19987_v17  ;;  %v20023_v33 = vpack.c.bf16 %v13747_v60, %v13746_v50  ;;  %v10473_v52 = vpop.f32.mrf.mxu0  ;;  %v20029_v6 = vpack.c.bf16 %v13741_v41, %v13740_v10  ;;  %v20031_v48 = vpack.c.bf16 %v13749_v53, %v13748_v58  ;;  %v15994_v0 = vld [vmem:[%s24297_s1 + $0x1a20] ss:$16 sps:$4 sm:$0xff]   ;;  %v15999_v53 = vld [vmem:[%s24297_s1 + $0x1804] ss:$16 sps:$4 sm:$0xff]   ;;  %v20050_v49 = vcombine.high %v1389_v30, %v1395_v44  ;;  %v13769_v17 = vld [vmem:[%s17357_s6 + $0x138] sm:$0xff] }
 0x1a4   : > { %24750 = vst [vmem:[#allocation147_spill] sm:$0xff] %v20016_v62  ;;  %v10556_v29 = vpop.f32.mrf.mxu1  ;;  %v10474_v45 = vadd.f32 %v10473_v52, %v19619_v25  ;;  %v20035_v57 = vadd.f32 %v10554_v2, %v10472_v40  ;;  %11090 = vmatpush1.bf16.msra.mxu0 %v15985_v37  ;;  %v16002_v25 = vld [vmem:[%s24297_s1 + $0x1a04] ss:$16 sps:$4 sm:$0xff]   ;;  %v20054_v32 = vcombine.high %v1392_v11, %v1398_v55  ;;  %v13804_v39 = vrot.slane %v20016_v62, 10  ;;  %v15997_v41 = vld [vmem:[%s24297_s1 + $0x1800] ss:$16 sps:$4 sm:$0xff]  }
 0x1a5   : > { %24751 = vst [vmem:[#allocation148_spill] sm:$0xff] %v20029_v6  ;;  %11173 = vmatpush1.bf16.msra.mxu1 %v15988_v16  ;;  %v20040_v18 = vpop.f32.mrf.mxu0  ;;  %11091 = vmatprep.subr.bf16.mxu0 %v15993_v42  ;;  %24754 = vst [vmem:[#allocation151_spill] sm:$0xff] %v20050_v49  ;;  %v24441_v38 = vrot.slane %v20023_v33, 6  ;;  %v1611_v60 = vrot.slane %v1605_v63, 4  ;;  %v13805_v37 = vrot.slane %v20029_v6, 10  ;;  %v1614_v16 = vrot.slane %v1609_v8, 4 }
 0x1a6   : > { %24752 = vst [vmem:[#allocation149_spill] sm:$0xff] %v20040_v18  ;;  %v20042_v27 = vpop.f32.mrf.mxu1  ;;  %11174 = vmatprep.subr.bf16.mxu1 %v15996_v61  ;;  %v20052_v10 = vadd.f32 %v10556_v29, %v10474_v45  ;;  %24755 = vst [vmem:[#allocation152_spill] sm:$0xff] %v20054_v32  ;;  %v24440_v14 = vrot.slane %v20031_v48, 6  ;;  %v16000_v58 = vld [vmem:[%s24297_s1 + $0x1a00] ss:$16 sps:$4 sm:$0xff]   ;;  %v20069_v40 = vcombine.low %v1389_v30, %v1395_v44 }
 0x1a7   : > { %24753 = vst [vmem:[#allocation150_spill] sm:$0xff] %v20042_v27  ;;  %v10479_v19 = vpop.f32.mrf.mxu0  ;;  %10976 = vmatmul.mubr.bf16.gmra.mxu0 %v19983_v54  ;;  %v16008_v52 = vld [vmem:[%s24297_s1 + $0x1be4] ss:$16 sps:$4 sm:$0xff]   ;;  %v20081_v45 = vcombine.low %v1392_v11, %v1398_v55  ;;  %v20099_v11 = vsel %vm19638_vm11, %v13805_v37, %v1609_v8 }
 0x1a8   : > { %v10562_v50 = vpop.f32.mrf.mxu1  ;;  %11059 = vmatmul.mubr.bf16.gmra.mxu1 %v19995_v26  ;;  %v10480_v42 = vadd.f32 %v10479_v19, %v19651_v56  ;;  %11092 = vmatpush1.bf16.msra.mxu0 %v15991_v1  ;;  %24756 = vst [vmem:[#allocation153_spill] sm:$0xff] %v20069_v40  ;;  %v16005_v56 = vld [vmem:[%s24297_s1 + $0x19e4] ss:$16 sps:$4 sm:$0xff]   ;;  %v20105_v55 = vsel %vm19638_vm11, %v1614_v16, %v24440_v14  ;;  %v16033_v14 = vld [vmem:[%s24297_s1 + $0x1940] ss:$16 sps:$4 sm:$0xff]  }
 0x1a9   : > { %11175 = vmatpush1.bf16.msra.mxu1 %v15994_v0  ;;  %v10481_v2 = vpop.f32.mrf.mxu0  ;;  %11093 = vmatprep.subr.bf16.mxu0 %v15999_v53  ;;  %24757 = vst [vmem:[#allocation154_spill] sm:$0xff] %v20081_v45  ;;  %v16003_v0 = vld [vmem:[%s24297_s1 + $0x19e0] ss:$16 sps:$4 sm:$0xff]   ;;  %v20089_v53 = vsel %vm19638_vm11, %v13804_v39, %v1605_v63  ;;  %v20131_v16 = vcombine.high %v20099_v11, %v20105_v55 }
 0x1aa   : > { %v10564_v61 = vpop.f32.mrf.mxu1  ;;  %11176 = vmatprep.subr.bf16.mxu1 %v16002_v25  ;;  %v10482_v29 = vadd.f32 %v10481_v2, %v19678_v3  ;;  %v20078_v1 = vadd.f32 %v10562_v50, %v10480_v42  ;;  %10985 = vmatprep.mubr.bf16.mxu0 %v20050_v49  ;;  %v20095_v3 = vsel %vm19638_vm11, %v1611_v60, %v24441_v38  ;;  %v16006_v39 = vld [vmem:[%s24297_s1 + $0x1be0] ss:$16 sps:$4 sm:$0xff]   ;;  %v16011_v50 = vld [vmem:[%s24297_s1 + $0x19c4] ss:$16 sps:$4 sm:$0xff]  }
 0x1ab   : > { %11068 = vmatprep.mubr.bf16.mxu1 %v20054_v32  ;;  %v10483_v30 = vpop.f32.mrf.mxu0  ;;  %v20127_v37 = vcombine.high %v20089_v53, %v20095_v3  ;;  %24761 = vst [vmem:[#allocation158_spill] sm:$0xff] %v20131_v16  ;;  %v16009_v2 = vld [vmem:[%s24297_s1 + $0x19c0] ss:$16 sps:$4 sm:$0xff]   ;;  %v16041_v38 = vld [vmem:[%s24297_s1 + $0x1924] ss:$16 sps:$4 sm:$0xff]   ;;  %v24764_v32 = vrot.slane %v20023_v33, 6 }
 0x1ac   : > { %v10566_v44 = vpop.f32.mrf.mxu1  ;;  %v10484_v25 = vadd.f32 %v10483_v30, %v19696_v21  ;;  %v20108_v63 = vadd.f32 %v10564_v61, %v10482_v29  ;;  %11094 = vmatpush1.bf16.msra.mxu0 %v15997_v41  ;;  %v16014_v21 = vld [vmem:[%s24297_s1 + $0x1bc4] ss:$16 sps:$4 sm:$0xff]   ;;  %v16012_v61 = vld [vmem:[%s24297_s1 + $0x1bc0] ss:$16 sps:$4 sm:$0xff]  }
 0x1ad   : > { %11177 = vmatpush1.bf16.msra.mxu1 %v16000_v58  ;;  %v20113_v19 = vpop.f32.mrf.mxu0  ;;  %11095 = vmatprep.subr.bf16.mxu0 %v16005_v56  ;;  %24760 = vst [vmem:[#allocation157_spill] sm:$0xff] %v20127_v37  ;;  %v16017_v56 = vld [vmem:[%s24297_s1 + $0x19a4] ss:$16 sps:$4 sm:$0xff]   ;;  %v1617_v49 = vrot.slane %v24764_v32, 4  ;;  %v16045_v32 = vld [vmem:[%s24297_s1 + $0x1900] ss:$16 sps:$4 sm:$0xff]  }
 0x1ae   : > { %24758 = vst [vmem:[#allocation155_spill] sm:$0xff] %v20113_v19  ;;  %v20115_v8 = vpop.f32.mrf.mxu1  ;;  %11178 = vmatprep.subr.bf16.mxu1 %v16008_v52  ;;  %v20123_v60 = vadd.f32 %v10566_v44, %v10484_v25  ;;  %v13757_v19 = vld [vmem:[%s17357_s6 + $0xd8] sm:$0xff]  ;;  %v13762_v27 = vld [vmem:[%s17357_s6 + $0x100] sm:$0xff]  ;;  %v13768_v54 = vld [vmem:[%s17357_s6 + $0x130] sm:$0xff] }
 0x1af   : > { %24759 = vst [vmem:[#allocation156_spill] sm:$0xff] %v20115_v8  ;;  %v10489_v42 = vpop.f32.mrf.mxu0  ;;  %10986 = vmatmul.mubr.bf16.gmra.mxu0 %v20069_v40  ;;  %v13765_v40 = vld [vmem:[%s17357_s6 + $0x118] sm:$0xff]  ;;  %v20274_v59 = vpack.c.bf16 %v13769_v17, %v13768_v54 }
 0x1b0   : > { %v10572_v41 = vpop.f32.mrf.mxu1  ;;  %11069 = vmatmul.mubr.bf16.gmra.mxu1 %v20081_v45  ;;  %v10490_v58 = vadd.f32 %v10489_v42, %v19722_v22  ;;  %11096 = vmatpush2.bf16.msra.mxu0 %v16003_v0  ;;  %v16020_v22 = vld [vmem:[%s24297_s1 + $0x1ba4] ss:$16 sps:$4 sm:$0xff]  }
 0x1b1   : > { %11179 = vmatpush2.bf16.msra.mxu1 %v16006_v39  ;;  %v10491_v52 = vpop.f32.mrf.mxu0  ;;  %11097 = vmatprep.subr.bf16.mxu0 %v16011_v50  ;;  %v16015_v39 = vld [vmem:[%s24297_s1 + $0x19a0] ss:$16 sps:$4 sm:$0xff]   ;;  %v16023_v42 = vld [vmem:[%s24297_s1 + $0x1984] ss:$16 sps:$4 sm:$0xff]   ;;  %24769 = vst [vmem:[#allocation164_spill] sm:$0xff] %v20274_v59 }
 0x1b2   : > { %v10574_v29 = vpop.f32.mrf.mxu1  ;;  %11180 = vmatprep.subr.bf16.mxu1 %v16014_v21  ;;  %v10492_v30 = vadd.f32 %v10491_v52, %v19727_v7  ;;  %v20149_v44 = vadd.f32 %v10572_v41, %v10490_v58  ;;  %11111 = vmatprep.mubr.bf16.mxu0 %v20127_v37  ;;  %v16018_v7 = vld [vmem:[%s24297_s1 + $0x1ba0] ss:$16 sps:$4 sm:$0xff]  }
 0x1b3   : > { %11194 = vmatprep.mubr.bf16.mxu1 %v20131_v16  ;;  %v10493_v0 = vpop.f32.mrf.mxu0  ;;  %v16021_v58 = vld [vmem:[%s24297_s1 + $0x1980] ss:$16 sps:$4 sm:$0xff]   ;;  %v13763_v16 = vld [vmem:[%s17357_s6 + $0x108] sm:$0xff] }
 0x1b4   : > { %v10576_v25 = vpop.f32.mrf.mxu1  ;;  %v10494_v50 = vadd.f32 %v10493_v0, %v19741_v51  ;;  %v20157_v21 = vadd.f32 %v10574_v29, %v10492_v30  ;;  %11098 = vmatpush2.bf16.msra.mxu0 %v16009_v2  ;;  %v16026_v51 = vld [vmem:[%s24297_s1 + $0x1b84] ss:$16 sps:$4 sm:$0xff]   ;;  %v16024_v2 = vld [vmem:[%s24297_s1 + $0x1b80] ss:$16 sps:$4 sm:$0xff]   ;;  %v13751_v30 = vld [vmem:[%s17357_s6 + $0xa8] sm:$0xff] }
 0x1b5   : > { %11181 = vmatpush2.bf16.msra.mxu1 %v16012_v61  ;;  %11099 = vmatprep.subr.bf16.mxu0 %v16017_v56  ;;  %v16029_v61 = vld [vmem:[%s24297_s1 + $0x1964] ss:$16 sps:$4 sm:$0xff]   ;;  %v16027_v29 = vld [vmem:[%s24297_s1 + $0x1960] ss:$16 sps:$4 sm:$0xff]  }
 0x1b6   : > { %11182 = vmatprep.subr.bf16.mxu1 %v16020_v22  ;;  %v20168_v41 = vadd.f32 %v10576_v25, %v10494_v50  ;;  %v16032_v56 = vld [vmem:[%s24297_s1 + $0x1b64] ss:$16 sps:$4 sm:$0xff]   ;;  %v16030_v22 = vld [vmem:[%s24297_s1 + $0x1b60] ss:$16 sps:$4 sm:$0xff]  }
 0x1b7   : > { %v13750_v52 = vld [vmem:[%s17357_s6 + $0xa0] sm:$0xff]  ;;  %v13752_v25 = vld [vmem:[%s17357_s6 + $0xb0] sm:$0xff] }
 0x1b8   : > { %11100 = vmatpush2.bf16.msra.mxu0 %v16015_v39  ;;  %v16035_v0 = vld [vmem:[%s24297_s1 + $0x1944] ss:$16 sps:$4 sm:$0xff]   ;;  %v13753_v39 = vld [vmem:[%s17357_s6 + $0xb8] sm:$0xff] }
 0x1b9   : > { %11183 = vmatpush2.bf16.msra.mxu1 %v16018_v7  ;;  %11101 = vmatprep.subr.bf16.mxu0 %v16023_v42  ;;  %v16038_v50 = vld [vmem:[%s24297_s1 + $0x1b44] ss:$16 sps:$4 sm:$0xff]   ;;  %v13755_v42 = vld [vmem:[%s17357_s6 + $0xc8] sm:$0xff] }
 0x1ba   : > { %11184 = vmatprep.subr.bf16.mxu1 %v16026_v51  ;;  %v13754_v7 = vld [vmem:[%s17357_s6 + $0xc0] sm:$0xff]  ;;  %v20200_v51 = vpack.c.bf16 %v13751_v30, %v13750_v52  ;;  %v20217_v30 = vpack.c.bf16 %v13753_v39, %v13752_v25  ;;  %v13760_v45 = vld [vmem:[%s17357_s6 + $0xf0] sm:$0xff]  ;;  %v13761_v25 = vld [vmem:[%s17357_s6 + $0xf8] sm:$0xff] }
 0x1bb   : > { %v16044_v52 = vld [vmem:[%s24297_s1 + $0x1b24] ss:$16 sps:$4 sm:$0xff]   ;;  %v20219_v8 = vpack.c.bf16 %v13755_v42, %v13754_v7  ;;  %v13767_v39 = vld [vmem:[%s17357_s6 + $0x128] sm:$0xff]  ;;  %v20256_v31 = vpack.c.bf16 %v13761_v25, %v13760_v45 }
 0x1bc   : > { %11102 = vmatpush2.bf16.msra.mxu0 %v16021_v58  ;;  %v16036_v58 = vld [vmem:[%s24297_s1 + $0x1b40] ss:$16 sps:$4 sm:$0xff]   ;;  %v1618_v18 = vrot.slane %v20200_v51, 6  ;;  %v16050_v7 = vld [vmem:[%s24297_s1 + $0x1b04] ss:$16 sps:$4 sm:$0xff]  }
 0x1bd   : > { %11185 = vmatpush2.bf16.msra.mxu1 %v16024_v2  ;;  %11103 = vmatprep.subr.bf16.mxu0 %v16029_v61  ;;  %v13756_v2 = vld [vmem:[%s17357_s6 + $0xd0] sm:$0xff]  ;;  %v13758_v61 = vld [vmem:[%s17357_s6 + $0xe0] sm:$0xff]  ;;  %v1624_v26 = vrot.slane %v20219_v8, 6  ;;  %24766 = vst [vmem:[#allocation162_spill] sm:$0xff] %v20256_v31 }
 0x1be   : > { %11186 = vmatprep.subr.bf16.mxu1 %v16032_v56  ;;  %v13759_v56 = vld [vmem:[%s17357_s6 + $0xe8] sm:$0xff]  ;;  %v20243_v42 = vpack.c.bf16 %v13757_v19, %v13756_v2  ;;  %v1623_v9 = vrot.slane %v1618_v18, 4  ;;  %v20253_v19 = vpack.c.bf16 %v13763_v16, %v13762_v27  ;;  %v16053_v45 = vld [vmem:[%s24297_s1 + $0x1ce4] ss:$16 sps:$4 sm:$0xff]   ;;  %v1619_v43 = vsel %vm19638_vm11, %v1617_v49, %v1618_v18 }
 0x1bf   : > { %v20225_v37 = vpack.c.bf16 %v13759_v56, %v13758_v61  ;;  %v1621_v61 = vrot.slane %v20217_v30, 6  ;;  %v13764_v56 = vld [vmem:[%s17357_s6 + $0x110] sm:$0xff]  ;;  %v1629_v47 = vrot.slane %v1624_v26, 4  ;;  %v20291_v18 = vcombine.low %v20089_v53, %v20095_v3 }
 0x1c0   : > { %11104 = vmatpush2.bf16.msra.mxu0 %v16027_v29  ;;  %v16039_v29 = vld [vmem:[%s24297_s1 + $0x1920] ss:$16 sps:$4 sm:$0xff]   ;;  %24763 = vst [vmem:[#allocation160_spill] sm:$0xff] %v20243_v42  ;;  %24765 = vst [vmem:[#allocation161_spill] sm:$0xff] %v20253_v19  ;;  %v20278_v46 = vpack.c.bf16 %v13765_v40, %v13764_v56  ;;  %v1625_v54 = vsel %vm19638_vm11, %v1623_v9, %v1624_v26  ;;  %v20295_v49 = vcombine.low %v20099_v11, %v20105_v55  ;;  %v16059_v53 = vld [vmem:[%s24297_s1 + $0x1cc4] ss:$16 sps:$4 sm:$0xff]   ;;  %v20324_v56 = vpop.f32.mrf.mxu0 }
 0x1c1   : > { %11187 = vmatpush2.bf16.msra.mxu1 %v16030_v22  ;;  %11105 = vmatprep.subr.bf16.mxu0 %v16035_v0  ;;  %24762 = vst [vmem:[#allocation159_spill] sm:$0xff] %v20225_v37  ;;  %v16042_v22 = vld [vmem:[%s24297_s1 + $0x1b20] ss:$16 sps:$4 sm:$0xff]   ;;  %v1630_v2 = vrot.slane %v20225_v37, 6  ;;  %v1626_v16 = vrot.slane %v1621_v61, 4  ;;  %24771 = vst [vmem:[#allocation166_spill] sm:$0xff] %v20291_v18 }
 0x1c2   : > { %11188 = vmatprep.subr.bf16.mxu1 %v16038_v50  ;;  %v13766_v0 = vld [vmem:[%s17357_s6 + $0x120] sm:$0xff]  ;;  %24770 = vst [vmem:[#allocation165_spill] sm:$0xff] %v20278_v46  ;;  %24772 = vst [vmem:[#allocation167_spill] sm:$0xff] %v20295_v49 }
 0x1c3   : > { %v16047_v50 = vld [vmem:[%s24297_s1 + $0x1904] ss:$16 sps:$4 sm:$0xff]   ;;  %v20272_v25 = vpack.c.bf16 %v13767_v39, %v13766_v0  ;;  %v1635_v17 = vrot.slane %v1630_v2, 4  ;;  %v16051_v40 = vld [vmem:[%s24297_s1 + $0x1ce0] ss:$16 sps:$4 sm:$0xff]   ;;  %24777 = vst [vmem:[#allocation172_spill] sm:$0xff] %v20324_v56 }
 0x1c4   : > { %11106 = vmatpush2.bf16.msra.mxu0 %v16033_v14  ;;  %v13771_v14 = vld [vmem:[%s17357_s6 + $0x148] sm:$0xff]  ;;  %v16056_v37 = vld [vmem:[%s24297_s1 + $0x1ee4] ss:$16 sps:$4 sm:$0xff]   ;;  %v16054_v26 = vld [vmem:[%s24297_s1 + $0x1ee0] ss:$16 sps:$4 sm:$0xff]  }
 0x1c5   : > { %11189 = vmatpush2.bf16.msra.mxu1 %v16036_v58  ;;  %11107 = vmatprep.subr.bf16.mxu0 %v16041_v38  ;;  %v16048_v38 = vld [vmem:[%s24297_s1 + $0x1b00] ss:$16 sps:$4 sm:$0xff]   ;;  %v24767_v58 = vrot.slane %v20031_v48, 6  ;;  %24768 = vst [vmem:[#allocation163_spill] sm:$0xff] %v20272_v25  ;;  %v20305_v0 = vpack.c.bf16 %v13771_v14, %v13770_v20  ;;  %v16062_v3 = vld [vmem:[%s24297_s1 + $0x1ec4] ss:$16 sps:$4 sm:$0xff]   ;;  %v20326_v14 = vpop.f32.mrf.mxu1 }
 0x1c6   : > { %11190 = vmatprep.subr.bf16.mxu1 %v16044_v52  ;;  %v1627_v52 = vrot.slane %v20243_v42, 6  ;;  %v1642_v55 = vrot.slane %v20272_v25, 6  ;;  %v1645_v20 = vrot.slane %v20274_v59, 6  ;;  %24778 = vst [vmem:[#allocation173_spill] sm:$0xff] %v20326_v14  ;;  %v13778_v14 = vld [vmem:[%s17357_s6 + $0x180] sm:$0xff] }
 0x1c7   : > { %v1620_v27 = vrot.slane %v24767_v58, 4  ;;  %v13772_v58 = vld [vmem:[%s17357_s6 + $0x150] sm:$0xff]  ;;  %24773 = vst [vmem:[#allocation168_spill] sm:$0xff] %v20305_v0 }
 0x1c8   : > { %11108 = vmatpush2.bf16.msra.mxu0 %v16039_v29  ;;  %v1636_v29 = vrot.slane %v20253_v19, 6  ;;  %v1628_v11 = vsel %vm19638_vm11, %v1626_v16, %v1627_v52  ;;  %v20316_v39 = vpack.c.bf16 %v13773_v4, %v13772_v58  ;;  %v1631_v4 = vsel %vm19638_vm11, %v1629_v47, %v1630_v2  ;;  %v13775_v16 = vld [vmem:[%s17357_s6 + $0x168] sm:$0xff]  ;;  %v16057_v58 = vld [vmem:[%s24297_s1 + $0x1cc0] ss:$16 sps:$4 sm:$0xff]   ;;  %v16065_v59 = vld [vmem:[%s24297_s1 + $0x1ca4] ss:$16 sps:$4 sm:$0xff]  }
 0x1c9   : > { %11191 = vmatpush2.bf16.msra.mxu1 %v16042_v22  ;;  %11109 = vmatprep.subr.bf16.mxu0 %v16047_v50  ;;  %v1633_v22 = vrot.slane %v20256_v31, 6  ;;  %v1622_v9 = vsel %vm19638_vm11, %v1620_v27, %v1621_v61  ;;  %v20319_v50 = vcombine.low %v1619_v43, %v1625_v54  ;;  %v1639_v61 = vrot.slane %v20278_v46, 6 }
 0x1ca   : > { %11192 = vmatprep.subr.bf16.mxu1 %v16050_v7  ;;  %24774 = vst [vmem:[#allocation169_spill] sm:$0xff] %v20316_v39  ;;  %v20321_v7 = vcombine.high %v1619_v43, %v1625_v54  ;;  %v13774_v43 = vld [vmem:[%s17357_s6 + $0x160] sm:$0xff]  ;;  %v1648_v47 = vrot.slane %v20305_v0, 6  ;;  %v20350_v25 = vcombine.low %v1622_v9, %v1628_v11  ;;  %v1647_v46 = vrot.slane %v1642_v55, 4 }
 0x1cb   : > { %24775 = vst [vmem:[#allocation170_spill] sm:$0xff] %v20319_v50  ;;  %v1638_v27 = vrot.slane %v1633_v22, 4  ;;  %v16060_v54 = vld [vmem:[%s24297_s1 + $0x1ec0] ss:$16 sps:$4 sm:$0xff]   ;;  %v1644_v2 = vrot.slane %v1639_v61, 4  ;;  %v1651_v0 = vrot.slane %v20316_v39, 6 }
 0x1cc   : > { %11110 = vmatpush2.bf16.msra.mxu0 %v16045_v32  ;;  %24776 = vst [vmem:[#allocation171_spill] sm:$0xff] %v20321_v7  ;;  %v1637_v32 = vsel %vm19638_vm11, %v1635_v17, %v1636_v29  ;;  %v13779_v17 = vld [vmem:[%s17357_s6 + $0x188] sm:$0xff]  ;;  %24780 = vst [vmem:[#allocation175_spill] sm:$0xff] %v20350_v25 }
 0x1cd   : > { %11193 = vmatpush2.bf16.msra.mxu1 %v16048_v38  ;;  %11245 = vmatprep.subr.bf16.mxu0 %v16053_v45  ;;  %v1632_v38 = vrot.slane %v1627_v52, 4  ;;  %v20340_v45 = vcombine.high %v1622_v9, %v1628_v11  ;;  %v20354_v31 = vcombine.low %v1631_v4, %v1637_v32  ;;  %v16068_v9 = vld [vmem:[%s24297_s1 + $0x1ea4] ss:$16 sps:$4 sm:$0xff]  }
 0x1ce   : > { %11328 = vmatprep.subr.bf16.mxu1 %v16056_v37  ;;  %v1641_v37 = vrot.slane %v1636_v29, 4  ;;  %v1650_v29 = vrot.slane %v1645_v20, 4 }
 0x1cf   : > { %24779 = vst [vmem:[#allocation174_spill] sm:$0xff] %v20340_v45  ;;  %v10615_v52 = vpop.f32.mrf.mxu0  ;;  %11112 = vmatmul.mubr.bf16.vlgmr.msra.gmra.mxu0 %v20291_v18  ;;  %24781 = vst [vmem:[#allocation176_spill] sm:$0xff] %v20354_v31  ;;  %v20356_v18 = vcombine.high %v1631_v4, %v1637_v32  ;;  %v1634_v11 = vsel %vm19638_vm11, %v1632_v38, %v1633_v22  ;;  %v13777_v4 = vld [vmem:[%s17357_s6 + $0x178] sm:$0xff]  ;;  %v16066_v22 = vld [vmem:[%s24297_s1 + $0x1ea0] ss:$16 sps:$4 sm:$0xff]  }
 0x1d0   : > { %v10698_v56 = vpop.f32.mrf.mxu1  ;;  %11195 = vmatmul.mubr.bf16.vlgmr.msra.gmra.mxu1 %v20295_v49  ;;  %v10616_v19 = vadd.f32 %v10615_v52, %v19870_v34  ;;  %11246 = vmatpush1.bf16.msra.mxu0 %v16051_v40  ;;  %v1640_v34 = vsel %vm19638_vm11, %v1638_v27, %v1639_v61  ;;  %v20365_v40 = vpack.c.bf16 %v13775_v16, %v13774_v43  ;;  %v13780_v38 = vld [vmem:[%s17357_s6 + $0x190] sm:$0xff] }
 0x1d1   : > { %11329 = vmatpush1.bf16.msra.mxu1 %v16054_v26  ;;  %24782 = vst [vmem:[#allocation177_spill] sm:$0xff] %v20356_v18  ;;  %v10617_v49 = vpop.f32.mrf.mxu0  ;;  %11247 = vmatprep.subr.bf16.mxu0 %v16059_v53  ;;  %v13776_v26 = vld [vmem:[%s17357_s6 + $0x170] sm:$0xff]  ;;  %v1643_v61 = vsel %vm19638_vm11, %v1641_v37, %v1642_v55  ;;  %v1646_v43 = vsel %vm19638_vm11, %v1644_v2, %v1645_v20 }
 0x1d2   : > { %v10700_v42 = vpop.f32.mrf.mxu1  ;;  %11330 = vmatprep.subr.bf16.mxu1 %v16062_v3  ;;  %24783 = vst [vmem:[#allocation178_spill] sm:$0xff] %v20365_v40  ;;  %v20369_v32 = vadd.f32 %v10698_v56, %v10616_v19  ;;  %v10618_v53 = vadd.f32 %v10617_v49, %v19888_v36  ;;  %11121 = vmatprep.mubr.bf16.mxu0 %v20321_v7  ;;  %v16063_v3 = vld [vmem:[%s24297_s1 + $0x1ca0] ss:$16 sps:$4 sm:$0xff]   ;;  %v13781_v19 = vld [vmem:[%s17357_s6 + $0x198] sm:$0xff]  ;;  %v16071_v36 = vld [vmem:[%s24297_s1 + $0x1c84] ss:$16 sps:$4 sm:$0xff]  }
 0x1d3   : > { %11204 = vmatprep.mubr.bf16.mxu1 %v20340_v45  ;;  %v10619_v56 = vpop.f32.mrf.mxu0  ;;  %v1649_v49 = vsel %vm19638_vm11, %v1647_v46, %v1648_v47  ;;  %v1652_v16 = vsel %vm19638_vm11, %v1650_v29, %v1651_v0  ;;  %v20393_v52 = vpack.c.bf16 %v13779_v17, %v13778_v14  ;;  %v20398_v45 = vpack.c.bf16 %v13777_v4, %v13776_v26  ;;  %v16074_v46 = vld [vmem:[%s24297_s1 + $0x1e84] ss:$16 sps:$4 sm:$0xff]  }
 0x1d4   : > { %24784 = vst [vmem:[#allocation179_spill] sm:$0xff] %v20369_v32  ;;  %v10702_v27 = vpop.f32.mrf.mxu1  ;;  %v20395_v55 = vadd.f32 %v10700_v42, %v10618_v53  ;;  %v10620_v37 = vadd.f32 %v10619_v56, %v19904_v15  ;;  %11248 = vmatpush1.bf16.msra.mxu0 %v16057_v58  ;;  %v20407_v20 = vcombine.low %v1634_v11, %v1640_v34  ;;  %v1653_v14 = vrot.slane %v1648_v47, 4 }
 0x1d5   : > { %24785 = vst [vmem:[#allocation180_spill] sm:$0xff] %v20393_v52  ;;  %11331 = vmatpush1.bf16.msra.mxu1 %v16060_v54  ;;  %24786 = vst [vmem:[#allocation181_spill] sm:$0xff] %v20398_v45  ;;  %v20400_v7 = vpop.f32.mrf.mxu0  ;;  %11249 = vmatprep.subr.bf16.mxu0 %v16065_v59  ;;  %v20409_v42 = vcombine.high %v1634_v11, %v1640_v34  ;;  %v1654_v15 = vrot.slane %v20365_v40, 6  ;;  %v16069_v54 = vld [vmem:[%s24297_s1 + $0x1c80] ss:$16 sps:$4 sm:$0xff]   ;;  %v20420_v2 = vcombine.low %v1643_v61, %v1649_v49 }
 0x1d6   : > { %24787 = vst [vmem:[#allocation182_spill] sm:$0xff] %v20400_v7  ;;  %v20402_v32 = vpop.f32.mrf.mxu1  ;;  %11332 = vmatprep.subr.bf16.mxu1 %v16068_v9  ;;  %24789 = vst [vmem:[#allocation184_spill] sm:$0xff] %v20407_v20  ;;  %v20412_v58 = vadd.f32 %v10702_v27, %v10620_v37  ;;  %v16072_v59 = vld [vmem:[%s24297_s1 + $0x1e80] ss:$16 sps:$4 sm:$0xff]   ;;  %v20422_v17 = vcombine.high %v1643_v61, %v1649_v49  ;;  %v20424_v29 = vrot.slane %v1651_v0, 4  ;;  %v1709_v53 = vshrl.u32 %v20016_v62, 16 }
 0x1d7   : > { %24788 = vst [vmem:[#allocation183_spill] sm:$0xff] %v20402_v32  ;;  %24790 = vst [vmem:[#allocation185_spill] sm:$0xff] %v20409_v42  ;;  %v10625_v9 = vpop.f32.mrf.mxu0  ;;  %11122 = vmatmul.mubr.bf16.gmra.mxu0 %v20319_v50  ;;  %v16077_v11 = vld [vmem:[%s24297_s1 + $0x1c64] ss:$16 sps:$4 sm:$0xff]   ;;  %v20431_v34 = vcombine.low %v1646_v43, %v1652_v16  ;;  %v20433_v26 = vcombine.high %v1646_v43, %v1652_v16  ;;  %v20435_v4 = vpack.c.bf16 %v13781_v19, %v13780_v38 }
 0x1d8   : > { %24791 = vst [vmem:[#allocation186_spill] sm:$0xff] %v20420_v2  ;;  %24792 = vst [vmem:[#allocation187_spill] sm:$0xff] %v20422_v17  ;;  %v10708_v47 = vpop.f32.mrf.mxu1  ;;  %11205 = vmatmul.mubr.bf16.gmra.mxu1 %v20350_v25  ;;  %v10626_v0 = vadd.f32 %v10625_v9, %v19934_v35  ;;  %11250 = vmatpush1.bf16.msra.mxu0 %v16063_v3  ;;  %v1660_v61 = vrot.slane %v20393_v52, 6  ;;  %v1657_v56 = vrot.slane %v20398_v45, 6  ;;  %v1712_v27 = vshll.u32 %v20016_v62, 16 }
 0x1d9   : > { %24793 = vst [vmem:[#allocation188_spill] sm:$0xff] %v20431_v34  ;;  %24794 = vst [vmem:[#allocation189_spill] sm:$0xff] %v20433_v26  ;;  %11333 = vmatpush1.bf16.msra.mxu1 %v16066_v22  ;;  %v10627_v49 = vpop.f32.mrf.mxu0  ;;  %11251 = vmatprep.subr.bf16.mxu0 %v16071_v36  ;;  %v16080_v38 = vld [vmem:[%s24297_s1 + $0x1e64] ss:$16 sps:$4 sm:$0xff]   ;;  %v1659_v19 = vrot.slane %v1654_v15, 4  ;;  %v1718_v43 = vshrl.u32 %v19997_v12, 16 }
 0x1da   : > { %v10710_v37 = vpop.f32.mrf.mxu1  ;;  %11334 = vmatprep.subr.bf16.mxu1 %v16074_v46  ;;  %v1721_v35 = vshll.u32 %v19997_v12, 16  ;;  %v1727_v3 = vshrl.u32 %v20029_v6, 16  ;;  %v10628_v22 = vadd.f32 %v10627_v49, %v19962_v23  ;;  %v20449_v16 = vadd.f32 %v10708_v47, %v10626_v0  ;;  %11131 = vmatprep.mubr.bf16.mxu0 %v20356_v18  ;;  %v16075_v36 = vld [vmem:[%s24297_s1 + $0x1c60] ss:$16 sps:$4 sm:$0xff]   ;;  %v16083_v47 = vld [vmem:[%s24297_s1 + $0x1c44] ss:$16 sps:$4 sm:$0xff]  }
 0x1db   : > { %v16078_v46 = vld [vmem:[%s24297_s1 + $0x1e60] ss:$16 sps:$4 sm:$0xff]   ;;  %11214 = vmatprep.mubr.bf16.mxu1 %v20409_v42  ;;  %v1730_v9 = vshll.u32 %v20029_v6, 16  ;;  %v1736_v32 = vshrl.u32 %v20001_v13, 16  ;;  %v10629_v7 = vpop.f32.mrf.mxu0  ;;  %v16086_v0 = vld [vmem:[%s24297_s1 + $0x1e44] ss:$16 sps:$4 sm:$0xff]   ;;  %v20469_v49 = vsel %vm19638_vm11, %v1653_v14, %v1654_v15 }
 0x1dc   : > { %24795 = vst [vmem:[#allocation190_spill] sm:$0xff] %v20449_v16  ;;  %v10712_v23 = vpop.f32.mrf.mxu1  ;;  %v1663_v42 = vrot.slane %v20435_v4, 6  ;;  %v20472_v18 = vrot.slane %v1709_v53, 6  ;;  %v1739_v25 = vshll.u32 %v20001_v13, 16  ;;  %v10630_v50 = vadd.f32 %v10629_v7, %v19975_v5  ;;  %11252 = vmatpush1.bf16.msra.mxu0 %v16069_v54  ;;  %v16081_v7 = vld [vmem:[%s24297_s1 + $0x1c40] ss:$16 sps:$4 sm:$0xff]  }
 0x1dd   : > { %v20476_v6 = vadd.f32 %v10710_v37, %v10628_v22  ;;  %11335 = vmatpush1.bf16.msra.mxu1 %v16072_v59  ;;  %v1662_v62 = vrot.slane %v1657_v56, 4  ;;  %v20478_v12 = vrot.slane %v1712_v27, 7  ;;  %v20480_v16 = vpop.f32.mrf.mxu0  ;;  %11253 = vmatprep.subr.bf16.mxu0 %v16077_v11  ;;  %v1720_v14 = vrot.slane %v1718_v43, 6  ;;  %v16084_v54 = vld [vmem:[%s24297_s1 + $0x1e40] ss:$16 sps:$4 sm:$0xff]  }
 0x1de   : > { %24796 = vst [vmem:[#allocation191_spill] sm:$0xff] %v20480_v16  ;;  %v20482_v52 = vpop.f32.mrf.mxu1  ;;  %11336 = vmatprep.subr.bf16.mxu1 %v16080_v38  ;;  %v1723_v15 = vrot.slane %v1721_v35, 7  ;;  %v1746_v53 = vshrl.u32 %v20023_v33, 16  ;;  %v1749_v13 = vshll.u32 %v20023_v33, 16  ;;  %v20486_v5 = vadd.f32 %v10712_v23, %v10630_v50  ;;  %v16089_v50 = vld [vmem:[%s24297_s1 + $0x1c24] ss:$16 sps:$4 sm:$0xff]  }
 0x1df   : > { %24797 = vst [vmem:[#allocation192_spill] sm:$0xff] %v20482_v52  ;;  %v20494_v59 = vrot.slane %v1727_v3, 6  ;;  %v1732_v11 = vrot.slane %v1730_v9, 7  ;;  %v1738_v27 = vrot.slane %v1736_v32, 6  ;;  %v10635_v37 = vpop.f32.mrf.mxu0  ;;  %11132 = vmatmul.mubr.bf16.gmra.mxu0 %v20354_v31  ;;  %v16092_v43 = vld [vmem:[%s24297_s1 + $0x1e24] ss:$16 sps:$4 sm:$0xff]   ;;  %v20506_v35 = vsel %vm19638_vm11, %v1659_v19, %v1660_v61 }
 0x1e0   : > { %v10718_v38 = vpop.f32.mrf.mxu1  ;;  %11215 = vmatmul.mubr.bf16.gmra.mxu1 %v20407_v20  ;;  %v1741_v3 = vrot.slane %v1739_v25, 7  ;;  %v1756_v32 = vshrl.u32 %v20031_v48, 16  ;;  %v1759_v22 = vshll.u32 %v20031_v48, 16  ;;  %v10636_v9 = vadd.f32 %v10635_v37, %v20019_v24  ;;  %11254 = vmatpush1.bf16.msra.mxu0 %v16075_v36  ;;  %v24816_v20 = vld [vmem:[#allocation163_spill] sm:$0xff] }
 0x1e1   : > { %11337 = vmatpush1.bf16.msra.mxu1 %v16078_v46  ;;  %v20514_v23 = vsel %vm19638_vm11, %v20424_v29, %v1657_v56  ;;  %v20518_v52 = vsel %vm19638_vm11, %v1662_v62, %v1663_v42  ;;  %v10637_v61 = vpop.f32.mrf.mxu0  ;;  %11255 = vmatprep.subr.bf16.mxu0 %v16083_v47  ;;  %v1715_v24 = vor.u32 %v20478_v12, %v20472_v18  ;;  %v1748_v25 = vrot.slane %v1746_v53, 6  ;;  %v16090_v62 = vld [vmem:[%s24297_s1 + $0x1e20] ss:$16 sps:$4 sm:$0xff]  }
 0x1e2   : > { %v10720_v19 = vpop.f32.mrf.mxu1  ;;  %11338 = vmatprep.subr.bf16.mxu1 %v16086_v0  ;;  %v10638_v36 = vadd.f32 %v10637_v61, %v20035_v57  ;;  %v20523_v46 = vadd.f32 %v10718_v38, %v10636_v9  ;;  %11141 = vmatprep.mubr.bf16.mxu0 %v20422_v17  ;;  %v1724_v42 = vor.u32 %v1723_v15, %v1720_v14  ;;  %v1751_v29 = vrot.slane %v1749_v13, 7  ;;  %v16095_v13 = vld [vmem:[%s24297_s1 + $0x1c04] ss:$16 sps:$4 sm:$0xff]  }
 0x1e3   : > { %11224 = vmatprep.mubr.bf16.mxu1 %v20433_v26  ;;  %v10639_v12 = vpop.f32.mrf.mxu0  ;;  %v1733_v57 = vor.u32 %v1732_v11, %v20494_v59  ;;  %v1742_v56 = vor.u32 %v1741_v3, %v1738_v27  ;;  %v1758_v47 = vrot.slane %v1756_v32, 6  ;;  %v1761_v0 = vrot.slane %v1759_v22, 7  ;;  %v16098_v14 = vld [vmem:[%s24297_s1 + $0x1e04] ss:$16 sps:$4 sm:$0xff]  }
 0x1e4   : > { %v10722_v18 = vpop.f32.mrf.mxu1  ;;  %v10640_v53 = vadd.f32 %v10639_v12, %v20052_v10  ;;  %v20535_v37 = vadd.f32 %v10720_v19, %v10638_v36  ;;  %11256 = vmatpush1.bf16.msra.mxu0 %v16081_v7  ;;  %v20549_v10 = vcombine.high %v20469_v49, %v20506_v35  ;;  %v16093_v7 = vld [vmem:[%s24297_s1 + $0x1c00] ss:$16 sps:$4 sm:$0xff]   ;;  %v20561_v59 = vcombine.high %v20514_v23, %v20518_v52  ;;  %v16146_v26 = vld [vmem:[%s24297_s1 + $0x1f04] ss:$16 sps:$4 sm:$0xff]  }
 0x1e5   : > { %11339 = vmatpush1.bf16.msra.mxu1 %v16084_v54  ;;  %v20537_v38 = vpop.f32.mrf.mxu0  ;;  %11257 = vmatprep.subr.bf16.mxu0 %v16089_v50  ;;  %v16096_v54 = vld [vmem:[%s24297_s1 + $0x1e00] ss:$16 sps:$4 sm:$0xff]   ;;  %v1716_v27 = vrot.slane %v1715_v24, 4  ;;  %v1744_v50 = vrot.slane %v1724_v42, 4  ;;  %v20571_v32 = vor.u32 %v1751_v29, %v1748_v25  ;;  %v1734_v22 = vrot.slane %v1733_v57, 4 }
 0x1e6   : > { %24798 = vst [vmem:[#allocation193_spill] sm:$0xff] %v20537_v38  ;;  %v20539_v9 = vpop.f32.mrf.mxu1  ;;  %11340 = vmatprep.subr.bf16.mxu1 %v16092_v43  ;;  %24800 = vst [vmem:[#allocation195_spill] sm:$0xff] %v20549_v10  ;;  %v20551_v15 = vadd.f32 %v10722_v18, %v10640_v53  ;;  %v1754_v61 = vrot.slane %v1742_v56, 4  ;;  %v20573_v19 = vor.u32 %v1761_v0, %v1758_v47  ;;  %v16101_v25 = vld [vmem:[%s24297_s1 + $0x1de4] ss:$16 sps:$4 sm:$0xff]   ;;  %v1846_v31 = vshrl.u32 %v24816_v20, 16 }
 0x1e7   : > { %24799 = vst [vmem:[#allocation194_spill] sm:$0xff] %v20539_v9  ;;  %24801 = vst [vmem:[#allocation196_spill] sm:$0xff] %v20561_v59  ;;  %v10645_v43 = vpop.f32.mrf.mxu0  ;;  %11142 = vmatmul.mubr.bf16.gmra.mxu0 %v20420_v2  ;;  %v20578_v24 = vcombine.low %v20469_v49, %v20506_v35  ;;  %v16104_v29 = vld [vmem:[%s24297_s1 + $0x1fe4] ss:$16 sps:$4 sm:$0xff]   ;;  %v16102_v49 = vld [vmem:[%s24297_s1 + $0x1fe0] ss:$16 sps:$4 sm:$0xff]   ;;  %v20598_v35 = vcombine.low %v20514_v23, %v20518_v52  ;;  %v20603_v47 = vsel %vm20565_vm14, %v1716_v27, %v1724_v42 }
 0x1e8   : > { %v10728_v3 = vpop.f32.mrf.mxu1  ;;  %11225 = vmatmul.mubr.bf16.gmra.mxu1 %v20431_v34  ;;  %v10646_v36 = vadd.f32 %v10645_v43, %v20078_v1  ;;  %11258 = vmatpush1.bf16.msra.mxu0 %v16087_v28  ;;  %v20608_v0 = vsel %vm20565_vm14, %v1744_v50, %v20571_v32  ;;  %v20612_v53 = vsel %vm20565_vm14, %v1734_v22, %v1742_v56  ;;  %v16107_v56 = vld [vmem:[%s24297_s1 + $0x1dc4] ss:$16 sps:$4 sm:$0xff]   ;;  %v1774_v17 = vrot.slane %v20573_v19, 4 }
 0x1e9   : > { %11341 = vmatpush1.bf16.msra.mxu1 %v16090_v62  ;;  %v10647_v12 = vpop.f32.mrf.mxu0  ;;  %11259 = vmatprep.subr.bf16.mxu0 %v16095_v13  ;;  %24804 = vst [vmem:[#allocation197_spill] sm:$0xff] %v20578_v24  ;;  %v16099_v62 = vld [vmem:[%s24297_s1 + $0x1de0] ss:$16 sps:$4 sm:$0xff]   ;;  %24805 = vst [vmem:[#allocation198_spill] sm:$0xff] %v20598_v35  ;;  %v20617_v52 = vsel %vm20565_vm14, %v1754_v61, %v20573_v19  ;;  %v16110_v27 = vld [vmem:[%s24297_s1 + $0x1fc4] ss:$16 sps:$4 sm:$0xff]  }
 0x1ea   : > { %v10730_v18 = vpop.f32.mrf.mxu1  ;;  %11342 = vmatprep.subr.bf16.mxu1 %v16098_v14  ;;  %v10648_v1 = vadd.f32 %v10647_v12, %v20108_v63  ;;  %v20587_v28 = vadd.f32 %v10728_v3, %v10646_v36  ;;  %11151 = vmatprep.mubr.bf16.mxu0 %v20549_v10  ;;  %v20646_v43 = vcombine.high %v20612_v53, %v20617_v52  ;;  %v24814_v34 = vld [vmem:[#allocation165_spill] sm:$0xff] }
 0x1eb   : > { %11234 = vmatprep.mubr.bf16.mxu1 %v20561_v59  ;;  %v10649_v57 = vpop.f32.mrf.mxu0  ;;  %v24813_v59 = vld [vmem:[#allocation161_spill] sm:$0xff]  ;;  %v1836_v2 = vshrl.u32 %v24814_v34, 16 }
 0x1ec   : > { %v10732_v63 = vpop.f32.mrf.mxu1  ;;  %v10650_v23 = vadd.f32 %v10649_v57, %v20123_v60  ;;  %v20620_v13 = vadd.f32 %v10730_v18, %v10648_v1  ;;  %11260 = vmatpush1.bf16.msra.mxu0 %v16093_v7  ;;  %v16105_v60 = vld [vmem:[%s24297_s1 + $0x1dc0] ss:$16 sps:$4 sm:$0xff]   ;;  %24809 = vst [vmem:[#allocation202_spill] sm:$0xff] %v20646_v43  ;;  %v16113_v18 = vld [vmem:[%s24297_s1 + $0x1da4] ss:$16 sps:$4 sm:$0xff]  }
 0x1ed   : > { %11343 = vmatpush1.bf16.msra.mxu1 %v16096_v54  ;;  %v20622_v42 = vpop.f32.mrf.mxu0  ;;  %11261 = vmatprep.subr.bf16.mxu0 %v16101_v25  ;;  %v16108_v7 = vld [vmem:[%s24297_s1 + $0x1fc0] ss:$16 sps:$4 sm:$0xff]   ;;  %v20642_v54 = vcombine.high %v20603_v47, %v20608_v0  ;;  %v16116_v25 = vld [vmem:[%s24297_s1 + $0x1fa4] ss:$16 sps:$4 sm:$0xff]  }
 0x1ee   : > { %24806 = vst [vmem:[#allocation199_spill] sm:$0xff] %v20622_v42  ;;  %v20624_v14 = vpop.f32.mrf.mxu1  ;;  %11344 = vmatprep.subr.bf16.mxu1 %v16104_v29  ;;  %v20632_v50 = vadd.f32 %v10732_v63, %v10650_v23 }
 0x1ef   : > { %24807 = vst [vmem:[#allocation200_spill] sm:$0xff] %v20624_v14  ;;  %24808 = vst [vmem:[#allocation201_spill] sm:$0xff] %v20642_v54  ;;  %v10655_v3 = vpop.f32.mrf.mxu0  ;;  %11152 = vmatmul.mubr.bf16.gmra.mxu0 %v20578_v24 }
 0x1f0   : > { %v10738_v22 = vpop.f32.mrf.mxu1  ;;  %11235 = vmatmul.mubr.bf16.gmra.mxu1 %v20598_v35  ;;  %v10656_v61 = vadd.f32 %v10655_v3, %v20149_v44  ;;  %11262 = vmatpush2.bf16.msra.mxu0 %v16099_v62  ;;  %v16111_v44 = vld [vmem:[%s24297_s1 + $0x1da0] ss:$16 sps:$4 sm:$0xff]   ;;  %v1766_v3 = vshrl.u32 %v20200_v51, 16  ;;  %v16140_v35 = vld [vmem:[%s24297_s1 + $0x1f24] ss:$16 sps:$4 sm:$0xff]  }
 0x1f1   : > { %11345 = vmatpush2.bf16.msra.mxu1 %v16102_v49  ;;  %v10657_v36 = vpop.f32.mrf.mxu0  ;;  %11263 = vmatprep.subr.bf16.mxu0 %v16107_v56  ;;  %v16114_v62 = vld [vmem:[%s24297_s1 + $0x1fa0] ss:$16 sps:$4 sm:$0xff]   ;;  %v16122_v56 = vld [vmem:[%s24297_s1 + $0x1f84] ss:$16 sps:$4 sm:$0xff]  }
 0x1f2   : > { %v10740_v12 = vpop.f32.mrf.mxu1  ;;  %11346 = vmatprep.subr.bf16.mxu1 %v16110_v27  ;;  %v10658_v29 = vadd.f32 %v10657_v36, %v20157_v21  ;;  %v20658_v1 = vadd.f32 %v10738_v22, %v10656_v61  ;;  %11277 = vmatprep.mubr.bf16.mxu0 %v20642_v54  ;;  %v16119_v21 = vld [vmem:[%s24297_s1 + $0x1d84] ss:$16 sps:$4 sm:$0xff]   ;;  %v1776_v36 = vshrl.u32 %v20217_v30, 16 }
 0x1f3   : > { %11360 = vmatprep.mubr.bf16.mxu1 %v20646_v43  ;;  %v10659_v49 = vpop.f32.mrf.mxu0  ;;  %v16125_v22 = vld [vmem:[%s24297_s1 + $0x1d64] ss:$16 sps:$4 sm:$0xff]  }
 0x1f4   : > { %v10742_v57 = vpop.f32.mrf.mxu1  ;;  %v10660_v63 = vadd.f32 %v10659_v49, %v20168_v41  ;;  %v20669_v23 = vadd.f32 %v10740_v12, %v10658_v29  ;;  %11264 = vmatpush2.bf16.msra.mxu0 %v16105_v60  ;;  %v16117_v41 = vld [vmem:[%s24297_s1 + $0x1d80] ss:$16 sps:$4 sm:$0xff]   ;;  %v1769_v60 = vshll.u32 %v20200_v51, 16  ;;  %v16128_v61 = vld [vmem:[%s24297_s1 + $0x1f64] ss:$16 sps:$4 sm:$0xff]   ;;  %v1779_v12 = vshll.u32 %v20217_v30, 16 }
 0x1f5   : > { %11347 = vmatpush2.bf16.msra.mxu1 %v16108_v7  ;;  %11265 = vmatprep.subr.bf16.mxu0 %v16113_v18  ;;  %v16120_v7 = vld [vmem:[%s24297_s1 + $0x1f80] ss:$16 sps:$4 sm:$0xff]   ;;  %v1786_v29 = vshrl.u32 %v20219_v8, 16  ;;  %v1789_v49 = vshll.u32 %v20219_v8, 16  ;;  %v1778_v14 = vrot.slane %v1776_v36, 6  ;;  %v24812_v36 = vld [vmem:[#allocation162_spill] sm:$0xff] }
 0x1f6   : > { %11348 = vmatprep.subr.bf16.mxu1 %v16116_v25  ;;  %v20677_v27 = vadd.f32 %v10742_v57, %v10660_v63  ;;  %v16123_v18 = vld [vmem:[%s24297_s1 + $0x1d60] ss:$16 sps:$4 sm:$0xff]   ;;  %v16131_v57 = vld [vmem:[%s24297_s1 + $0x1d44] ss:$16 sps:$4 sm:$0xff]   ;;  %v1781_v42 = vrot.slane %v1779_v12, 7  ;;  %v1816_v12 = vshrl.u32 %v24812_v36, 16 }
 0x1f7   : > { %v16126_v25 = vld [vmem:[%s24297_s1 + $0x1f60] ss:$16 sps:$4 sm:$0xff]   ;;  %v16134_v63 = vld [vmem:[%s24297_s1 + $0x1f44] ss:$16 sps:$4 sm:$0xff]   ;;  %v1788_v43 = vrot.slane %v1786_v29, 6  ;;  %v1819_v54 = vshll.u32 %v24812_v36, 16 }
 0x1f8   : > { %11266 = vmatpush2.bf16.msra.mxu0 %v16111_v44  ;;  %v1768_v44 = vrot.slane %v1766_v3, 6  ;;  %v1782_v24 = vor.u32 %v1781_v42, %v1778_v14  ;;  %v16143_v42 = vld [vmem:[%s24297_s1 + $0x1d04] ss:$16 sps:$4 sm:$0xff]   ;;  %v1764_v14 = vrot.slane %v20571_v32, 4 }
 0x1f9   : > { %11349 = vmatpush2.bf16.msra.mxu1 %v16114_v62  ;;  %11267 = vmatprep.subr.bf16.mxu0 %v16119_v21  ;;  %v1771_v62 = vrot.slane %v1769_v60, 7  ;;  %v24810_v21 = vld [vmem:[#allocation160_spill] sm:$0xff]  ;;  %v24811_v60 = vld [vmem:[#allocation159_spill] sm:$0xff]  ;;  %v1821_v10 = vrot.slane %v1819_v54, 7 }
 0x1fa   : > { %11350 = vmatprep.subr.bf16.mxu1 %v16122_v56  ;;  %v1796_v56 = vshrl.u32 %v24810_v21, 16  ;;  %v1799_v3 = vshll.u32 %v24810_v21, 16  ;;  %v1806_v9 = vshrl.u32 %v24811_v60, 16  ;;  %v1809_v38 = vshll.u32 %v24811_v60, 16  ;;  %v16144_v54 = vld [vmem:[%s24297_s1 + $0x1f00] ss:$16 sps:$4 sm:$0xff]  }
 0x1fb   : > { %v1772_v16 = vor.u32 %v1771_v62, %v1768_v44  ;;  %v1794_v32 = vrot.slane %v1782_v24, 4 }
 0x1fc   : > { %11268 = vmatpush2.bf16.msra.mxu0 %v16117_v41  ;;  %v16129_v41 = vld [vmem:[%s24297_s1 + $0x1d40] ss:$16 sps:$4 sm:$0xff]   ;;  %v1798_v44 = vrot.slane %v1796_v56, 6  ;;  %v1801_v29 = vrot.slane %v1799_v3, 7  ;;  %v1808_v62 = vrot.slane %v1806_v9, 6  ;;  %v1818_v3 = vrot.slane %v1816_v12, 6 }
 0x1fd   : > { %11351 = vmatpush2.bf16.msra.mxu1 %v16120_v7  ;;  %11269 = vmatprep.subr.bf16.mxu0 %v16125_v22  ;;  %v16132_v7 = vld [vmem:[%s24297_s1 + $0x1f40] ss:$16 sps:$4 sm:$0xff]   ;;  %v1791_v22 = vrot.slane %v1789_v49, 7  ;;  %v1811_v49 = vrot.slane %v1809_v38, 7  ;;  %v1784_v9 = vrot.slane %v1772_v16, 4  ;;  %v1839_v38 = vshll.u32 %v24814_v34, 16  ;;  %v20798_v34 = vpop.f32.mrf.mxu0 }
 0x1fe   : > { %11352 = vmatprep.subr.bf16.mxu1 %v16128_v61  ;;  %v16137_v61 = vld [vmem:[%s24297_s1 + $0x1d24] ss:$16 sps:$4 sm:$0xff]   ;;  %v1773_v19 = vsel %vm20565_vm14, %v1764_v14, %v1772_v16  ;;  %24820 = vst [vmem:[#allocation204_spill] sm:$0xff] %v20798_v34 }
 0x1ff   : > { %v20739_v56 = vor.u32 %v1791_v22, %v1788_v43  ;;  %v16141_v43 = vld [vmem:[%s24297_s1 + $0x1d00] ss:$16 sps:$4 sm:$0xff]   ;;  %v16152_v16 = vld [vmem:[%s24297_s1 + $0x22e4] ss:$16 sps:$4 sm:$0xff]  }
 0x200   : > { %11270 = vmatpush2.bf16.msra.mxu0 %v16123_v18  ;;  %v16135_v18 = vld [vmem:[%s24297_s1 + $0x1d20] ss:$16 sps:$4 sm:$0xff]  }
 0x201   : > { %11353 = vmatpush2.bf16.msra.mxu1 %v16126_v25  ;;  %11271 = vmatprep.subr.bf16.mxu0 %v16131_v57  ;;  %v16138_v25 = vld [vmem:[%s24297_s1 + $0x1f20] ss:$16 sps:$4 sm:$0xff]   ;;  %v1826_v57 = vshrl.u32 %v24813_v59, 16  ;;  %v1793_v12 = vsel %vm20565_vm14, %v1784_v9, %v20739_v56  ;;  %v20788_v9 = vcombine.low %v20612_v53, %v20617_v52  ;;  %v20800_v53 = vpop.f32.mrf.mxu1  ;;  %v16158_v52 = vld [vmem:[%s24297_s1 + $0x22c4] ss:$16 sps:$4 sm:$0xff]  }
 0x202   : > { %11354 = vmatprep.subr.bf16.mxu1 %v16134_v63  ;;  %v1829_v63 = vshll.u32 %v24813_v59, 16  ;;  %24821 = vst [vmem:[#allocation205_spill] sm:$0xff] %v20800_v53 }
 0x203   : > { %v1828_v22 = vrot.slane %v1826_v57, 6  ;;  %24819 = vst [vmem:[#allocation203_spill] sm:$0xff] %v20788_v9 }
 0x204   : > { %11272 = vmatpush2.bf16.msra.mxu0 %v16129_v41  ;;  %v1802_v41 = vor.u32 %v1801_v29, %v1798_v44  ;;  %v16149_v44 = vld [vmem:[%s24297_s1 + $0x20e4] ss:$16 sps:$4 sm:$0xff]   ;;  %v1822_v29 = vor.u32 %v1821_v10, %v1818_v3  ;;  %v20793_v3 = vcombine.low %v1773_v19, %v1793_v12 }
 0x205   : > { %11355 = vmatpush2.bf16.msra.mxu1 %v16132_v7  ;;  %11273 = vmatprep.subr.bf16.mxu0 %v16137_v61  ;;  %v1812_v7 = vor.u32 %v1811_v49, %v1808_v62  ;;  %v1831_v61 = vrot.slane %v1829_v63, 7  ;;  %v1838_v62 = vrot.slane %v1836_v2, 6  ;;  %v1841_v49 = vrot.slane %v1839_v38, 7  ;;  %v16147_v2 = vld [vmem:[%s24297_s1 + $0x20e0] ss:$16 sps:$4 sm:$0xff]  }
 0x206   : > { %11356 = vmatprep.subr.bf16.mxu1 %v16140_v35  ;;  %v20755_v35 = vcombine.low %v20603_v47, %v20608_v0  ;;  %v1849_v47 = vshll.u32 %v24816_v20, 16  ;;  %v1783_v0 = vsel %vm20565_vm14, %v1774_v17, %v1782_v24  ;;  %v1803_v10 = vsel %vm20565_vm14, %v1794_v32, %v1802_v41  ;;  %v24818_v17 = vld [vmem:[#allocation164_spill] sm:$0xff] }
 0x207   : > { %v20783_v14 = vor.u32 %v1831_v61, %v1828_v22  ;;  %v1856_v24 = vshrl.u32 %v24818_v17, 16  ;;  %v1814_v38 = vrot.slane %v1802_v41, 4  ;;  %v1834_v32 = vrot.slane %v1822_v29, 4 }
 0x208   : > { %24815 = vst [vmem:[#allocation160_spill] sm:$0xff] %v20755_v35  ;;  %11274 = vmatpush2.bf16.msra.mxu0 %v16135_v18  ;;  %v1804_v18 = vrot.slane %v20739_v56, 4  ;;  %v16155_v56 = vld [vmem:[%s24297_s1 + $0x20c4] ss:$16 sps:$4 sm:$0xff]   ;;  %v20796_v22 = vor.u32 %v1841_v49, %v1838_v62  ;;  %v1848_v61 = vrot.slane %v1846_v31, 6  ;;  %v1851_v20 = vrot.slane %v1849_v47, 7 }
 0x209   : > { %11357 = vmatpush2.bf16.msra.mxu1 %v16138_v25  ;;  %11275 = vmatprep.subr.bf16.mxu0 %v16143_v42  ;;  %v24817_v25 = vld [vmem:[#allocation168_spill] sm:$0xff]  ;;  %v1824_v42 = vrot.slane %v1812_v7, 4  ;;  %v20805_v41 = vcombine.high %v1773_v19, %v1793_v12  ;;  %v16153_v31 = vld [vmem:[%s24297_s1 + $0x20c0] ss:$16 sps:$4 sm:$0xff]   ;;  %v1858_v12 = vrot.slane %v1856_v24, 6  ;;  %v1844_v53 = vrot.slane %v20783_v14, 4 }
 0x20a   : > { %11358 = vmatprep.subr.bf16.mxu1 %v16146_v26  ;;  %v1866_v57 = vshrl.u32 %v24817_v25, 16  ;;  %v1869_v63 = vshll.u32 %v24817_v25, 16  ;;  %v16150_v26 = vld [vmem:[%s24297_s1 + $0x22e0] ss:$16 sps:$4 sm:$0xff]   ;;  %v1859_v25 = vshll.u32 %v24818_v17, 16  ;;  %v20807_v17 = vcombine.low %v1783_v0, %v1803_v10 }
 0x20b   : > { %24822 = vst [vmem:[#allocation206_spill] sm:$0xff] %v20805_v41  ;;  %v16156_v62 = vld [vmem:[%s24297_s1 + $0x22c0] ss:$16 sps:$4 sm:$0xff]   ;;  %v20819_v49 = vsel %vm20565_vm14, %v1804_v18, %v1812_v7  ;;  %v20824_v19 = vsel %vm20565_vm14, %v1824_v42, %v20783_v14  ;;  %v20833_v7 = vsel %vm20565_vm14, %v1814_v38, %v1822_v29  ;;  %v20841_v24 = vsel %vm20565_vm14, %v1834_v32, %v20796_v22 }
 0x20c   : > { %11276 = vmatpush2.bf16.msra.mxu0 %v16141_v43  ;;  %v1868_v43 = vrot.slane %v1866_v57, 6  ;;  %v1861_v18 = vrot.slane %v1859_v25, 7  ;;  %v1876_v57 = vshrl.u32 %v20316_v39, 16  ;;  %v1852_v34 = vor.u32 %v1851_v20, %v1848_v61  ;;  %v16164_v25 = vld [vmem:[%s24297_s1 + $0x22a4] ss:$16 sps:$4 sm:$0xff]  }
 0x20d   : > { %11359 = vmatpush2.bf16.msra.mxu1 %v16144_v54  ;;  %11411 = vmatprep.subr.bf16.mxu0 %v16149_v44  ;;  %v1871_v54 = vrot.slane %v1869_v63, 7  ;;  %v20815_v44 = vcombine.high %v1783_v0, %v1803_v10  ;;  %v16161_v0 = vld [vmem:[%s24297_s1 + $0x20a4] ss:$16 sps:$4 sm:$0xff]   ;;  %v1879_v63 = vshll.u32 %v20316_v39, 16  ;;  %v1886_v38 = vshrl.u32 %v20365_v40, 16 }
 0x20e   : > { %11494 = vmatprep.subr.bf16.mxu1 %v16152_v16  ;;  %v24824_v10 = vld [vmem:[#allocation179_spill] sm:$0xff]  ;;  %v1889_v32 = vshll.u32 %v20365_v40, 16  ;;  %v24826_v40 = vld [vmem:[#allocation180_spill] sm:$0xff] }
 0x20f   : > { %24823 = vst [vmem:[#allocation207_spill] sm:$0xff] %v20815_v44  ;;  %v10781_v47 = vpop.f32.mrf.mxu0  ;;  %11278 = vmatmul.mubr.bf16.vlgmr.msra.gmra.mxu0 %v20755_v35  ;;  %v16162_v61 = vld [vmem:[%s24297_s1 + $0x22a0] ss:$16 sps:$4 sm:$0xff]   ;;  %v1906_v39 = vshrl.u32 %v24826_v40, 16  ;;  %v1888_v36 = vrot.slane %v1886_v38, 6  ;;  %v1854_v38 = vrot.slane %v20796_v22, 4 }
 0x210   : > { %v10864_v16 = vpop.f32.mrf.mxu1  ;;  %11361 = vmatmul.mubr.bf16.vlgmr.msra.gmra.mxu1 %v20788_v9  ;;  %v10782_v42 = vadd.f32 %v10781_v47, %v24824_v10  ;;  %11412 = vmatpush1.bf16.msra.mxu0 %v16147_v2  ;;  %v20849_v2 = vcombine.high %v20819_v49, %v20824_v19  ;;  %v1862_v10 = vor.u32 %v1861_v18, %v1858_v12  ;;  %v1891_v60 = vrot.slane %v1889_v32, 7  ;;  %v16176_v22 = vld [vmem:[%s24297_s1 + $0x2264] ss:$16 sps:$4 sm:$0xff]  }
 0x211   : > { %11495 = vmatpush1.bf16.msra.mxu1 %v16150_v26  ;;  %v10783_v9 = vpop.f32.mrf.mxu0  ;;  %11413 = vmatprep.subr.bf16.mxu0 %v16155_v56  ;;  %v20851_v26 = vor.u32 %v1871_v54, %v1868_v43  ;;  %v16159_v56 = vld [vmem:[%s24297_s1 + $0x20a0] ss:$16 sps:$4 sm:$0xff]   ;;  %v1899_v43 = vshll.u32 %v20398_v45, 16  ;;  %v1909_v12 = vshll.u32 %v24826_v40, 16  ;;  %v1916_v18 = vshrl.u32 %v20435_v4, 16 }
 0x212   : > { %v10866_v29 = vpop.f32.mrf.mxu1  ;;  %11496 = vmatprep.subr.bf16.mxu1 %v16158_v52  ;;  %v20855_v14 = vadd.f32 %v10864_v16, %v10782_v42  ;;  %v10784_v20 = vadd.f32 %v10783_v9, %v20395_v55  ;;  %11287 = vmatprep.mubr.bf16.mxu0 %v20805_v41  ;;  %v1896_v52 = vshrl.u32 %v20398_v45, 16  ;;  %v16167_v55 = vld [vmem:[%s24297_s1 + $0x2084] ss:$16 sps:$4 sm:$0xff]   ;;  %v20876_v16 = vcombine.high %v20833_v7, %v20841_v24 }
 0x213   : > { %11370 = vmatprep.mubr.bf16.mxu1 %v20815_v44  ;;  %v10785_v54 = vpop.f32.mrf.mxu0  ;;  %v16170_v9 = vld [vmem:[%s24297_s1 + $0x2284] ss:$16 sps:$4 sm:$0xff]   ;;  %v1878_v42 = vrot.slane %v1876_v57, 6  ;;  %v1881_v44 = vrot.slane %v1879_v63, 7  ;;  %v1864_v45 = vrot.slane %v1852_v34, 4  ;;  %v1901_v63 = vrot.slane %v1899_v43, 7 }
 0x214   : > { %24825 = vst [vmem:[#allocation179_spill] sm:$0xff] %v20855_v14  ;;  %v10868_v47 = vpop.f32.mrf.mxu1  ;;  %v20878_v41 = vadd.f32 %v10866_v29, %v10784_v20  ;;  %v10786_v35 = vadd.f32 %v10785_v54, %v20412_v58  ;;  %11414 = vmatpush1.bf16.msra.mxu0 %v16153_v31  ;;  %v16165_v58 = vld [vmem:[%s24297_s1 + $0x2080] ss:$16 sps:$4 sm:$0xff]   ;;  %v1874_v32 = vrot.slane %v1862_v10, 4  ;;  %v24829_v54 = vld [vmem:[#allocation190_spill] sm:$0xff]  ;;  %v1853_v43 = vsel %vm20565_vm14, %v1844_v53, %v1852_v34 }
 0x215   : > { %11497 = vmatpush1.bf16.msra.mxu1 %v16156_v62  ;;  %v20882_v14 = vpop.f32.mrf.mxu0  ;;  %11415 = vmatprep.subr.bf16.mxu0 %v16161_v0  ;;  %v16168_v31 = vld [vmem:[%s24297_s1 + $0x2280] ss:$16 sps:$4 sm:$0xff]   ;;  %v1898_v62 = vrot.slane %v1896_v52, 6  ;;  %v1919_v0 = vshll.u32 %v20435_v4, 16  ;;  %v20903_v20 = vor.u32 %v1881_v44, %v1878_v42  ;;  %v1892_v44 = vor.u32 %v1891_v60, %v1888_v36 }
 0x216   : > { %24827 = vst [vmem:[#allocation180_spill] sm:$0xff] %v20882_v14  ;;  %v20884_v59 = vpop.f32.mrf.mxu1  ;;  %11498 = vmatprep.subr.bf16.mxu1 %v16164_v25  ;;  %v20888_v57 = vadd.f32 %v10868_v47, %v10786_v35  ;;  %v16173_v35 = vld [vmem:[%s24297_s1 + $0x2064] ss:$16 sps:$4 sm:$0xff]   ;;  %v1873_v47 = vsel %vm20565_vm14, %v1864_v45, %v20851_v26  ;;  %v1908_v42 = vrot.slane %v1906_v39, 6  ;;  %v16171_v45 = vld [vmem:[%s24297_s1 + $0x2060] ss:$16 sps:$4 sm:$0xff]  }
 0x217   : > { %24828 = vst [vmem:[#allocation208_spill] sm:$0xff] %v20884_v59  ;;  %v10791_v29 = vpop.f32.mrf.mxu0  ;;  %11288 = vmatmul.mubr.bf16.gmra.mxu0 %v20793_v3  ;;  %v16174_v34 = vld [vmem:[%s24297_s1 + $0x2260] ss:$16 sps:$4 sm:$0xff]   ;;  %v1902_v60 = vor.u32 %v1901_v63, %v1898_v62  ;;  %v1921_v39 = vrot.slane %v1919_v0, 7  ;;  %v1904_v63 = vrot.slane %v1892_v44, 4 }
 0x218   : > { %v10874_v25 = vpop.f32.mrf.mxu1  ;;  %11371 = vmatmul.mubr.bf16.gmra.mxu1 %v20807_v17  ;;  %v10792_v52 = vadd.f32 %v10791_v29, %v24829_v54  ;;  %11416 = vmatpush1.bf16.msra.mxu0 %v16159_v56  ;;  %v1911_v29 = vrot.slane %v1909_v12, 7  ;;  %v1918_v56 = vrot.slane %v1916_v18, 6  ;;  %v1883_v12 = vsel %vm20565_vm14, %v1874_v32, %v20903_v20 }
 0x219   : > { %11499 = vmatpush1.bf16.msra.mxu1 %v16162_v61  ;;  %v10793_v59 = vpop.f32.mrf.mxu0  ;;  %11417 = vmatprep.subr.bf16.mxu0 %v16167_v55  ;;  %v16179_v55 = vld [vmem:[%s24297_s1 + $0x2044] ss:$16 sps:$4 sm:$0xff]  }
 0x21a   : > { %v10876_v14 = vpop.f32.mrf.mxu1  ;;  %11500 = vmatprep.subr.bf16.mxu1 %v16170_v9  ;;  %v10794_v61 = vadd.f32 %v10793_v59, %v20476_v6  ;;  %v20915_v54 = vadd.f32 %v10874_v25, %v10792_v52  ;;  %11297 = vmatprep.mubr.bf16.mxu0 %v20849_v2  ;;  %v20927_v6 = vcombine.low %v20819_v49, %v20824_v19  ;;  %v1884_v49 = vrot.slane %v20851_v26, 4  ;;  %v16177_v26 = vld [vmem:[%s24297_s1 + $0x2040] ss:$16 sps:$4 sm:$0xff]  }
 0x21b   : > { %11380 = vmatprep.mubr.bf16.mxu1 %v20876_v16  ;;  %v10795_v36 = vpop.f32.mrf.mxu0  ;;  %v20931_v59 = vcombine.low %v20833_v7, %v20841_v24  ;;  %v1863_v9 = vsel %vm20565_vm14, %v1854_v38, %v1862_v10  ;;  %v16182_v24 = vld [vmem:[%s24297_s1 + $0x2244] ss:$16 sps:$4 sm:$0xff]   ;;  %v20952_v10 = vcombine.high %v1853_v43, %v1873_v47  ;;  %v1914_v25 = vrot.slane %v1902_v60, 4 }
 0x21c   : > { %v10878_v53 = vpop.f32.mrf.mxu1  ;;  %v10796_v18 = vadd.f32 %v10795_v36, %v20486_v5  ;;  %v20942_v62 = vadd.f32 %v10876_v14, %v10794_v61  ;;  %11418 = vmatpush1.bf16.msra.mxu0 %v16165_v58  ;;  %v1912_v5 = vor.u32 %v1911_v29, %v1908_v42  ;;  %v1894_v14 = vrot.slane %v20903_v20, 4  ;;  %v16185_v29 = vld [vmem:[%s24297_s1 + $0x2024] ss:$16 sps:$4 sm:$0xff]  }
 0x21d   : > { %11501 = vmatpush1.bf16.msra.mxu1 %v16168_v31  ;;  %v20945_v19 = vpop.f32.mrf.mxu0  ;;  %11419 = vmatprep.subr.bf16.mxu0 %v16173_v35  ;;  %v16180_v31 = vld [vmem:[%s24297_s1 + $0x2240] ss:$16 sps:$4 sm:$0xff]   ;;  %v20963_v0 = vcombine.high %v1863_v9, %v1883_v12  ;;  %v1922_v35 = vor.u32 %v1921_v39, %v1918_v56  ;;  %v20968_v52 = vcombine.low %v1853_v43, %v1873_v47  ;;  %v16188_v56 = vld [vmem:[%s24297_s1 + $0x2224] ss:$16 sps:$4 sm:$0xff]  }
 0x21e   : > { %24830 = vst [vmem:[#allocation190_spill] sm:$0xff] %v20945_v19  ;;  %v20947_v7 = vpop.f32.mrf.mxu1  ;;  %11502 = vmatprep.subr.bf16.mxu1 %v16176_v22  ;;  %v20955_v58 = vadd.f32 %v10878_v53, %v10796_v18  ;;  %v1893_v61 = vsel %vm20565_vm14, %v1884_v49, %v1892_v44  ;;  %v1903_v43 = vsel %vm20565_vm14, %v1894_v14, %v1902_v60  ;;  %v16186_v44 = vld [vmem:[%s24297_s1 + $0x2220] ss:$16 sps:$4 sm:$0xff]   ;;  %v24833_v18 = vld [vmem:[#allocation146_spill] sm:$0xff] }
 0x21f   : > { %24831 = vst [vmem:[#allocation209_spill] sm:$0xff] %v20947_v7  ;;  %v10801_v38 = vpop.f32.mrf.mxu0  ;;  %11298 = vmatmul.mubr.bf16.gmra.mxu0 %v20927_v6  ;;  %v1923_v39 = vsel %vm20565_vm14, %v1914_v25, %v1922_v35  ;;  %v24832_v60 = vld [vmem:[#allocation145_spill] sm:$0xff]  ;;  %v1973_v49 = vrot.slane %v24833_v18, 7  ;;  %v16257_v19 = vld [vmem:[%s24297_s1 + $0xac] ss:$16 sps:$4 sm:$0xff]  }
 0x220   : > { %v10884_v32 = vpop.f32.mrf.mxu1  ;;  %11381 = vmatmul.mubr.bf16.gmra.mxu1 %v20931_v59  ;;  %v10802_v20 = vadd.f32 %v10801_v38, %v20523_v46  ;;  %11420 = vmatpush1.bf16.msra.mxu0 %v16171_v45  ;;  %v1913_v46 = vsel %vm20565_vm14, %v1904_v63, %v1912_v5  ;;  %v1969_v36 = vrot.slane %v24832_v60, 7  ;;  %v16192_v25 = vld [vmem:[%s24297_s1 + $0x2200] ss:$16 sps:$4 sm:$0xff]   ;;  %v16290_v35 = vld [vmem:[%s24297_s1 + $0x20c] ss:$16 sps:$4 sm:$0xff]  }
 0x221   : > { %11503 = vmatpush1.bf16.msra.mxu1 %v16174_v34  ;;  %v10803_v22 = vpop.f32.mrf.mxu0  ;;  %11421 = vmatprep.subr.bf16.mxu0 %v16179_v55  ;;  %v16183_v34 = vld [vmem:[%s24297_s1 + $0x2020] ss:$16 sps:$4 sm:$0xff]   ;;  %v20996_v55 = vcombine.low %v1863_v9, %v1883_v12  ;;  %v16191_v9 = vld [vmem:[%s24297_s1 + $0x2004] ss:$16 sps:$4 sm:$0xff]   ;;  %v21012_v14 = vcombine.high %v1893_v61, %v1913_v46  ;;  %v1978_v60 = vrot.slane %v1973_v49, 4 }
 0x222   : > { %v10886_v42 = vpop.f32.mrf.mxu1  ;;  %11504 = vmatprep.subr.bf16.mxu1 %v16182_v24  ;;  %v10804_v47 = vadd.f32 %v10803_v22, %v20535_v37  ;;  %v20983_v45 = vadd.f32 %v10884_v32, %v10802_v20  ;;  %11307 = vmatprep.mubr.bf16.mxu0 %v20952_v10  ;;  %v16194_v12 = vld [vmem:[%s24297_s1 + $0x2204] ss:$16 sps:$4 sm:$0xff]   ;;  %v1975_v20 = vrot.slane %v1969_v36, 4 }
 0x223   : > { %11390 = vmatprep.mubr.bf16.mxu1 %v20963_v0  ;;  %v10805_v37 = vpop.f32.mrf.mxu0  ;;  %v24838_v38 = vld [vmem:[#allocation147_spill] sm:$0xff] }
 0x224   : > { %v10888_v53 = vpop.f32.mrf.mxu1  ;;  %v10806_v24 = vadd.f32 %v10805_v37, %v20551_v15  ;;  %v21000_v63 = vadd.f32 %v10886_v42, %v10804_v47  ;;  %11422 = vmatpush1.bf16.msra.mxu0 %v16177_v26  ;;  %v21014_v15 = vcombine.high %v1903_v43, %v1923_v39  ;;  %v13806_v32 = vrot.slane %v24838_v38, 11  ;;  %v16197_v22 = vld [vmem:[%s24297_s1 + $0x21e4] ss:$16 sps:$4 sm:$0xff]  }
 0x225   : > { %11505 = vmatpush1.bf16.msra.mxu1 %v16180_v31  ;;  %v21002_v5 = vpop.f32.mrf.mxu0  ;;  %11423 = vmatprep.subr.bf16.mxu0 %v16185_v29  ;;  %v16189_v31 = vld [vmem:[%s24297_s1 + $0x2000] ss:$16 sps:$4 sm:$0xff]   ;;  %v21037_v38 = vcombine.low %v1893_v61, %v1913_v46  ;;  %v21055_v46 = vcombine.low %v1903_v43, %v1923_v39  ;;  %v24843_v43 = vrot.slane %v20031_v48, 7 }
 0x226   : > { %24834 = vst [vmem:[#allocation145_spill] sm:$0xff] %v21002_v5  ;;  %v21004_v11 = vpop.f32.mrf.mxu1  ;;  %11506 = vmatprep.subr.bf16.mxu1 %v16188_v56  ;;  %v21016_v26 = vadd.f32 %v10888_v53, %v10806_v24  ;;  %v24839_v56 = vld [vmem:[#allocation148_spill] sm:$0xff]  ;;  %v16198_v61 = vld [vmem:[%s24297_s1 + $0x23e0] ss:$16 sps:$4 sm:$0xff]  }
 0x227   : > { %24835 = vst [vmem:[#allocation146_spill] sm:$0xff] %v21004_v11  ;;  %v10811_v42 = vpop.f32.mrf.mxu0  ;;  %11308 = vmatmul.mubr.bf16.gmra.mxu0 %v20968_v52  ;;  %v13807_v47 = vrot.slane %v24839_v56, 11  ;;  %24840 = vst [vmem:[#allocation147_spill] sm:$0xff] %v21037_v38  ;;  %v16200_v56 = vld [vmem:[%s24297_s1 + $0x23e4] ss:$16 sps:$4 sm:$0xff]   ;;  %v21076_v39 = vsel %vm21026_vm1, %v1978_v60, %v24843_v43 }
 0x228   : > { %v10894_v29 = vpop.f32.mrf.mxu1  ;;  %11391 = vmatmul.mubr.bf16.gmra.mxu1 %v20996_v55  ;;  %v10812_v53 = vadd.f32 %v10811_v42, %v20587_v28  ;;  %11424 = vmatpush1.bf16.msra.mxu0 %v16183_v34  ;;  %v16195_v28 = vld [vmem:[%s24297_s1 + $0x21e0] ss:$16 sps:$4 sm:$0xff]   ;;  %24841 = vst [vmem:[#allocation148_spill] sm:$0xff] %v21055_v46 }
 0x229   : > { %11507 = vmatpush1.bf16.msra.mxu1 %v16186_v44  ;;  %v10813_v18 = vpop.f32.mrf.mxu0  ;;  %11425 = vmatprep.subr.bf16.mxu0 %v16191_v9  ;;  %v24842_v9 = vrot.slane %v20023_v33, 7  ;;  %v21070_v42 = vsel %vm21026_vm1, %v13807_v47, %v1973_v49  ;;  %v16203_v49 = vld [vmem:[%s24297_s1 + $0x21c4] ss:$16 sps:$4 sm:$0xff]  }
 0x22a   : > { %v10896_v24 = vpop.f32.mrf.mxu1  ;;  %11508 = vmatprep.subr.bf16.mxu1 %v16194_v12  ;;  %v10814_v37 = vadd.f32 %v10813_v18, %v20620_v13  ;;  %v21046_v11 = vadd.f32 %v10894_v29, %v10812_v53  ;;  %11317 = vmatprep.mubr.bf16.mxu0 %v21012_v14  ;;  %v21060_v13 = vsel %vm21026_vm1, %v13806_v32, %v1969_v36  ;;  %v16206_v47 = vld [vmem:[%s24297_s1 + $0x23c4] ss:$16 sps:$4 sm:$0xff]  }
 0x22b   : > { %11400 = vmatprep.mubr.bf16.mxu1 %v21014_v15  ;;  %v10815_v34 = vpop.f32.mrf.mxu0  ;;  %v21066_v12 = vsel %vm21026_vm1, %v1975_v20, %v24842_v9 }
 0x22c   : > { %v10898_v44 = vpop.f32.mrf.mxu1  ;;  %v10816_v29 = vadd.f32 %v10815_v34, %v20632_v50  ;;  %v21079_v36 = vadd.f32 %v10896_v24, %v10814_v37  ;;  %11426 = vmatpush1.bf16.msra.mxu0 %v16189_v31  ;;  %v16201_v50 = vld [vmem:[%s24297_s1 + $0x21c0] ss:$16 sps:$4 sm:$0xff]   ;;  %v16209_v34 = vld [vmem:[%s24297_s1 + $0x21a4] ss:$16 sps:$4 sm:$0xff]  }
 0x22d   : > { %11509 = vmatpush1.bf16.msra.mxu1 %v16192_v25  ;;  %v21081_v32 = vpop.f32.mrf.mxu0  ;;  %11427 = vmatprep.subr.bf16.mxu0 %v16197_v22  ;;  %v16204_v31 = vld [vmem:[%s24297_s1 + $0x23c0] ss:$16 sps:$4 sm:$0xff]   ;;  %v21101_v25 = vcombine.high %v21060_v13, %v21066_v12  ;;  %v21105_v22 = vcombine.high %v21070_v42, %v21076_v39 }
 0x22e   : > { %24844 = vst [vmem:[#allocation210_spill] sm:$0xff] %v21081_v32  ;;  %v21083_v20 = vpop.f32.mrf.mxu1  ;;  %11510 = vmatprep.subr.bf16.mxu1 %v16200_v56  ;;  %v21091_v60 = vadd.f32 %v10898_v44, %v10816_v29  ;;  %v16212_v44 = vld [vmem:[%s24297_s1 + $0x23a4] ss:$16 sps:$4 sm:$0xff]  }
 0x22f   : > { %24845 = vst [vmem:[#allocation211_spill] sm:$0xff] %v21083_v20  ;;  %24846 = vst [vmem:[#allocation212_spill] sm:$0xff] %v21101_v25  ;;  %v10821_v37 = vpop.f32.mrf.mxu0  ;;  %11318 = vmatmul.mubr.bf16.gmra.mxu0 %v21037_v38  ;;  %v24860_v20 = vld [vmem:[#allocation179_spill] sm:$0xff]  ;;  %v16963_v38 = vld [vmem:[%s24297_s1 + $0x1de8] ss:$16 sps:$4 sm:$0xff]  }
 0x230   : > { %24847 = vst [vmem:[#allocation213_spill] sm:$0xff] %v21105_v22  ;;  %v10904_v53 = vpop.f32.mrf.mxu1  ;;  %11401 = vmatmul.mubr.bf16.gmra.mxu1 %v21055_v46  ;;  %v10822_v18 = vadd.f32 %v10821_v37, %v20658_v1  ;;  %11428 = vmatpush2.bf16.msra.mxu0 %v16195_v28  ;;  %v16207_v1 = vld [vmem:[%s24297_s1 + $0x21a0] ss:$16 sps:$4 sm:$0xff]   ;;  %v16218_v37 = vld [vmem:[%s24297_s1 + $0x2384] ss:$16 sps:$4 sm:$0xff]  }
 0x231   : > { %11511 = vmatpush2.bf16.msra.mxu1 %v16198_v61  ;;  %v10823_v24 = vpop.f32.mrf.mxu0  ;;  %11429 = vmatprep.subr.bf16.mxu0 %v16203_v49  ;;  %v16210_v28 = vld [vmem:[%s24297_s1 + $0x23a0] ss:$16 sps:$4 sm:$0xff]  }
 0x232   : > { %v10906_v56 = vpop.f32.mrf.mxu1  ;;  %11512 = vmatprep.subr.bf16.mxu1 %v16206_v47  ;;  %v10824_v9 = vadd.f32 %v10823_v24, %v20669_v23  ;;  %v21117_v43 = vadd.f32 %v10904_v53, %v10822_v18  ;;  %11443 = vmatprep.mubr.bf16.mxu0 %v21101_v25  ;;  %v16215_v23 = vld [vmem:[%s24297_s1 + $0x2184] ss:$16 sps:$4 sm:$0xff]   ;;  %v16219_v24 = vld [vmem:[%s24297_s1 + $0x2160] ss:$16 sps:$4 sm:$0xff]   ;;  %v16927_v25 = vld [vmem:[%s24297_s1 + $0x1ca8] ss:$16 sps:$4 sm:$0xff]  }
 0x233   : > { %11526 = vmatprep.mubr.bf16.mxu1 %v21105_v22  ;;  %v10825_v61 = vpop.f32.mrf.mxu0  ;;  %v16224_v18 = vld [vmem:[%s24297_s1 + $0x2364] ss:$16 sps:$4 sm:$0xff]  }
 0x234   : > { %v10908_v29 = vpop.f32.mrf.mxu1  ;;  %v10826_v49 = vadd.f32 %v10825_v61, %v20677_v27  ;;  %v21128_v47 = vadd.f32 %v10906_v56, %v10824_v9  ;;  %11430 = vmatpush2.bf16.msra.mxu0 %v16201_v50  ;;  %v16213_v27 = vld [vmem:[%s24297_s1 + $0x2180] ss:$16 sps:$4 sm:$0xff]   ;;  %v16236_v61 = vld [vmem:[%s24297_s1 + $0x2324] ss:$16 sps:$4 sm:$0xff]  }
 0x235   : > { %11513 = vmatpush2.bf16.msra.mxu1 %v16204_v31  ;;  %11431 = vmatprep.subr.bf16.mxu0 %v16209_v34  ;;  %v16216_v50 = vld [vmem:[%s24297_s1 + $0x2380] ss:$16 sps:$4 sm:$0xff]   ;;  %v16221_v31 = vld [vmem:[%s24297_s1 + $0x2164] ss:$16 sps:$4 sm:$0xff]  }
 0x236   : > { %11514 = vmatprep.subr.bf16.mxu1 %v16212_v44  ;;  %v21136_v53 = vadd.f32 %v10908_v29, %v10826_v49  ;;  %v16222_v56 = vld [vmem:[%s24297_s1 + $0x2360] ss:$16 sps:$4 sm:$0xff]   ;;  %v16227_v34 = vld [vmem:[%s24297_s1 + $0x2144] ss:$16 sps:$4 sm:$0xff]   ;;  %v1982_v29 = vrot.slane %v20200_v51, 7  ;;  %v1985_v49 = vrot.slane %v20217_v30, 7 }
 0x237   : > { %v16230_v44 = vld [vmem:[%s24297_s1 + $0x2344] ss:$16 sps:$4 sm:$0xff]   ;;  %v16225_v9 = vld [vmem:[%s24297_s1 + $0x2140] ss:$16 sps:$4 sm:$0xff]   ;;  %v24848_v30 = vrot.slane %v20023_v33, 7 }
 0x238   : > { %11432 = vmatpush2.bf16.msra.mxu0 %v16207_v1  ;;  %v16228_v1 = vld [vmem:[%s24297_s1 + $0x2340] ss:$16 sps:$4 sm:$0xff]   ;;  %v16242_v51 = vld [vmem:[%s24297_s1 + $0x2304] ss:$16 sps:$4 sm:$0xff]  }
 0x239   : > { %11515 = vmatpush2.bf16.msra.mxu1 %v16210_v28  ;;  %11433 = vmatprep.subr.bf16.mxu0 %v16215_v23  ;;  %v16233_v28 = vld [vmem:[%s24297_s1 + $0x2124] ss:$16 sps:$4 sm:$0xff]   ;;  %v16231_v23 = vld [vmem:[%s24297_s1 + $0x2120] ss:$16 sps:$4 sm:$0xff]  }
 0x23a   : > { %11516 = vmatprep.subr.bf16.mxu1 %v16218_v37  ;;  %v16234_v37 = vld [vmem:[%s24297_s1 + $0x2320] ss:$16 sps:$4 sm:$0xff]  }
 0x23b   : > { %v16240_v33 = vld [vmem:[%s24297_s1 + $0x2300] ss:$16 sps:$4 sm:$0xff]  }
 0x23c   : > { %11434 = vmatpush2.bf16.msra.mxu0 %v16213_v27  ;;  %v16239_v27 = vld [vmem:[%s24297_s1 + $0x2104] ss:$16 sps:$4 sm:$0xff]  }
 0x23d   : > { %11517 = vmatpush2.bf16.msra.mxu1 %v16216_v50  ;;  %11435 = vmatprep.subr.bf16.mxu0 %v16221_v31  ;;  %v1981_v50 = vrot.slane %v24848_v30, 4  ;;  %v1987_v31 = vrot.slane %v1982_v29, 4 }
 0x23e   : > { %11518 = vmatprep.subr.bf16.mxu1 %v16224_v18  ;;  %v1988_v18 = vrot.slane %v20219_v8, 7  ;;  %v16248_v8 = vld [vmem:[%s24297_s1 + $0x2ec] ss:$16 sps:$4 sm:$0xff]  }
 0x240   : > { %11436 = vmatpush2.bf16.msra.mxu0 %v16219_v24  ;;  %v24849_v24 = vrot.slane %v20031_v48, 7  ;;  %v16245_v48 = vld [vmem:[%s24297_s1 + $0xec] ss:$16 sps:$4 sm:$0xff]  }
 0x241   : > { %11519 = vmatpush2.bf16.msra.mxu1 %v16222_v56  ;;  %11437 = vmatprep.subr.bf16.mxu0 %v16227_v34  ;;  %v1990_v34 = vrot.slane %v1985_v49, 4 }
 0x242   : > { %11520 = vmatprep.subr.bf16.mxu1 %v16230_v44  ;;  %v1984_v56 = vrot.slane %v24849_v24, 4  ;;  %v1991_v44 = vrot.slane %v24810_v21, 7  ;;  %v24850_v21 = vld [vmem:[#allocation159_spill] sm:$0xff]  ;;  %v21233_v24 = vpop.f32.mrf.mxu0 }
 0x244   : > { %11438 = vmatpush2.bf16.msra.mxu0 %v16225_v9  ;;  %v16237_v9 = vld [vmem:[%s24297_s1 + $0x2100] ss:$16 sps:$4 sm:$0xff]  }
 0x245   : > { %11521 = vmatpush2.bf16.msra.mxu1 %v16228_v1  ;;  %11439 = vmatprep.subr.bf16.mxu0 %v16233_v28  ;;  %v1994_v1 = vrot.slane %v24850_v21, 7  ;;  %v21209_v28 = vcombine.low %v21060_v13, %v21066_v12  ;;  %v16251_v13 = vld [vmem:[%s24297_s1 + $0xcc] ss:$16 sps:$4 sm:$0xff]   ;;  %v1989_v12 = vsel %vm21026_vm1, %v1987_v31, %v1988_v18  ;;  %v1993_v31 = vrot.slane %v1988_v18, 4 }
 0x246   : > { %11522 = vmatprep.subr.bf16.mxu1 %v16236_v61  ;;  %v21213_v61 = vcombine.low %v21070_v42, %v21076_v39  ;;  %v1986_v42 = vsel %vm21026_vm1, %v1984_v56, %v1985_v49  ;;  %v1992_v39 = vsel %vm21026_vm1, %v1990_v34, %v1991_v44  ;;  %v24856_v49 = vld [vmem:[#allocation161_spill] sm:$0xff]  ;;  %v16249_v34 = vld [vmem:[%s24297_s1 + $0xc8] ss:$16 sps:$4 sm:$0xff]   ;;  %v1996_v18 = vrot.slane %v1991_v44, 4 }
 0x247   : > { %24851 = vst [vmem:[#allocation159_spill] sm:$0xff] %v21209_v28  ;;  %v1999_v21 = vrot.slane %v1994_v1, 4  ;;  %v2000_v56 = vrot.slane %v24856_v49, 7  ;;  %v21263_v44 = vsel %vm21026_vm1, %v1993_v31, %v1994_v1  ;;  %v16258_v1 = vld [vmem:[%s24297_s1 + $0x2a8] ss:$16 sps:$4 sm:$0xff]  }
 0x248   : > { %11440 = vmatpush2.bf16.msra.mxu0 %v16231_v23  ;;  %24852 = vst [vmem:[#allocation214_spill] sm:$0xff] %v21213_v61  ;;  %v16243_v23 = vld [vmem:[%s24297_s1 + $0xe8] ss:$16 sps:$4 sm:$0xff]  }
 0x249   : > { %11523 = vmatpush2.bf16.msra.mxu1 %v16234_v37  ;;  %11441 = vmatprep.subr.bf16.mxu0 %v16239_v27  ;;  %v16246_v37 = vld [vmem:[%s24297_s1 + $0x2e8] ss:$16 sps:$4 sm:$0xff]   ;;  %v1983_v27 = vsel %vm21026_vm1, %v1981_v50, %v1982_v29  ;;  %v21235_v29 = vpop.f32.mrf.mxu1  ;;  %v16254_v50 = vld [vmem:[%s24297_s1 + $0x2cc] ss:$16 sps:$4 sm:$0xff]  }
 0x24a   : > { %11524 = vmatprep.subr.bf16.mxu1 %v16242_v51  ;;  %v24853_v51 = vld [vmem:[#allocation162_spill] sm:$0xff]  ;;  %24855 = vst [vmem:[#allocation215_spill] sm:$0xff] %v21235_v29  ;;  %v24859_v29 = vld [vmem:[#allocation165_spill] sm:$0xff]  ;;  %v24862_v31 = vld [vmem:[#allocation164_spill] sm:$0xff] }
 0x24b   : > { %v1997_v30 = vrot.slane %v24853_v51, 7  ;;  %24854 = vst [vmem:[#allocation162_spill] sm:$0xff] %v21233_v24  ;;  %v2003_v24 = vrot.slane %v24859_v29, 7 }
 0x24c   : > { %11442 = vmatpush2.bf16.msra.mxu0 %v16237_v9  ;;  %v16252_v9 = vld [vmem:[%s24297_s1 + $0x2c8] ss:$16 sps:$4 sm:$0xff]  }
 0x24d   : > { %11525 = vmatpush2.bf16.msra.mxu1 %v16240_v33  ;;  %11577 = vmatprep.subr.bf16.mxu0 %v16245_v48  ;;  %v21247_v33 = vcombine.high %v1983_v27, %v1989_v12  ;;  %v21249_v48 = vcombine.high %v1986_v42, %v1992_v39  ;;  %v2002_v49 = vrot.slane %v1997_v30, 4 }
 0x24e   : > { %11660 = vmatprep.subr.bf16.mxu1 %v16248_v8 }
 0x24f   : > { %24857 = vst [vmem:[#allocation161_spill] sm:$0xff] %v21247_v33  ;;  %24858 = vst [vmem:[#allocation216_spill] sm:$0xff] %v21249_v48  ;;  %v10947_v8 = vpop.f32.mrf.mxu0  ;;  %11444 = vmatmul.mubr.bf16.vlgmr.msra.gmra.mxu0 %v21209_v28  ;;  %v2005_v28 = vrot.slane %v2000_v56, 4 }
 0x250   : > { %v11030_v51 = vpop.f32.mrf.mxu1  ;;  %11527 = vmatmul.mubr.bf16.vlgmr.msra.gmra.mxu1 %v21213_v61  ;;  %v10948_v32 = vadd.f32 %v10947_v8, %v24860_v20  ;;  %11578 = vmatpush1.bf16.msra.mxu0 %v16243_v23  ;;  %v16260_v61 = vld [vmem:[%s24297_s1 + $0x2ac] ss:$16 sps:$4 sm:$0xff]   ;;  %v2001_v20 = vsel %vm21026_vm1, %v1999_v21, %v2000_v56  ;;  %v24861_v23 = vld [vmem:[#allocation163_spill] sm:$0xff]  ;;  %v2009_v21 = vrot.slane %v24862_v31, 7  ;;  %v2004_v31 = vsel %vm21026_vm1, %v2002_v49, %v2003_v24 }
 0x251   : > { %11661 = vmatpush1.bf16.msra.mxu1 %v16246_v37  ;;  %v10949_v5 = vpop.f32.mrf.mxu0  ;;  %11579 = vmatprep.subr.bf16.mxu0 %v16251_v13  ;;  %v2006_v37 = vrot.slane %v24861_v23, 7  ;;  %v2008_v49 = vrot.slane %v2003_v24, 4 }
 0x252   : > { %v11032_v7 = vpop.f32.mrf.mxu1  ;;  %11662 = vmatprep.subr.bf16.mxu1 %v16254_v50  ;;  %v21268_v29 = vadd.f32 %v11030_v51, %v10948_v32  ;;  %v10950_v13 = vadd.f32 %v10949_v5, %v20878_v41  ;;  %11453 = vmatprep.mubr.bf16.mxu0 %v21247_v33  ;;  %v16255_v50 = vld [vmem:[%s24297_s1 + $0xa8] ss:$16 sps:$4 sm:$0xff]   ;;  %v21280_v32 = vcombine.low %v1983_v27, %v1989_v12  ;;  %v16263_v41 = vld [vmem:[%s24297_s1 + $0x8c] ss:$16 sps:$4 sm:$0xff]  }
 0x253   : > { %11536 = vmatprep.mubr.bf16.mxu1 %v21249_v48  ;;  %v10951_v8 = vpop.f32.mrf.mxu0  ;;  %v21282_v51 = vcombine.low %v1986_v42, %v1992_v39  ;;  %v16266_v5 = vld [vmem:[%s24297_s1 + $0x28c] ss:$16 sps:$4 sm:$0xff]   ;;  %v1998_v33 = vsel %vm21026_vm1, %v1996_v18, %v1997_v30  ;;  %v21298_v12 = vcombine.high %v21263_v44, %v2001_v20  ;;  %v2011_v30 = vrot.slane %v2006_v37, 4 }
 0x254   : > { %v11034_v23 = vpop.f32.mrf.mxu1  ;;  %24863 = vst [vmem:[#allocation165_spill] sm:$0xff] %v21280_v32  ;;  %v21294_v48 = vadd.f32 %v11032_v7, %v10950_v13  ;;  %v10952_v27 = vadd.f32 %v10951_v8, %v20888_v57  ;;  %11580 = vmatpush1.bf16.msra.mxu0 %v16249_v34  ;;  %v24868_v18 = vld [vmem:[#allocation168_spill] sm:$0xff]  ;;  %v2014_v13 = vrot.slane %v2009_v21, 4 }
 0x255   : > { %24864 = vst [vmem:[#allocation179_spill] sm:$0xff] %v21282_v51  ;;  %11663 = vmatpush1.bf16.msra.mxu1 %v16252_v9  ;;  %24865 = vst [vmem:[#allocation163_spill] sm:$0xff] %v21298_v12  ;;  %v21300_v42 = vpop.f32.mrf.mxu0  ;;  %11581 = vmatprep.subr.bf16.mxu0 %v16257_v19  ;;  %v2012_v22 = vrot.slane %v24868_v18, 7  ;;  %v16261_v57 = vld [vmem:[%s24297_s1 + $0x88] ss:$16 sps:$4 sm:$0xff]   ;;  %v21313_v9 = vcombine.high %v1998_v33, %v2004_v31  ;;  %v24870_v19 = vld [vmem:[#allocation169_spill] sm:$0xff] }
 0x256   : > { %24866 = vst [vmem:[#allocation164_spill] sm:$0xff] %v21300_v42  ;;  %v21302_v39 = vpop.f32.mrf.mxu1  ;;  %11664 = vmatprep.subr.bf16.mxu1 %v16260_v61  ;;  %v21305_v7 = vadd.f32 %v11034_v23, %v10952_v27  ;;  %v16264_v34 = vld [vmem:[%s24297_s1 + $0x288] ss:$16 sps:$4 sm:$0xff]   ;;  %v2015_v61 = vrot.slane %v24870_v19, 7  ;;  %v16269_v18 = vld [vmem:[%s24297_s1 + $0x6c] ss:$16 sps:$4 sm:$0xff]  }
 0x257   : > { %24867 = vst [vmem:[#allocation217_spill] sm:$0xff] %v21302_v39  ;;  %24869 = vst [vmem:[#allocation168_spill] sm:$0xff] %v21313_v9  ;;  %v10957_v56 = vpop.f32.mrf.mxu0  ;;  %11454 = vmatmul.mubr.bf16.gmra.mxu0 %v21280_v32  ;;  %v16272_v19 = vld [vmem:[%s24297_s1 + $0x26c] ss:$16 sps:$4 sm:$0xff]   ;;  %v2007_v32 = vsel %vm21026_vm1, %v2005_v28, %v2006_v37  ;;  %v16270_v28 = vld [vmem:[%s24297_s1 + $0x268] ss:$16 sps:$4 sm:$0xff]  }
 0x258   : > { %v11040_v8 = vpop.f32.mrf.mxu1  ;;  %11537 = vmatmul.mubr.bf16.gmra.mxu1 %v21282_v51  ;;  %v10958_v24 = vadd.f32 %v10957_v56, %v20915_v54  ;;  %11582 = vmatpush1.bf16.msra.mxu0 %v16255_v50  ;;  %v2013_v54 = vsel %vm21026_vm1, %v2011_v30, %v2012_v22  ;;  %v2010_v50 = vsel %vm21026_vm1, %v2008_v49, %v2009_v21  ;;  %v24871_v21 = vld [vmem:[#allocation178_spill] sm:$0xff] }
 0x259   : > { %11665 = vmatpush1.bf16.msra.mxu1 %v16258_v1  ;;  %v10959_v23 = vpop.f32.mrf.mxu0  ;;  %11583 = vmatprep.subr.bf16.mxu0 %v16263_v41  ;;  %v2016_v37 = vsel %vm21026_vm1, %v2014_v13, %v2015_v61  ;;  %v2018_v30 = vrot.slane %v24871_v21, 7  ;;  %v21346_v56 = vcombine.low %v21263_v44, %v2001_v20  ;;  %v16275_v44 = vld [vmem:[%s24297_s1 + $0x4c] ss:$16 sps:$4 sm:$0xff]   ;;  %v21364_v20 = vcombine.high %v2007_v32, %v2013_v54  ;;  %v16771_v39 = vld [vmem:[%s24297_s1 + $0x15e8] ss:$16 sps:$4 sm:$0xff]  }
 0x25a   : > { %v11042_v27 = vpop.f32.mrf.mxu1  ;;  %11666 = vmatprep.subr.bf16.mxu1 %v16266_v5  ;;  %v10960_v1 = vadd.f32 %v10959_v23, %v20942_v62  ;;  %v21332_v41 = vadd.f32 %v11040_v8, %v10958_v24  ;;  %11463 = vmatprep.mubr.bf16.mxu0 %v21298_v12  ;;  %v16267_v5 = vld [vmem:[%s24297_s1 + $0x68] ss:$16 sps:$4 sm:$0xff]   ;;  %v21348_v8 = vcombine.low %v1998_v33, %v2004_v31  ;;  %v24874_v24 = vld [vmem:[#allocation181_spill] sm:$0xff]  ;;  %v16278_v33 = vld [vmem:[%s24297_s1 + $0x24c] ss:$16 sps:$4 sm:$0xff]  }
 0x25b   : > { %11546 = vmatprep.mubr.bf16.mxu1 %v21313_v9  ;;  %v10961_v62 = vpop.f32.mrf.mxu0  ;;  %24872 = vst [vmem:[#allocation169_spill] sm:$0xff] %v21346_v56  ;;  %v2021_v23 = vrot.slane %v24874_v24, 7  ;;  %24877 = vst [vmem:[#allocation219_spill] sm:$0xff] %v21364_v20 }
 0x25c   : > { %v11044_v49 = vpop.f32.mrf.mxu1  ;;  %24873 = vst [vmem:[#allocation178_spill] sm:$0xff] %v21348_v8  ;;  %v10962_v12 = vadd.f32 %v10961_v62, %v20955_v58  ;;  %v21352_v51 = vadd.f32 %v11042_v27, %v10960_v1  ;;  %11584 = vmatpush1.bf16.msra.mxu0 %v16261_v57  ;;  %v21366_v58 = vcombine.high %v2010_v50, %v2016_v37  ;;  %v16273_v57 = vld [vmem:[%s24297_s1 + $0x48] ss:$16 sps:$4 sm:$0xff]   ;;  %v2017_v27 = vrot.slane %v2012_v22, 4 }
 0x25d   : > { %11667 = vmatpush1.bf16.msra.mxu1 %v16264_v34  ;;  %v21354_v9 = vpop.f32.mrf.mxu0  ;;  %11585 = vmatprep.subr.bf16.mxu0 %v16269_v18  ;;  %v16276_v34 = vld [vmem:[%s24297_s1 + $0x248] ss:$16 sps:$4 sm:$0xff]   ;;  %v2023_v18 = vrot.slane %v2018_v30, 4  ;;  %v2026_v62 = vrot.slane %v2021_v23, 4  ;;  %v21381_v22 = vcombine.low %v2007_v32, %v2013_v54  ;;  %v21399_v54 = vcombine.low %v2010_v50, %v2016_v37 }
 0x25e   : > { %24875 = vst [vmem:[#allocation181_spill] sm:$0xff] %v21354_v9  ;;  %v21356_v13 = vpop.f32.mrf.mxu1  ;;  %11668 = vmatprep.subr.bf16.mxu1 %v16272_v19  ;;  %24878 = vst [vmem:[#allocation220_spill] sm:$0xff] %v21366_v58  ;;  %v21368_v31 = vadd.f32 %v11044_v49, %v10962_v12  ;;  %v2024_v19 = vrot.slane %v24826_v40, 7  ;;  %v2020_v12 = vrot.slane %v2015_v61, 4  ;;  %v2027_v49 = vrot.slane %v20435_v4, 7 }
 0x25f   : > { %24876 = vst [vmem:[#allocation218_spill] sm:$0xff] %v21356_v13  ;;  %v10967_v1 = vpop.f32.mrf.mxu0  ;;  %11464 = vmatmul.mubr.bf16.gmra.mxu0 %v21346_v56  ;;  %24879 = vst [vmem:[#allocation221_spill] sm:$0xff] %v21381_v22  ;;  %v16281_v40 = vld [vmem:[%s24297_s1 + $0x2c] ss:$16 sps:$4 sm:$0xff]   ;;  %v16282_v32 = vld [vmem:[%s24297_s1 + $0x228] ss:$16 sps:$4 sm:$0xff]  }
 0x260   : > { %v11050_v21 = vpop.f32.mrf.mxu1  ;;  %11547 = vmatmul.mubr.bf16.gmra.mxu1 %v21348_v8  ;;  %v10968_v24 = vadd.f32 %v10967_v1, %v20983_v45  ;;  %11586 = vmatpush1.bf16.msra.mxu0 %v16267_v5  ;;  %v16284_v61 = vld [vmem:[%s24297_s1 + $0x22c] ss:$16 sps:$4 sm:$0xff]   ;;  %v16279_v45 = vld [vmem:[%s24297_s1 + $0x28] ss:$16 sps:$4 sm:$0xff]   ;;  %24880 = vst [vmem:[#allocation222_spill] sm:$0xff] %v21399_v54 }
 0x261   : > { %11669 = vmatpush1.bf16.msra.mxu1 %v16270_v28  ;;  %v10969_v13 = vpop.f32.mrf.mxu0  ;;  %11587 = vmatprep.subr.bf16.mxu0 %v16275_v44  ;;  %v2022_v44 = vsel %vm21026_vm1, %v2020_v12, %v2021_v23  ;;  %v16735_v56 = vld [vmem:[%s24297_s1 + $0x14a8] ss:$16 sps:$4 sm:$0xff]  }
 0x262   : > { %v11052_v9 = vpop.f32.mrf.mxu1  ;;  %11670 = vmatprep.subr.bf16.mxu1 %v16278_v33  ;;  %v10970_v4 = vadd.f32 %v10969_v13, %v21000_v63  ;;  %v21390_v8 = vadd.f32 %v11050_v21, %v10968_v24  ;;  %11473 = vmatprep.mubr.bf16.mxu0 %v21364_v20  ;;  %v2019_v63 = vsel %vm21026_vm1, %v2017_v27, %v2018_v30  ;;  %v16287_v30 = vld [vmem:[%s24297_s1 + $0xc] ss:$16 sps:$4 sm:$0xff]  }
 0x263   : > { %11556 = vmatprep.mubr.bf16.mxu1 %v21366_v58  ;;  %v10971_v5 = vpop.f32.mrf.mxu0  ;;  %v2025_v13 = vsel %vm21026_vm1, %v2023_v18, %v2024_v19  ;;  %v2028_v33 = vsel %vm21026_vm1, %v2026_v62, %v2027_v49  ;;  %v16293_v49 = vld [vmem:[%s24297_s1 + $0x1ec] ss:$16 sps:$4 sm:$0xff]  }
 0x264   : > { %v11054_v28 = vpop.f32.mrf.mxu1  ;;  %v10972_v1 = vadd.f32 %v10971_v5, %v21016_v26  ;;  %v21411_v50 = vadd.f32 %v11052_v9, %v10970_v4  ;;  %11588 = vmatpush1.bf16.msra.mxu0 %v16273_v57  ;;  %v16285_v26 = vld [vmem:[%s24297_s1 + $0x8] ss:$16 sps:$4 sm:$0xff]   ;;  %v21431_v57 = vcombine.high %v2019_v63, %v2025_v13  ;;  %v16296_v24 = vld [vmem:[%s24297_s1 + $0x3ec] ss:$16 sps:$4 sm:$0xff]   ;;  %v21455_v5 = vcombine.low %v2019_v63, %v2025_v13 }
 0x265   : > { %11671 = vmatpush1.bf16.msra.mxu1 %v16276_v34  ;;  %v21413_v37 = vpop.f32.mrf.mxu0  ;;  %11589 = vmatprep.subr.bf16.mxu0 %v16281_v40  ;;  %v16288_v9 = vld [vmem:[%s24297_s1 + $0x208] ss:$16 sps:$4 sm:$0xff]   ;;  %v21433_v34 = vcombine.high %v2022_v44, %v2028_v33  ;;  %v16302_v63 = vld [vmem:[%s24297_s1 + $0x3cc] ss:$16 sps:$4 sm:$0xff]  }
 0x266   : > { %24881 = vst [vmem:[#allocation223_spill] sm:$0xff] %v21413_v37  ;;  %v21415_v21 = vpop.f32.mrf.mxu1  ;;  %11672 = vmatprep.subr.bf16.mxu1 %v16284_v61  ;;  %v21423_v23 = vadd.f32 %v11054_v28, %v10972_v1  ;;  %24883 = vst [vmem:[#allocation225_spill] sm:$0xff] %v21431_v57  ;;  %v16294_v4 = vld [vmem:[%s24297_s1 + $0x3e8] ss:$16 sps:$4 sm:$0xff]   ;;  %v21457_v28 = vcombine.low %v2022_v44, %v2028_v33 }
 0x267   : > { %24882 = vst [vmem:[#allocation224_spill] sm:$0xff] %v21415_v21  ;;  %24884 = vst [vmem:[#allocation226_spill] sm:$0xff] %v21433_v34  ;;  %v10977_v27 = vpop.f32.mrf.mxu0  ;;  %11474 = vmatmul.mubr.bf16.gmra.mxu0 %v21381_v22  ;;  %v16300_v44 = vld [vmem:[%s24297_s1 + $0x3c8] ss:$16 sps:$4 sm:$0xff]  }
 0x268   : > { %v11060_v18 = vpop.f32.mrf.mxu1  ;;  %11557 = vmatmul.mubr.bf16.gmra.mxu1 %v21399_v54  ;;  %v10978_v19 = vadd.f32 %v10977_v27, %v21046_v11  ;;  %11590 = vmatpush1.bf16.msra.mxu0 %v16279_v45  ;;  %v16291_v11 = vld [vmem:[%s24297_s1 + $0x1e8] ss:$16 sps:$4 sm:$0xff]   ;;  %24885 = vst [vmem:[#allocation227_spill] sm:$0xff] %v21455_v5  ;;  %24886 = vst [vmem:[#allocation228_spill] sm:$0xff] %v21457_v28  ;;  %v16299_v27 = vld [vmem:[%s24297_s1 + $0x1cc] ss:$16 sps:$4 sm:$0xff]  }
 0x269   : > { %11673 = vmatpush1.bf16.msra.mxu1 %v16282_v32  ;;  %v10979_v12 = vpop.f32.mrf.mxu0  ;;  %11591 = vmatprep.subr.bf16.mxu0 %v16287_v30  ;;  %v25016_v21 = vld [vmem:[#allocation104_spill] sm:$0xff] }
 0x26a   : > { %v11062_v62 = vpop.f32.mrf.mxu1  ;;  %11674 = vmatprep.subr.bf16.mxu1 %v16290_v35  ;;  %v10980_v40 = vadd.f32 %v10979_v12, %v21079_v36  ;;  %v21445_v61 = vadd.f32 %v11060_v18, %v10978_v19  ;;  %11483 = vmatprep.mubr.bf16.mxu0 %v21431_v57  ;;  %v16305_v12 = vld [vmem:[%s24297_s1 + $0x1ac] ss:$16 sps:$4 sm:$0xff]  }
 0x26b   : > { %11566 = vmatprep.mubr.bf16.mxu1 %v21433_v34  ;;  %v10981_v45 = vpop.f32.mrf.mxu0 }
 0x26c   : > { %v11064_v32 = vpop.f32.mrf.mxu1  ;;  %v10982_v36 = vadd.f32 %v10981_v45, %v21091_v60  ;;  %v21460_v1 = vadd.f32 %v11062_v62, %v10980_v40  ;;  %11592 = vmatpush1.bf16.msra.mxu0 %v16285_v26  ;;  %v16297_v60 = vld [vmem:[%s24297_s1 + $0x1c8] ss:$16 sps:$4 sm:$0xff]   ;;  %v16308_v62 = vld [vmem:[%s24297_s1 + $0x3ac] ss:$16 sps:$4 sm:$0xff]  }
 0x26d   : > { %11675 = vmatpush1.bf16.msra.mxu1 %v16288_v9  ;;  %v21462_v30 = vpop.f32.mrf.mxu0  ;;  %11593 = vmatprep.subr.bf16.mxu0 %v16293_v49  ;;  %v16306_v40 = vld [vmem:[%s24297_s1 + $0x3a8] ss:$16 sps:$4 sm:$0xff]  }
 0x26e   : > { %24887 = vst [vmem:[#allocation229_spill] sm:$0xff] %v21462_v30  ;;  %v21464_v35 = vpop.f32.mrf.mxu1  ;;  %11676 = vmatprep.subr.bf16.mxu1 %v16296_v24  ;;  %v21472_v13 = vadd.f32 %v11064_v32, %v10982_v36 }
 0x26f   : > { %24888 = vst [vmem:[#allocation230_spill] sm:$0xff] %v21464_v35  ;;  %v10987_v33 = vpop.f32.mrf.mxu0  ;;  %11484 = vmatmul.mubr.bf16.gmra.mxu0 %v21455_v5 }
 0x270   : > { %v11070_v26 = vpop.f32.mrf.mxu1  ;;  %11567 = vmatmul.mubr.bf16.gmra.mxu1 %v21457_v28  ;;  %v10988_v9 = vadd.f32 %v10987_v33, %v21117_v43  ;;  %11594 = vmatpush2.bf16.msra.mxu0 %v16291_v11  ;;  %v16303_v43 = vld [vmem:[%s24297_s1 + $0x1a8] ss:$16 sps:$4 sm:$0xff]   ;;  %v24889_v11 = vld [vmem:[#allocation3_spill] sm:$0xff] }
 0x271   : > { %11677 = vmatpush2.bf16.msra.mxu1 %v16294_v4  ;;  %v10989_v18 = vpop.f32.mrf.mxu0  ;;  %11595 = vmatprep.subr.bf16.mxu0 %v16299_v27  ;;  %v24890_v4 = vld [vmem:[#allocation4_spill] sm:$0xff] }
 0x272   : > { %v11072_v19 = vpop.f32.mrf.mxu1  ;;  %11678 = vmatprep.subr.bf16.mxu1 %v16302_v63  ;;  %v10990_v49 = vadd.f32 %v10989_v18, %v21128_v47  ;;  %v21490_v24 = vadd.f32 %v11070_v26, %v10988_v9  ;;  %11609 = vmatprep.mubr.bf16.mxu0 %v24889_v11  ;;  %v16311_v47 = vld [vmem:[%s24297_s1 + $0x18c] ss:$16 sps:$4 sm:$0xff]   ;;  %v16315_v9 = vld [vmem:[%s24297_s1 + $0x168] ss:$16 sps:$4 sm:$0xff]  }
 0x273   : > { %11692 = vmatprep.mubr.bf16.mxu1 %v24890_v4  ;;  %v10991_v45 = vpop.f32.mrf.mxu0  ;;  %v16314_v63 = vld [vmem:[%s24297_s1 + $0x38c] ss:$16 sps:$4 sm:$0xff]   ;;  %v16318_v18 = vld [vmem:[%s24297_s1 + $0x368] ss:$16 sps:$4 sm:$0xff]  }
 0x274   : > { %v11074_v32 = vpop.f32.mrf.mxu1  ;;  %v10992_v36 = vadd.f32 %v10991_v45, %v21136_v53  ;;  %v21501_v27 = vadd.f32 %v11072_v19, %v10990_v49  ;;  %11596 = vmatpush2.bf16.msra.mxu0 %v16297_v60  ;;  %v16309_v53 = vld [vmem:[%s24297_s1 + $0x188] ss:$16 sps:$4 sm:$0xff]   ;;  %v16320_v26 = vld [vmem:[%s24297_s1 + $0x36c] ss:$16 sps:$4 sm:$0xff]  }
 0x275   : > { %11679 = vmatpush2.bf16.msra.mxu1 %v16300_v44  ;;  %11597 = vmatprep.subr.bf16.mxu0 %v16305_v12  ;;  %v16312_v60 = vld [vmem:[%s24297_s1 + $0x388] ss:$16 sps:$4 sm:$0xff]   ;;  %v16317_v44 = vld [vmem:[%s24297_s1 + $0x16c] ss:$16 sps:$4 sm:$0xff]  }
 0x276   : > { %11680 = vmatprep.subr.bf16.mxu1 %v16308_v62  ;;  %v21509_v33 = vadd.f32 %v11074_v32, %v10992_v36  ;;  %v16323_v19 = vld [vmem:[%s24297_s1 + $0x14c] ss:$16 sps:$4 sm:$0xff]   ;;  %v16321_v62 = vld [vmem:[%s24297_s1 + $0x148] ss:$16 sps:$4 sm:$0xff]  }
 0x277   : > { %v16326_v12 = vld [vmem:[%s24297_s1 + $0x34c] ss:$16 sps:$4 sm:$0xff]   ;;  %v16324_v49 = vld [vmem:[%s24297_s1 + $0x348] ss:$16 sps:$4 sm:$0xff]  }
 0x278   : > { %11598 = vmatpush2.bf16.msra.mxu0 %v16303_v43  ;;  %v16329_v43 = vld [vmem:[%s24297_s1 + $0x12c] ss:$16 sps:$4 sm:$0xff]   ;;  %v16327_v11 = vld [vmem:[%s24297_s1 + $0x128] ss:$16 sps:$4 sm:$0xff]  }
 0x279   : > { %11681 = vmatpush2.bf16.msra.mxu1 %v16306_v40  ;;  %11599 = vmatprep.subr.bf16.mxu0 %v16311_v47  ;;  %v16332_v40 = vld [vmem:[%s24297_s1 + $0x32c] ss:$16 sps:$4 sm:$0xff]   ;;  %v16330_v4 = vld [vmem:[%s24297_s1 + $0x328] ss:$16 sps:$4 sm:$0xff]  }
 0x27a   : > { %11682 = vmatprep.subr.bf16.mxu1 %v16314_v63  ;;  %v16335_v45 = vld [vmem:[%s24297_s1 + $0x10c] ss:$16 sps:$4 sm:$0xff]   ;;  %v16333_v36 = vld [vmem:[%s24297_s1 + $0x108] ss:$16 sps:$4 sm:$0xff]  }
 0x27b   : > { %v16338_v32 = vld [vmem:[%s24297_s1 + $0x30c] ss:$16 sps:$4 sm:$0xff]   ;;  %v16336_v47 = vld [vmem:[%s24297_s1 + $0x308] ss:$16 sps:$4 sm:$0xff]  }
 0x27c   : > { %11600 = vmatpush2.bf16.msra.mxu0 %v16309_v53  ;;  %v16341_v63 = vld [vmem:[%s24297_s1 + $0x4ec] ss:$16 sps:$4 sm:$0xff]  }
 0x27d   : > { %11683 = vmatpush2.bf16.msra.mxu1 %v16312_v60  ;;  %11601 = vmatprep.subr.bf16.mxu0 %v16317_v44  ;;  %v16344_v53 = vld [vmem:[%s24297_s1 + $0x6ec] ss:$16 sps:$4 sm:$0xff]   ;;  %v16339_v60 = vld [vmem:[%s24297_s1 + $0x4e8] ss:$16 sps:$4 sm:$0xff]  }
 0x27e   : > { %11684 = vmatprep.subr.bf16.mxu1 %v16320_v26  ;;  %v16342_v44 = vld [vmem:[%s24297_s1 + $0x6e8] ss:$16 sps:$4 sm:$0xff]   ;;  %v21577_v26 = vpop.f32.mrf.mxu0 }
 0x27f   : > { %24891 = vst [vmem:[#allocation3_spill] sm:$0xff] %v21577_v26 }
 0x280   : > { %11602 = vmatpush2.bf16.msra.mxu0 %v16315_v9  ;;  %v21579_v9 = vpop.f32.mrf.mxu1 }
 0x281   : > { %11685 = vmatpush2.bf16.msra.mxu1 %v16318_v18  ;;  %11603 = vmatprep.subr.bf16.mxu0 %v16323_v19  ;;  %24892 = vst [vmem:[#allocation4_spill] sm:$0xff] %v21579_v9  ;;  %v16347_v18 = vld [vmem:[%s24297_s1 + $0x4cc] ss:$16 sps:$4 sm:$0xff]  }
 0x282   : > { %11686 = vmatprep.subr.bf16.mxu1 %v16326_v12  ;;  %v16350_v19 = vld [vmem:[%s24297_s1 + $0x6cc] ss:$16 sps:$4 sm:$0xff]   ;;  %v16345_v12 = vld [vmem:[%s24297_s1 + $0x4c8] ss:$16 sps:$4 sm:$0xff]  }
 0x284   : > { %11604 = vmatpush2.bf16.msra.mxu0 %v16321_v62  ;;  %v16348_v62 = vld [vmem:[%s24297_s1 + $0x6c8] ss:$16 sps:$4 sm:$0xff]  }
 0x285   : > { %11687 = vmatpush2.bf16.msra.mxu1 %v16324_v49  ;;  %11605 = vmatprep.subr.bf16.mxu0 %v16329_v43 }
 0x286   : > { %11688 = vmatprep.subr.bf16.mxu1 %v16332_v40  ;;  %v24893_v40 = vld [vmem:[#allocation5_spill] sm:$0xff] }
 0x288   : > { %11606 = vmatpush2.bf16.msra.mxu0 %v16327_v11  ;;  %v24894_v11 = vld [vmem:[#allocation6_spill] sm:$0xff] }
 0x289   : > { %11689 = vmatpush2.bf16.msra.mxu1 %v16330_v4  ;;  %11607 = vmatprep.subr.bf16.mxu0 %v16335_v45 }
 0x28a   : > { %11690 = vmatprep.subr.bf16.mxu1 %v16338_v32 }
 0x28c   : > { %11608 = vmatpush2.bf16.msra.mxu0 %v16333_v36  ;;  %v16353_v36 = vld [vmem:[%s24297_s1 + $0x4ac] ss:$16 sps:$4 sm:$0xff]  }
 0x28d   : > { %11691 = vmatpush2.bf16.msra.mxu1 %v16336_v47  ;;  %11743 = vmatprep.subr.bf16.mxu0 %v16341_v63  ;;  %v16356_v47 = vld [vmem:[%s24297_s1 + $0x6ac] ss:$16 sps:$4 sm:$0xff]  }
 0x28e   : > { %11826 = vmatprep.subr.bf16.mxu1 %v16344_v53 }
 0x28f   : > { %v11113_v49 = vpop.f32.mrf.mxu0  ;;  %11610 = vmatmul.mubr.bf16.vlgmr.msra.gmra.mxu0 %v24893_v40 }
 0x290   : > { %v11196_v43 = vpop.f32.mrf.mxu1  ;;  %11693 = vmatmul.mubr.bf16.vlgmr.msra.gmra.mxu1 %v24894_v11  ;;  %v11114_v4 = vadd.f32 %v11113_v49, %v21268_v29  ;;  %11744 = vmatpush1.bf16.msra.mxu0 %v16339_v60  ;;  %v16351_v29 = vld [vmem:[%s24297_s1 + $0x4a8] ss:$16 sps:$4 sm:$0xff]  }
 0x291   : > { %11827 = vmatpush1.bf16.msra.mxu1 %v16342_v44  ;;  %v11115_v45 = vpop.f32.mrf.mxu0  ;;  %11745 = vmatprep.subr.bf16.mxu0 %v16347_v18  ;;  %v16354_v60 = vld [vmem:[%s24297_s1 + $0x6a8] ss:$16 sps:$4 sm:$0xff]   ;;  %v24895_v44 = vld [vmem:[#allocation7_spill] sm:$0xff] }
 0x292   : > { %v11198_v32 = vpop.f32.mrf.mxu1  ;;  %11828 = vmatprep.subr.bf16.mxu1 %v16350_v19  ;;  %v21602_v63 = vadd.f32 %v11196_v43, %v11114_v4  ;;  %v11116_v53 = vadd.f32 %v11115_v45, %v21294_v48  ;;  %11619 = vmatprep.mubr.bf16.mxu0 %v24895_v44  ;;  %v24896_v18 = vld [vmem:[#allocation8_spill] sm:$0xff] }
 0x293   : > { %11702 = vmatprep.mubr.bf16.mxu1 %v24896_v18  ;;  %v11117_v19 = vpop.f32.mrf.mxu0  ;;  %v16359_v4 = vld [vmem:[%s24297_s1 + $0x48c] ss:$16 sps:$4 sm:$0xff]  }
 0x294   : > { %v11200_v49 = vpop.f32.mrf.mxu1  ;;  %v21613_v40 = vadd.f32 %v11198_v32, %v11116_v53  ;;  %v11118_v43 = vadd.f32 %v11117_v19, %v21305_v7  ;;  %11746 = vmatpush1.bf16.msra.mxu0 %v16345_v12  ;;  %v16362_v45 = vld [vmem:[%s24297_s1 + $0x68c] ss:$16 sps:$4 sm:$0xff]   ;;  %v16357_v7 = vld [vmem:[%s24297_s1 + $0x488] ss:$16 sps:$4 sm:$0xff]  }
 0x295   : > { %11829 = vmatpush1.bf16.msra.mxu1 %v16348_v62  ;;  %v21616_v48 = vpop.f32.mrf.mxu0  ;;  %11747 = vmatprep.subr.bf16.mxu0 %v16353_v36  ;;  %v16360_v12 = vld [vmem:[%s24297_s1 + $0x688] ss:$16 sps:$4 sm:$0xff]  }
 0x296   : > { %24897 = vst [vmem:[#allocation5_spill] sm:$0xff] %v21616_v48  ;;  %v21618_v11 = vpop.f32.mrf.mxu1  ;;  %11830 = vmatprep.subr.bf16.mxu1 %v16356_v47  ;;  %v21626_v32 = vadd.f32 %v11200_v49, %v11118_v43  ;;  %v24899_v47 = vld [vmem:[#allocation10_spill] sm:$0xff]  ;;  %v24900_v53 = vld [vmem:[#allocation12_spill] sm:$0xff] }
 0x297   : > { %24898 = vst [vmem:[#allocation6_spill] sm:$0xff] %v21618_v11  ;;  %v11123_v62 = vpop.f32.mrf.mxu0  ;;  %11620 = vmatmul.mubr.bf16.gmra.mxu0 %v24899_v47  ;;  %v16365_v49 = vld [vmem:[%s24297_s1 + $0x46c] ss:$16 sps:$4 sm:$0xff]   ;;  %v16759_v11 = vld [vmem:[%s24297_s1 + $0x1428] ss:$16 sps:$4 sm:$0xff]  }
 0x298   : > { %v11206_v36 = vpop.f32.mrf.mxu1  ;;  %11703 = vmatmul.mubr.bf16.gmra.mxu1 %v24900_v53  ;;  %v11124_v44 = vadd.f32 %v11123_v62, %v21332_v41  ;;  %11748 = vmatpush1.bf16.msra.mxu0 %v16351_v29  ;;  %v16368_v43 = vld [vmem:[%s24297_s1 + $0x66c] ss:$16 sps:$4 sm:$0xff]   ;;  %v16363_v41 = vld [vmem:[%s24297_s1 + $0x468] ss:$16 sps:$4 sm:$0xff]  }
 0x299   : > { %11831 = vmatpush1.bf16.msra.mxu1 %v16354_v60  ;;  %v11125_v18 = vpop.f32.mrf.mxu0  ;;  %11749 = vmatprep.subr.bf16.mxu0 %v16359_v4  ;;  %v16366_v29 = vld [vmem:[%s24297_s1 + $0x668] ss:$16 sps:$4 sm:$0xff]   ;;  %v24902_v4 = vld [vmem:[#allocation15_spill] sm:$0xff] }
 0x29a   : > { %v11208_v19 = vpop.f32.mrf.mxu1  ;;  %11832 = vmatprep.subr.bf16.mxu1 %v16362_v45  ;;  %v11126_v47 = vadd.f32 %v11125_v18, %v21352_v51  ;;  %v21644_v9 = vadd.f32 %v11206_v36, %v11124_v44  ;;  %v24901_v60 = vld [vmem:[#allocation14_spill] sm:$0xff]  ;;  %11712 = vmatprep.mubr.bf16.mxu1 %v24902_v4 }
 0x29b   : > { %11629 = vmatprep.mubr.bf16.mxu0 %v24901_v60  ;;  %v11127_v45 = vpop.f32.mrf.mxu0  ;;  %v16371_v44 = vld [vmem:[%s24297_s1 + $0x44c] ss:$16 sps:$4 sm:$0xff]  }
 0x29c   : > { %v11210_v62 = vpop.f32.mrf.mxu1  ;;  %v11128_v53 = vadd.f32 %v11127_v45, %v21368_v31  ;;  %v21655_v28 = vadd.f32 %v11208_v19, %v11126_v47  ;;  %11750 = vmatpush1.bf16.msra.mxu0 %v16357_v7  ;;  %v16374_v18 = vld [vmem:[%s24297_s1 + $0x64c] ss:$16 sps:$4 sm:$0xff]   ;;  %v16369_v31 = vld [vmem:[%s24297_s1 + $0x448] ss:$16 sps:$4 sm:$0xff]  }
 0x29d   : > { %11833 = vmatpush1.bf16.msra.mxu1 %v16360_v12  ;;  %v21657_v51 = vpop.f32.mrf.mxu0  ;;  %11751 = vmatprep.subr.bf16.mxu0 %v16365_v49  ;;  %v16372_v7 = vld [vmem:[%s24297_s1 + $0x648] ss:$16 sps:$4 sm:$0xff]  }
 0x29e   : > { %24903 = vst [vmem:[#allocation7_spill] sm:$0xff] %v21657_v51  ;;  %v21659_v36 = vpop.f32.mrf.mxu1  ;;  %11834 = vmatprep.subr.bf16.mxu1 %v16368_v43  ;;  %v21667_v60 = vadd.f32 %v11210_v62, %v11128_v53  ;;  %v24905_v49 = vld [vmem:[#allocation16_spill] sm:$0xff]  ;;  %v24906_v43 = vld [vmem:[#allocation17_spill] sm:$0xff] }
 0x29f   : > { %24904 = vst [vmem:[#allocation8_spill] sm:$0xff] %v21659_v36  ;;  %v11133_v12 = vpop.f32.mrf.mxu0  ;;  %11630 = vmatmul.mubr.bf16.gmra.mxu0 %v24905_v49  ;;  %v16377_v62 = vld [vmem:[%s24297_s1 + $0x42c] ss:$16 sps:$4 sm:$0xff]   ;;  %v16747_v51 = vld [vmem:[%s24297_s1 + $0x1468] ss:$16 sps:$4 sm:$0xff]  }
 0x2a0   : > { %v11216_v19 = vpop.f32.mrf.mxu1  ;;  %11713 = vmatmul.mubr.bf16.gmra.mxu1 %v24906_v43  ;;  %v11134_v47 = vadd.f32 %v11133_v12, %v21390_v8  ;;  %11752 = vmatpush1.bf16.msra.mxu0 %v16363_v41  ;;  %v16380_v53 = vld [vmem:[%s24297_s1 + $0x62c] ss:$16 sps:$4 sm:$0xff]   ;;  %v16375_v8 = vld [vmem:[%s24297_s1 + $0x428] ss:$16 sps:$4 sm:$0xff]  }
 0x2a1   : > { %11835 = vmatpush1.bf16.msra.mxu1 %v16366_v29  ;;  %v11135_v4 = vpop.f32.mrf.mxu0  ;;  %11753 = vmatprep.subr.bf16.mxu0 %v16371_v44  ;;  %v16378_v41 = vld [vmem:[%s24297_s1 + $0x628] ss:$16 sps:$4 sm:$0xff]   ;;  %v24908_v44 = vld [vmem:[#allocation19_spill] sm:$0xff] }
 0x2a2   : > { %v11218_v45 = vpop.f32.mrf.mxu1  ;;  %11836 = vmatprep.subr.bf16.mxu1 %v16374_v18  ;;  %v11136_v49 = vadd.f32 %v11135_v4, %v21411_v50  ;;  %v21685_v5 = vadd.f32 %v11216_v19, %v11134_v47  ;;  %v24907_v29 = vld [vmem:[#allocation18_spill] sm:$0xff]  ;;  %11722 = vmatprep.mubr.bf16.mxu1 %v24908_v44 }
 0x2a3   : > { %11639 = vmatprep.mubr.bf16.mxu0 %v24907_v29  ;;  %v11137_v18 = vpop.f32.mrf.mxu0  ;;  %v16383_v47 = vld [vmem:[%s24297_s1 + $0x40c] ss:$16 sps:$4 sm:$0xff]  }
 0x2a4   : > { %v11220_v12 = vpop.f32.mrf.mxu1  ;;  %v11138_v43 = vadd.f32 %v11137_v18, %v21423_v23  ;;  %v21696_v26 = vadd.f32 %v11218_v45, %v11136_v49  ;;  %11754 = vmatpush1.bf16.msra.mxu0 %v16369_v31  ;;  %v16386_v4 = vld [vmem:[%s24297_s1 + $0x60c] ss:$16 sps:$4 sm:$0xff]   ;;  %v16381_v23 = vld [vmem:[%s24297_s1 + $0x408] ss:$16 sps:$4 sm:$0xff]  }
 0x2a5   : > { %11837 = vmatpush1.bf16.msra.mxu1 %v16372_v7  ;;  %v21698_v50 = vpop.f32.mrf.mxu0  ;;  %11755 = vmatprep.subr.bf16.mxu0 %v16377_v62  ;;  %v16384_v31 = vld [vmem:[%s24297_s1 + $0x608] ss:$16 sps:$4 sm:$0xff]  }
 0x2a6   : > { %24909 = vst [vmem:[#allocation10_spill] sm:$0xff] %v21698_v50  ;;  %v21700_v19 = vpop.f32.mrf.mxu1  ;;  %11838 = vmatprep.subr.bf16.mxu1 %v16380_v53  ;;  %v21708_v29 = vadd.f32 %v11220_v12, %v11138_v43  ;;  %v24911_v62 = vld [vmem:[#allocation20_spill] sm:$0xff]  ;;  %v24912_v53 = vld [vmem:[#allocation21_spill] sm:$0xff] }
 0x2a7   : > { %24910 = vst [vmem:[#allocation12_spill] sm:$0xff] %v21700_v19  ;;  %v11143_v7 = vpop.f32.mrf.mxu0  ;;  %11640 = vmatmul.mubr.bf16.gmra.mxu0 %v24911_v62  ;;  %v16389_v12 = vld [vmem:[%s24297_s1 + $0x5ec] ss:$16 sps:$4 sm:$0xff]  }
 0x2a8   : > { %v11226_v45 = vpop.f32.mrf.mxu1  ;;  %11723 = vmatmul.mubr.bf16.gmra.mxu1 %v24912_v53  ;;  %v11144_v49 = vadd.f32 %v11143_v7, %v21445_v61  ;;  %11756 = vmatpush1.bf16.msra.mxu0 %v16375_v8  ;;  %v16392_v43 = vld [vmem:[%s24297_s1 + $0x7ec] ss:$16 sps:$4 sm:$0xff]   ;;  %v16387_v61 = vld [vmem:[%s24297_s1 + $0x5e8] ss:$16 sps:$4 sm:$0xff]  }
 0x2a9   : > { %11839 = vmatpush1.bf16.msra.mxu1 %v16378_v41  ;;  %v11145_v44 = vpop.f32.mrf.mxu0  ;;  %11757 = vmatprep.subr.bf16.mxu0 %v16383_v47  ;;  %v16390_v8 = vld [vmem:[%s24297_s1 + $0x7e8] ss:$16 sps:$4 sm:$0xff]   ;;  %v24914_v47 = vld [vmem:[#allocation23_spill] sm:$0xff] }
 0x2aa   : > { %v11228_v18 = vpop.f32.mrf.mxu1  ;;  %11840 = vmatprep.subr.bf16.mxu1 %v16386_v4  ;;  %v11146_v62 = vadd.f32 %v11145_v44, %v21460_v1  ;;  %v21726_v35 = vadd.f32 %v11226_v45, %v11144_v49  ;;  %v24913_v41 = vld [vmem:[#allocation22_spill] sm:$0xff]  ;;  %11732 = vmatprep.mubr.bf16.mxu1 %v24914_v47 }
 0x2ab   : > { %11649 = vmatprep.mubr.bf16.mxu0 %v24913_v41  ;;  %v11147_v4 = vpop.f32.mrf.mxu0  ;;  %v16395_v49 = vld [vmem:[%s24297_s1 + $0x5cc] ss:$16 sps:$4 sm:$0xff]  }
 0x2ac   : > { %v11230_v7 = vpop.f32.mrf.mxu1  ;;  %v11148_v53 = vadd.f32 %v11147_v4, %v21472_v13  ;;  %v21737_v19 = vadd.f32 %v11228_v18, %v11146_v62  ;;  %11758 = vmatpush1.bf16.msra.mxu0 %v16381_v23  ;;  %v16398_v44 = vld [vmem:[%s24297_s1 + $0x7cc] ss:$16 sps:$4 sm:$0xff]   ;;  %v16393_v13 = vld [vmem:[%s24297_s1 + $0x5c8] ss:$16 sps:$4 sm:$0xff]  }
 0x2ad   : > { %11841 = vmatpush1.bf16.msra.mxu1 %v16384_v31  ;;  %v21739_v1 = vpop.f32.mrf.mxu0  ;;  %11759 = vmatprep.subr.bf16.mxu0 %v16389_v12  ;;  %v16396_v23 = vld [vmem:[%s24297_s1 + $0x7c8] ss:$16 sps:$4 sm:$0xff]  }
 0x2ae   : > { %24915 = vst [vmem:[#allocation14_spill] sm:$0xff] %v21739_v1  ;;  %v21741_v45 = vpop.f32.mrf.mxu1  ;;  %11842 = vmatprep.subr.bf16.mxu1 %v16392_v43  ;;  %v21749_v41 = vadd.f32 %v11230_v7, %v11148_v53  ;;  %v24917_v12 = vld [vmem:[#allocation24_spill] sm:$0xff]  ;;  %v24918_v43 = vld [vmem:[#allocation25_spill] sm:$0xff] }
 0x2af   : > { %24916 = vst [vmem:[#allocation15_spill] sm:$0xff] %v21741_v45  ;;  %v11153_v31 = vpop.f32.mrf.mxu0  ;;  %11650 = vmatmul.mubr.bf16.gmra.mxu0 %v24917_v12  ;;  %v16401_v7 = vld [vmem:[%s24297_s1 + $0x5ac] ss:$16 sps:$4 sm:$0xff]  }
 0x2b0   : > { %v11236_v18 = vpop.f32.mrf.mxu1  ;;  %11733 = vmatmul.mubr.bf16.gmra.mxu1 %v24918_v43  ;;  %v11154_v62 = vadd.f32 %v11153_v31, %v21490_v24  ;;  %11760 = vmatpush2.bf16.msra.mxu0 %v16387_v61  ;;  %v16404_v53 = vld [vmem:[%s24297_s1 + $0x7ac] ss:$16 sps:$4 sm:$0xff]   ;;  %v16399_v24 = vld [vmem:[%s24297_s1 + $0x5a8] ss:$16 sps:$4 sm:$0xff]  }
 0x2b1   : > { %11843 = vmatpush2.bf16.msra.mxu1 %v16390_v8  ;;  %v11155_v47 = vpop.f32.mrf.mxu0  ;;  %11761 = vmatprep.subr.bf16.mxu0 %v16395_v49  ;;  %v16402_v61 = vld [vmem:[%s24297_s1 + $0x7a8] ss:$16 sps:$4 sm:$0xff]   ;;  %v24920_v49 = vld [vmem:[#allocation27_spill] sm:$0xff] }
 0x2b2   : > { %v11238_v4 = vpop.f32.mrf.mxu1  ;;  %11844 = vmatprep.subr.bf16.mxu1 %v16398_v44  ;;  %v11156_v12 = vadd.f32 %v11155_v47, %v21501_v27  ;;  %v21767_v45 = vadd.f32 %v11236_v18, %v11154_v62  ;;  %v24919_v8 = vld [vmem:[#allocation26_spill] sm:$0xff]  ;;  %11858 = vmatprep.mubr.bf16.mxu1 %v24920_v49 }
 0x2b3   : > { %11775 = vmatprep.mubr.bf16.mxu0 %v24919_v8  ;;  %v11157_v44 = vpop.f32.mrf.mxu0  ;;  %v16407_v27 = vld [vmem:[%s24297_s1 + $0x58c] ss:$16 sps:$4 sm:$0xff]  }
 0x2b4   : > { %v11240_v31 = vpop.f32.mrf.mxu1  ;;  %v11158_v43 = vadd.f32 %v11157_v44, %v21509_v33  ;;  %v21778_v1 = vadd.f32 %v11238_v4, %v11156_v12  ;;  %11762 = vmatpush2.bf16.msra.mxu0 %v16393_v13  ;;  %v16410_v18 = vld [vmem:[%s24297_s1 + $0x78c] ss:$16 sps:$4 sm:$0xff]   ;;  %v16405_v33 = vld [vmem:[%s24297_s1 + $0x588] ss:$16 sps:$4 sm:$0xff]  }
 0x2b5   : > { %11845 = vmatpush2.bf16.msra.mxu1 %v16396_v23  ;;  %11763 = vmatprep.subr.bf16.mxu0 %v16401_v7  ;;  %v16408_v13 = vld [vmem:[%s24297_s1 + $0x788] ss:$16 sps:$4 sm:$0xff]   ;;  %v16413_v23 = vld [vmem:[%s24297_s1 + $0x56c] ss:$16 sps:$4 sm:$0xff]  }
 0x2b6   : > { %11846 = vmatprep.subr.bf16.mxu1 %v16404_v53  ;;  %v21786_v62 = vadd.f32 %v11240_v31, %v11158_v43  ;;  %v16416_v47 = vld [vmem:[%s24297_s1 + $0x76c] ss:$16 sps:$4 sm:$0xff]   ;;  %v16411_v4 = vld [vmem:[%s24297_s1 + $0x568] ss:$16 sps:$4 sm:$0xff]  }
 0x2b7   : > { %v16414_v7 = vld [vmem:[%s24297_s1 + $0x768] ss:$16 sps:$4 sm:$0xff]   ;;  %v16419_v53 = vld [vmem:[%s24297_s1 + $0x54c] ss:$16 sps:$4 sm:$0xff]  }
 0x2b8   : > { %11764 = vmatpush2.bf16.msra.mxu0 %v16399_v24  ;;  %v16422_v12 = vld [vmem:[%s24297_s1 + $0x74c] ss:$16 sps:$4 sm:$0xff]   ;;  %v16417_v24 = vld [vmem:[%s24297_s1 + $0x548] ss:$16 sps:$4 sm:$0xff]  }
 0x2b9   : > { %11847 = vmatpush2.bf16.msra.mxu1 %v16402_v61  ;;  %11765 = vmatprep.subr.bf16.mxu0 %v16407_v27  ;;  %v16420_v61 = vld [vmem:[%s24297_s1 + $0x748] ss:$16 sps:$4 sm:$0xff]   ;;  %v16425_v8 = vld [vmem:[%s24297_s1 + $0x52c] ss:$16 sps:$4 sm:$0xff]  }
 0x2ba   : > { %11848 = vmatprep.subr.bf16.mxu1 %v16410_v18  ;;  %v16428_v49 = vld [vmem:[%s24297_s1 + $0x72c] ss:$16 sps:$4 sm:$0xff]   ;;  %v16423_v44 = vld [vmem:[%s24297_s1 + $0x528] ss:$16 sps:$4 sm:$0xff]  }
 0x2bb   : > { %v16426_v31 = vld [vmem:[%s24297_s1 + $0x728] ss:$16 sps:$4 sm:$0xff]   ;;  %v16431_v43 = vld [vmem:[%s24297_s1 + $0x50c] ss:$16 sps:$4 sm:$0xff]  }
 0x2bc   : > { %11766 = vmatpush2.bf16.msra.mxu0 %v16405_v33  ;;  %v16434_v27 = vld [vmem:[%s24297_s1 + $0x70c] ss:$16 sps:$4 sm:$0xff]   ;;  %v16429_v18 = vld [vmem:[%s24297_s1 + $0x508] ss:$16 sps:$4 sm:$0xff]  }
 0x2bd   : > { %11849 = vmatpush2.bf16.msra.mxu1 %v16408_v13  ;;  %11767 = vmatprep.subr.bf16.mxu0 %v16413_v23  ;;  %v16432_v33 = vld [vmem:[%s24297_s1 + $0x708] ss:$16 sps:$4 sm:$0xff]   ;;  %v16437_v13 = vld [vmem:[%s24297_s1 + $0x8ec] ss:$16 sps:$4 sm:$0xff]  }
 0x2be   : > { %11850 = vmatprep.subr.bf16.mxu1 %v16416_v47  ;;  %v16440_v23 = vld [vmem:[%s24297_s1 + $0xaec] ss:$16 sps:$4 sm:$0xff]   ;;  %v16435_v47 = vld [vmem:[%s24297_s1 + $0x8e8] ss:$16 sps:$4 sm:$0xff]  }
 0x2c0   : > { %11768 = vmatpush2.bf16.msra.mxu0 %v16411_v4  ;;  %v16438_v4 = vld [vmem:[%s24297_s1 + $0xae8] ss:$16 sps:$4 sm:$0xff]  }
 0x2c1   : > { %11851 = vmatpush2.bf16.msra.mxu1 %v16414_v7  ;;  %11769 = vmatprep.subr.bf16.mxu0 %v16419_v53  ;;  %v21854_v7 = vpop.f32.mrf.mxu0  ;;  %v21856_v53 = vpop.f32.mrf.mxu1 }
 0x2c2   : > { %11852 = vmatprep.subr.bf16.mxu1 %v16422_v12  ;;  %24921 = vst [vmem:[#allocation16_spill] sm:$0xff] %v21854_v7  ;;  %24922 = vst [vmem:[#allocation17_spill] sm:$0xff] %v21856_v53  ;;  %v16443_v12 = vld [vmem:[%s24297_s1 + $0x8cc] ss:$16 sps:$4 sm:$0xff]  }
 0x2c4   : > { %11770 = vmatpush2.bf16.msra.mxu0 %v16417_v24  ;;  %v16446_v24 = vld [vmem:[%s24297_s1 + $0xacc] ss:$16 sps:$4 sm:$0xff]  }
 0x2c5   : > { %11853 = vmatpush2.bf16.msra.mxu1 %v16420_v61  ;;  %11771 = vmatprep.subr.bf16.mxu0 %v16425_v8  ;;  %v16441_v61 = vld [vmem:[%s24297_s1 + $0x8c8] ss:$16 sps:$4 sm:$0xff]  }
 0x2c6   : > { %11854 = vmatprep.subr.bf16.mxu1 %v16428_v49  ;;  %v16444_v8 = vld [vmem:[%s24297_s1 + $0xac8] ss:$16 sps:$4 sm:$0xff]  }
 0x2c8   : > { %11772 = vmatpush2.bf16.msra.mxu0 %v16423_v44 }
 0x2c9   : > { %11855 = vmatpush2.bf16.msra.mxu1 %v16426_v31  ;;  %11773 = vmatprep.subr.bf16.mxu0 %v16431_v43  ;;  %v24923_v31 = vld [vmem:[#allocation29_spill] sm:$0xff]  ;;  %v24924_v43 = vld [vmem:[#allocation30_spill] sm:$0xff] }
 0x2ca   : > { %11856 = vmatprep.subr.bf16.mxu1 %v16434_v27 }
 0x2cc   : > { %11774 = vmatpush2.bf16.msra.mxu0 %v16429_v18 }
 0x2cd   : > { %11857 = vmatpush2.bf16.msra.mxu1 %v16432_v33  ;;  %11909 = vmatprep.subr.bf16.mxu0 %v16437_v13  ;;  %v16449_v13 = vld [vmem:[%s24297_s1 + $0x8ac] ss:$16 sps:$4 sm:$0xff]  }
 0x2ce   : > { %11992 = vmatprep.subr.bf16.mxu1 %v16440_v23  ;;  %v16452_v23 = vld [vmem:[%s24297_s1 + $0xaac] ss:$16 sps:$4 sm:$0xff]  }
 0x2cf   : > { %v11279_v49 = vpop.f32.mrf.mxu0  ;;  %11776 = vmatmul.mubr.bf16.vlgmr.msra.gmra.mxu0 %v24923_v31 }
 0x2d0   : > { %v11362_v44 = vpop.f32.mrf.mxu1  ;;  %11859 = vmatmul.mubr.bf16.vlgmr.msra.gmra.mxu1 %v24924_v43  ;;  %v11280_v27 = vadd.f32 %v11279_v49, %v21602_v63  ;;  %11910 = vmatpush1.bf16.msra.mxu0 %v16435_v47  ;;  %v24925_v43 = vld [vmem:[#allocation31_spill] sm:$0xff]  ;;  %v16447_v63 = vld [vmem:[%s24297_s1 + $0x8a8] ss:$16 sps:$4 sm:$0xff]  }
 0x2d1   : > { %11993 = vmatpush1.bf16.msra.mxu1 %v16438_v4  ;;  %v11281_v18 = vpop.f32.mrf.mxu0  ;;  %11911 = vmatprep.subr.bf16.mxu0 %v16443_v12  ;;  %v16450_v47 = vld [vmem:[%s24297_s1 + $0xaa8] ss:$16 sps:$4 sm:$0xff]  }
 0x2d2   : > { %v11364_v33 = vpop.f32.mrf.mxu1  ;;  %11994 = vmatprep.subr.bf16.mxu1 %v16446_v24  ;;  %v21879_v53 = vadd.f32 %v11362_v44, %v11280_v27  ;;  %v11282_v31 = vadd.f32 %v11281_v18, %v21613_v40  ;;  %11785 = vmatprep.mubr.bf16.mxu0 %v24925_v43  ;;  %v24926_v4 = vld [vmem:[#allocation34_spill] sm:$0xff] }
 0x2d3   : > { %11868 = vmatprep.mubr.bf16.mxu1 %v24926_v4  ;;  %v11283_v12 = vpop.f32.mrf.mxu0  ;;  %v16455_v18 = vld [vmem:[%s24297_s1 + $0x88c] ss:$16 sps:$4 sm:$0xff]  }
 0x2d4   : > { %v11366_v24 = vpop.f32.mrf.mxu1  ;;  %v21890_v49 = vadd.f32 %v11364_v33, %v11282_v31  ;;  %v11284_v44 = vadd.f32 %v11283_v12, %v21626_v32  ;;  %11912 = vmatpush1.bf16.msra.mxu0 %v16441_v61  ;;  %v16458_v43 = vld [vmem:[%s24297_s1 + $0xa8c] ss:$16 sps:$4 sm:$0xff]   ;;  %v24929_v32 = vld [vmem:[#allocation33_spill] sm:$0xff] }
 0x2d5   : > { %11995 = vmatpush1.bf16.msra.mxu1 %v16444_v8  ;;  %v21893_v40 = vpop.f32.mrf.mxu0  ;;  %11913 = vmatprep.subr.bf16.mxu0 %v16449_v13  ;;  %v24930_v8 = vld [vmem:[#allocation35_spill] sm:$0xff]  ;;  %v16453_v13 = vld [vmem:[%s24297_s1 + $0x888] ss:$16 sps:$4 sm:$0xff]  }
 0x2d6   : > { %24927 = vst [vmem:[#allocation18_spill] sm:$0xff] %v21893_v40  ;;  %v21895_v27 = vpop.f32.mrf.mxu1  ;;  %11996 = vmatprep.subr.bf16.mxu1 %v16452_v23  ;;  %v21903_v33 = vadd.f32 %v11366_v24, %v11284_v44  ;;  %v16456_v23 = vld [vmem:[%s24297_s1 + $0xa88] ss:$16 sps:$4 sm:$0xff]   ;;  %v16461_v44 = vld [vmem:[%s24297_s1 + $0x86c] ss:$16 sps:$4 sm:$0xff]  }
 0x2d7   : > { %24928 = vst [vmem:[#allocation19_spill] sm:$0xff] %v21895_v27  ;;  %v11289_v31 = vpop.f32.mrf.mxu0  ;;  %11786 = vmatmul.mubr.bf16.gmra.mxu0 %v24929_v32  ;;  %v16459_v32 = vld [vmem:[%s24297_s1 + $0x868] ss:$16 sps:$4 sm:$0xff]  }
 0x2d8   : > { %v11372_v61 = vpop.f32.mrf.mxu1  ;;  %11869 = vmatmul.mubr.bf16.gmra.mxu1 %v24930_v8  ;;  %v11290_v4 = vadd.f32 %v11289_v31, %v21644_v9  ;;  %11914 = vmatpush1.bf16.msra.mxu0 %v16447_v63  ;;  %v16464_v9 = vld [vmem:[%s24297_s1 + $0xa6c] ss:$16 sps:$4 sm:$0xff]  }
 0x2d9   : > { %11997 = vmatpush1.bf16.msra.mxu1 %v16450_v47  ;;  %v11291_v12 = vpop.f32.mrf.mxu0  ;;  %11915 = vmatprep.subr.bf16.mxu0 %v16455_v18  ;;  %v24931_v31 = vld [vmem:[#allocation36_spill] sm:$0xff] }
 0x2da   : > { %v11374_v24 = vpop.f32.mrf.mxu1  ;;  %11998 = vmatprep.subr.bf16.mxu1 %v16458_v43  ;;  %v11292_v63 = vadd.f32 %v11291_v12, %v21655_v28  ;;  %v21921_v47 = vadd.f32 %v11372_v61, %v11290_v4  ;;  %11795 = vmatprep.mubr.bf16.mxu0 %v24931_v31  ;;  %v16462_v18 = vld [vmem:[%s24297_s1 + $0xa68] ss:$16 sps:$4 sm:$0xff]   ;;  %v16467_v4 = vld [vmem:[%s24297_s1 + $0x84c] ss:$16 sps:$4 sm:$0xff]  }
 0x2db   : > { %v24932_v43 = vld [vmem:[#allocation38_spill] sm:$0xff]  ;;  %v11293_v8 = vpop.f32.mrf.mxu0 }
 0x2dc   : > { %11878 = vmatprep.mubr.bf16.mxu1 %v24932_v43  ;;  %v11376_v7 = vpop.f32.mrf.mxu1  ;;  %v11294_v34 = vadd.f32 %v11293_v8, %v21667_v60  ;;  %v21932_v57 = vadd.f32 %v11374_v24, %v11292_v63  ;;  %11916 = vmatpush1.bf16.msra.mxu0 %v16453_v13  ;;  %v16470_v12 = vld [vmem:[%s24297_s1 + $0xa4c] ss:$16 sps:$4 sm:$0xff]   ;;  %v24935_v24 = vld [vmem:[#allocation37_spill] sm:$0xff] }
 0x2dd   : > { %11999 = vmatpush1.bf16.msra.mxu1 %v16456_v23  ;;  %v21934_v28 = vpop.f32.mrf.mxu0  ;;  %11917 = vmatprep.subr.bf16.mxu0 %v16461_v44  ;;  %v24936_v23 = vld [vmem:[#allocation39_spill] sm:$0xff]  ;;  %v16465_v44 = vld [vmem:[%s24297_s1 + $0x848] ss:$16 sps:$4 sm:$0xff]   ;;  %v16473_v43 = vld [vmem:[%s24297_s1 + $0x82c] ss:$16 sps:$4 sm:$0xff]  }
 0x2de   : > { %24933 = vst [vmem:[#allocation20_spill] sm:$0xff] %v21934_v28  ;;  %v21936_v61 = vpop.f32.mrf.mxu1  ;;  %12000 = vmatprep.subr.bf16.mxu1 %v16464_v9  ;;  %v21944_v31 = vadd.f32 %v11376_v7, %v11294_v34  ;;  %v16468_v9 = vld [vmem:[%s24297_s1 + $0xa48] ss:$16 sps:$4 sm:$0xff]  }
 0x2df   : > { %24934 = vst [vmem:[#allocation21_spill] sm:$0xff] %v21936_v61  ;;  %v11299_v60 = vpop.f32.mrf.mxu0  ;;  %11796 = vmatmul.mubr.bf16.gmra.mxu0 %v24935_v24  ;;  %v24937_v8 = vld [vmem:[#allocation40_spill] sm:$0xff] }
 0x2e0   : > { %v11382_v13 = vpop.f32.mrf.mxu1  ;;  %11879 = vmatmul.mubr.bf16.gmra.mxu1 %v24936_v23  ;;  %v11300_v63 = vadd.f32 %v11299_v60, %v21685_v5  ;;  %11918 = vmatpush1.bf16.msra.mxu0 %v16459_v32  ;;  %v16476_v5 = vld [vmem:[%s24297_s1 + $0xa2c] ss:$16 sps:$4 sm:$0xff]   ;;  %v16471_v60 = vld [vmem:[%s24297_s1 + $0x828] ss:$16 sps:$4 sm:$0xff]  }
 0x2e1   : > { %12001 = vmatpush1.bf16.msra.mxu1 %v16462_v18  ;;  %v11301_v34 = vpop.f32.mrf.mxu0  ;;  %11919 = vmatprep.subr.bf16.mxu0 %v16467_v4  ;;  %v16474_v4 = vld [vmem:[%s24297_s1 + $0xa28] ss:$16 sps:$4 sm:$0xff]  }
 0x2e2   : > { %v11384_v7 = vpop.f32.mrf.mxu1  ;;  %12002 = vmatprep.subr.bf16.mxu1 %v16470_v12  ;;  %v11302_v32 = vadd.f32 %v11301_v34, %v21696_v26  ;;  %v21962_v18 = vadd.f32 %v11382_v13, %v11300_v63  ;;  %11805 = vmatprep.mubr.bf16.mxu0 %v24937_v8  ;;  %v24938_v12 = vld [vmem:[#allocation42_spill] sm:$0xff] }
 0x2e3   : > { %11888 = vmatprep.mubr.bf16.mxu1 %v24938_v12  ;;  %v11303_v24 = vpop.f32.mrf.mxu0  ;;  %v16479_v63 = vld [vmem:[%s24297_s1 + $0x80c] ss:$16 sps:$4 sm:$0xff]  }
 0x2e4   : > { %v11386_v23 = vpop.f32.mrf.mxu1  ;;  %v11304_v61 = vadd.f32 %v11303_v24, %v21708_v29  ;;  %v21973_v54 = vadd.f32 %v11384_v7, %v11302_v32  ;;  %11920 = vmatpush1.bf16.msra.mxu0 %v16465_v44  ;;  %v16482_v34 = vld [vmem:[%s24297_s1 + $0xa0c] ss:$16 sps:$4 sm:$0xff]   ;;  %v24941_v7 = vld [vmem:[#allocation41_spill] sm:$0xff] }
 0x2e5   : > { %12003 = vmatpush1.bf16.msra.mxu1 %v16468_v9  ;;  %v21975_v26 = vpop.f32.mrf.mxu0  ;;  %11921 = vmatprep.subr.bf16.mxu0 %v16473_v43  ;;  %v24942_v9 = vld [vmem:[#allocation43_spill] sm:$0xff]  ;;  %v16477_v43 = vld [vmem:[%s24297_s1 + $0x808] ss:$16 sps:$4 sm:$0xff]   ;;  %v16485_v24 = vld [vmem:[%s24297_s1 + $0x9ec] ss:$16 sps:$4 sm:$0xff]  }
 0x2e6   : > { %24939 = vst [vmem:[#allocation22_spill] sm:$0xff] %v21975_v26  ;;  %v21977_v13 = vpop.f32.mrf.mxu1  ;;  %12004 = vmatprep.subr.bf16.mxu1 %v16476_v5  ;;  %v21985_v8 = vadd.f32 %v11386_v23, %v11304_v61  ;;  %v16480_v5 = vld [vmem:[%s24297_s1 + $0xa08] ss:$16 sps:$4 sm:$0xff]  }
 0x2e7   : > { %24940 = vst [vmem:[#allocation23_spill] sm:$0xff] %v21977_v13  ;;  %v11309_v29 = vpop.f32.mrf.mxu0  ;;  %11806 = vmatmul.mubr.bf16.gmra.mxu0 %v24941_v7  ;;  %v24943_v23 = vld [vmem:[#allocation44_spill] sm:$0xff] }
 0x2e8   : > { %v11392_v44 = vpop.f32.mrf.mxu1  ;;  %11889 = vmatmul.mubr.bf16.gmra.mxu1 %v24942_v9  ;;  %v11310_v32 = vadd.f32 %v11309_v29, %v21726_v35  ;;  %11922 = vmatpush1.bf16.msra.mxu0 %v16471_v60  ;;  %v16488_v35 = vld [vmem:[%s24297_s1 + $0xbec] ss:$16 sps:$4 sm:$0xff]   ;;  %v16483_v29 = vld [vmem:[%s24297_s1 + $0x9e8] ss:$16 sps:$4 sm:$0xff]  }
 0x2e9   : > { %12005 = vmatpush1.bf16.msra.mxu1 %v16474_v4  ;;  %v11311_v61 = vpop.f32.mrf.mxu0  ;;  %11923 = vmatprep.subr.bf16.mxu0 %v16479_v63  ;;  %v16486_v63 = vld [vmem:[%s24297_s1 + $0xbe8] ss:$16 sps:$4 sm:$0xff]  }
 0x2ea   : > { %v11394_v12 = vpop.f32.mrf.mxu1  ;;  %12006 = vmatprep.subr.bf16.mxu1 %v16482_v34  ;;  %v11312_v60 = vadd.f32 %v11311_v61, %v21737_v19  ;;  %v22003_v4 = vadd.f32 %v11392_v44, %v11310_v32  ;;  %11815 = vmatprep.mubr.bf16.mxu0 %v24943_v23  ;;  %v24944_v34 = vld [vmem:[#allocation45_spill] sm:$0xff]  ;;  %v16491_v32 = vld [vmem:[%s24297_s1 + $0x9cc] ss:$16 sps:$4 sm:$0xff]  }
 0x2eb   : > { %11898 = vmatprep.mubr.bf16.mxu1 %v24944_v34  ;;  %v11313_v7 = vpop.f32.mrf.mxu0  ;;  %v16494_v61 = vld [vmem:[%s24297_s1 + $0xbcc] ss:$16 sps:$4 sm:$0xff]  }
 0x2ec   : > { %v11396_v9 = vpop.f32.mrf.mxu1  ;;  %v11314_v13 = vadd.f32 %v11313_v7, %v21749_v41  ;;  %v22014_v26 = vadd.f32 %v11394_v12, %v11312_v60  ;;  %11924 = vmatpush1.bf16.msra.mxu0 %v16477_v43  ;;  %v24947_v12 = vld [vmem:[#allocation61_spill] sm:$0xff]  ;;  %v16497_v7 = vld [vmem:[%s24297_s1 + $0x9ac] ss:$16 sps:$4 sm:$0xff]  }
 0x2ed   : > { %12007 = vmatpush1.bf16.msra.mxu1 %v16480_v5  ;;  %v22016_v19 = vpop.f32.mrf.mxu0  ;;  %11925 = vmatprep.subr.bf16.mxu0 %v16485_v24  ;;  %v24948_v5 = vld [vmem:[#allocation62_spill] sm:$0xff] }
 0x2ee   : > { %24945 = vst [vmem:[#allocation24_spill] sm:$0xff] %v22016_v19  ;;  %v22018_v44 = vpop.f32.mrf.mxu1  ;;  %12008 = vmatprep.subr.bf16.mxu1 %v16488_v35  ;;  %v22026_v23 = vadd.f32 %v11396_v9, %v11314_v13  ;;  %v16489_v24 = vld [vmem:[%s24297_s1 + $0x9c8] ss:$16 sps:$4 sm:$0xff]   ;;  %v24949_v9 = vld [vmem:[#allocation11_spill] sm:$0xff] }
 0x2ef   : > { %24946 = vst [vmem:[#allocation25_spill] sm:$0xff] %v22018_v44  ;;  %v11319_v41 = vpop.f32.mrf.mxu0  ;;  %11816 = vmatmul.mubr.bf16.gmra.mxu0 %v24947_v12  ;;  %v16492_v35 = vld [vmem:[%s24297_s1 + $0xbc8] ss:$16 sps:$4 sm:$0xff]  }
 0x2f0   : > { %v11402_v43 = vpop.f32.mrf.mxu1  ;;  %11899 = vmatmul.mubr.bf16.gmra.mxu1 %v24948_v5  ;;  %v11320_v60 = vadd.f32 %v11319_v41, %v21767_v45  ;;  %11926 = vmatpush2.bf16.msra.mxu0 %v16483_v29  ;;  %v16500_v45 = vld [vmem:[%s24297_s1 + $0xbac] ss:$16 sps:$4 sm:$0xff]   ;;  %v16495_v44 = vld [vmem:[%s24297_s1 + $0x9a8] ss:$16 sps:$4 sm:$0xff]  }
 0x2f1   : > { %12009 = vmatpush2.bf16.msra.mxu1 %v16486_v63  ;;  %v11321_v13 = vpop.f32.mrf.mxu0  ;;  %11927 = vmatprep.subr.bf16.mxu0 %v16491_v32  ;;  %v24950_v41 = vld [vmem:[#allocation28_spill] sm:$0xff] }
 0x2f2   : > { %v11404_v34 = vpop.f32.mrf.mxu1  ;;  %12010 = vmatprep.subr.bf16.mxu1 %v16494_v61  ;;  %v11322_v29 = vadd.f32 %v11321_v13, %v21778_v1  ;;  %v22044_v63 = vadd.f32 %v11402_v43, %v11320_v60  ;;  %11941 = vmatprep.mubr.bf16.mxu0 %v24949_v9  ;;  %v16498_v1 = vld [vmem:[%s24297_s1 + $0xba8] ss:$16 sps:$4 sm:$0xff]   ;;  %v16503_v43 = vld [vmem:[%s24297_s1 + $0x98c] ss:$16 sps:$4 sm:$0xff]  }
 0x2f3   : > { %12024 = vmatprep.mubr.bf16.mxu1 %v24950_v41  ;;  %v11323_v12 = vpop.f32.mrf.mxu0  ;;  %v16509_v13 = vld [vmem:[%s24297_s1 + $0x96c] ss:$16 sps:$4 sm:$0xff]   ;;  %v16513_v9 = vld [vmem:[%s24297_s1 + $0x948] ss:$16 sps:$4 sm:$0xff]  }
 0x2f4   : > { %v11406_v5 = vpop.f32.mrf.mxu1  ;;  %v11324_v32 = vadd.f32 %v11323_v12, %v21786_v62  ;;  %v22049_v61 = vadd.f32 %v11404_v34, %v11322_v29  ;;  %11928 = vmatpush2.bf16.msra.mxu0 %v16489_v24  ;;  %v16506_v62 = vld [vmem:[%s24297_s1 + $0xb8c] ss:$16 sps:$4 sm:$0xff]   ;;  %v16501_v24 = vld [vmem:[%s24297_s1 + $0x988] ss:$16 sps:$4 sm:$0xff]  }
 0x2f5   : > { %12011 = vmatpush2.bf16.msra.mxu1 %v16492_v35  ;;  %11929 = vmatprep.subr.bf16.mxu0 %v16497_v7  ;;  %v16504_v35 = vld [vmem:[%s24297_s1 + $0xb88] ss:$16 sps:$4 sm:$0xff]   ;;  %v16512_v34 = vld [vmem:[%s24297_s1 + $0xb6c] ss:$16 sps:$4 sm:$0xff]  }
 0x2f6   : > { %12012 = vmatprep.subr.bf16.mxu1 %v16500_v45  ;;  %v22063_v60 = vadd.f32 %v11406_v5, %v11324_v32  ;;  %v16510_v7 = vld [vmem:[%s24297_s1 + $0xb68] ss:$16 sps:$4 sm:$0xff]   ;;  %v16515_v45 = vld [vmem:[%s24297_s1 + $0x94c] ss:$16 sps:$4 sm:$0xff]  }
 0x2f7   : > { %v16518_v29 = vld [vmem:[%s24297_s1 + $0xb4c] ss:$16 sps:$4 sm:$0xff]   ;;  %v16516_v41 = vld [vmem:[%s24297_s1 + $0xb48] ss:$16 sps:$4 sm:$0xff]  }
 0x2f8   : > { %11930 = vmatpush2.bf16.msra.mxu0 %v16495_v44  ;;  %v16507_v44 = vld [vmem:[%s24297_s1 + $0x968] ss:$16 sps:$4 sm:$0xff]   ;;  %v16521_v12 = vld [vmem:[%s24297_s1 + $0x92c] ss:$16 sps:$4 sm:$0xff]  }
 0x2f9   : > { %12013 = vmatpush2.bf16.msra.mxu1 %v16498_v1  ;;  %11931 = vmatprep.subr.bf16.mxu0 %v16503_v43  ;;  %v16524_v5 = vld [vmem:[%s24297_s1 + $0xb2c] ss:$16 sps:$4 sm:$0xff]   ;;  %v16519_v32 = vld [vmem:[%s24297_s1 + $0x928] ss:$16 sps:$4 sm:$0xff]  }
 0x2fa   : > { %12014 = vmatprep.subr.bf16.mxu1 %v16506_v62  ;;  %v16522_v1 = vld [vmem:[%s24297_s1 + $0xb28] ss:$16 sps:$4 sm:$0xff]   ;;  %v16527_v43 = vld [vmem:[%s24297_s1 + $0x90c] ss:$16 sps:$4 sm:$0xff]  }
 0x2fb   : > { %v16530_v62 = vld [vmem:[%s24297_s1 + $0xb0c] ss:$16 sps:$4 sm:$0xff]  }
 0x2fc   : > { %11932 = vmatpush2.bf16.msra.mxu0 %v16501_v24  ;;  %v16525_v24 = vld [vmem:[%s24297_s1 + $0x908] ss:$16 sps:$4 sm:$0xff]  }
 0x2fd   : > { %12015 = vmatpush2.bf16.msra.mxu1 %v16504_v35  ;;  %11933 = vmatprep.subr.bf16.mxu0 %v16509_v13  ;;  %v16528_v35 = vld [vmem:[%s24297_s1 + $0xb08] ss:$16 sps:$4 sm:$0xff]   ;;  %v16533_v13 = vld [vmem:[%s24297_s1 + $0xcec] ss:$16 sps:$4 sm:$0xff]  }
 0x2fe   : > { %12016 = vmatprep.subr.bf16.mxu1 %v16512_v34  ;;  %v16536_v34 = vld [vmem:[%s24297_s1 + $0xeec] ss:$16 sps:$4 sm:$0xff]  }
 0x300   : > { %11934 = vmatpush2.bf16.msra.mxu0 %v16507_v44  ;;  %v16531_v44 = vld [vmem:[%s24297_s1 + $0xce8] ss:$16 sps:$4 sm:$0xff]  }
 0x301   : > { %12017 = vmatpush2.bf16.msra.mxu1 %v16510_v7  ;;  %11935 = vmatprep.subr.bf16.mxu0 %v16515_v45  ;;  %v16534_v7 = vld [vmem:[%s24297_s1 + $0xee8] ss:$16 sps:$4 sm:$0xff]   ;;  %v22131_v45 = vpop.f32.mrf.mxu0 }
 0x302   : > { %12018 = vmatprep.subr.bf16.mxu1 %v16518_v29  ;;  %24951 = vst [vmem:[#allocation26_spill] sm:$0xff] %v22131_v45  ;;  %v22133_v29 = vpop.f32.mrf.mxu1 }
 0x303   : > { %24952 = vst [vmem:[#allocation27_spill] sm:$0xff] %v22133_v29 }
 0x304   : > { %11936 = vmatpush2.bf16.msra.mxu0 %v16513_v9  ;;  %v16539_v9 = vld [vmem:[%s24297_s1 + $0xccc] ss:$16 sps:$4 sm:$0xff]  }
 0x305   : > { %12019 = vmatpush2.bf16.msra.mxu1 %v16516_v41  ;;  %11937 = vmatprep.subr.bf16.mxu0 %v16521_v12  ;;  %v16542_v41 = vld [vmem:[%s24297_s1 + $0xecc] ss:$16 sps:$4 sm:$0xff]  }
 0x306   : > { %12020 = vmatprep.subr.bf16.mxu1 %v16524_v5 }
 0x308   : > { %11938 = vmatpush2.bf16.msra.mxu0 %v16519_v32  ;;  %v24953_v32 = vld [vmem:[#allocation32_spill] sm:$0xff] }
 0x309   : > { %12021 = vmatpush2.bf16.msra.mxu1 %v16522_v1  ;;  %11939 = vmatprep.subr.bf16.mxu0 %v16527_v43  ;;  %v24954_v1 = vld [vmem:[#allocation9_spill] sm:$0xff] }
 0x30a   : > { %12022 = vmatprep.subr.bf16.mxu1 %v16530_v62  ;;  %v16537_v62 = vld [vmem:[%s24297_s1 + $0xcc8] ss:$16 sps:$4 sm:$0xff]  }
 0x30c   : > { %11940 = vmatpush2.bf16.msra.mxu0 %v16525_v24  ;;  %v16540_v24 = vld [vmem:[%s24297_s1 + $0xec8] ss:$16 sps:$4 sm:$0xff]  }
 0x30d   : > { %12023 = vmatpush2.bf16.msra.mxu1 %v16528_v35  ;;  %12075 = vmatprep.subr.bf16.mxu0 %v16533_v13 }
 0x30e   : > { %12158 = vmatprep.subr.bf16.mxu1 %v16536_v34  ;;  %v16545_v34 = vld [vmem:[%s24297_s1 + $0xcac] ss:$16 sps:$4 sm:$0xff]  }
 0x30f   : > { %v11445_v12 = vpop.f32.mrf.mxu0  ;;  %11942 = vmatmul.mubr.bf16.vlgmr.msra.gmra.mxu0 %v24953_v32  ;;  %v24956_v32 = vld [vmem:[#allocation47_spill] sm:$0xff] }
 0x310   : > { %v11528_v5 = vpop.f32.mrf.mxu1  ;;  %12025 = vmatmul.mubr.bf16.vlgmr.msra.gmra.mxu1 %v24954_v1  ;;  %v11446_v43 = vadd.f32 %v11445_v12, %v21879_v53  ;;  %12076 = vmatpush1.bf16.msra.mxu0 %v16531_v44  ;;  %v16548_v53 = vld [vmem:[%s24297_s1 + $0xeac] ss:$16 sps:$4 sm:$0xff]   ;;  %v24955_v12 = vld [vmem:[#allocation13_spill] sm:$0xff] }
 0x311   : > { %12159 = vmatpush1.bf16.msra.mxu1 %v16534_v7  ;;  %v11447_v35 = vpop.f32.mrf.mxu0  ;;  %12077 = vmatprep.subr.bf16.mxu0 %v16539_v9 }
 0x312   : > { %v11530_v13 = vpop.f32.mrf.mxu1  ;;  %12160 = vmatprep.subr.bf16.mxu1 %v16542_v41  ;;  %v11529_v44 = vadd.f32 %v11528_v5, %v11446_v43  ;;  %v11448_v7 = vadd.f32 %v11447_v35, %v21890_v49  ;;  %11951 = vmatprep.mubr.bf16.mxu0 %v24955_v12  ;;  %v16543_v41 = vld [vmem:[%s24297_s1 + $0xca8] ss:$16 sps:$4 sm:$0xff]  }
 0x313   : > { %12034 = vmatprep.mubr.bf16.mxu1 %v24956_v32  ;;  %v11449_v1 = vpop.f32.mrf.mxu0  ;;  %v16546_v49 = vld [vmem:[%s24297_s1 + $0xea8] ss:$16 sps:$4 sm:$0xff]  }
 0x314   : > { %v11532_v29 = vpop.f32.mrf.mxu1  ;;  %v22159_v45 = vadd.f32 %v11530_v13, %v11448_v7  ;;  %v11450_v9 = vadd.f32 %v11449_v1, %v21903_v33  ;;  %12078 = vmatpush1.bf16.msra.mxu0 %v16537_v62  ;;  %v16551_v33 = vld [vmem:[%s24297_s1 + $0xc8c] ss:$16 sps:$4 sm:$0xff]   ;;  %v13071_v32 = vmax.f32 %v11529_v44, 0.0 }
 0x315   : > { %12161 = vmatpush1.bf16.msra.mxu1 %v16540_v24  ;;  %v22168_v5 = vpop.f32.mrf.mxu0  ;;  %12079 = vmatprep.subr.bf16.mxu0 %v16545_v34  ;;  %v16554_v62 = vld [vmem:[%s24297_s1 + $0xe8c] ss:$16 sps:$4 sm:$0xff]  }
 0x316   : > { %24957 = vst [vmem:[#allocation29_spill] sm:$0xff] %v22159_v45  ;;  %24958 = vst [vmem:[#allocation30_spill] sm:$0xff] %v22168_v5  ;;  %v22170_v43 = vpop.f32.mrf.mxu1  ;;  %12162 = vmatprep.subr.bf16.mxu1 %v16548_v53  ;;  %v11533_v24 = vadd.f32 %v11532_v29, %v11450_v9  ;;  %v24960_v13 = vld [vmem:[#allocation46_spill] sm:$0xff]  ;;  %v24961_v12 = vld [vmem:[#allocation48_spill] sm:$0xff] }
 0x317   : > { %24959 = vst [vmem:[#allocation31_spill] sm:$0xff] %v22170_v43  ;;  %v11455_v35 = vpop.f32.mrf.mxu0  ;;  %11952 = vmatmul.mubr.bf16.gmra.mxu0 %v24960_v13  ;;  %v16549_v53 = vld [vmem:[%s24297_s1 + $0xc88] ss:$16 sps:$4 sm:$0xff]   ;;  %v16557_v44 = vld [vmem:[%s24297_s1 + $0xc6c] ss:$16 sps:$4 sm:$0xff]   ;;  %v24964_v13 = vld [vmem:[#allocation51_spill] sm:$0xff] }
 0x318   : > { %v11538_v7 = vpop.f32.mrf.mxu1  ;;  %12035 = vmatmul.mubr.bf16.gmra.mxu1 %v24961_v12  ;;  %v13075_v1 = vmax.f32 %v11533_v24, 0.0  ;;  %v11456_v34 = vadd.f32 %v11455_v35, %v21921_v47  ;;  %12080 = vmatpush1.bf16.msra.mxu0 %v16543_v41  ;;  %v16552_v29 = vld [vmem:[%s24297_s1 + $0xe88] ss:$16 sps:$4 sm:$0xff]   ;;  %v16560_v47 = vld [vmem:[%s24297_s1 + $0xe6c] ss:$16 sps:$4 sm:$0xff]   ;;  %v24963_v35 = vld [vmem:[#allocation49_spill] sm:$0xff] }
 0x319   : > { %12163 = vmatpush1.bf16.msra.mxu1 %v16546_v49  ;;  %v11457_v9 = vpop.f32.mrf.mxu0  ;;  %12081 = vmatprep.subr.bf16.mxu0 %v16551_v33  ;;  %v16678_v43 = vld [vmem:[%s24297_s1 + $0x13e8] ss:$16 sps:$4 sm:$0xff]   ;;  %v25017_v5 = vld [vmem:[#allocation105_spill] sm:$0xff] }
 0x31a   : > { %v11540_v19 = vpop.f32.mrf.mxu1  ;;  %12164 = vmatprep.subr.bf16.mxu1 %v16554_v62  ;;  %v22193_v41 = vpack.c.bf16 %v13075_v1, %v13071_v32  ;;  %v11458_v49 = vadd.f32 %v11457_v9, %v21932_v57  ;;  %v11539_v24 = vadd.f32 %v11538_v7, %v11456_v34  ;;  %11961 = vmatprep.mubr.bf16.mxu0 %v24963_v35  ;;  %v16555_v32 = vld [vmem:[%s24297_s1 + $0xc68] ss:$16 sps:$4 sm:$0xff]  }
 0x31b   : > { %12044 = vmatprep.mubr.bf16.mxu1 %v24964_v13  ;;  %v11459_v12 = vpop.f32.mrf.mxu0  ;;  %v16558_v57 = vld [vmem:[%s24297_s1 + $0xe68] ss:$16 sps:$4 sm:$0xff]  }
 0x31c   : > { %24962 = vst [vmem:[#allocation34_spill] sm:$0xff] %v22193_v41  ;;  %v11542_v33 = vpop.f32.mrf.mxu1  ;;  %v11460_v62 = vadd.f32 %v11459_v12, %v21944_v31  ;;  %v22199_v45 = vadd.f32 %v11540_v19, %v11458_v49  ;;  %12082 = vmatpush1.bf16.msra.mxu0 %v16549_v53  ;;  %v16563_v31 = vld [vmem:[%s24297_s1 + $0xc4c] ss:$16 sps:$4 sm:$0xff]   ;;  %v13079_v35 = vmax.f32 %v11539_v24, 0.0  ;;  %v16564_v12 = vld [vmem:[%s24297_s1 + $0xe48] ss:$16 sps:$4 sm:$0xff]  }
 0x31d   : > { %12165 = vmatpush1.bf16.msra.mxu1 %v16552_v29  ;;  %v22207_v7 = vpop.f32.mrf.mxu0  ;;  %12083 = vmatprep.subr.bf16.mxu0 %v16557_v44  ;;  %v16566_v19 = vld [vmem:[%s24297_s1 + $0xe4c] ss:$16 sps:$4 sm:$0xff]  }
 0x31e   : > { %24965 = vst [vmem:[#allocation33_spill] sm:$0xff] %v22199_v45  ;;  %24966 = vst [vmem:[#allocation35_spill] sm:$0xff] %v22207_v7  ;;  %v22209_v1 = vpop.f32.mrf.mxu1  ;;  %12166 = vmatprep.subr.bf16.mxu1 %v16560_v47  ;;  %v11543_v34 = vadd.f32 %v11542_v33, %v11460_v62  ;;  %v24968_v29 = vld [vmem:[#allocation50_spill] sm:$0xff]  ;;  %v24969_v49 = vld [vmem:[#allocation52_spill] sm:$0xff] }
 0x31f   : > { %24967 = vst [vmem:[#allocation36_spill] sm:$0xff] %v22209_v1  ;;  %v11465_v53 = vpop.f32.mrf.mxu0  ;;  %11962 = vmatmul.mubr.bf16.gmra.mxu0 %v24968_v29  ;;  %v16561_v47 = vld [vmem:[%s24297_s1 + $0xc48] ss:$16 sps:$4 sm:$0xff]   ;;  %v16569_v24 = vld [vmem:[%s24297_s1 + $0xc2c] ss:$16 sps:$4 sm:$0xff]   ;;  %v24972_v29 = vld [vmem:[#allocation55_spill] sm:$0xff] }
 0x320   : > { %v11548_v9 = vpop.f32.mrf.mxu1  ;;  %12045 = vmatmul.mubr.bf16.gmra.mxu1 %v24969_v49  ;;  %v13083_v13 = vmax.f32 %v11543_v34, 0.0  ;;  %v11466_v44 = vadd.f32 %v11465_v53, %v21962_v18  ;;  %12084 = vmatpush1.bf16.msra.mxu0 %v16555_v32  ;;  %v16572_v18 = vld [vmem:[%s24297_s1 + $0xe2c] ss:$16 sps:$4 sm:$0xff]   ;;  %v24971_v53 = vld [vmem:[#allocation53_spill] sm:$0xff] }
 0x321   : > { %12167 = vmatpush1.bf16.msra.mxu1 %v16558_v57  ;;  %v11467_v33 = vpop.f32.mrf.mxu0  ;;  %12085 = vmatprep.subr.bf16.mxu0 %v16563_v31 }
 0x322   : > { %v11550_v62 = vpop.f32.mrf.mxu1  ;;  %12168 = vmatprep.subr.bf16.mxu1 %v16566_v19  ;;  %v22232_v32 = vpack.c.bf16 %v13083_v13, %v13079_v35  ;;  %v11468_v57 = vadd.f32 %v11467_v33, %v21973_v54  ;;  %v11549_v34 = vadd.f32 %v11548_v9, %v11466_v44  ;;  %11971 = vmatprep.mubr.bf16.mxu0 %v24971_v53  ;;  %v16567_v35 = vld [vmem:[%s24297_s1 + $0xc28] ss:$16 sps:$4 sm:$0xff]   ;;  %v16578_v44 = vld [vmem:[%s24297_s1 + $0xe0c] ss:$16 sps:$4 sm:$0xff]  }
 0x323   : > { %12054 = vmatprep.mubr.bf16.mxu1 %v24972_v29  ;;  %v11469_v49 = vpop.f32.mrf.mxu0  ;;  %v16570_v54 = vld [vmem:[%s24297_s1 + $0xe28] ss:$16 sps:$4 sm:$0xff]  }
 0x324   : > { %24970 = vst [vmem:[#allocation38_spill] sm:$0xff] %v22232_v32  ;;  %v11552_v31 = vpop.f32.mrf.mxu1  ;;  %v11470_v19 = vadd.f32 %v11469_v49, %v21985_v8  ;;  %v22238_v41 = vadd.f32 %v11550_v62, %v11468_v57  ;;  %12086 = vmatpush1.bf16.msra.mxu0 %v16561_v47  ;;  %v16575_v8 = vld [vmem:[%s24297_s1 + $0xc0c] ss:$16 sps:$4 sm:$0xff]   ;;  %v13087_v53 = vmax.f32 %v11549_v34, 0.0  ;;  %v16576_v49 = vld [vmem:[%s24297_s1 + $0xe08] ss:$16 sps:$4 sm:$0xff]  }
 0x325   : > { %12169 = vmatpush1.bf16.msra.mxu1 %v16564_v12  ;;  %v22246_v9 = vpop.f32.mrf.mxu0  ;;  %12087 = vmatprep.subr.bf16.mxu0 %v16569_v24  ;;  %v24976_v33 = vld [vmem:[#allocation54_spill] sm:$0xff]  ;;  %v24977_v57 = vld [vmem:[#allocation56_spill] sm:$0xff] }
 0x326   : > { %24973 = vst [vmem:[#allocation37_spill] sm:$0xff] %v22238_v41  ;;  %24974 = vst [vmem:[#allocation39_spill] sm:$0xff] %v22246_v9  ;;  %v22248_v13 = vpop.f32.mrf.mxu1  ;;  %12170 = vmatprep.subr.bf16.mxu1 %v16572_v18  ;;  %v11553_v47 = vadd.f32 %v11552_v31, %v11470_v19  ;;  %v16573_v18 = vld [vmem:[%s24297_s1 + $0xc08] ss:$16 sps:$4 sm:$0xff]   ;;  %v16581_v34 = vld [vmem:[%s24297_s1 + $0xdec] ss:$16 sps:$4 sm:$0xff]  }
 0x327   : > { %24975 = vst [vmem:[#allocation40_spill] sm:$0xff] %v22248_v13  ;;  %v11475_v12 = vpop.f32.mrf.mxu0  ;;  %11972 = vmatmul.mubr.bf16.gmra.mxu0 %v24976_v33  ;;  %v24980_v33 = vld [vmem:[#allocation59_spill] sm:$0xff]  ;;  %v16666_v9 = vld [vmem:[%s24297_s1 + $0x1228] ss:$16 sps:$4 sm:$0xff]  }
 0x328   : > { %v11558_v62 = vpop.f32.mrf.mxu1  ;;  %12055 = vmatmul.mubr.bf16.gmra.mxu1 %v24977_v57  ;;  %v13091_v29 = vmax.f32 %v11553_v47, 0.0  ;;  %v11476_v24 = vadd.f32 %v11475_v12, %v22003_v4  ;;  %12088 = vmatpush1.bf16.msra.mxu0 %v16567_v35  ;;  %v16584_v4 = vld [vmem:[%s24297_s1 + $0xfec] ss:$16 sps:$4 sm:$0xff]   ;;  %v24979_v12 = vld [vmem:[#allocation57_spill] sm:$0xff] }
 0x329   : > { %12171 = vmatpush1.bf16.msra.mxu1 %v16570_v54  ;;  %v11477_v31 = vpop.f32.mrf.mxu0  ;;  %12089 = vmatprep.subr.bf16.mxu0 %v16575_v8 }
 0x32a   : > { %v11560_v19 = vpop.f32.mrf.mxu1  ;;  %12172 = vmatprep.subr.bf16.mxu1 %v16578_v44  ;;  %v22271_v35 = vpack.c.bf16 %v13091_v29, %v13087_v53  ;;  %v11478_v54 = vadd.f32 %v11477_v31, %v22014_v26  ;;  %v11559_v47 = vadd.f32 %v11558_v62, %v11476_v24  ;;  %11981 = vmatprep.mubr.bf16.mxu0 %v24979_v12  ;;  %v16579_v53 = vld [vmem:[%s24297_s1 + $0xde8] ss:$16 sps:$4 sm:$0xff]   ;;  %v16590_v24 = vld [vmem:[%s24297_s1 + $0xfcc] ss:$16 sps:$4 sm:$0xff]  }
 0x32b   : > { %12064 = vmatprep.mubr.bf16.mxu1 %v24980_v33  ;;  %v11479_v57 = vpop.f32.mrf.mxu0  ;;  %v16582_v26 = vld [vmem:[%s24297_s1 + $0xfe8] ss:$16 sps:$4 sm:$0xff]  }
 0x32c   : > { %24978 = vst [vmem:[#allocation42_spill] sm:$0xff] %v22271_v35  ;;  %v11562_v8 = vpop.f32.mrf.mxu1  ;;  %v11480_v44 = vadd.f32 %v11479_v57, %v22026_v23  ;;  %v22277_v32 = vadd.f32 %v11560_v19, %v11478_v54  ;;  %12090 = vmatpush1.bf16.msra.mxu0 %v16573_v18  ;;  %v16587_v23 = vld [vmem:[%s24297_s1 + $0xdcc] ss:$16 sps:$4 sm:$0xff]   ;;  %v13095_v12 = vmax.f32 %v11559_v47, 0.0  ;;  %v16588_v57 = vld [vmem:[%s24297_s1 + $0xfc8] ss:$16 sps:$4 sm:$0xff]  }
 0x32d   : > { %12173 = vmatpush1.bf16.msra.mxu1 %v16576_v49  ;;  %v22285_v62 = vpop.f32.mrf.mxu0  ;;  %12091 = vmatprep.subr.bf16.mxu0 %v16581_v34  ;;  %v24984_v31 = vld [vmem:[#allocation58_spill] sm:$0xff]  ;;  %v24985_v54 = vld [vmem:[#allocation60_spill] sm:$0xff] }
 0x32e   : > { %24981 = vst [vmem:[#allocation41_spill] sm:$0xff] %v22277_v32  ;;  %24982 = vst [vmem:[#allocation43_spill] sm:$0xff] %v22285_v62  ;;  %v22287_v29 = vpop.f32.mrf.mxu1  ;;  %12174 = vmatprep.subr.bf16.mxu1 %v16584_v4  ;;  %v11563_v18 = vadd.f32 %v11562_v8, %v11480_v44  ;;  %v16585_v4 = vld [vmem:[%s24297_s1 + $0xdc8] ss:$16 sps:$4 sm:$0xff]   ;;  %v16593_v47 = vld [vmem:[%s24297_s1 + $0xdac] ss:$16 sps:$4 sm:$0xff]  }
 0x32f   : > { %24983 = vst [vmem:[#allocation44_spill] sm:$0xff] %v22287_v29  ;;  %v11485_v49 = vpop.f32.mrf.mxu0  ;;  %11982 = vmatmul.mubr.bf16.gmra.mxu0 %v24984_v31  ;;  %v24988_v31 = vld [vmem:[#allocation68_spill] sm:$0xff] }
 0x330   : > { %v11568_v19 = vpop.f32.mrf.mxu1  ;;  %12065 = vmatmul.mubr.bf16.gmra.mxu1 %v24985_v54  ;;  %v13099_v33 = vmax.f32 %v11563_v18, 0.0  ;;  %v11486_v34 = vadd.f32 %v11485_v49, %v22044_v63  ;;  %12092 = vmatpush2.bf16.msra.mxu0 %v16579_v53  ;;  %v16596_v63 = vld [vmem:[%s24297_s1 + $0xfac] ss:$16 sps:$4 sm:$0xff]   ;;  %v24987_v49 = vld [vmem:[#allocation67_spill] sm:$0xff]  ;;  %v16654_v29 = vld [vmem:[%s24297_s1 + $0x1268] ss:$16 sps:$4 sm:$0xff]  }
 0x331   : > { %12175 = vmatpush2.bf16.msra.mxu1 %v16582_v26  ;;  %v11487_v8 = vpop.f32.mrf.mxu0  ;;  %12093 = vmatprep.subr.bf16.mxu0 %v16587_v23 }
 0x332   : > { %v11570_v44 = vpop.f32.mrf.mxu1  ;;  %12176 = vmatprep.subr.bf16.mxu1 %v16590_v24  ;;  %v22310_v53 = vpack.c.bf16 %v13099_v33, %v13095_v12  ;;  %v11488_v26 = vadd.f32 %v11487_v8, %v22049_v61  ;;  %v11569_v18 = vadd.f32 %v11568_v19, %v11486_v34  ;;  %12107 = vmatprep.mubr.bf16.mxu0 %v24987_v49  ;;  %v16591_v12 = vld [vmem:[%s24297_s1 + $0xda8] ss:$16 sps:$4 sm:$0xff]   ;;  %v16599_v19 = vld [vmem:[%s24297_s1 + $0xd8c] ss:$16 sps:$4 sm:$0xff]  }
 0x333   : > { %12190 = vmatprep.mubr.bf16.mxu1 %v24988_v31  ;;  %v11489_v54 = vpop.f32.mrf.mxu0  ;;  %v16594_v61 = vld [vmem:[%s24297_s1 + $0xfa8] ss:$16 sps:$4 sm:$0xff]   ;;  %v16611_v49 = vld [vmem:[%s24297_s1 + $0xd4c] ss:$16 sps:$4 sm:$0xff]  }
 0x334   : > { %24986 = vst [vmem:[#allocation45_spill] sm:$0xff] %v22310_v53  ;;  %v11572_v23 = vpop.f32.mrf.mxu1  ;;  %v11490_v24 = vadd.f32 %v11489_v54, %v22063_v60  ;;  %v22316_v35 = vadd.f32 %v11570_v44, %v11488_v26  ;;  %12094 = vmatpush2.bf16.msra.mxu0 %v16585_v4  ;;  %v16602_v60 = vld [vmem:[%s24297_s1 + $0xf8c] ss:$16 sps:$4 sm:$0xff]   ;;  %v13103_v34 = vmax.f32 %v11569_v18, 0.0  ;;  %v16600_v8 = vld [vmem:[%s24297_s1 + $0xf88] ss:$16 sps:$4 sm:$0xff]  }
 0x335   : > { %12177 = vmatpush2.bf16.msra.mxu1 %v16588_v57  ;;  %12095 = vmatprep.subr.bf16.mxu0 %v16593_v47  ;;  %v16597_v57 = vld [vmem:[%s24297_s1 + $0xd88] ss:$16 sps:$4 sm:$0xff]   ;;  %v16605_v44 = vld [vmem:[%s24297_s1 + $0xd6c] ss:$16 sps:$4 sm:$0xff]  }
 0x336   : > { %24989 = vst [vmem:[#allocation61_spill] sm:$0xff] %v22316_v35  ;;  %12178 = vmatprep.subr.bf16.mxu1 %v16596_v63  ;;  %v11573_v33 = vadd.f32 %v11572_v23, %v11490_v24  ;;  %v16608_v47 = vld [vmem:[%s24297_s1 + $0xf6c] ss:$16 sps:$4 sm:$0xff]   ;;  %v16603_v26 = vld [vmem:[%s24297_s1 + $0xd68] ss:$16 sps:$4 sm:$0xff]  }
 0x337   : > { %v16606_v18 = vld [vmem:[%s24297_s1 + $0xf68] ss:$16 sps:$4 sm:$0xff]   ;;  %v16614_v31 = vld [vmem:[%s24297_s1 + $0xf4c] ss:$16 sps:$4 sm:$0xff]  }
 0x338   : > { %v13107_v4 = vmax.f32 %v11573_v33, 0.0  ;;  %12096 = vmatpush2.bf16.msra.mxu0 %v16591_v12  ;;  %v16609_v54 = vld [vmem:[%s24297_s1 + $0xd48] ss:$16 sps:$4 sm:$0xff]   ;;  %v16617_v24 = vld [vmem:[%s24297_s1 + $0xd2c] ss:$16 sps:$4 sm:$0xff]  }
 0x339   : > { %12179 = vmatpush2.bf16.msra.mxu1 %v16594_v61  ;;  %12097 = vmatprep.subr.bf16.mxu0 %v16599_v19  ;;  %v16612_v23 = vld [vmem:[%s24297_s1 + $0xf48] ss:$16 sps:$4 sm:$0xff]   ;;  %v16620_v12 = vld [vmem:[%s24297_s1 + $0xf2c] ss:$16 sps:$4 sm:$0xff]  }
 0x33a   : > { %12180 = vmatprep.subr.bf16.mxu1 %v16602_v60  ;;  %v22342_v63 = vpack.c.bf16 %v13107_v4, %v13103_v34  ;;  %v16615_v61 = vld [vmem:[%s24297_s1 + $0xd28] ss:$16 sps:$4 sm:$0xff]   ;;  %v16623_v60 = vld [vmem:[%s24297_s1 + $0xd0c] ss:$16 sps:$4 sm:$0xff]  }
 0x33b   : > { %v16618_v19 = vld [vmem:[%s24297_s1 + $0xf28] ss:$16 sps:$4 sm:$0xff]   ;;  %v16626_v33 = vld [vmem:[%s24297_s1 + $0xf0c] ss:$16 sps:$4 sm:$0xff]  }
 0x33c   : > { %24990 = vst [vmem:[#allocation62_spill] sm:$0xff] %v22342_v63  ;;  %12098 = vmatpush2.bf16.msra.mxu0 %v16597_v57  ;;  %v16621_v34 = vld [vmem:[%s24297_s1 + $0xd08] ss:$16 sps:$4 sm:$0xff]   ;;  %v24991_v57 = vld [vmem:[#allocation71_spill] sm:$0xff] }
 0x33d   : > { %12181 = vmatpush2.bf16.msra.mxu1 %v16600_v8  ;;  %12099 = vmatprep.subr.bf16.mxu0 %v16605_v44  ;;  %v16624_v4 = vld [vmem:[%s24297_s1 + $0xf08] ss:$16 sps:$4 sm:$0xff]   ;;  %v3413_v8 = vsub.s32 2, %v24991_v57  ;;  %v16629_v44 = vld [vmem:[%s24297_s1 + $0x10ec] ss:$16 sps:$4 sm:$0xff]  }
 0x33e   : > { %12182 = vmatprep.subr.bf16.mxu1 %v16608_v47  ;;  %v16632_v47 = vld [vmem:[%s24297_s1 + $0x12ec] ss:$16 sps:$4 sm:$0xff]   ;;  %v16639_v35 = vld [vmem:[%s24297_s1 + $0x10a8] ss:$16 sps:$4 sm:$0xff]  }
 0x340   : > { %12100 = vmatpush2.bf16.msra.mxu0 %v16603_v26  ;;  %v3417_v26 = vsub.s32 3, %v24991_v57 }
 0x341   : > { %12183 = vmatpush2.bf16.msra.mxu1 %v16606_v18  ;;  %12101 = vmatprep.subr.bf16.mxu0 %v16611_v49  ;;  %v17139_v18 = vld [vmem:[%s24298_s2] sm:$0xf] }
 0x342   : > { %12184 = vmatprep.subr.bf16.mxu1 %v16614_v31  ;;  %v22397_v49 = vrot.slane %v17139_v18, %v3413_v8  ;;  %v16627_v31 = vld [vmem:[%s24297_s1 + $0x10e8] ss:$16 sps:$4 sm:$0xff]  }
 0x343   : > { %v16633_v8 = vld [vmem:[%s24297_s1 + $0x10c8] ss:$16 sps:$4 sm:$0xff]  }
 0x344   : > { %12102 = vmatpush2.bf16.msra.mxu0 %v16609_v54  ;;  %v16630_v54 = vld [vmem:[%s24297_s1 + $0x12e8] ss:$16 sps:$4 sm:$0xff]  }
 0x345   : > { %12185 = vmatpush2.bf16.msra.mxu1 %v16612_v23  ;;  %12103 = vmatprep.subr.bf16.mxu0 %v16617_v24  ;;  %v22405_v23 = vpop.f32.mrf.mxu0  ;;  %v22407_v24 = vpop.f32.mrf.mxu1 }
 0x346   : > { %12186 = vmatprep.subr.bf16.mxu1 %v16620_v12  ;;  %24992 = vst [vmem:[#allocation11_spill] sm:$0xff] %v22405_v23  ;;  %24993 = vst [vmem:[#allocation28_spill] sm:$0xff] %v22407_v24  ;;  %v16635_v12 = vld [vmem:[%s24297_s1 + $0x10cc] ss:$16 sps:$4 sm:$0xff]  }
 0x348   : > { %12104 = vmatpush2.bf16.msra.mxu0 %v16615_v61  ;;  %v16638_v61 = vld [vmem:[%s24297_s1 + $0x12cc] ss:$16 sps:$4 sm:$0xff]  }
 0x349   : > { %12187 = vmatpush2.bf16.msra.mxu1 %v16618_v19  ;;  %12105 = vmatprep.subr.bf16.mxu0 %v16623_v60  ;;  %v22415_v19 = vrot.slane %v17139_v18, %v3417_v26  ;;  %v16641_v18 = vld [vmem:[%s24297_s1 + $0x10ac] ss:$16 sps:$4 sm:$0xff]  }
 0x34a   : > { %12188 = vmatprep.subr.bf16.mxu1 %v16626_v33 }
 0x34c   : > { %12106 = vmatpush2.bf16.msra.mxu0 %v16621_v34  ;;  %v24994_v34 = vld [vmem:[#allocation76_spill] sm:$0xff] }
 0x34d   : > { %12189 = vmatpush2.bf16.msra.mxu1 %v16624_v4  ;;  %12241 = vmatprep.subr.bf16.mxu0 %v16629_v44  ;;  %v24995_v4 = vld [vmem:[#allocation77_spill] sm:$0xff]  ;;  %v16636_v44 = vld [vmem:[%s24297_s1 + $0x12c8] ss:$16 sps:$4 sm:$0xff]  }
 0x34e   : > { %12324 = vmatprep.subr.bf16.mxu1 %v16632_v47 }
 0x34f   : > { %v11611_v60 = vpop.f32.mrf.mxu0  ;;  %12108 = vmatmul.mubr.bf16.vlgmr.msra.gmra.mxu0 %v24994_v34  ;;  %v24996_v34 = vld [vmem:[#allocation80_spill] sm:$0xff] }
 0x350   : > { %v11694_v33 = vpop.f32.mrf.mxu1  ;;  %12191 = vmatmul.mubr.bf16.vlgmr.msra.gmra.mxu1 %v24995_v4  ;;  %v11612_v57 = vadd.f32 %v11611_v60, %v22397_v49  ;;  %12242 = vmatpush1.bf16.msra.mxu0 %v16627_v31  ;;  %v16644_v31 = vld [vmem:[%s24297_s1 + $0x12ac] ss:$16 sps:$4 sm:$0xff]   ;;  %v24997_v4 = vld [vmem:[#allocation81_spill] sm:$0xff] }
 0x351   : > { %12325 = vmatpush1.bf16.msra.mxu1 %v16630_v54  ;;  %v11613_v47 = vpop.f32.mrf.mxu0  ;;  %12243 = vmatprep.subr.bf16.mxu0 %v16635_v12 }
 0x352   : > { %v11696_v26 = vpop.f32.mrf.mxu1  ;;  %12326 = vmatprep.subr.bf16.mxu1 %v16638_v61  ;;  %v22432_v54 = vadd.f32 %v11694_v33, %v11612_v57  ;;  %v11614_v60 = vadd.f32 %v11613_v47, %v22415_v19  ;;  %12117 = vmatprep.mubr.bf16.mxu0 %v24996_v34  ;;  %v16642_v33 = vld [vmem:[%s24297_s1 + $0x12a8] ss:$16 sps:$4 sm:$0xff]  }
 0x353   : > { %12200 = vmatprep.mubr.bf16.mxu1 %v24997_v4  ;;  %v11615_v63 = vpop.f32.mrf.mxu0 }
 0x354   : > { %v11698_v53 = vpop.f32.mrf.mxu1  ;;  %v22437_v12 = vadd.f32 %v11696_v26, %v11614_v60  ;;  %v11616_v61 = vadd.f32 %v11615_v63, %v22397_v49  ;;  %12244 = vmatpush1.bf16.msra.mxu0 %v16633_v8  ;;  %v16647_v63 = vld [vmem:[%s24297_s1 + $0x108c] ss:$16 sps:$4 sm:$0xff]   ;;  %v25001_v60 = vld [vmem:[#allocation83_spill] sm:$0xff] }
 0x355   : > { %12327 = vmatpush1.bf16.msra.mxu1 %v16636_v44  ;;  %v22446_v57 = vpop.f32.mrf.mxu0  ;;  %12245 = vmatprep.subr.bf16.mxu0 %v16641_v18  ;;  %v16650_v8 = vld [vmem:[%s24297_s1 + $0x128c] ss:$16 sps:$4 sm:$0xff]   ;;  %v16645_v18 = vld [vmem:[%s24297_s1 + $0x1088] ss:$16 sps:$4 sm:$0xff]  }
 0x356   : > { %24998 = vst [vmem:[#allocation32_spill] sm:$0xff] %v22446_v57  ;;  %v22448_v47 = vpop.f32.mrf.mxu1  ;;  %12328 = vmatprep.subr.bf16.mxu1 %v16644_v31  ;;  %v22456_v44 = vadd.f32 %v11698_v53, %v11616_v61  ;;  %v25000_v26 = vld [vmem:[#allocation82_spill] sm:$0xff] }
 0x357   : > { %24999 = vst [vmem:[#allocation9_spill] sm:$0xff] %v22448_v47  ;;  %12118 = vmatmul.mubr.bf16.gmra.mxu0 %v25000_v26  ;;  %v11621_v34 = vpop.f32.mrf.mxu0  ;;  %v16648_v31 = vld [vmem:[%s24297_s1 + $0x1288] ss:$16 sps:$4 sm:$0xff]   ;;  %v16653_v53 = vld [vmem:[%s24297_s1 + $0x106c] ss:$16 sps:$4 sm:$0xff]  }
 0x358   : > { %12201 = vmatmul.mubr.bf16.gmra.mxu1 %v25001_v60  ;;  %v11704_v4 = vpop.f32.mrf.mxu1  ;;  %12246 = vmatpush1.bf16.msra.mxu0 %v16639_v35  ;;  %v11622_v24 = vadd.f32 %v11621_v34, %v22397_v49  ;;  %v16656_v35 = vld [vmem:[%s24297_s1 + $0x126c] ss:$16 sps:$4 sm:$0xff]   ;;  %v16651_v34 = vld [vmem:[%s24297_s1 + $0x1068] ss:$16 sps:$4 sm:$0xff]  }
 0x359   : > { %12329 = vmatpush1.bf16.msra.mxu1 %v16642_v33  ;;  %12247 = vmatprep.subr.bf16.mxu0 %v16647_v63  ;;  %v11623_v61 = vpop.f32.mrf.mxu0  ;;  %v25002_v26 = vld [vmem:[#allocation86_spill] sm:$0xff]  ;;  %v25003_v60 = vld [vmem:[#allocation88_spill] sm:$0xff] }
 0x35a   : > { %12330 = vmatprep.subr.bf16.mxu1 %v16650_v8  ;;  %v11706_v33 = vpop.f32.mrf.mxu1  ;;  %12127 = vmatprep.mubr.bf16.mxu0 %v25002_v26  ;;  %v11624_v32 = vadd.f32 %v11623_v61, %v22415_v19  ;;  %v22476_v23 = vadd.f32 %v11704_v4, %v11622_v24  ;;  %v16659_v24 = vld [vmem:[%s24297_s1 + $0x104c] ss:$16 sps:$4 sm:$0xff]   ;;  %v16879_v47 = vld [vmem:[%s24297_s1 + $0x19a8] ss:$16 sps:$4 sm:$0xff]  }
 0x35b   : > { %12210 = vmatprep.mubr.bf16.mxu1 %v25003_v60  ;;  %v11625_v63 = vpop.f32.mrf.mxu0  ;;  %v16662_v4 = vld [vmem:[%s24297_s1 + $0x124c] ss:$16 sps:$4 sm:$0xff]   ;;  %v25006_v60 = vld [vmem:[#allocation87_spill] sm:$0xff] }
 0x35c   : > { %v11708_v8 = vpop.f32.mrf.mxu1  ;;  %12248 = vmatpush1.bf16.msra.mxu0 %v16645_v18  ;;  %v11626_v26 = vadd.f32 %v11625_v63, %v22397_v49  ;;  %v22485_v41 = vadd.f32 %v11706_v33, %v11624_v32  ;;  %v25007_v32 = vld [vmem:[#allocation89_spill] sm:$0xff]  ;;  %v16657_v33 = vld [vmem:[%s24297_s1 + $0x1048] ss:$16 sps:$4 sm:$0xff]  }
 0x35d   : > { %12331 = vmatpush1.bf16.msra.mxu1 %v16648_v31  ;;  %12249 = vmatprep.subr.bf16.mxu0 %v16653_v53  ;;  %v22493_v18 = vpop.f32.mrf.mxu0  ;;  %v16660_v63 = vld [vmem:[%s24297_s1 + $0x1248] ss:$16 sps:$4 sm:$0xff]  }
 0x35e   : > { %12332 = vmatprep.subr.bf16.mxu1 %v16656_v35  ;;  %25004 = vst [vmem:[#allocation13_spill] sm:$0xff] %v22493_v18  ;;  %v22495_v31 = vpop.f32.mrf.mxu1  ;;  %v22497_v61 = vadd.f32 %v11708_v8, %v11626_v26  ;;  %v16665_v8 = vld [vmem:[%s24297_s1 + $0x102c] ss:$16 sps:$4 sm:$0xff]   ;;  %v16867_v18 = vld [vmem:[%s24297_s1 + $0x19e8] ss:$16 sps:$4 sm:$0xff]  }
 0x35f   : > { %25005 = vst [vmem:[#allocation47_spill] sm:$0xff] %v22495_v31  ;;  %12128 = vmatmul.mubr.bf16.gmra.mxu0 %v25006_v60  ;;  %v11631_v53 = vpop.f32.mrf.mxu0  ;;  %v25008_v60 = vld [vmem:[#allocation90_spill] sm:$0xff] }
 0x360   : > { %12211 = vmatmul.mubr.bf16.gmra.mxu1 %v25007_v32  ;;  %v11714_v35 = vpop.f32.mrf.mxu1  ;;  %12250 = vmatpush1.bf16.msra.mxu0 %v16651_v34  ;;  %v11632_v62 = vadd.f32 %v11631_v53, %v22397_v49  ;;  %v25009_v32 = vld [vmem:[#allocation93_spill] sm:$0xff]  ;;  %v16663_v53 = vld [vmem:[%s24297_s1 + $0x1028] ss:$16 sps:$4 sm:$0xff]  }
 0x361   : > { %12333 = vmatpush1.bf16.msra.mxu1 %v16654_v29  ;;  %12251 = vmatprep.subr.bf16.mxu0 %v16659_v24  ;;  %v16668_v29 = vld [vmem:[%s24297_s1 + $0x122c] ss:$16 sps:$4 sm:$0xff]   ;;  %v11633_v34 = vpop.f32.mrf.mxu0  ;;  %v16831_v31 = vld [vmem:[%s24297_s1 + $0x18a8] ss:$16 sps:$4 sm:$0xff]  }
 0x362   : > { %12334 = vmatprep.subr.bf16.mxu1 %v16662_v4  ;;  %v11716_v26 = vpop.f32.mrf.mxu1  ;;  %12137 = vmatprep.mubr.bf16.mxu0 %v25008_v60  ;;  %v11634_v13 = vadd.f32 %v11633_v34, %v22415_v19  ;;  %v22517_v45 = vadd.f32 %v11714_v35, %v11632_v62  ;;  %v16671_v62 = vld [vmem:[%s24297_s1 + $0x100c] ss:$16 sps:$4 sm:$0xff]  }
 0x363   : > { %12220 = vmatprep.mubr.bf16.mxu1 %v25009_v32  ;;  %v11635_v24 = vpop.f32.mrf.mxu0  ;;  %v16674_v35 = vld [vmem:[%s24297_s1 + $0x120c] ss:$16 sps:$4 sm:$0xff]  }
 0x364   : > { %v11718_v4 = vpop.f32.mrf.mxu1  ;;  %12252 = vmatpush1.bf16.msra.mxu0 %v16657_v33  ;;  %v11636_v60 = vadd.f32 %v11635_v24, %v22397_v49  ;;  %v22526_v1 = vadd.f32 %v11716_v26, %v11634_v13  ;;  %v25010_v32 = vld [vmem:[#allocation94_spill] sm:$0xff]  ;;  %v25011_v13 = vld [vmem:[#allocation95_spill] sm:$0xff] }
 0x365   : > { %12335 = vmatpush1.bf16.msra.mxu1 %v16660_v63  ;;  %12253 = vmatprep.subr.bf16.mxu0 %v16665_v8  ;;  %v22534_v33 = vpop.f32.mrf.mxu0  ;;  %v16669_v26 = vld [vmem:[%s24297_s1 + $0x1008] ss:$16 sps:$4 sm:$0xff]  }
 0x366   : > { %12336 = vmatprep.subr.bf16.mxu1 %v16668_v29  ;;  %v22536_v63 = vpop.f32.mrf.mxu1  ;;  %v22538_v34 = vadd.f32 %v11718_v4, %v11636_v60  ;;  %v16672_v24 = vld [vmem:[%s24297_s1 + $0x1208] ss:$16 sps:$4 sm:$0xff]   ;;  %v16677_v4 = vld [vmem:[%s24297_s1 + $0x11ec] ss:$16 sps:$4 sm:$0xff]  }
 0x367   : > { %12138 = vmatmul.mubr.bf16.gmra.mxu0 %v25010_v32  ;;  %v11641_v8 = vpop.f32.mrf.mxu0  ;;  %v25012_v32 = vld [vmem:[#allocation98_spill] sm:$0xff] }
 0x368   : > { %12221 = vmatmul.mubr.bf16.gmra.mxu1 %v25011_v13  ;;  %v11724_v29 = vpop.f32.mrf.mxu1  ;;  %12254 = vmatpush1.bf16.msra.mxu0 %v16663_v53  ;;  %v11642_v7 = vadd.f32 %v11641_v8, %v22397_v49  ;;  %v25013_v13 = vld [vmem:[#allocation99_spill] sm:$0xff]  ;;  %v16675_v8 = vld [vmem:[%s24297_s1 + $0x11e8] ss:$16 sps:$4 sm:$0xff]  }
 0x369   : > { %12337 = vmatpush1.bf16.msra.mxu1 %v16666_v9  ;;  %12255 = vmatprep.subr.bf16.mxu0 %v16671_v62  ;;  %v16680_v9 = vld [vmem:[%s24297_s1 + $0x13ec] ss:$16 sps:$4 sm:$0xff]   ;;  %v11643_v53 = vpop.f32.mrf.mxu0 }
 0x36a   : > { %12338 = vmatprep.subr.bf16.mxu1 %v16674_v35  ;;  %v11726_v60 = vpop.f32.mrf.mxu1  ;;  %12147 = vmatprep.mubr.bf16.mxu0 %v25012_v32  ;;  %v11644_v22 = vadd.f32 %v11643_v53, %v22415_v19  ;;  %v22558_v30 = vadd.f32 %v11724_v29, %v11642_v7  ;;  %v16683_v7 = vld [vmem:[%s24297_s1 + $0x11cc] ss:$16 sps:$4 sm:$0xff]  }
 0x36b   : > { %12230 = vmatprep.mubr.bf16.mxu1 %v25013_v13  ;;  %v11645_v62 = vpop.f32.mrf.mxu0  ;;  %v16686_v29 = vld [vmem:[%s24297_s1 + $0x13cc] ss:$16 sps:$4 sm:$0xff]  }
 0x36c   : > { %v11728_v35 = vpop.f32.mrf.mxu1  ;;  %12256 = vmatpush1.bf16.msra.mxu0 %v16669_v26  ;;  %v11646_v32 = vadd.f32 %v11645_v62, %v22397_v49  ;;  %v22567_v50 = vadd.f32 %v11726_v60, %v11644_v22  ;;  %v25014_v13 = vld [vmem:[#allocation100_spill] sm:$0xff]  ;;  %v25015_v22 = vld [vmem:[#allocation101_spill] sm:$0xff] }
 0x36d   : > { %12339 = vmatpush1.bf16.msra.mxu1 %v16672_v24  ;;  %12257 = vmatprep.subr.bf16.mxu0 %v16677_v4  ;;  %v22575_v26 = vpop.f32.mrf.mxu0  ;;  %v16681_v60 = vld [vmem:[%s24297_s1 + $0x11c8] ss:$16 sps:$4 sm:$0xff]  }
 0x36e   : > { %12340 = vmatprep.subr.bf16.mxu1 %v16680_v9  ;;  %v22577_v24 = vpop.f32.mrf.mxu1  ;;  %v22579_v53 = vadd.f32 %v11728_v35, %v11646_v32  ;;  %v16684_v62 = vld [vmem:[%s24297_s1 + $0x13c8] ss:$16 sps:$4 sm:$0xff]   ;;  %v16689_v35 = vld [vmem:[%s24297_s1 + $0x11ac] ss:$16 sps:$4 sm:$0xff]  }
 0x36f   : > { %12148 = vmatmul.mubr.bf16.gmra.mxu0 %v25014_v13  ;;  %v11651_v4 = vpop.f32.mrf.mxu0 }
 0x370   : > { %12231 = vmatmul.mubr.bf16.gmra.mxu1 %v25015_v22  ;;  %v11734_v9 = vpop.f32.mrf.mxu1  ;;  %12258 = vmatpush2.bf16.msra.mxu0 %v16675_v8  ;;  %v11652_v28 = vadd.f32 %v11651_v4, %v22397_v49  ;;  %v16690_v4 = vld [vmem:[%s24297_s1 + $0x13a8] ss:$16 sps:$4 sm:$0xff]  }
 0x371   : > { %12341 = vmatpush2.bf16.msra.mxu1 %v16678_v43  ;;  %12259 = vmatprep.subr.bf16.mxu0 %v16683_v7  ;;  %v16692_v43 = vld [vmem:[%s24297_s1 + $0x13ac] ss:$16 sps:$4 sm:$0xff]   ;;  %v11653_v8 = vpop.f32.mrf.mxu0 }
 0x372   : > { %12342 = vmatprep.subr.bf16.mxu1 %v16686_v29  ;;  %v11736_v32 = vpop.f32.mrf.mxu1  ;;  %v11654_v13 = vadd.f32 %v11653_v8, %v22415_v19  ;;  %v22597_v22 = vadd.f32 %v11734_v9, %v11652_v28  ;;  %12273 = vmatprep.mubr.bf16.mxu0 %v25016_v21  ;;  %v16687_v29 = vld [vmem:[%s24297_s1 + $0x11a8] ss:$16 sps:$4 sm:$0xff]   ;;  %v16695_v21 = vld [vmem:[%s24297_s1 + $0x118c] ss:$16 sps:$4 sm:$0xff]  }
 0x373   : > { %12356 = vmatprep.mubr.bf16.mxu1 %v25017_v5  ;;  %v11655_v7 = vpop.f32.mrf.mxu0  ;;  %v16698_v28 = vld [vmem:[%s24297_s1 + $0x138c] ss:$16 sps:$4 sm:$0xff]  }
 0x374   : > { %12260 = vmatpush2.bf16.msra.mxu0 %v16681_v60  ;;  %v11656_v36 = vadd.f32 %v11655_v7, %v22397_v49  ;;  %v22608_v8 = vadd.f32 %v11736_v32, %v11654_v13  ;;  %v11738_v5 = vpop.f32.mrf.mxu1  ;;  %v16693_v49 = vld [vmem:[%s24297_s1 + $0x1188] ss:$16 sps:$4 sm:$0xff]   ;;  %v16707_v32 = vld [vmem:[%s24297_s1 + $0x114c] ss:$16 sps:$4 sm:$0xff]  }
 0x375   : > { %12343 = vmatpush2.bf16.msra.mxu1 %v16684_v62  ;;  %12261 = vmatprep.subr.bf16.mxu0 %v16689_v35  ;;  %v16696_v60 = vld [vmem:[%s24297_s1 + $0x1388] ss:$16 sps:$4 sm:$0xff]   ;;  %v16701_v62 = vld [vmem:[%s24297_s1 + $0x116c] ss:$16 sps:$4 sm:$0xff]  }
 0x376   : > { %12344 = vmatprep.subr.bf16.mxu1 %v16692_v43  ;;  %v22616_v9 = vadd.f32 %v11738_v5, %v11656_v36  ;;  %v16704_v36 = vld [vmem:[%s24297_s1 + $0x136c] ss:$16 sps:$4 sm:$0xff]   ;;  %v16699_v35 = vld [vmem:[%s24297_s1 + $0x1168] ss:$16 sps:$4 sm:$0xff]  }
 0x377   : > { %v16702_v43 = vld [vmem:[%s24297_s1 + $0x1368] ss:$16 sps:$4 sm:$0xff]   ;;  %v16710_v13 = vld [vmem:[%s24297_s1 + $0x134c] ss:$16 sps:$4 sm:$0xff]  }
 0x378   : > { %12262 = vmatpush2.bf16.msra.mxu0 %v16687_v29  ;;  %v16705_v7 = vld [vmem:[%s24297_s1 + $0x1148] ss:$16 sps:$4 sm:$0xff]  }
 0x379   : > { %12345 = vmatpush2.bf16.msra.mxu1 %v16690_v4  ;;  %12263 = vmatprep.subr.bf16.mxu0 %v16695_v21  ;;  %v16708_v29 = vld [vmem:[%s24297_s1 + $0x1348] ss:$16 sps:$4 sm:$0xff]   ;;  %v16713_v4 = vld [vmem:[%s24297_s1 + $0x112c] ss:$16 sps:$4 sm:$0xff]  }
 0x37a   : > { %12346 = vmatprep.subr.bf16.mxu1 %v16698_v28  ;;  %v16716_v21 = vld [vmem:[%s24297_s1 + $0x132c] ss:$16 sps:$4 sm:$0xff]   ;;  %v16711_v28 = vld [vmem:[%s24297_s1 + $0x1128] ss:$16 sps:$4 sm:$0xff]  }
 0x37b   : > { %v16714_v5 = vld [vmem:[%s24297_s1 + $0x1328] ss:$16 sps:$4 sm:$0xff]  }
 0x37c   : > { %12264 = vmatpush2.bf16.msra.mxu0 %v16693_v49  ;;  %v16719_v49 = vld [vmem:[%s24297_s1 + $0x110c] ss:$16 sps:$4 sm:$0xff]  }
 0x37d   : > { %12347 = vmatpush2.bf16.msra.mxu1 %v16696_v60  ;;  %12265 = vmatprep.subr.bf16.mxu0 %v16701_v62  ;;  %v16722_v60 = vld [vmem:[%s24297_s1 + $0x130c] ss:$16 sps:$4 sm:$0xff]   ;;  %v16717_v62 = vld [vmem:[%s24297_s1 + $0x1108] ss:$16 sps:$4 sm:$0xff]  }
 0x37e   : > { %12348 = vmatprep.subr.bf16.mxu1 %v16704_v36  ;;  %v16720_v36 = vld [vmem:[%s24297_s1 + $0x1308] ss:$16 sps:$4 sm:$0xff]  }
 0x380   : > { %12266 = vmatpush2.bf16.msra.mxu0 %v16699_v35  ;;  %v16725_v35 = vld [vmem:[%s24297_s1 + $0x14ec] ss:$16 sps:$4 sm:$0xff]  }
 0x381   : > { %12349 = vmatpush2.bf16.msra.mxu1 %v16702_v43  ;;  %12267 = vmatprep.subr.bf16.mxu0 %v16707_v32  ;;  %v16728_v43 = vld [vmem:[%s24297_s1 + $0x16ec] ss:$16 sps:$4 sm:$0xff]   ;;  %v16723_v32 = vld [vmem:[%s24297_s1 + $0x14e8] ss:$16 sps:$4 sm:$0xff]  }
 0x382   : > { %12350 = vmatprep.subr.bf16.mxu1 %v16710_v13  ;;  %v16726_v13 = vld [vmem:[%s24297_s1 + $0x16e8] ss:$16 sps:$4 sm:$0xff]  }
 0x384   : > { %12268 = vmatpush2.bf16.msra.mxu0 %v16705_v7  ;;  %v22684_v7 = vpop.f32.mrf.mxu0 }
 0x385   : > { %12351 = vmatpush2.bf16.msra.mxu1 %v16708_v29  ;;  %12269 = vmatprep.subr.bf16.mxu0 %v16713_v4  ;;  %v22686_v29 = vpop.f32.mrf.mxu1  ;;  %v16731_v4 = vld [vmem:[%s24297_s1 + $0x14cc] ss:$16 sps:$4 sm:$0xff]  }
 0x386   : > { %12352 = vmatprep.subr.bf16.mxu1 %v16716_v21  ;;  %v16734_v21 = vld [vmem:[%s24297_s1 + $0x16cc] ss:$16 sps:$4 sm:$0xff]  }
 0x388   : > { %12270 = vmatpush2.bf16.msra.mxu0 %v16711_v28 }
 0x389   : > { %12353 = vmatpush2.bf16.msra.mxu1 %v16714_v5  ;;  %12271 = vmatprep.subr.bf16.mxu0 %v16719_v49  ;;  %v25018_v49 = vld [vmem:[#allocation106_spill] sm:$0xff] }
 0x38a   : > { %12354 = vmatprep.subr.bf16.mxu1 %v16722_v60  ;;  %v25019_v60 = vld [vmem:[#allocation107_spill] sm:$0xff] }
 0x38c   : > { %12272 = vmatpush2.bf16.msra.mxu0 %v16717_v62 }
 0x38d   : > { %12355 = vmatpush2.bf16.msra.mxu1 %v16720_v36  ;;  %12407 = vmatprep.subr.bf16.mxu0 %v16725_v35  ;;  %v16729_v36 = vld [vmem:[%s24297_s1 + $0x14c8] ss:$16 sps:$4 sm:$0xff]  }
 0x38e   : > { %12490 = vmatprep.subr.bf16.mxu1 %v16728_v43  ;;  %v16732_v35 = vld [vmem:[%s24297_s1 + $0x16c8] ss:$16 sps:$4 sm:$0xff]  }
 0x38f   : > { %v11777_v28 = vpop.f32.mrf.mxu0  ;;  %12274 = vmatmul.mubr.bf16.vlgmr.msra.gmra.mxu0 %v25018_v49  ;;  %v16737_v49 = vld [vmem:[%s24297_s1 + $0x14ac] ss:$16 sps:$4 sm:$0xff]  }
 0x390   : > { %v11860_v5 = vpop.f32.mrf.mxu1  ;;  %12357 = vmatmul.mubr.bf16.vlgmr.msra.gmra.mxu1 %v25019_v60  ;;  %v11778_v62 = vadd.f32 %v11777_v28, %v22432_v54  ;;  %12408 = vmatpush1.bf16.msra.mxu0 %v16723_v32  ;;  %v16740_v54 = vld [vmem:[%s24297_s1 + $0x16ac] ss:$16 sps:$4 sm:$0xff]  }
 0x391   : > { %12491 = vmatpush1.bf16.msra.mxu1 %v16726_v13  ;;  %v11779_v43 = vpop.f32.mrf.mxu0  ;;  %12409 = vmatprep.subr.bf16.mxu0 %v16731_v4  ;;  %v25020_v28 = vld [vmem:[#allocation108_spill] sm:$0xff] }
 0x392   : > { %v11862_v58 = vpop.f32.mrf.mxu1  ;;  %12492 = vmatprep.subr.bf16.mxu1 %v16734_v21  ;;  %v22709_v32 = vadd.f32 %v11860_v5, %v11778_v62  ;;  %v11780_v13 = vadd.f32 %v11779_v43, %v22437_v12  ;;  %12283 = vmatprep.mubr.bf16.mxu0 %v25020_v28  ;;  %v25021_v60 = vld [vmem:[#allocation112_spill] sm:$0xff] }
 0x393   : > { %12366 = vmatprep.mubr.bf16.mxu1 %v25021_v60  ;;  %v11781_v20 = vpop.f32.mrf.mxu0  ;;  %v16738_v12 = vld [vmem:[%s24297_s1 + $0x16a8] ss:$16 sps:$4 sm:$0xff]  }
 0x394   : > { %v11864_v27 = vpop.f32.mrf.mxu1  ;;  %v22714_v4 = vadd.f32 %v11862_v58, %v11780_v13  ;;  %v11782_v21 = vadd.f32 %v11781_v20, %v22456_v44  ;;  %12410 = vmatpush1.bf16.msra.mxu0 %v16729_v36  ;;  %v16743_v20 = vld [vmem:[%s24297_s1 + $0x148c] ss:$16 sps:$4 sm:$0xff]   ;;  %v25025_v13 = vld [vmem:[#allocation113_spill] sm:$0xff] }
 0x395   : > { %12493 = vmatpush1.bf16.msra.mxu1 %v16732_v35  ;;  %v22723_v5 = vpop.f32.mrf.mxu0  ;;  %12411 = vmatprep.subr.bf16.mxu0 %v16737_v49  ;;  %v16746_v58 = vld [vmem:[%s24297_s1 + $0x168c] ss:$16 sps:$4 sm:$0xff]   ;;  %v25024_v35 = vld [vmem:[#allocation111_spill] sm:$0xff]  ;;  %v16741_v49 = vld [vmem:[%s24297_s1 + $0x1488] ss:$16 sps:$4 sm:$0xff]  }
 0x396   : > { %25022 = vst [vmem:[#allocation46_spill] sm:$0xff] %v22723_v5  ;;  %v22725_v62 = vpop.f32.mrf.mxu1  ;;  %12494 = vmatprep.subr.bf16.mxu1 %v16740_v54  ;;  %v22733_v44 = vadd.f32 %v11864_v27, %v11782_v21  ;;  %v16744_v54 = vld [vmem:[%s24297_s1 + $0x1688] ss:$16 sps:$4 sm:$0xff]   ;;  %v16749_v21 = vld [vmem:[%s24297_s1 + $0x146c] ss:$16 sps:$4 sm:$0xff]  }
 0x397   : > { %25023 = vst [vmem:[#allocation48_spill] sm:$0xff] %v22725_v62  ;;  %v11787_v36 = vpop.f32.mrf.mxu0  ;;  %12284 = vmatmul.mubr.bf16.gmra.mxu0 %v25024_v35  ;;  %v25027_v35 = vld [vmem:[#allocation115_spill] sm:$0xff] }
 0x398   : > { %v11870_v43 = vpop.f32.mrf.mxu1  ;;  %12367 = vmatmul.mubr.bf16.gmra.mxu1 %v25025_v13  ;;  %v11788_v28 = vadd.f32 %v11787_v36, %v22476_v23  ;;  %12412 = vmatpush1.bf16.msra.mxu0 %v16735_v56  ;;  %v16752_v56 = vld [vmem:[%s24297_s1 + $0x166c] ss:$16 sps:$4 sm:$0xff]  }
 0x399   : > { %12495 = vmatpush1.bf16.msra.mxu1 %v16738_v12  ;;  %v11789_v27 = vpop.f32.mrf.mxu0  ;;  %12413 = vmatprep.subr.bf16.mxu0 %v16743_v20  ;;  %v25026_v36 = vld [vmem:[#allocation114_spill] sm:$0xff] }
 0x39a   : > { %v11872_v60 = vpop.f32.mrf.mxu1  ;;  %12496 = vmatprep.subr.bf16.mxu1 %v16746_v58  ;;  %v11790_v23 = vadd.f32 %v11789_v27, %v22485_v41  ;;  %v22751_v12 = vadd.f32 %v11870_v43, %v11788_v28  ;;  %12293 = vmatprep.mubr.bf16.mxu0 %v25026_v36  ;;  %v16750_v41 = vld [vmem:[%s24297_s1 + $0x1668] ss:$16 sps:$4 sm:$0xff]   ;;  %v25031_v36 = vld [vmem:[#allocation119_spill] sm:$0xff] }
 0x39b   : > { %12376 = vmatprep.mubr.bf16.mxu1 %v25027_v35  ;;  %v11791_v13 = vpop.f32.mrf.mxu0 }
 0x39c   : > { %v11874_v37 = vpop.f32.mrf.mxu1  ;;  %v11792_v20 = vadd.f32 %v11791_v13, %v22497_v61  ;;  %v22756_v58 = vadd.f32 %v11872_v60, %v11790_v23  ;;  %12414 = vmatpush1.bf16.msra.mxu0 %v16741_v49  ;;  %v16755_v61 = vld [vmem:[%s24297_s1 + $0x144c] ss:$16 sps:$4 sm:$0xff]  }
 0x39d   : > { %12497 = vmatpush1.bf16.msra.mxu1 %v16744_v54  ;;  %v22764_v43 = vpop.f32.mrf.mxu0  ;;  %12415 = vmatprep.subr.bf16.mxu0 %v16749_v21  ;;  %v16758_v49 = vld [vmem:[%s24297_s1 + $0x164c] ss:$16 sps:$4 sm:$0xff]   ;;  %v16753_v21 = vld [vmem:[%s24297_s1 + $0x1448] ss:$16 sps:$4 sm:$0xff]  }
 0x39e   : > { %25028 = vst [vmem:[#allocation49_spill] sm:$0xff] %v22764_v43  ;;  %v22766_v28 = vpop.f32.mrf.mxu1  ;;  %12498 = vmatprep.subr.bf16.mxu1 %v16752_v56  ;;  %v22774_v54 = vadd.f32 %v11874_v37, %v11792_v20  ;;  %v25030_v60 = vld [vmem:[#allocation118_spill] sm:$0xff] }
 0x39f   : > { %25029 = vst [vmem:[#allocation51_spill] sm:$0xff] %v22766_v28  ;;  %v11797_v27 = vpop.f32.mrf.mxu0  ;;  %12294 = vmatmul.mubr.bf16.gmra.mxu0 %v25030_v60  ;;  %v16756_v56 = vld [vmem:[%s24297_s1 + $0x1648] ss:$16 sps:$4 sm:$0xff]   ;;  %v16761_v20 = vld [vmem:[%s24297_s1 + $0x142c] ss:$16 sps:$4 sm:$0xff]   ;;  %v25033_v60 = vld [vmem:[#allocation123_spill] sm:$0xff] }
 0x3a0   : > { %v11880_v23 = vpop.f32.mrf.mxu1  ;;  %12377 = vmatmul.mubr.bf16.gmra.mxu1 %v25031_v36  ;;  %v11798_v35 = vadd.f32 %v11797_v27, %v22517_v45  ;;  %12416 = vmatpush1.bf16.msra.mxu0 %v16747_v51  ;;  %v16764_v51 = vld [vmem:[%s24297_s1 + $0x162c] ss:$16 sps:$4 sm:$0xff]   ;;  %v16783_v28 = vld [vmem:[%s24297_s1 + $0x15a8] ss:$16 sps:$4 sm:$0xff]  }
 0x3a1   : > { %12499 = vmatpush1.bf16.msra.mxu1 %v16750_v41  ;;  %v11799_v37 = vpop.f32.mrf.mxu0  ;;  %12417 = vmatprep.subr.bf16.mxu0 %v16755_v61  ;;  %v25032_v27 = vld [vmem:[#allocation122_spill] sm:$0xff] }
 0x3a2   : > { %v11882_v13 = vpop.f32.mrf.mxu1  ;;  %12500 = vmatprep.subr.bf16.mxu1 %v16758_v49  ;;  %v11800_v45 = vadd.f32 %v11799_v37, %v22526_v1  ;;  %v22792_v41 = vadd.f32 %v11880_v23, %v11798_v35  ;;  %12303 = vmatprep.mubr.bf16.mxu0 %v25032_v27  ;;  %v16762_v1 = vld [vmem:[%s24297_s1 + $0x1628] ss:$16 sps:$4 sm:$0xff]   ;;  %v25035_v27 = vld [vmem:[#allocation125_spill] sm:$0xff] }
 0x3a3   : > { %12386 = vmatprep.mubr.bf16.mxu1 %v25033_v60  ;;  %v11801_v36 = vpop.f32.mrf.mxu0 }
 0x3a4   : > { %v11884_v40 = vpop.f32.mrf.mxu1  ;;  %v11802_v61 = vadd.f32 %v11801_v36, %v22538_v34  ;;  %v22797_v49 = vadd.f32 %v11882_v13, %v11800_v45  ;;  %12418 = vmatpush1.bf16.msra.mxu0 %v16753_v21  ;;  %v16767_v34 = vld [vmem:[%s24297_s1 + $0x140c] ss:$16 sps:$4 sm:$0xff]  }
 0x3a5   : > { %12501 = vmatpush1.bf16.msra.mxu1 %v16756_v56  ;;  %v22805_v23 = vpop.f32.mrf.mxu0  ;;  %12419 = vmatprep.subr.bf16.mxu0 %v16761_v20  ;;  %v16770_v21 = vld [vmem:[%s24297_s1 + $0x160c] ss:$16 sps:$4 sm:$0xff]   ;;  %v16765_v20 = vld [vmem:[%s24297_s1 + $0x1408] ss:$16 sps:$4 sm:$0xff]  }
 0x3a6   : > { %v22807_v35 = vpop.f32.mrf.mxu1  ;;  %12502 = vmatprep.subr.bf16.mxu1 %v16764_v51  ;;  %v22815_v56 = vadd.f32 %v11884_v40, %v11802_v61  ;;  %v25034_v13 = vld [vmem:[#allocation124_spill] sm:$0xff] }
 0x3a7   : > { %v11807_v37 = vpop.f32.mrf.mxu0  ;;  %12304 = vmatmul.mubr.bf16.gmra.mxu0 %v25034_v13  ;;  %v16768_v51 = vld [vmem:[%s24297_s1 + $0x1608] ss:$16 sps:$4 sm:$0xff]   ;;  %v16773_v61 = vld [vmem:[%s24297_s1 + $0x15ec] ss:$16 sps:$4 sm:$0xff]  }
 0x3a8   : > { %v11890_v45 = vpop.f32.mrf.mxu1  ;;  %12387 = vmatmul.mubr.bf16.gmra.mxu1 %v25035_v27  ;;  %v11808_v60 = vadd.f32 %v11807_v37, %v22558_v30  ;;  %12420 = vmatpush1.bf16.msra.mxu0 %v16759_v11  ;;  %v16776_v30 = vld [vmem:[%s24297_s1 + $0x17ec] ss:$16 sps:$4 sm:$0xff]   ;;  %v25036_v37 = vld [vmem:[#allocation127_spill] sm:$0xff] }
 0x3a9   : > { %12503 = vmatpush1.bf16.msra.mxu1 %v16762_v1  ;;  %v11809_v40 = vpop.f32.mrf.mxu0  ;;  %12421 = vmatprep.subr.bf16.mxu0 %v16767_v34  ;;  %v25037_v13 = vld [vmem:[#allocation128_spill] sm:$0xff] }
 0x3aa   : > { %v11892_v36 = vpop.f32.mrf.mxu1  ;;  %12504 = vmatprep.subr.bf16.mxu1 %v16770_v21  ;;  %v11810_v11 = vadd.f32 %v11809_v40, %v22567_v50  ;;  %v22833_v1 = vadd.f32 %v11890_v45, %v11808_v60  ;;  %12313 = vmatprep.mubr.bf16.mxu0 %v25036_v37  ;;  %v16774_v50 = vld [vmem:[%s24297_s1 + $0x17e8] ss:$16 sps:$4 sm:$0xff]   ;;  %v25039_v37 = vld [vmem:[#allocation65_spill] sm:$0xff] }
 0x3ab   : > { %12396 = vmatprep.mubr.bf16.mxu1 %v25037_v13  ;;  %v11811_v27 = vpop.f32.mrf.mxu0 }
 0x3ac   : > { %v11894_v48 = vpop.f32.mrf.mxu1  ;;  %v11812_v34 = vadd.f32 %v11811_v27, %v22579_v53  ;;  %v22838_v21 = vadd.f32 %v11892_v36, %v11810_v11  ;;  %12422 = vmatpush1.bf16.msra.mxu0 %v16765_v20  ;;  %v16779_v53 = vld [vmem:[%s24297_s1 + $0x15cc] ss:$16 sps:$4 sm:$0xff]  }
 0x3ad   : > { %12505 = vmatpush1.bf16.msra.mxu1 %v16768_v51  ;;  %v22846_v45 = vpop.f32.mrf.mxu0  ;;  %12423 = vmatprep.subr.bf16.mxu0 %v16773_v61  ;;  %v16782_v20 = vld [vmem:[%s24297_s1 + $0x17cc] ss:$16 sps:$4 sm:$0xff]   ;;  %v16777_v61 = vld [vmem:[%s24297_s1 + $0x15c8] ss:$16 sps:$4 sm:$0xff]  }
 0x3ae   : > { %v22848_v60 = vpop.f32.mrf.mxu1  ;;  %12506 = vmatprep.subr.bf16.mxu1 %v16776_v30  ;;  %v22856_v51 = vadd.f32 %v11894_v48, %v11812_v34  ;;  %v25038_v36 = vld [vmem:[#allocation64_spill] sm:$0xff] }
 0x3af   : > { %v11817_v40 = vpop.f32.mrf.mxu0  ;;  %12314 = vmatmul.mubr.bf16.gmra.mxu0 %v25038_v36  ;;  %v16780_v30 = vld [vmem:[%s24297_s1 + $0x17c8] ss:$16 sps:$4 sm:$0xff]   ;;  %v16785_v34 = vld [vmem:[%s24297_s1 + $0x15ac] ss:$16 sps:$4 sm:$0xff]   ;;  %v25041_v36 = vld [vmem:[#allocation131_spill] sm:$0xff] }
 0x3b0   : > { %v11900_v11 = vpop.f32.mrf.mxu1  ;;  %12397 = vmatmul.mubr.bf16.gmra.mxu1 %v25039_v37  ;;  %v11818_v13 = vadd.f32 %v11817_v40, %v22597_v22  ;;  %12424 = vmatpush2.bf16.msra.mxu0 %v16771_v39  ;;  %v16788_v39 = vld [vmem:[%s24297_s1 + $0x17ac] ss:$16 sps:$4 sm:$0xff]  }
 0x3b1   : > { %12507 = vmatpush2.bf16.msra.mxu1 %v16774_v50  ;;  %v11819_v48 = vpop.f32.mrf.mxu0  ;;  %12425 = vmatprep.subr.bf16.mxu0 %v16779_v53  ;;  %v25040_v40 = vld [vmem:[#allocation130_spill] sm:$0xff] }
 0x3b2   : > { %v11902_v27 = vpop.f32.mrf.mxu1  ;;  %12508 = vmatprep.subr.bf16.mxu1 %v16782_v20  ;;  %v11820_v22 = vadd.f32 %v11819_v48, %v22608_v8  ;;  %v22874_v50 = vadd.f32 %v11900_v11, %v11818_v13  ;;  %12439 = vmatprep.mubr.bf16.mxu0 %v25040_v40  ;;  %v16786_v8 = vld [vmem:[%s24297_s1 + $0x17a8] ss:$16 sps:$4 sm:$0xff]   ;;  %v16791_v11 = vld [vmem:[%s24297_s1 + $0x158c] ss:$16 sps:$4 sm:$0xff]  }
 0x3b3   : > { %12522 = vmatprep.mubr.bf16.mxu1 %v25041_v36  ;;  %v11821_v37 = vpop.f32.mrf.mxu0  ;;  %v16797_v48 = vld [vmem:[%s24297_s1 + $0x156c] ss:$16 sps:$4 sm:$0xff]   ;;  %v16804_v40 = vld [vmem:[%s24297_s1 + $0x1748] ss:$16 sps:$4 sm:$0xff]  }
 0x3b4   : > { %v11904_v42 = vpop.f32.mrf.mxu1  ;;  %v11822_v53 = vadd.f32 %v11821_v37, %v22616_v9  ;;  %v22879_v20 = vadd.f32 %v11902_v27, %v11820_v22  ;;  %12426 = vmatpush2.bf16.msra.mxu0 %v16777_v61  ;;  %v16794_v9 = vld [vmem:[%s24297_s1 + $0x178c] ss:$16 sps:$4 sm:$0xff]   ;;  %v16789_v61 = vld [vmem:[%s24297_s1 + $0x1588] ss:$16 sps:$4 sm:$0xff]  }
 0x3b5   : > { %12509 = vmatpush2.bf16.msra.mxu1 %v16780_v30  ;;  %12427 = vmatprep.subr.bf16.mxu0 %v16785_v34  ;;  %v16792_v30 = vld [vmem:[%s24297_s1 + $0x1788] ss:$16 sps:$4 sm:$0xff]   ;;  %v16803_v34 = vld [vmem:[%s24297_s1 + $0x154c] ss:$16 sps:$4 sm:$0xff]  }
 0x3b6   : > { %12510 = vmatprep.subr.bf16.mxu1 %v16788_v39  ;;  %v22893_v13 = vadd.f32 %v11904_v42, %v11822_v53  ;;  %v16800_v42 = vld [vmem:[%s24297_s1 + $0x176c] ss:$16 sps:$4 sm:$0xff]   ;;  %v16798_v27 = vld [vmem:[%s24297_s1 + $0x1768] ss:$16 sps:$4 sm:$0xff]  }
 0x3b7   : > { %v16806_v39 = vld [vmem:[%s24297_s1 + $0x174c] ss:$16 sps:$4 sm:$0xff]   ;;  %v16801_v22 = vld [vmem:[%s24297_s1 + $0x1548] ss:$16 sps:$4 sm:$0xff]  }
 0x3b8   : > { %12428 = vmatpush2.bf16.msra.mxu0 %v16783_v28  ;;  %v16795_v28 = vld [vmem:[%s24297_s1 + $0x1568] ss:$16 sps:$4 sm:$0xff]   ;;  %v16809_v36 = vld [vmem:[%s24297_s1 + $0x152c] ss:$16 sps:$4 sm:$0xff]  }
 0x3b9   : > { %12511 = vmatpush2.bf16.msra.mxu1 %v16786_v8  ;;  %12429 = vmatprep.subr.bf16.mxu0 %v16791_v11  ;;  %v16812_v37 = vld [vmem:[%s24297_s1 + $0x172c] ss:$16 sps:$4 sm:$0xff]   ;;  %v16807_v53 = vld [vmem:[%s24297_s1 + $0x1528] ss:$16 sps:$4 sm:$0xff]  }
 0x3ba   : > { %12512 = vmatprep.subr.bf16.mxu1 %v16794_v9  ;;  %v16810_v8 = vld [vmem:[%s24297_s1 + $0x1728] ss:$16 sps:$4 sm:$0xff]   ;;  %v16815_v11 = vld [vmem:[%s24297_s1 + $0x150c] ss:$16 sps:$4 sm:$0xff]  }
 0x3bb   : > { %v16818_v9 = vld [vmem:[%s24297_s1 + $0x170c] ss:$16 sps:$4 sm:$0xff]  }
 0x3bc   : > { %12430 = vmatpush2.bf16.msra.mxu0 %v16789_v61  ;;  %v16813_v61 = vld [vmem:[%s24297_s1 + $0x1508] ss:$16 sps:$4 sm:$0xff]  }
 0x3bd   : > { %12513 = vmatpush2.bf16.msra.mxu1 %v16792_v30  ;;  %12431 = vmatprep.subr.bf16.mxu0 %v16797_v48  ;;  %v16816_v30 = vld [vmem:[%s24297_s1 + $0x1708] ss:$16 sps:$4 sm:$0xff]   ;;  %v16821_v48 = vld [vmem:[%s24297_s1 + $0x18ec] ss:$16 sps:$4 sm:$0xff]  }
 0x3be   : > { %12514 = vmatprep.subr.bf16.mxu1 %v16800_v42  ;;  %v16824_v42 = vld [vmem:[%s24297_s1 + $0x1aec] ss:$16 sps:$4 sm:$0xff]  }
 0x3c0   : > { %12432 = vmatpush2.bf16.msra.mxu0 %v16795_v28  ;;  %v16819_v28 = vld [vmem:[%s24297_s1 + $0x18e8] ss:$16 sps:$4 sm:$0xff]  }
 0x3c1   : > { %12515 = vmatpush2.bf16.msra.mxu1 %v16798_v27  ;;  %12433 = vmatprep.subr.bf16.mxu0 %v16803_v34  ;;  %v16822_v27 = vld [vmem:[%s24297_s1 + $0x1ae8] ss:$16 sps:$4 sm:$0xff]   ;;  %v22961_v34 = vpop.f32.mrf.mxu0 }
 0x3c2   : > { %12516 = vmatprep.subr.bf16.mxu1 %v16806_v39  ;;  %v22963_v39 = vpop.f32.mrf.mxu1 }
 0x3c4   : > { %12434 = vmatpush2.bf16.msra.mxu0 %v16801_v22  ;;  %v16827_v22 = vld [vmem:[%s24297_s1 + $0x18cc] ss:$16 sps:$4 sm:$0xff]  }
 0x3c5   : > { %12517 = vmatpush2.bf16.msra.mxu1 %v16804_v40  ;;  %12435 = vmatprep.subr.bf16.mxu0 %v16809_v36  ;;  %v16830_v40 = vld [vmem:[%s24297_s1 + $0x1acc] ss:$16 sps:$4 sm:$0xff]  }
 0x3c6   : > { %12518 = vmatprep.subr.bf16.mxu1 %v16812_v37 }
 0x3c8   : > { %12436 = vmatpush2.bf16.msra.mxu0 %v16807_v53  ;;  %v25042_v53 = vld [vmem:[#allocation69_spill] sm:$0xff] }
 0x3c9   : > { %12519 = vmatpush2.bf16.msra.mxu1 %v16810_v8  ;;  %12437 = vmatprep.subr.bf16.mxu0 %v16815_v11  ;;  %v25043_v8 = vld [vmem:[#allocation70_spill] sm:$0xff] }
 0x3ca   : > { %12520 = vmatprep.subr.bf16.mxu1 %v16818_v9  ;;  %v16825_v9 = vld [vmem:[%s24297_s1 + $0x18c8] ss:$16 sps:$4 sm:$0xff]  }
 0x3cc   : > { %12438 = vmatpush2.bf16.msra.mxu0 %v16813_v61  ;;  %v16828_v61 = vld [vmem:[%s24297_s1 + $0x1ac8] ss:$16 sps:$4 sm:$0xff]  }
 0x3cd   : > { %12521 = vmatpush2.bf16.msra.mxu1 %v16816_v30  ;;  %12573 = vmatprep.subr.bf16.mxu0 %v16821_v48 }
 0x3ce   : > { %12656 = vmatprep.subr.bf16.mxu1 %v16824_v42  ;;  %v16833_v42 = vld [vmem:[%s24297_s1 + $0x18ac] ss:$16 sps:$4 sm:$0xff]  }
 0x3cf   : > { %v11943_v36 = vpop.f32.mrf.mxu0  ;;  %12440 = vmatmul.mubr.bf16.vlgmr.msra.gmra.mxu0 %v25042_v53  ;;  %v25045_v53 = vld [vmem:[#allocation75_spill] sm:$0xff] }
 0x3d0   : > { %v12026_v37 = vpop.f32.mrf.mxu1  ;;  %12523 = vmatmul.mubr.bf16.vlgmr.msra.gmra.mxu1 %v25043_v8  ;;  %v11944_v11 = vadd.f32 %v11943_v36, %v22709_v32  ;;  %12574 = vmatpush1.bf16.msra.mxu0 %v16819_v28  ;;  %v16836_v32 = vld [vmem:[%s24297_s1 + $0x1aac] ss:$16 sps:$4 sm:$0xff]  }
 0x3d1   : > { %12657 = vmatpush1.bf16.msra.mxu1 %v16822_v27  ;;  %v11945_v30 = vpop.f32.mrf.mxu0  ;;  %12575 = vmatprep.subr.bf16.mxu0 %v16827_v22  ;;  %v25044_v36 = vld [vmem:[#allocation74_spill] sm:$0xff] }
 0x3d2   : > { %v12028_v48 = vpop.f32.mrf.mxu1  ;;  %12658 = vmatprep.subr.bf16.mxu1 %v16830_v40  ;;  %v22986_v28 = vadd.f32 %v12026_v37, %v11944_v11  ;;  %v11946_v27 = vadd.f32 %v11945_v30, %v22714_v4  ;;  %12449 = vmatprep.mubr.bf16.mxu0 %v25044_v36  ;;  %v16834_v4 = vld [vmem:[%s24297_s1 + $0x1aa8] ss:$16 sps:$4 sm:$0xff]  }
 0x3d3   : > { %12532 = vmatprep.mubr.bf16.mxu1 %v25045_v53  ;;  %v11947_v8 = vpop.f32.mrf.mxu0  ;;  %v25049_v36 = vld [vmem:[#allocation132_spill] sm:$0xff] }
 0x3d4   : > { %v12030_v43 = vpop.f32.mrf.mxu1  ;;  %v22991_v22 = vadd.f32 %v12028_v48, %v11946_v27  ;;  %v11948_v40 = vadd.f32 %v11947_v8, %v22733_v44  ;;  %12576 = vmatpush1.bf16.msra.mxu0 %v16825_v9  ;;  %v16839_v44 = vld [vmem:[%s24297_s1 + $0x188c] ss:$16 sps:$4 sm:$0xff]  }
 0x3d5   : > { %12659 = vmatpush1.bf16.msra.mxu1 %v16828_v61  ;;  %v23000_v37 = vpop.f32.mrf.mxu0  ;;  %12577 = vmatprep.subr.bf16.mxu0 %v16833_v42  ;;  %v16842_v9 = vld [vmem:[%s24297_s1 + $0x1a8c] ss:$16 sps:$4 sm:$0xff]   ;;  %v16837_v42 = vld [vmem:[%s24297_s1 + $0x1888] ss:$16 sps:$4 sm:$0xff]  }
 0x3d6   : > { %25046 = vst [vmem:[#allocation50_spill] sm:$0xff] %v23000_v37  ;;  %v23002_v11 = vpop.f32.mrf.mxu1  ;;  %12660 = vmatprep.subr.bf16.mxu1 %v16836_v32  ;;  %v23010_v61 = vadd.f32 %v12030_v43, %v11948_v40  ;;  %v25048_v48 = vld [vmem:[#allocation78_spill] sm:$0xff] }
 0x3d7   : > { %25047 = vst [vmem:[#allocation52_spill] sm:$0xff] %v23002_v11  ;;  %v11953_v30 = vpop.f32.mrf.mxu0  ;;  %12450 = vmatmul.mubr.bf16.gmra.mxu0 %v25048_v48  ;;  %v16840_v32 = vld [vmem:[%s24297_s1 + $0x1a88] ss:$16 sps:$4 sm:$0xff]   ;;  %v16845_v40 = vld [vmem:[%s24297_s1 + $0x186c] ss:$16 sps:$4 sm:$0xff]  }
 0x3d8   : > { %v12036_v27 = vpop.f32.mrf.mxu1  ;;  %12533 = vmatmul.mubr.bf16.gmra.mxu1 %v25049_v36  ;;  %v11954_v53 = vadd.f32 %v11953_v30, %v22751_v12  ;;  %12578 = vmatpush1.bf16.msra.mxu0 %v16831_v31  ;;  %v16848_v31 = vld [vmem:[%s24297_s1 + $0x1a6c] ss:$16 sps:$4 sm:$0xff]   ;;  %v25050_v30 = vld [vmem:[#allocation135_spill] sm:$0xff]  ;;  %v16843_v37 = vld [vmem:[%s24297_s1 + $0x1868] ss:$16 sps:$4 sm:$0xff]  }
 0x3d9   : > { %12661 = vmatpush1.bf16.msra.mxu1 %v16834_v4  ;;  %v11955_v43 = vpop.f32.mrf.mxu0  ;;  %12579 = vmatprep.subr.bf16.mxu0 %v16839_v44  ;;  %v25051_v48 = vld [vmem:[#allocation136_spill] sm:$0xff] }
 0x3da   : > { %v12038_v8 = vpop.f32.mrf.mxu1  ;;  %12662 = vmatprep.subr.bf16.mxu1 %v16842_v9  ;;  %v11956_v12 = vadd.f32 %v11955_v43, %v22756_v58  ;;  %v23028_v4 = vadd.f32 %v12036_v27, %v11954_v53  ;;  %12459 = vmatprep.mubr.bf16.mxu0 %v25050_v30  ;;  %v16846_v58 = vld [vmem:[%s24297_s1 + $0x1a68] ss:$16 sps:$4 sm:$0xff]  }
 0x3db   : > { %12542 = vmatprep.mubr.bf16.mxu1 %v25051_v48  ;;  %v11957_v36 = vpop.f32.mrf.mxu0  ;;  %v25055_v30 = vld [vmem:[#allocation138_spill] sm:$0xff] }
 0x3dc   : > { %v12040_v11 = vpop.f32.mrf.mxu1  ;;  %v11958_v44 = vadd.f32 %v11957_v36, %v22774_v54  ;;  %v23033_v9 = vadd.f32 %v12038_v8, %v11956_v12  ;;  %12580 = vmatpush1.bf16.msra.mxu0 %v16837_v42  ;;  %v16851_v54 = vld [vmem:[%s24297_s1 + $0x184c] ss:$16 sps:$4 sm:$0xff]   ;;  %v25054_v8 = vld [vmem:[#allocation137_spill] sm:$0xff] }
 0x3dd   : > { %12663 = vmatpush1.bf16.msra.mxu1 %v16840_v32  ;;  %v23041_v27 = vpop.f32.mrf.mxu0  ;;  %12581 = vmatprep.subr.bf16.mxu0 %v16845_v40  ;;  %v16854_v42 = vld [vmem:[%s24297_s1 + $0x1a4c] ss:$16 sps:$4 sm:$0xff]   ;;  %v16849_v40 = vld [vmem:[%s24297_s1 + $0x1848] ss:$16 sps:$4 sm:$0xff]  }
 0x3de   : > { %25052 = vst [vmem:[#allocation53_spill] sm:$0xff] %v23041_v27  ;;  %v23043_v53 = vpop.f32.mrf.mxu1  ;;  %12664 = vmatprep.subr.bf16.mxu1 %v16848_v31  ;;  %v23051_v32 = vadd.f32 %v12040_v11, %v11958_v44  ;;  %v16852_v31 = vld [vmem:[%s24297_s1 + $0x1a48] ss:$16 sps:$4 sm:$0xff]   ;;  %v16857_v44 = vld [vmem:[%s24297_s1 + $0x182c] ss:$16 sps:$4 sm:$0xff]  }
 0x3df   : > { %25053 = vst [vmem:[#allocation55_spill] sm:$0xff] %v23043_v53  ;;  %v11963_v43 = vpop.f32.mrf.mxu0  ;;  %12460 = vmatmul.mubr.bf16.gmra.mxu0 %v25054_v8  ;;  %v25057_v8 = vld [vmem:[#allocation143_spill] sm:$0xff]  ;;  %v16855_v27 = vld [vmem:[%s24297_s1 + $0x1828] ss:$16 sps:$4 sm:$0xff]  }
 0x3e0   : > { %v12046_v12 = vpop.f32.mrf.mxu1  ;;  %12543 = vmatmul.mubr.bf16.gmra.mxu1 %v25055_v30  ;;  %v11964_v48 = vadd.f32 %v11963_v43, %v22792_v41  ;;  %12582 = vmatpush1.bf16.msra.mxu0 %v16843_v37  ;;  %v16860_v41 = vld [vmem:[%s24297_s1 + $0x1a2c] ss:$16 sps:$4 sm:$0xff]  }
 0x3e1   : > { %12665 = vmatpush1.bf16.msra.mxu1 %v16846_v58  ;;  %v11965_v11 = vpop.f32.mrf.mxu0  ;;  %12583 = vmatprep.subr.bf16.mxu0 %v16851_v54  ;;  %v25056_v43 = vld [vmem:[#allocation142_spill] sm:$0xff] }
 0x3e2   : > { %v12048_v36 = vpop.f32.mrf.mxu1  ;;  %12666 = vmatprep.subr.bf16.mxu1 %v16854_v42  ;;  %v11966_v37 = vadd.f32 %v11965_v11, %v22797_v49  ;;  %v23069_v58 = vadd.f32 %v12046_v12, %v11964_v48  ;;  %12469 = vmatprep.mubr.bf16.mxu0 %v25056_v43  ;;  %v16858_v49 = vld [vmem:[%s24297_s1 + $0x1a28] ss:$16 sps:$4 sm:$0xff]  }
 0x3e3   : > { %12552 = vmatprep.mubr.bf16.mxu1 %v25057_v8  ;;  %v11967_v30 = vpop.f32.mrf.mxu0  ;;  %v25059_v43 = vld [vmem:[#allocation144_spill] sm:$0xff] }
 0x3e4   : > { %v12050_v53 = vpop.f32.mrf.mxu1  ;;  %v11968_v54 = vadd.f32 %v11967_v30, %v22815_v56  ;;  %v23074_v42 = vadd.f32 %v12048_v36, %v11966_v37  ;;  %12584 = vmatpush1.bf16.msra.mxu0 %v16849_v40  ;;  %v16863_v56 = vld [vmem:[%s24297_s1 + $0x180c] ss:$16 sps:$4 sm:$0xff]   ;;  %v25058_v36 = vld [vmem:[#allocation141_spill] sm:$0xff] }
 0x3e5   : > { %12667 = vmatpush1.bf16.msra.mxu1 %v16852_v31  ;;  %v23082_v12 = vpop.f32.mrf.mxu0  ;;  %12585 = vmatprep.subr.bf16.mxu0 %v16857_v44  ;;  %v16866_v40 = vld [vmem:[%s24297_s1 + $0x1a0c] ss:$16 sps:$4 sm:$0xff]   ;;  %v16861_v44 = vld [vmem:[%s24297_s1 + $0x1808] ss:$16 sps:$4 sm:$0xff]  }
 0x3e6   : > { %v23084_v48 = vpop.f32.mrf.mxu1  ;;  %12668 = vmatprep.subr.bf16.mxu1 %v16860_v41  ;;  %v23092_v31 = vadd.f32 %v12050_v53, %v11968_v54  ;;  %v16864_v41 = vld [vmem:[%s24297_s1 + $0x1a08] ss:$16 sps:$4 sm:$0xff]   ;;  %v16869_v54 = vld [vmem:[%s24297_s1 + $0x19ec] ss:$16 sps:$4 sm:$0xff]  }
 0x3e7   : > { %v11973_v11 = vpop.f32.mrf.mxu0  ;;  %12470 = vmatmul.mubr.bf16.gmra.mxu0 %v25058_v36  ;;  %v25061_v36 = vld [vmem:[#allocation152_spill] sm:$0xff] }
 0x3e8   : > { %v12056_v37 = vpop.f32.mrf.mxu1  ;;  %12553 = vmatmul.mubr.bf16.gmra.mxu1 %v25059_v43  ;;  %v11974_v8 = vadd.f32 %v11973_v11, %v22833_v1  ;;  %12586 = vmatpush1.bf16.msra.mxu0 %v16855_v27  ;;  %v16872_v1 = vld [vmem:[%s24297_s1 + $0x1bec] ss:$16 sps:$4 sm:$0xff]   ;;  %v25060_v11 = vld [vmem:[#allocation151_spill] sm:$0xff] }
 0x3e9   : > { %12669 = vmatpush1.bf16.msra.mxu1 %v16858_v49  ;;  %v11975_v53 = vpop.f32.mrf.mxu0  ;;  %12587 = vmatprep.subr.bf16.mxu0 %v16863_v56 }
 0x3ea   : > { %v12058_v30 = vpop.f32.mrf.mxu1  ;;  %12670 = vmatprep.subr.bf16.mxu1 %v16866_v40  ;;  %v11976_v27 = vadd.f32 %v11975_v53, %v22838_v21  ;;  %v23110_v49 = vadd.f32 %v12056_v37, %v11974_v8  ;;  %12479 = vmatprep.mubr.bf16.mxu0 %v25060_v11  ;;  %v16870_v21 = vld [vmem:[%s24297_s1 + $0x1be8] ss:$16 sps:$4 sm:$0xff]  }
 0x3eb   : > { %12562 = vmatprep.mubr.bf16.mxu1 %v25061_v36  ;;  %v11977_v43 = vpop.f32.mrf.mxu0  ;;  %v25063_v11 = vld [vmem:[#allocation154_spill] sm:$0xff] }
 0x3ec   : > { %v12060_v62 = vpop.f32.mrf.mxu1  ;;  %v11978_v56 = vadd.f32 %v11977_v43, %v22856_v51  ;;  %v23115_v40 = vadd.f32 %v12058_v30, %v11976_v27  ;;  %12588 = vmatpush1.bf16.msra.mxu0 %v16861_v44  ;;  %v16875_v51 = vld [vmem:[%s24297_s1 + $0x19cc] ss:$16 sps:$4 sm:$0xff]   ;;  %v25062_v30 = vld [vmem:[#allocation153_spill] sm:$0xff] }
 0x3ed   : > { %12671 = vmatpush1.bf16.msra.mxu1 %v16864_v41  ;;  %v23123_v37 = vpop.f32.mrf.mxu0  ;;  %12589 = vmatprep.subr.bf16.mxu0 %v16869_v54  ;;  %v16878_v44 = vld [vmem:[%s24297_s1 + $0x1bcc] ss:$16 sps:$4 sm:$0xff]   ;;  %v16873_v54 = vld [vmem:[%s24297_s1 + $0x19c8] ss:$16 sps:$4 sm:$0xff]  }
 0x3ee   : > { %v23125_v8 = vpop.f32.mrf.mxu1  ;;  %12672 = vmatprep.subr.bf16.mxu1 %v16872_v1  ;;  %v23133_v41 = vadd.f32 %v12060_v62, %v11978_v56  ;;  %v16876_v1 = vld [vmem:[%s24297_s1 + $0x1bc8] ss:$16 sps:$4 sm:$0xff]   ;;  %v16881_v56 = vld [vmem:[%s24297_s1 + $0x19ac] ss:$16 sps:$4 sm:$0xff]  }
 0x3ef   : > { %v11983_v53 = vpop.f32.mrf.mxu0  ;;  %12480 = vmatmul.mubr.bf16.gmra.mxu0 %v25062_v30  ;;  %v25065_v30 = vld [vmem:[#allocation158_spill] sm:$0xff] }
 0x3f0   : > { %v12066_v27 = vpop.f32.mrf.mxu1  ;;  %12563 = vmatmul.mubr.bf16.gmra.mxu1 %v25063_v11  ;;  %v11984_v36 = vadd.f32 %v11983_v53, %v22874_v50  ;;  %12590 = vmatpush2.bf16.msra.mxu0 %v16867_v18  ;;  %v16884_v18 = vld [vmem:[%s24297_s1 + $0x1bac] ss:$16 sps:$4 sm:$0xff]   ;;  %v25064_v53 = vld [vmem:[#allocation157_spill] sm:$0xff] }
 0x3f1   : > { %12673 = vmatpush2.bf16.msra.mxu1 %v16870_v21  ;;  %v11985_v62 = vpop.f32.mrf.mxu0  ;;  %12591 = vmatprep.subr.bf16.mxu0 %v16875_v51 }
 0x3f2   : > { %v12068_v43 = vpop.f32.mrf.mxu1  ;;  %12674 = vmatprep.subr.bf16.mxu1 %v16878_v44  ;;  %v11986_v50 = vadd.f32 %v11985_v62, %v22879_v20  ;;  %v23151_v21 = vadd.f32 %v12066_v27, %v11984_v36  ;;  %12605 = vmatprep.mubr.bf16.mxu0 %v25064_v53  ;;  %v16882_v20 = vld [vmem:[%s24297_s1 + $0x1ba8] ss:$16 sps:$4 sm:$0xff]   ;;  %v16887_v27 = vld [vmem:[%s24297_s1 + $0x198c] ss:$16 sps:$4 sm:$0xff]  }
 0x3f3   : > { %12688 = vmatprep.mubr.bf16.mxu1 %v25065_v30  ;;  %v11987_v11 = vpop.f32.mrf.mxu0  ;;  %v16893_v62 = vld [vmem:[%s24297_s1 + $0x196c] ss:$16 sps:$4 sm:$0xff]   ;;  %v16900_v53 = vld [vmem:[%s24297_s1 + $0x1b48] ss:$16 sps:$4 sm:$0xff]  }
 0x3f4   : > { %v12070_v5 = vpop.f32.mrf.mxu1  ;;  %v11988_v51 = vadd.f32 %v11987_v11, %v22893_v13  ;;  %v23156_v44 = vadd.f32 %v12068_v43, %v11986_v50  ;;  %12592 = vmatpush2.bf16.msra.mxu0 %v16873_v54  ;;  %v16890_v13 = vld [vmem:[%s24297_s1 + $0x1b8c] ss:$16 sps:$4 sm:$0xff]   ;;  %v16885_v54 = vld [vmem:[%s24297_s1 + $0x1988] ss:$16 sps:$4 sm:$0xff]  }
 0x3f5   : > { %12675 = vmatpush2.bf16.msra.mxu1 %v16876_v1  ;;  %12593 = vmatprep.subr.bf16.mxu0 %v16881_v56  ;;  %v16888_v1 = vld [vmem:[%s24297_s1 + $0x1b88] ss:$16 sps:$4 sm:$0xff]   ;;  %v16899_v56 = vld [vmem:[%s24297_s1 + $0x194c] ss:$16 sps:$4 sm:$0xff]  }
 0x3f6   : > { %12676 = vmatprep.subr.bf16.mxu1 %v16884_v18  ;;  %v23170_v36 = vadd.f32 %v12070_v5, %v11988_v51  ;;  %v16896_v5 = vld [vmem:[%s24297_s1 + $0x1b6c] ss:$16 sps:$4 sm:$0xff]   ;;  %v16894_v43 = vld [vmem:[%s24297_s1 + $0x1b68] ss:$16 sps:$4 sm:$0xff]  }
 0x3f7   : > { %v16902_v18 = vld [vmem:[%s24297_s1 + $0x1b4c] ss:$16 sps:$4 sm:$0xff]   ;;  %v16897_v50 = vld [vmem:[%s24297_s1 + $0x1948] ss:$16 sps:$4 sm:$0xff]  }
 0x3f8   : > { %12594 = vmatpush2.bf16.msra.mxu0 %v16879_v47  ;;  %v16891_v47 = vld [vmem:[%s24297_s1 + $0x1968] ss:$16 sps:$4 sm:$0xff]   ;;  %v16905_v30 = vld [vmem:[%s24297_s1 + $0x192c] ss:$16 sps:$4 sm:$0xff]  }
 0x3f9   : > { %12677 = vmatpush2.bf16.msra.mxu1 %v16882_v20  ;;  %12595 = vmatprep.subr.bf16.mxu0 %v16887_v27  ;;  %v16908_v11 = vld [vmem:[%s24297_s1 + $0x1b2c] ss:$16 sps:$4 sm:$0xff]   ;;  %v16903_v51 = vld [vmem:[%s24297_s1 + $0x1928] ss:$16 sps:$4 sm:$0xff]  }
 0x3fa   : > { %12678 = vmatprep.subr.bf16.mxu1 %v16890_v13  ;;  %v16906_v20 = vld [vmem:[%s24297_s1 + $0x1b28] ss:$16 sps:$4 sm:$0xff]   ;;  %v16911_v27 = vld [vmem:[%s24297_s1 + $0x190c] ss:$16 sps:$4 sm:$0xff]  }
 0x3fb   : > { %v16914_v13 = vld [vmem:[%s24297_s1 + $0x1b0c] ss:$16 sps:$4 sm:$0xff]  }
 0x3fc   : > { %12596 = vmatpush2.bf16.msra.mxu0 %v16885_v54  ;;  %v16909_v54 = vld [vmem:[%s24297_s1 + $0x1908] ss:$16 sps:$4 sm:$0xff]  }
 0x3fd   : > { %12679 = vmatpush2.bf16.msra.mxu1 %v16888_v1  ;;  %12597 = vmatprep.subr.bf16.mxu0 %v16893_v62  ;;  %v16912_v1 = vld [vmem:[%s24297_s1 + $0x1b08] ss:$16 sps:$4 sm:$0xff]   ;;  %v16917_v62 = vld [vmem:[%s24297_s1 + $0x1cec] ss:$16 sps:$4 sm:$0xff]  }
 0x3fe   : > { %12680 = vmatprep.subr.bf16.mxu1 %v16896_v5  ;;  %v16920_v5 = vld [vmem:[%s24297_s1 + $0x1eec] ss:$16 sps:$4 sm:$0xff]  }
 0x400   : > { %12598 = vmatpush2.bf16.msra.mxu0 %v16891_v47  ;;  %v16915_v47 = vld [vmem:[%s24297_s1 + $0x1ce8] ss:$16 sps:$4 sm:$0xff]  }
 0x401   : > { %12681 = vmatpush2.bf16.msra.mxu1 %v16894_v43  ;;  %12599 = vmatprep.subr.bf16.mxu0 %v16899_v56  ;;  %v16918_v43 = vld [vmem:[%s24297_s1 + $0x1ee8] ss:$16 sps:$4 sm:$0xff]   ;;  %v23238_v56 = vpop.f32.mrf.mxu0 }
 0x402   : > { %12682 = vmatprep.subr.bf16.mxu1 %v16902_v18  ;;  %v23240_v18 = vpop.f32.mrf.mxu1 }
 0x403   : > { %25066 = vst [vmem:[#allocation54_spill] sm:$0xff] %v23240_v18 }
 0x404   : > { %12600 = vmatpush2.bf16.msra.mxu0 %v16897_v50  ;;  %v16923_v50 = vld [vmem:[%s24297_s1 + $0x1ccc] ss:$16 sps:$4 sm:$0xff]  }
 0x405   : > { %12683 = vmatpush2.bf16.msra.mxu1 %v16900_v53  ;;  %12601 = vmatprep.subr.bf16.mxu0 %v16905_v30  ;;  %v16926_v53 = vld [vmem:[%s24297_s1 + $0x1ecc] ss:$16 sps:$4 sm:$0xff]  }
 0x406   : > { %12684 = vmatprep.subr.bf16.mxu1 %v16908_v11 }
 0x408   : > { %12602 = vmatpush2.bf16.msra.mxu0 %v16903_v51  ;;  %v25067_v51 = vld [vmem:[#allocation166_spill] sm:$0xff] }
 0x409   : > { %12685 = vmatpush2.bf16.msra.mxu1 %v16906_v20  ;;  %12603 = vmatprep.subr.bf16.mxu0 %v16911_v27  ;;  %v25068_v20 = vld [vmem:[#allocation167_spill] sm:$0xff] }
 0x40a   : > { %12686 = vmatprep.subr.bf16.mxu1 %v16914_v13  ;;  %v16921_v13 = vld [vmem:[%s24297_s1 + $0x1cc8] ss:$16 sps:$4 sm:$0xff]  }
 0x40c   : > { %12604 = vmatpush2.bf16.msra.mxu0 %v16909_v54  ;;  %v16924_v54 = vld [vmem:[%s24297_s1 + $0x1ec8] ss:$16 sps:$4 sm:$0xff]  }
 0x40d   : > { %12687 = vmatpush2.bf16.msra.mxu1 %v16912_v1  ;;  %12739 = vmatprep.subr.bf16.mxu0 %v16917_v62 }
 0x40e   : > { %12822 = vmatprep.subr.bf16.mxu1 %v16920_v5  ;;  %v16929_v5 = vld [vmem:[%s24297_s1 + $0x1cac] ss:$16 sps:$4 sm:$0xff]  }
 0x40f   : > { %v12109_v30 = vpop.f32.mrf.mxu0  ;;  %12606 = vmatmul.mubr.bf16.vlgmr.msra.gmra.mxu0 %v25067_v51  ;;  %v25070_v51 = vld [vmem:[#allocation174_spill] sm:$0xff] }
 0x410   : > { %v12192_v11 = vpop.f32.mrf.mxu1  ;;  %12689 = vmatmul.mubr.bf16.vlgmr.msra.gmra.mxu1 %v25068_v20  ;;  %v12110_v27 = vadd.f32 %v12109_v30, %v22986_v28  ;;  %12740 = vmatpush1.bf16.msra.mxu0 %v16915_v47  ;;  %v16932_v28 = vld [vmem:[%s24297_s1 + $0x1eac] ss:$16 sps:$4 sm:$0xff]   ;;  %v25069_v30 = vld [vmem:[#allocation171_spill] sm:$0xff] }
 0x411   : > { %12823 = vmatpush1.bf16.msra.mxu1 %v16918_v43  ;;  %v12111_v1 = vpop.f32.mrf.mxu0  ;;  %12741 = vmatprep.subr.bf16.mxu0 %v16923_v50 }
 0x412   : > { %v12194_v62 = vpop.f32.mrf.mxu1  ;;  %12824 = vmatprep.subr.bf16.mxu1 %v16926_v53  ;;  %v23263_v47 = vadd.f32 %v12192_v11, %v12110_v27  ;;  %v12112_v43 = vadd.f32 %v12111_v1, %v22991_v22  ;;  %12615 = vmatprep.mubr.bf16.mxu0 %v25069_v30  ;;  %v16930_v22 = vld [vmem:[%s24297_s1 + $0x1ea8] ss:$16 sps:$4 sm:$0xff]   ;;  %v25074_v30 = vld [vmem:[#allocation175_spill] sm:$0xff] }
 0x413   : > { %12698 = vmatprep.mubr.bf16.mxu1 %v25070_v51  ;;  %v12113_v20 = vpop.f32.mrf.mxu0 }
 0x414   : > { %v12196_v57 = vpop.f32.mrf.mxu1  ;;  %v23268_v50 = vadd.f32 %v12194_v62, %v12112_v43  ;;  %v12114_v53 = vadd.f32 %v12113_v20, %v23010_v61  ;;  %12742 = vmatpush1.bf16.msra.mxu0 %v16921_v13  ;;  %v16935_v61 = vld [vmem:[%s24297_s1 + $0x1c8c] ss:$16 sps:$4 sm:$0xff]  }
 0x415   : > { %12825 = vmatpush1.bf16.msra.mxu1 %v16924_v54  ;;  %v23277_v11 = vpop.f32.mrf.mxu0  ;;  %12743 = vmatprep.subr.bf16.mxu0 %v16929_v5  ;;  %v16938_v13 = vld [vmem:[%s24297_s1 + $0x1e8c] ss:$16 sps:$4 sm:$0xff]   ;;  %v16933_v5 = vld [vmem:[%s24297_s1 + $0x1c88] ss:$16 sps:$4 sm:$0xff]  }
 0x416   : > { %25071 = vst [vmem:[#allocation56_spill] sm:$0xff] %v23277_v11  ;;  %v23279_v27 = vpop.f32.mrf.mxu1  ;;  %12826 = vmatprep.subr.bf16.mxu1 %v16932_v28  ;;  %v23287_v54 = vadd.f32 %v12196_v57, %v12114_v53  ;;  %v25073_v62 = vld [vmem:[#allocation170_spill] sm:$0xff] }
 0x417   : > { %25072 = vst [vmem:[#allocation57_spill] sm:$0xff] %v23279_v27  ;;  %v12119_v1 = vpop.f32.mrf.mxu0  ;;  %12616 = vmatmul.mubr.bf16.gmra.mxu0 %v25073_v62  ;;  %v16936_v28 = vld [vmem:[%s24297_s1 + $0x1e88] ss:$16 sps:$4 sm:$0xff]   ;;  %v16941_v53 = vld [vmem:[%s24297_s1 + $0x1c6c] ss:$16 sps:$4 sm:$0xff]   ;;  %v25076_v62 = vld [vmem:[#allocation185_spill] sm:$0xff] }
 0x418   : > { %v12202_v43 = vpop.f32.mrf.mxu1  ;;  %12699 = vmatmul.mubr.bf16.gmra.mxu1 %v25074_v30  ;;  %v12120_v51 = vadd.f32 %v12119_v1, %v23028_v4  ;;  %12744 = vmatpush1.bf16.msra.mxu0 %v16927_v25  ;;  %v16944_v25 = vld [vmem:[%s24297_s1 + $0x1e6c] ss:$16 sps:$4 sm:$0xff]   ;;  %v25075_v1 = vld [vmem:[#allocation177_spill] sm:$0xff]  ;;  %v16939_v11 = vld [vmem:[%s24297_s1 + $0x1c68] ss:$16 sps:$4 sm:$0xff]  }
 0x419   : > { %12827 = vmatpush1.bf16.msra.mxu1 %v16930_v22  ;;  %v12121_v57 = vpop.f32.mrf.mxu0  ;;  %12745 = vmatprep.subr.bf16.mxu0 %v16935_v61 }
 0x41a   : > { %v12204_v20 = vpop.f32.mrf.mxu1  ;;  %12828 = vmatprep.subr.bf16.mxu1 %v16938_v13  ;;  %v12122_v4 = vadd.f32 %v12121_v57, %v23033_v9  ;;  %v23305_v22 = vadd.f32 %v12202_v43, %v12120_v51  ;;  %12625 = vmatprep.mubr.bf16.mxu0 %v25075_v1  ;;  %v16942_v9 = vld [vmem:[%s24297_s1 + $0x1e68] ss:$16 sps:$4 sm:$0xff]  }
 0x41b   : > { %12708 = vmatprep.mubr.bf16.mxu1 %v25076_v62  ;;  %v12123_v30 = vpop.f32.mrf.mxu0  ;;  %v25080_v1 = vld [vmem:[#allocation184_spill] sm:$0xff] }
 0x41c   : > { %v12206_v27 = vpop.f32.mrf.mxu1  ;;  %v12124_v61 = vadd.f32 %v12123_v30, %v23051_v32  ;;  %v23310_v13 = vadd.f32 %v12204_v20, %v12122_v4  ;;  %12746 = vmatpush1.bf16.msra.mxu0 %v16933_v5  ;;  %v16947_v32 = vld [vmem:[%s24297_s1 + $0x1c4c] ss:$16 sps:$4 sm:$0xff]  }
 0x41d   : > { %12829 = vmatpush1.bf16.msra.mxu1 %v16936_v28  ;;  %v23318_v43 = vpop.f32.mrf.mxu0  ;;  %12747 = vmatprep.subr.bf16.mxu0 %v16941_v53  ;;  %v16950_v5 = vld [vmem:[%s24297_s1 + $0x1e4c] ss:$16 sps:$4 sm:$0xff]   ;;  %v16945_v53 = vld [vmem:[%s24297_s1 + $0x1c48] ss:$16 sps:$4 sm:$0xff]  }
 0x41e   : > { %25077 = vst [vmem:[#allocation59_spill] sm:$0xff] %v23318_v43  ;;  %v23320_v51 = vpop.f32.mrf.mxu1  ;;  %12830 = vmatprep.subr.bf16.mxu1 %v16944_v25  ;;  %v23328_v28 = vadd.f32 %v12206_v27, %v12124_v61  ;;  %v25079_v20 = vld [vmem:[#allocation176_spill] sm:$0xff] }
 0x41f   : > { %25078 = vst [vmem:[#allocation58_spill] sm:$0xff] %v23320_v51  ;;  %v12129_v57 = vpop.f32.mrf.mxu0  ;;  %12626 = vmatmul.mubr.bf16.gmra.mxu0 %v25079_v20  ;;  %v16948_v25 = vld [vmem:[%s24297_s1 + $0x1e48] ss:$16 sps:$4 sm:$0xff]   ;;  %v16953_v61 = vld [vmem:[%s24297_s1 + $0x1c2c] ss:$16 sps:$4 sm:$0xff]   ;;  %v25082_v20 = vld [vmem:[#allocation189_spill] sm:$0xff] }
 0x420   : > { %v12212_v4 = vpop.f32.mrf.mxu1  ;;  %12709 = vmatmul.mubr.bf16.gmra.mxu1 %v25080_v1  ;;  %v12130_v62 = vadd.f32 %v12129_v57, %v23069_v58  ;;  %12748 = vmatpush1.bf16.msra.mxu0 %v16939_v11  ;;  %v16956_v58 = vld [vmem:[%s24297_s1 + $0x1e2c] ss:$16 sps:$4 sm:$0xff]   ;;  %v25081_v57 = vld [vmem:[#allocation187_spill] sm:$0xff]  ;;  %v16951_v43 = vld [vmem:[%s24297_s1 + $0x1c28] ss:$16 sps:$4 sm:$0xff]  }
 0x421   : > { %12831 = vmatpush1.bf16.msra.mxu1 %v16942_v9  ;;  %v12131_v27 = vpop.f32.mrf.mxu0  ;;  %12749 = vmatprep.subr.bf16.mxu0 %v16947_v32 }
 0x422   : > { %v12214_v30 = vpop.f32.mrf.mxu1  ;;  %12832 = vmatprep.subr.bf16.mxu1 %v16950_v5  ;;  %v12132_v11 = vadd.f32 %v12131_v27, %v23074_v42  ;;  %v23346_v9 = vadd.f32 %v12212_v4, %v12130_v62  ;;  %12635 = vmatprep.mubr.bf16.mxu0 %v25081_v57  ;;  %v16954_v42 = vld [vmem:[%s24297_s1 + $0x1e28] ss:$16 sps:$4 sm:$0xff]  }
 0x423   : > { %12718 = vmatprep.mubr.bf16.mxu1 %v25082_v20  ;;  %v12133_v1 = vpop.f32.mrf.mxu0  ;;  %v25084_v57 = vld [vmem:[#allocation188_spill] sm:$0xff] }
 0x424   : > { %v12216_v51 = vpop.f32.mrf.mxu1  ;;  %v12134_v32 = vadd.f32 %v12133_v1, %v23092_v31  ;;  %v23351_v5 = vadd.f32 %v12214_v30, %v12132_v11  ;;  %12750 = vmatpush1.bf16.msra.mxu0 %v16945_v53  ;;  %v16959_v31 = vld [vmem:[%s24297_s1 + $0x1c0c] ss:$16 sps:$4 sm:$0xff]  }
 0x425   : > { %12833 = vmatpush1.bf16.msra.mxu1 %v16948_v25  ;;  %v23359_v4 = vpop.f32.mrf.mxu0  ;;  %12751 = vmatprep.subr.bf16.mxu0 %v16953_v61  ;;  %v16962_v53 = vld [vmem:[%s24297_s1 + $0x1e0c] ss:$16 sps:$4 sm:$0xff]   ;;  %v16957_v61 = vld [vmem:[%s24297_s1 + $0x1c08] ss:$16 sps:$4 sm:$0xff]  }
 0x426   : > { %v23361_v62 = vpop.f32.mrf.mxu1  ;;  %12834 = vmatprep.subr.bf16.mxu1 %v16956_v58  ;;  %v23369_v25 = vadd.f32 %v12216_v51, %v12134_v32  ;;  %v25083_v30 = vld [vmem:[#allocation186_spill] sm:$0xff] }
 0x427   : > { %v12139_v27 = vpop.f32.mrf.mxu0  ;;  %12636 = vmatmul.mubr.bf16.gmra.mxu0 %v25083_v30  ;;  %v16960_v58 = vld [vmem:[%s24297_s1 + $0x1e08] ss:$16 sps:$4 sm:$0xff]   ;;  %v16965_v32 = vld [vmem:[%s24297_s1 + $0x1dec] ss:$16 sps:$4 sm:$0xff]  }
 0x428   : > { %v12222_v11 = vpop.f32.mrf.mxu1  ;;  %12719 = vmatmul.mubr.bf16.gmra.mxu1 %v25084_v57  ;;  %v12140_v20 = vadd.f32 %v12139_v27, %v23110_v49  ;;  %12752 = vmatpush1.bf16.msra.mxu0 %v16951_v43  ;;  %v16968_v49 = vld [vmem:[%s24297_s1 + $0x1fec] ss:$16 sps:$4 sm:$0xff]   ;;  %v25085_v27 = vld [vmem:[#allocation195_spill] sm:$0xff] }
 0x429   : > { %12835 = vmatpush1.bf16.msra.mxu1 %v16954_v42  ;;  %v12141_v51 = vpop.f32.mrf.mxu0  ;;  %12753 = vmatprep.subr.bf16.mxu0 %v16959_v31  ;;  %v25086_v30 = vld [vmem:[#allocation196_spill] sm:$0xff] }
 0x42a   : > { %v12224_v1 = vpop.f32.mrf.mxu1  ;;  %12836 = vmatprep.subr.bf16.mxu1 %v16962_v53  ;;  %v12142_v43 = vadd.f32 %v12141_v51, %v23115_v40  ;;  %v23387_v42 = vadd.f32 %v12222_v11, %v12140_v20  ;;  %12645 = vmatprep.mubr.bf16.mxu0 %v25085_v27  ;;  %v16966_v40 = vld [vmem:[%s24297_s1 + $0x1fe8] ss:$16 sps:$4 sm:$0xff]  }
 0x42b   : > { %12728 = vmatprep.mubr.bf16.mxu1 %v25086_v30  ;;  %v12143_v57 = vpop.f32.mrf.mxu0  ;;  %v25089_v27 = vld [vmem:[#allocation198_spill] sm:$0xff] }
 0x42c   : > { %v12226_v46 = vpop.f32.mrf.mxu1  ;;  %v12144_v31 = vadd.f32 %v12143_v57, %v23133_v41  ;;  %v23392_v53 = vadd.f32 %v12224_v1, %v12142_v43  ;;  %12754 = vmatpush1.bf16.msra.mxu0 %v16957_v61  ;;  %v16971_v41 = vld [vmem:[%s24297_s1 + $0x1dcc] ss:$16 sps:$4 sm:$0xff]   ;;  %v25088_v1 = vld [vmem:[#allocation197_spill] sm:$0xff] }
 0x42d   : > { %12837 = vmatpush1.bf16.msra.mxu1 %v16960_v58  ;;  %v23400_v11 = vpop.f32.mrf.mxu0  ;;  %12755 = vmatprep.subr.bf16.mxu0 %v16965_v32  ;;  %v16974_v61 = vld [vmem:[%s24297_s1 + $0x1fcc] ss:$16 sps:$4 sm:$0xff]   ;;  %v16969_v32 = vld [vmem:[%s24297_s1 + $0x1dc8] ss:$16 sps:$4 sm:$0xff]  }
 0x42e   : > { %v23402_v20 = vpop.f32.mrf.mxu1  ;;  %12838 = vmatprep.subr.bf16.mxu1 %v16968_v49  ;;  %v23410_v58 = vadd.f32 %v12226_v46, %v12144_v31  ;;  %v16972_v49 = vld [vmem:[%s24297_s1 + $0x1fc8] ss:$16 sps:$4 sm:$0xff]   ;;  %v16977_v31 = vld [vmem:[%s24297_s1 + $0x1dac] ss:$16 sps:$4 sm:$0xff]  }
 0x42f   : > { %v12149_v51 = vpop.f32.mrf.mxu0  ;;  %12646 = vmatmul.mubr.bf16.gmra.mxu0 %v25088_v1  ;;  %v25091_v1 = vld [vmem:[#allocation202_spill] sm:$0xff] }
 0x430   : > { %25087 = vst [vmem:[#allocation60_spill] sm:$0xff] %v23410_v58  ;;  %v12232_v43 = vpop.f32.mrf.mxu1  ;;  %12729 = vmatmul.mubr.bf16.gmra.mxu1 %v25089_v27  ;;  %v12150_v30 = vadd.f32 %v12149_v51, %v23151_v21  ;;  %12756 = vmatpush2.bf16.msra.mxu0 %v16963_v38  ;;  %v16980_v38 = vld [vmem:[%s24297_s1 + $0x1fac] ss:$16 sps:$4 sm:$0xff]   ;;  %v25090_v51 = vld [vmem:[#allocation201_spill] sm:$0xff]  ;;  %v16975_v58 = vld [vmem:[%s24297_s1 + $0x1da8] ss:$16 sps:$4 sm:$0xff]  }
 0x431   : > { %12839 = vmatpush2.bf16.msra.mxu1 %v16966_v40  ;;  %v12151_v46 = vpop.f32.mrf.mxu0  ;;  %12757 = vmatprep.subr.bf16.mxu0 %v16971_v41 }
 0x432   : > { %v12234_v57 = vpop.f32.mrf.mxu1  ;;  %12840 = vmatprep.subr.bf16.mxu1 %v16974_v61  ;;  %v12152_v21 = vadd.f32 %v12151_v46, %v23156_v44  ;;  %v23428_v40 = vadd.f32 %v12232_v43, %v12150_v30  ;;  %12771 = vmatprep.mubr.bf16.mxu0 %v25090_v51  ;;  %v16978_v44 = vld [vmem:[%s24297_s1 + $0x1fa8] ss:$16 sps:$4 sm:$0xff]   ;;  %v16983_v43 = vld [vmem:[%s24297_s1 + $0x1d8c] ss:$16 sps:$4 sm:$0xff]  }
 0x433   : > { %12854 = vmatprep.mubr.bf16.mxu1 %v25091_v1  ;;  %v12153_v27 = vpop.f32.mrf.mxu0  ;;  %v16989_v46 = vld [vmem:[%s24297_s1 + $0x1d6c] ss:$16 sps:$4 sm:$0xff]   ;;  %v16996_v51 = vld [vmem:[%s24297_s1 + $0x1f48] ss:$16 sps:$4 sm:$0xff]  }
 0x434   : > { %v12236_v18 = vpop.f32.mrf.mxu1  ;;  %v12154_v41 = vadd.f32 %v12153_v27, %v23170_v36  ;;  %v23433_v61 = vadd.f32 %v12234_v57, %v12152_v21  ;;  %12758 = vmatpush2.bf16.msra.mxu0 %v16969_v32  ;;  %v16986_v36 = vld [vmem:[%s24297_s1 + $0x1f8c] ss:$16 sps:$4 sm:$0xff]   ;;  %v16981_v32 = vld [vmem:[%s24297_s1 + $0x1d88] ss:$16 sps:$4 sm:$0xff]  }
 0x435   : > { %12841 = vmatpush2.bf16.msra.mxu1 %v16972_v49  ;;  %12759 = vmatprep.subr.bf16.mxu0 %v16977_v31  ;;  %v16984_v49 = vld [vmem:[%s24297_s1 + $0x1f88] ss:$16 sps:$4 sm:$0xff]   ;;  %v16995_v31 = vld [vmem:[%s24297_s1 + $0x1d4c] ss:$16 sps:$4 sm:$0xff]  }
 0x436   : > { %25092 = vst [vmem:[#allocation67_spill] sm:$0xff] %v23433_v61  ;;  %12842 = vmatprep.subr.bf16.mxu1 %v16980_v38  ;;  %v23447_v30 = vadd.f32 %v12236_v18, %v12154_v41  ;;  %v16992_v18 = vld [vmem:[%s24297_s1 + $0x1f6c] ss:$16 sps:$4 sm:$0xff]   ;;  %v16990_v57 = vld [vmem:[%s24297_s1 + $0x1f68] ss:$16 sps:$4 sm:$0xff]  }
 0x437   : > { %v16998_v38 = vld [vmem:[%s24297_s1 + $0x1f4c] ss:$16 sps:$4 sm:$0xff]   ;;  %v16993_v21 = vld [vmem:[%s24297_s1 + $0x1d48] ss:$16 sps:$4 sm:$0xff]  }
 0x438   : > { %25093 = vst [vmem:[#allocation68_spill] sm:$0xff] %v23447_v30  ;;  %12760 = vmatpush2.bf16.msra.mxu0 %v16975_v58  ;;  %v16987_v58 = vld [vmem:[%s24297_s1 + $0x1d68] ss:$16 sps:$4 sm:$0xff]   ;;  %v17001_v1 = vld [vmem:[%s24297_s1 + $0x1d2c] ss:$16 sps:$4 sm:$0xff]  }
 0x439   : > { %12843 = vmatpush2.bf16.msra.mxu1 %v16978_v44  ;;  %12761 = vmatprep.subr.bf16.mxu0 %v16983_v43  ;;  %v17004_v27 = vld [vmem:[%s24297_s1 + $0x1f2c] ss:$16 sps:$4 sm:$0xff]   ;;  %v16999_v41 = vld [vmem:[%s24297_s1 + $0x1d28] ss:$16 sps:$4 sm:$0xff]  }
 0x43a   : > { %12844 = vmatprep.subr.bf16.mxu1 %v16986_v36  ;;  %v17002_v44 = vld [vmem:[%s24297_s1 + $0x1f28] ss:$16 sps:$4 sm:$0xff]   ;;  %v17007_v43 = vld [vmem:[%s24297_s1 + $0x1d0c] ss:$16 sps:$4 sm:$0xff]  }
 0x43b   : > { %v17010_v36 = vld [vmem:[%s24297_s1 + $0x1f0c] ss:$16 sps:$4 sm:$0xff]  }
 0x43c   : > { %12762 = vmatpush2.bf16.msra.mxu0 %v16981_v32  ;;  %v17005_v32 = vld [vmem:[%s24297_s1 + $0x1d08] ss:$16 sps:$4 sm:$0xff]  }
 0x43d   : > { %12845 = vmatpush2.bf16.msra.mxu1 %v16984_v49  ;;  %12763 = vmatprep.subr.bf16.mxu0 %v16989_v46  ;;  %v17008_v49 = vld [vmem:[%s24297_s1 + $0x1f08] ss:$16 sps:$4 sm:$0xff]   ;;  %v17013_v46 = vld [vmem:[%s24297_s1 + $0x20ec] ss:$16 sps:$4 sm:$0xff]  }
 0x43e   : > { %12846 = vmatprep.subr.bf16.mxu1 %v16992_v18  ;;  %v17016_v18 = vld [vmem:[%s24297_s1 + $0x22ec] ss:$16 sps:$4 sm:$0xff]  }
 0x440   : > { %12764 = vmatpush2.bf16.msra.mxu0 %v16987_v58  ;;  %v17011_v58 = vld [vmem:[%s24297_s1 + $0x20e8] ss:$16 sps:$4 sm:$0xff]  }
 0x441   : > { %12847 = vmatpush2.bf16.msra.mxu1 %v16990_v57  ;;  %12765 = vmatprep.subr.bf16.mxu0 %v16995_v31  ;;  %v17014_v57 = vld [vmem:[%s24297_s1 + $0x22e8] ss:$16 sps:$4 sm:$0xff]   ;;  %v23515_v31 = vpop.f32.mrf.mxu0 }
 0x442   : > { %12848 = vmatprep.subr.bf16.mxu1 %v16998_v38  ;;  %v23517_v38 = vpop.f32.mrf.mxu1 }
 0x443   : > { %25094 = vst [vmem:[#allocation71_spill] sm:$0xff] %v23517_v38 }
 0x444   : > { %12766 = vmatpush2.bf16.msra.mxu0 %v16993_v21  ;;  %v17019_v21 = vld [vmem:[%s24297_s1 + $0x20cc] ss:$16 sps:$4 sm:$0xff]  }
 0x445   : > { %12849 = vmatpush2.bf16.msra.mxu1 %v16996_v51  ;;  %12767 = vmatprep.subr.bf16.mxu0 %v17001_v1  ;;  %v17022_v51 = vld [vmem:[%s24297_s1 + $0x22cc] ss:$16 sps:$4 sm:$0xff]   ;;  %v11638_v1 = vadd.f32 %v22534_v33, %v22415_v19 }
 0x446   : > { %12850 = vmatprep.subr.bf16.mxu1 %v17004_v27 }
 0x448   : > { %12768 = vmatpush2.bf16.msra.mxu0 %v16999_v41 }
 0x449   : > { %12851 = vmatpush2.bf16.msra.mxu1 %v17002_v44  ;;  %12769 = vmatprep.subr.bf16.mxu0 %v17007_v43  ;;  %v25095_v44 = vld [vmem:[#allocation160_spill] sm:$0xff]  ;;  %v25096_v43 = vld [vmem:[#allocation203_spill] sm:$0xff] }
 0x44a   : > { %12852 = vmatprep.subr.bf16.mxu1 %v17010_v36 }
 0x44c   : > { %12770 = vmatpush2.bf16.msra.mxu0 %v17005_v32  ;;  %v17017_v32 = vld [vmem:[%s24297_s1 + $0x20c8] ss:$16 sps:$4 sm:$0xff]  }
 0x44d   : > { %12853 = vmatpush2.bf16.msra.mxu1 %v17008_v49  ;;  %12905 = vmatprep.subr.bf16.mxu0 %v17013_v46  ;;  %v17020_v49 = vld [vmem:[%s24297_s1 + $0x22c8] ss:$16 sps:$4 sm:$0xff]  }
 0x44e   : > { %12988 = vmatprep.subr.bf16.mxu1 %v17016_v18  ;;  %v17025_v18 = vld [vmem:[%s24297_s1 + $0x20ac] ss:$16 sps:$4 sm:$0xff]  }
 0x44f   : > { %v12275_v27 = vpop.f32.mrf.mxu0  ;;  %12772 = vmatmul.mubr.bf16.vlgmr.msra.gmra.mxu0 %v25095_v44  ;;  %v25097_v44 = vld [vmem:[#allocation206_spill] sm:$0xff] }
 0x450   : > { %v12358_v41 = vpop.f32.mrf.mxu1  ;;  %12855 = vmatmul.mubr.bf16.vlgmr.msra.gmra.mxu1 %v25096_v43  ;;  %v12276_v36 = vadd.f32 %v12275_v27, %v23263_v47  ;;  %12906 = vmatpush1.bf16.msra.mxu0 %v17011_v58  ;;  %v17028_v47 = vld [vmem:[%s24297_s1 + $0x22ac] ss:$16 sps:$4 sm:$0xff]   ;;  %v11721_v58 = vadd.f32 %v22536_v63, %v11638_v1  ;;  %v25098_v43 = vld [vmem:[#allocation207_spill] sm:$0xff]  ;;  %v17023_v63 = vld [vmem:[%s24297_s1 + $0x20a8] ss:$16 sps:$4 sm:$0xff]   ;;  %v11648_v1 = vadd.f32 %v22575_v26, %v22415_v19 }
 0x451   : > { %12989 = vmatpush1.bf16.msra.mxu1 %v17014_v57  ;;  %v12277_v46 = vpop.f32.mrf.mxu0  ;;  %12907 = vmatprep.subr.bf16.mxu0 %v17019_v21 }
 0x452   : > { %v12360_v33 = vpop.f32.mrf.mxu1  ;;  %12990 = vmatprep.subr.bf16.mxu1 %v17022_v51  ;;  %v23543_v57 = vadd.f32 %v12358_v41, %v12276_v36  ;;  %v12278_v27 = vadd.f32 %v12277_v46, %v23268_v50  ;;  %12781 = vmatprep.mubr.bf16.mxu0 %v25097_v44  ;;  %v11804_v30 = vadd.f32 %v22805_v23, %v11721_v58  ;;  %v17026_v50 = vld [vmem:[%s24297_s1 + $0x22a8] ss:$16 sps:$4 sm:$0xff]   ;;  %v17034_v36 = vld [vmem:[%s24297_s1 + $0x228c] ss:$16 sps:$4 sm:$0xff]  }
 0x453   : > { %12864 = vmatprep.mubr.bf16.mxu1 %v25098_v43  ;;  %v12279_v21 = vpop.f32.mrf.mxu0 }
 0x454   : > { %v12362_v51 = vpop.f32.mrf.mxu1  ;;  %v23549_v38 = vadd.f32 %v12360_v33, %v12278_v27  ;;  %v12280_v61 = vadd.f32 %v12279_v21, %v23287_v54  ;;  %12908 = vmatpush1.bf16.msra.mxu0 %v17017_v32  ;;  %v17031_v54 = vld [vmem:[%s24297_s1 + $0x208c] ss:$16 sps:$4 sm:$0xff]   ;;  %v11887_v46 = vadd.f32 %v22807_v35, %v11804_v30 }
 0x455   : > { %12991 = vmatpush1.bf16.msra.mxu1 %v17020_v49  ;;  %v23560_v41 = vpop.f32.mrf.mxu0  ;;  %12909 = vmatprep.subr.bf16.mxu0 %v17025_v18  ;;  %v17029_v18 = vld [vmem:[%s24297_s1 + $0x2088] ss:$16 sps:$4 sm:$0xff]   ;;  %v17040_v35 = vld [vmem:[%s24297_s1 + $0x226c] ss:$16 sps:$4 sm:$0xff]  }
 0x456   : > { %v23562_v23 = vpop.f32.mrf.mxu1  ;;  %12992 = vmatprep.subr.bf16.mxu1 %v17028_v47  ;;  %v23570_v32 = vadd.f32 %v12362_v51, %v12280_v61  ;;  %v17032_v61 = vld [vmem:[%s24297_s1 + $0x2288] ss:$16 sps:$4 sm:$0xff]   ;;  %v11731_v47 = vadd.f32 %v22577_v24, %v11648_v1 }
 0x457   : > { %v12285_v49 = vpop.f32.mrf.mxu0  ;;  %12782 = vmatmul.mubr.bf16.gmra.mxu0 %v20793_v3 }
 0x458   : > { %v12368_v26 = vpop.f32.mrf.mxu1  ;;  %12865 = vmatmul.mubr.bf16.gmra.mxu1 %v20807_v17  ;;  %v12286_v33 = vadd.f32 %v12285_v49, %v23305_v22  ;;  %12910 = vmatpush1.bf16.msra.mxu0 %v17023_v63  ;;  %v17037_v17 = vld [vmem:[%s24297_s1 + $0x206c] ss:$16 sps:$4 sm:$0xff]   ;;  %v11970_v22 = vadd.f32 %v23082_v12, %v11887_v46  ;;  %v11814_v43 = vadd.f32 %v22846_v45, %v11731_v47  ;;  %v17035_v12 = vld [vmem:[%s24297_s1 + $0x2068] ss:$16 sps:$4 sm:$0xff]  }
 0x459   : > { %12993 = vmatpush1.bf16.msra.mxu1 %v17026_v50  ;;  %v12287_v3 = vpop.f32.mrf.mxu0  ;;  %12911 = vmatprep.subr.bf16.mxu0 %v17031_v54  ;;  %v17046_v63 = vld [vmem:[%s24297_s1 + $0x224c] ss:$16 sps:$4 sm:$0xff]   ;;  %v17044_v46 = vld [vmem:[%s24297_s1 + $0x2248] ss:$16 sps:$4 sm:$0xff]  }
 0x45a   : > { %v12370_v58 = vpop.f32.mrf.mxu1  ;;  %12994 = vmatprep.subr.bf16.mxu1 %v17034_v36  ;;  %v12288_v30 = vadd.f32 %v12287_v3, %v23310_v13  ;;  %v23591_v27 = vadd.f32 %v12368_v26, %v12286_v33  ;;  %12791 = vmatprep.mubr.bf16.mxu0 %v20849_v2  ;;  %v17038_v2 = vld [vmem:[%s24297_s1 + $0x2268] ss:$16 sps:$4 sm:$0xff]   ;;  %v12053_v50 = vadd.f32 %v23084_v48, %v11970_v22 }
 0x45b   : > { %12874 = vmatprep.mubr.bf16.mxu1 %v20876_v16  ;;  %v12289_v24 = vpop.f32.mrf.mxu0  ;;  %v11658_v16 = vadd.f32 %v22684_v7, %v22415_v19  ;;  %v11897_v36 = vadd.f32 %v22848_v60, %v11814_v43  ;;  %v17041_v48 = vld [vmem:[%s24297_s1 + $0x2048] ss:$16 sps:$4 sm:$0xff]   ;;  %v17049_v60 = vld [vmem:[%s24297_s1 + $0x202c] ss:$16 sps:$4 sm:$0xff]  }
 0x45c   : > { %v12372_v44 = vpop.f32.mrf.mxu1  ;;  %v12290_v21 = vadd.f32 %v12289_v24, %v23328_v28  ;;  %v23597_v51 = vadd.f32 %v12370_v58, %v12288_v30  ;;  %12912 = vmatpush1.bf16.msra.mxu0 %v17029_v18  ;;  %v17043_v28 = vld [vmem:[%s24297_s1 + $0x204c] ss:$16 sps:$4 sm:$0xff]   ;;  %v12136_v49 = vadd.f32 %v23359_v4, %v12053_v50 }
 0x45d   : > { %12995 = vmatpush1.bf16.msra.mxu1 %v17032_v61  ;;  %v23607_v13 = vpop.f32.mrf.mxu0  ;;  %12913 = vmatprep.subr.bf16.mxu0 %v17037_v17  ;;  %v11980_v4 = vadd.f32 %v23123_v37, %v11897_v36  ;;  %v17047_v37 = vld [vmem:[%s24297_s1 + $0x2028] ss:$16 sps:$4 sm:$0xff]  }
 0x45e   : > { %v23609_v45 = vpop.f32.mrf.mxu1  ;;  %12996 = vmatprep.subr.bf16.mxu1 %v17040_v35  ;;  %v23618_v1 = vadd.f32 %v12372_v44, %v12290_v21  ;;  %v12219_v58 = vadd.f32 %v23361_v62, %v12136_v49  ;;  %v17058_v62 = vld [vmem:[%s24297_s1 + $0x220c] ss:$16 sps:$4 sm:$0xff]  }
 0x45f   : > { %v12295_v54 = vpop.f32.mrf.mxu0  ;;  %12792 = vmatmul.mubr.bf16.gmra.mxu0 %v20927_v6  ;;  %v11741_v6 = vadd.f32 %v22686_v29, %v11658_v16  ;;  %v25099_v36 = vld [vmem:[#allocation60_spill] sm:$0xff] }
 0x460   : > { %v12378_v7 = vpop.f32.mrf.mxu1  ;;  %12875 = vmatmul.mubr.bf16.gmra.mxu1 %v20931_v59  ;;  %v12296_v26 = vadd.f32 %v12295_v54, %v23346_v9  ;;  %12914 = vmatpush1.bf16.msra.mxu0 %v17035_v12  ;;  %v17052_v9 = vld [vmem:[%s24297_s1 + $0x222c] ss:$16 sps:$4 sm:$0xff]  }
 0x461   : > { %12997 = vmatpush1.bf16.msra.mxu1 %v17038_v2  ;;  %v12297_v33 = vpop.f32.mrf.mxu0  ;;  %12915 = vmatprep.subr.bf16.mxu0 %v17043_v28  ;;  %v11824_v29 = vadd.f32 %v22961_v34, %v11741_v6 }
 0x462   : > { %v12380_v59 = vpop.f32.mrf.mxu1  ;;  %12998 = vmatprep.subr.bf16.mxu1 %v17046_v63  ;;  %v12298_v18 = vadd.f32 %v12297_v33, %v23351_v5  ;;  %v23640_v61 = vadd.f32 %v12378_v7, %v12296_v26  ;;  %12801 = vmatprep.mubr.bf16.mxu0 %v20952_v10  ;;  %v17050_v10 = vld [vmem:[%s24297_s1 + $0x2228] ss:$16 sps:$4 sm:$0xff]   ;;  %v17055_v5 = vld [vmem:[%s24297_s1 + $0x200c] ss:$16 sps:$4 sm:$0xff]  }
 0x463   : > { %12884 = vmatprep.mubr.bf16.mxu1 %v20963_v0  ;;  %v12299_v47 = vpop.f32.mrf.mxu0  ;;  %v11907_v24 = vadd.f32 %v22963_v39, %v11824_v29  ;;  %v17056_v39 = vld [vmem:[%s24297_s1 + $0x2208] ss:$16 sps:$4 sm:$0xff]  }
 0x464   : > { %v12382_v3 = vpop.f32.mrf.mxu1  ;;  %v12300_v17 = vadd.f32 %v12299_v47, %v23369_v25  ;;  %v23647_v35 = vadd.f32 %v12380_v59, %v12298_v18  ;;  %12916 = vmatpush1.bf16.msra.mxu0 %v17041_v48  ;;  %v12063_v25 = vadd.f32 %v23125_v8, %v11980_v4  ;;  %v17053_v8 = vld [vmem:[%s24297_s1 + $0x2008] ss:$16 sps:$4 sm:$0xff]   ;;  %v17070_v48 = vld [vmem:[%s24297_s1 + $0x23cc] ss:$16 sps:$4 sm:$0xff]  }
 0x465   : > { %12999 = vmatpush1.bf16.msra.mxu1 %v17044_v46  ;;  %v12301_v0 = vpop.f32.mrf.mxu0  ;;  %12917 = vmatprep.subr.bf16.mxu0 %v17049_v60  ;;  %v25100_v46 = vld [vmem:[#allocation54_spill] sm:$0xff]  ;;  %v25102_v18 = vld [vmem:[#allocation148_spill] sm:$0xff] }
 0x466   : > { %v12384_v34 = vpop.f32.mrf.mxu1  ;;  %13000 = vmatprep.subr.bf16.mxu1 %v17052_v9  ;;  %v12302_v22 = vadd.f32 %v12301_v0, %v12219_v58  ;;  %v23662_v30 = vadd.f32 %v12382_v3, %v12300_v17  ;;  %v12146_v21 = vadd.f32 %v23400_v11, %v12063_v25  ;;  %v11990_v11 = vadd.f32 %v23238_v56, %v11907_v24  ;;  %v17059_v56 = vld [vmem:[%s24297_s1 + $0x21e8] ss:$16 sps:$4 sm:$0xff]   ;;  %v25101_v9 = vld [vmem:[#allocation147_spill] sm:$0xff] }
 0x467   : > { %v12305_v44 = vpop.f32.mrf.mxu0  ;;  %12802 = vmatmul.mubr.bf16.gmra.mxu0 %v20968_v52  ;;  %v17065_v58 = vld [vmem:[%s24297_s1 + $0x21c8] ss:$16 sps:$4 sm:$0xff]  }
 0x468   : > { %v12388_v43 = vpop.f32.mrf.mxu1  ;;  %12885 = vmatmul.mubr.bf16.gmra.mxu1 %v20996_v55  ;;  %v12306_v12 = vadd.f32 %v12305_v44, %v23387_v42  ;;  %v23669_v2 = vadd.f32 %v12384_v34, %v12302_v22  ;;  %12918 = vmatpush1.bf16.msra.mxu0 %v17047_v37  ;;  %v17061_v55 = vld [vmem:[%s24297_s1 + $0x21ec] ss:$16 sps:$4 sm:$0xff]   ;;  %v12229_v7 = vadd.f32 %v23402_v20, %v12146_v21  ;;  %v17068_v17 = vld [vmem:[%s24297_s1 + $0x23c8] ss:$16 sps:$4 sm:$0xff]   ;;  %v25103_v37 = vld [vmem:[#allocation79_spill] sm:$0xff] }
 0x469   : > { %13001 = vmatpush1.bf16.msra.mxu1 %v17050_v10  ;;  %v12307_v52 = vpop.f32.mrf.mxu0  ;;  %12919 = vmatprep.subr.bf16.mxu0 %v17055_v5  ;;  %v17064_v42 = vld [vmem:[%s24297_s1 + $0x23ec] ss:$16 sps:$4 sm:$0xff]   ;;  %v12073_v6 = vadd.f32 %v25100_v46, %v11990_v11  ;;  %v25107_v44 = vld [vmem:[#allocation213_spill] sm:$0xff]  ;;  %v17077_v46 = vld [vmem:[%s24297_s1 + $0x2188] ss:$16 sps:$4 sm:$0xff]  }
 0x46a   : > { %v12390_v16 = vpop.f32.mrf.mxu1  ;;  %13002 = vmatprep.subr.bf16.mxu1 %v17058_v62  ;;  %v12308_v28 = vadd.f32 %v12307_v52, %v23392_v53  ;;  %v23685_v63 = vadd.f32 %v12388_v43, %v12306_v12  ;;  %12811 = vmatprep.mubr.bf16.mxu0 %v21012_v14  ;;  %v17062_v14 = vld [vmem:[%s24297_s1 + $0x23e8] ss:$16 sps:$4 sm:$0xff]   ;;  %v17067_v20 = vld [vmem:[%s24297_s1 + $0x21cc] ss:$16 sps:$4 sm:$0xff]   ;;  %v25105_v62 = vld [vmem:[#allocation67_spill] sm:$0xff] }
 0x46b   : > { %12894 = vmatprep.mubr.bf16.mxu1 %v21014_v15  ;;  %v12309_v50 = vpop.f32.mrf.mxu0  ;;  %v12156_v29 = vadd.f32 %v23515_v31, %v12073_v6  ;;  %v25104_v10 = vld [vmem:[#allocation84_spill] sm:$0xff]  ;;  %v25108_v12 = vld [vmem:[#allocation71_spill] sm:$0xff]  ;;  %v25110_v11 = vld [vmem:[#allocation85_spill] sm:$0xff] }
 0x46c   : > { %v12392_v54 = vpop.f32.mrf.mxu1  ;;  %v12310_v49 = vadd.f32 %v12309_v50, %v25099_v36  ;;  %v23691_v26 = vadd.f32 %v12390_v16, %v12308_v28  ;;  %12920 = vmatpush1.bf16.msra.mxu0 %v17053_v8  ;;  %v10124_v0 = vadd.f32 %v25104_v10, %v25103_v37  ;;  %v17076_v31 = vld [vmem:[%s24297_s1 + $0x23ac] ss:$16 sps:$4 sm:$0xff]   ;;  %v17080_v6 = vld [vmem:[%s24297_s1 + $0x2388] ss:$16 sps:$4 sm:$0xff]  }
 0x46d   : > { %13003 = vmatpush1.bf16.msra.mxu1 %v17056_v39  ;;  %v12311_v53 = vpop.f32.mrf.mxu0  ;;  %12921 = vmatprep.subr.bf16.mxu0 %v17061_v55  ;;  %v25106_v24 = vld [vmem:[#allocation212_spill] sm:$0xff]  ;;  %v12239_v8 = vadd.f32 %v25108_v12, %v12156_v29 }
 0x46e   : > { %v12394_v15 = vpop.f32.mrf.mxu1  ;;  %13004 = vmatprep.subr.bf16.mxu1 %v17064_v42  ;;  %v12312_v33 = vadd.f32 %v12311_v53, %v12229_v7  ;;  %v23706_v59 = vadd.f32 %v12392_v54, %v12310_v49  ;;  %v25109_v39 = vld [vmem:[#allocation68_spill] sm:$0xff]  ;;  %v10207_v28 = vadd.f32 %v25110_v11, %v10124_v0 }
 0x46f   : > { %v12315_v60 = vpop.f32.mrf.mxu0  ;;  %12812 = vmatmul.mubr.bf16.gmra.mxu0 %v25101_v9  ;;  %v17071_v55 = vld [vmem:[%s24297_s1 + $0x21a8] ss:$16 sps:$4 sm:$0xff]   ;;  %v17079_v7 = vld [vmem:[%s24297_s1 + $0x218c] ss:$16 sps:$4 sm:$0xff]  }
 0x470   : > { %v12398_v4 = vpop.f32.mrf.mxu1  ;;  %12895 = vmatmul.mubr.bf16.gmra.mxu1 %v25102_v18  ;;  %v12316_v47 = vadd.f32 %v12315_v60, %v23428_v40  ;;  %v23712_v3 = vadd.f32 %v12394_v15, %v12312_v33  ;;  %12922 = vmatpush2.bf16.msra.mxu0 %v17059_v56  ;;  %v17073_v40 = vld [vmem:[%s24297_s1 + $0x21ac] ss:$16 sps:$4 sm:$0xff]   ;;  %v17074_v42 = vld [vmem:[%s24297_s1 + $0x23a8] ss:$16 sps:$4 sm:$0xff]   ;;  %v25113_v33 = vld [vmem:[#allocation91_spill] sm:$0xff] }
 0x471   : > { %13005 = vmatpush2.bf16.msra.mxu1 %v17062_v14  ;;  %v12317_v34 = vpop.f32.mrf.mxu0  ;;  %12923 = vmatprep.subr.bf16.mxu0 %v17067_v20  ;;  %v17082_v36 = vld [vmem:[%s24297_s1 + $0x238c] ss:$16 sps:$4 sm:$0xff]   ;;  %v10134_v60 = vadd.f32 %v25113_v33, %v25103_v37  ;;  %v25114_v18 = vld [vmem:[#allocation117_spill] sm:$0xff]  ;;  %v17086_v10 = vld [vmem:[%s24297_s1 + $0x2368] ss:$16 sps:$4 sm:$0xff]  }
 0x472   : > { %v12400_v5 = vpop.f32.mrf.mxu1  ;;  %13006 = vmatprep.subr.bf16.mxu1 %v17070_v48  ;;  %v12318_v25 = vadd.f32 %v12317_v34, %v25105_v62  ;;  %v23729_v22 = vadd.f32 %v12398_v4, %v12316_v47  ;;  %12937 = vmatprep.mubr.bf16.mxu0 %v25106_v24  ;;  %v25111_v14 = vld [vmem:[#allocation116_spill] sm:$0xff]  ;;  %v25115_v47 = vld [vmem:[#allocation9_spill] sm:$0xff] }
 0x473   : > { %13020 = vmatprep.mubr.bf16.mxu1 %v25107_v44  ;;  %v12319_v43 = vpop.f32.mrf.mxu0  ;;  %v10290_v53 = vadd.f32 %v25111_v14, %v10207_v28  ;;  %v25112_v15 = vld [vmem:[#allocation32_spill] sm:$0xff] }
 0x474   : > { %v12402_v21 = vpop.f32.mrf.mxu1  ;;  %v12320_v52 = vadd.f32 %v12319_v43, %v25109_v39  ;;  %v23735_v16 = vadd.f32 %v12400_v5, %v12318_v25  ;;  %12924 = vmatpush2.bf16.msra.mxu0 %v17065_v58  ;;  %v11618_v20 = vadd.f32 %v25112_v15, %v22415_v19  ;;  %v17085_v9 = vld [vmem:[%s24297_s1 + $0x216c] ss:$16 sps:$4 sm:$0xff]   ;;  %v25117_v5 = vld [vmem:[#allocation133_spill] sm:$0xff]  ;;  %v17092_v39 = vld [vmem:[%s24297_s1 + $0x2348] ss:$16 sps:$4 sm:$0xff]  }
 0x475   : > { %13007 = vmatpush2.bf16.msra.mxu1 %v17068_v17  ;;  %v12321_v50 = vpop.f32.mrf.mxu0  ;;  %12925 = vmatprep.subr.bf16.mxu0 %v17073_v40  ;;  %v17088_v4 = vld [vmem:[%s24297_s1 + $0x236c] ss:$16 sps:$4 sm:$0xff]   ;;  %v10373_v29 = vadd.f32 %v25114_v18, %v10290_v53  ;;  %v17083_v17 = vld [vmem:[%s24297_s1 + $0x2168] ss:$16 sps:$4 sm:$0xff]   ;;  %v25126_v53 = vld [vmem:[#allocation47_spill] sm:$0xff] }
 0x476   : > { %v12404_v54 = vpop.f32.mrf.mxu1  ;;  %13008 = vmatprep.subr.bf16.mxu1 %v17076_v31  ;;  %v12322_v49 = vadd.f32 %v12321_v50, %v12239_v8  ;;  %v23750_v56 = vadd.f32 %v12402_v21, %v12320_v52  ;;  %v11701_v58 = vadd.f32 %v25115_v47, %v11618_v20  ;;  %v25116_v0 = vld [vmem:[#allocation92_spill] sm:$0xff]  ;;  %v25118_v25 = vld [vmem:[#allocation46_spill] sm:$0xff]  ;;  %v25120_v21 = vld [vmem:[#allocation13_spill] sm:$0xff] }
 0x477   : > { %v10217_v34 = vadd.f32 %v25116_v0, %v10134_v60  ;;  %v10456_v40 = vadd.f32 %v25117_v5, %v10373_v29  ;;  %v17091_v31 = vld [vmem:[%s24297_s1 + $0x214c] ss:$16 sps:$4 sm:$0xff]   ;;  %v11628_v12 = vadd.f32 %v25120_v21, %v22415_v19  ;;  %v17089_v8 = vld [vmem:[%s24297_s1 + $0x2148] ss:$16 sps:$4 sm:$0xff]   ;;  %v25128_v60 = vld [vmem:[#allocation97_spill] sm:$0xff] }
 0x478   : > { %v23755_v48 = vadd.f32 %v12404_v54, %v12322_v49  ;;  %12926 = vmatpush2.bf16.msra.mxu0 %v17071_v55  ;;  %v17094_v62 = vld [vmem:[%s24297_s1 + $0x234c] ss:$16 sps:$4 sm:$0xff]   ;;  %v11784_v24 = vadd.f32 %v25118_v25, %v11701_v58  ;;  %v17098_v33 = vld [vmem:[%s24297_s1 + $0x2328] ss:$16 sps:$4 sm:$0xff]   ;;  %v25130_v58 = vld [vmem:[#allocation49_spill] sm:$0xff] }
 0x479   : > { %13009 = vmatpush2.bf16.msra.mxu1 %v17074_v42  ;;  %12927 = vmatprep.subr.bf16.mxu0 %v17079_v7  ;;  %v25119_v44 = vld [vmem:[#allocation120_spill] sm:$0xff]  ;;  %v25122_v42 = vld [vmem:[#allocation134_spill] sm:$0xff]  ;;  %v25124_v7 = vld [vmem:[#allocation121_spill] sm:$0xff]  ;;  %v11711_v15 = vadd.f32 %v25126_v53, %v11628_v12 }
 0x47a   : > { %13010 = vmatprep.subr.bf16.mxu1 %v17082_v36  ;;  %v10300_v43 = vadd.f32 %v25119_v44, %v10217_v34  ;;  %v25121_v52 = vld [vmem:[#allocation96_spill] sm:$0xff]  ;;  %v10539_v11 = vadd.f32 %v25122_v42, %v10456_v40  ;;  %v25125_v49 = vld [vmem:[#allocation182_spill] sm:$0xff]  ;;  %v25132_v34 = vld [vmem:[#allocation183_spill] sm:$0xff] }
 0x47b   : > { %v10144_v55 = vadd.f32 %v25121_v52, %v25103_v37  ;;  %v17097_v19 = vld [vmem:[%s24297_s1 + $0x212c] ss:$16 sps:$4 sm:$0xff]   ;;  %v17104_v25 = vld [vmem:[%s24297_s1 + $0x2308] ss:$16 sps:$4 sm:$0xff]   ;;  %v25137_v52 = vld [vmem:[#allocation51_spill] sm:$0xff] }
 0x47c   : > { %12928 = vmatpush2.bf16.msra.mxu0 %v17077_v46  ;;  %v17100_v28 = vld [vmem:[%s24297_s1 + $0x232c] ss:$16 sps:$4 sm:$0xff]   ;;  %v10383_v36 = vadd.f32 %v25124_v7, %v10300_v43  ;;  %v10622_v14 = vadd.f32 %v25125_v49, %v10539_v11  ;;  %v25141_v7 = vld [vmem:[#allocation53_spill] sm:$0xff]  ;;  %v25142_v49 = vld [vmem:[#allocation103_spill] sm:$0xff] }
 0x47d   : > { %13011 = vmatpush2.bf16.msra.mxu1 %v17080_v6  ;;  %12929 = vmatprep.subr.bf16.mxu0 %v17085_v9  ;;  %v25123_v50 = vld [vmem:[#allocation48_spill] sm:$0xff]  ;;  %v25127_v20 = vld [vmem:[#allocation50_spill] sm:$0xff]  ;;  %v10227_v9 = vadd.f32 %v25128_v60, %v10144_v55  ;;  %v25143_v53 = vld [vmem:[#allocation149_spill] sm:$0xff] }
 0x47e   : > { %13012 = vmatprep.subr.bf16.mxu1 %v17088_v4  ;;  %v11867_v54 = vadd.f32 %v25123_v50, %v11784_v24  ;;  %v17095_v6 = vld [vmem:[%s24297_s1 + $0x2128] ss:$16 sps:$4 sm:$0xff]   ;;  %v25129_v4 = vld [vmem:[#allocation139_spill] sm:$0xff]  ;;  %v17103_v29 = vld [vmem:[%s24297_s1 + $0x210c] ss:$16 sps:$4 sm:$0xff]   ;;  %v10705_v5 = vadd.f32 %v25132_v34, %v10622_v14 }
 0x47f   : > { %v10466_v18 = vadd.f32 %v25129_v4, %v10383_v36  ;;  %v17106_v47 = vld [vmem:[%s24297_s1 + $0x230c] ss:$16 sps:$4 sm:$0xff]   ;;  %v25140_v50 = vld [vmem:[#allocation191_spill] sm:$0xff] }
 0x480   : > { %12930 = vmatpush2.bf16.msra.mxu0 %v17083_v17  ;;  %v11950_v46 = vadd.f32 %v25127_v20, %v11867_v54  ;;  %v11794_v17 = vadd.f32 %v25130_v58, %v11711_v15  ;;  %v25133_v40 = vld [vmem:[#allocation52_spill] sm:$0xff]  ;;  %v25134_v24 = vld [vmem:[#allocation102_spill] sm:$0xff]  ;;  %v25149_v34 = vld [vmem:[#allocation159_spill] sm:$0xff] }
 0x481   : > { %13013 = vmatpush2.bf16.msra.mxu1 %v17086_v10  ;;  %12931 = vmatprep.subr.bf16.mxu0 %v17091_v31  ;;  %v25131_v10 = vld [vmem:[#allocation63_spill] sm:$0xff]  ;;  %v10154_v44 = vadd.f32 %v25134_v24, %v25103_v37  ;;  %v25135_v43 = vld [vmem:[#allocation140_spill] sm:$0xff]  ;;  %v25146_v4 = vld [vmem:[#allocation66_spill] sm:$0xff] }
 0x482   : > { %13014 = vmatprep.subr.bf16.mxu1 %v17094_v62  ;;  %v10310_v0 = vadd.f32 %v25131_v10, %v10227_v9  ;;  %v12033_v31 = vadd.f32 %v25133_v40, %v11950_v46  ;;  %v17101_v62 = vld [vmem:[%s24297_s1 + $0x2108] ss:$16 sps:$4 sm:$0xff]   ;;  %v10549_v21 = vadd.f32 %v25135_v43, %v10466_v18  ;;  %v11877_v55 = vadd.f32 %v25137_v52, %v11794_v17  ;;  %v17109_v9 = vld [vmem:[%s24299_s3 + $0x70] sm:$0xff]   ;;  %v25151_v40 = vld [vmem:[#allocation55_spill] sm:$0xff] }
 0x483   : > { %v25136_v12 = vld [vmem:[#allocation180_spill] sm:$0xff]  ;;  %v10237_v14 = vadd.f32 %v25142_v49, %v10154_v44  ;;  %v25152_v24 = vld [vmem:[#allocation161_spill] sm:$0xff] }
 0x484   : > { %12932 = vmatpush2.bf16.msra.mxu0 %v17089_v8  ;;  %v10788_v8 = vadd.f32 %v25136_v12, %v10705_v5  ;;  %v25138_v42 = vld [vmem:[#allocation56_spill] sm:$0xff]  ;;  %v10632_v54 = vadd.f32 %v25140_v50, %v10549_v21  ;;  %v11960_v36 = vadd.f32 %v25141_v7, %v11877_v55  ;;  %v25150_v5 = vld [vmem:[#allocation214_spill] sm:$0xff]  ;;  %v25154_v43 = vld [vmem:[#allocation109_spill] sm:$0xff] }
 0x485   : > { %13015 = vmatpush2.bf16.msra.mxu1 %v17092_v39  ;;  %12933 = vmatprep.subr.bf16.mxu0 %v17097_v19  ;;  %v17107_v39 = vld [vmem:[%s24299_s3 + $0x78] sm:$0xff]   ;;  %v12116_v11 = vadd.f32 %v25138_v42, %v12033_v31  ;;  %v25144_v20 = vld [vmem:[#allocation208_spill] sm:$0xff]  ;;  %v10320_v18 = vadd.f32 %v25146_v4, %v10237_v14  ;;  %v10164_v21 = vadd.f32 %v25154_v43, %v25103_v37  ;;  %v25158_v50 = vld [vmem:[#allocation129_spill] sm:$0xff] }
 0x486   : > { %13016 = vmatprep.subr.bf16.mxu1 %v17100_v28  ;;  %v25139_v19 = vld [vmem:[#allocation126_spill] sm:$0xff]  ;;  %v10871_v46 = vadd.f32 %v25144_v20, %v10788_v8  ;;  %v25148_v58 = vld [vmem:[#allocation164_spill] sm:$0xff]  ;;  %v12043_v31 = vadd.f32 %v25151_v40, %v11960_v36  ;;  %v25159_v7 = vld [vmem:[#allocation193_spill] sm:$0xff] }
 0x487   : > { %v10393_v28 = vadd.f32 %v25139_v19, %v10310_v0  ;;  %v25153_v44 = vld [vmem:[#allocation216_spill] sm:$0xff]  ;;  %v25155_v12 = vld [vmem:[#allocation150_spill] sm:$0xff]  ;;  %v25163_v4 = vld [vmem:[#allocation209_spill] sm:$0xff] }
 0x488   : > { %12934 = vmatpush2.bf16.msra.mxu0 %v17095_v6  ;;  %v17108_v6 = vld [vmem:[%s24299_s3 + $0x38] sm:$0xff]   ;;  %v10954_v17 = vadd.f32 %v25148_v58, %v10871_v46  ;;  %v17111_v37 = vld [vmem:[%s24299_s3 + $0x68] sm:$0xff]  }
 0x489   : > { %13017 = vmatpush2.bf16.msra.mxu1 %v17098_v33  ;;  %12935 = vmatprep.subr.bf16.mxu0 %v17103_v29  ;;  %v10476_v15 = vadd.f32 %v25143_v53, %v10393_v28  ;;  %v25145_v33 = vld [vmem:[#allocation57_spill] sm:$0xff]  ;;  %v25147_v29 = vld [vmem:[#allocation192_spill] sm:$0xff] }
 0x48a   : > { %13018 = vmatprep.subr.bf16.mxu1 %v17106_v47  ;;  %v12199_v60 = vadd.f32 %v25145_v33, %v12116_v11  ;;  %v10715_v47 = vadd.f32 %v25147_v29, %v10632_v54  ;;  %v25157_v11 = vld [vmem:[#allocation59_spill] sm:$0xff]  ;;  %v10403_v54 = vadd.f32 %v25158_v50, %v10320_v18  ;;  %v25160_v53 = vld [vmem:[#allocation217_spill] sm:$0xff]  ;;  %v17112_v58 = vld [vmem:[%s24299_s3 + $0x28] sm:$0xff]  }
 0x48b   : > { %v10559_v8 = vadd.f32 %v25155_v12, %v10476_v15  ;;  %v11037_v15 = vadd.f32 %v25160_v53, %v10954_v17  ;;  %v25164_v17 = vld [vmem:[#allocation5_spill] sm:$0xff]  ;;  %v25166_v40 = vld [vmem:[#allocation72_spill] sm:$0xff]  ;;  %v25170_v12 = vld [vmem:[#allocation179_spill] sm:$0xff] }
 0x48c   : > { %12936 = vmatpush2.bf16.msra.mxu0 %v17101_v62  ;;  %v12282_v62 = vadd.f32 %v23560_v41, %v12199_v60  ;;  %v17110_v41 = vld [vmem:[%s24299_s3 + $0x30] sm:$0xff]   ;;  %v25162_v60 = vld [vmem:[#allocation155_spill] sm:$0xff] }
 0x48d   : > { %13019 = vmatpush2.bf16.msra.mxu1 %v17104_v25  ;;  %15261 = vmatprep.subr.bf16.mxu0 %v17107_v39  ;;  %v25156_v39 = vld [vmem:[#allocation190_spill] sm:$0xff]  ;;  %v10642_v36 = vadd.f32 %v25159_v7, %v10559_v8  ;;  %v17114_v7 = vld [vmem:[%s24299_s3 + $0x20] sm:$0xff]   ;;  %v25176_v53 = vld [vmem:[#allocation73_spill] sm:$0xff] }
 0x48e   : > { %v10798_v52 = vadd.f32 %v25156_v39, %v10715_v47  ;;  %v12365_v20 = vadd.f32 %v23562_v23, %v12282_v62  ;;  %v25165_v23 = vld [vmem:[#allocation58_spill] sm:$0xff] }
 0x48f   : > { %v12441_v10 = vpop.f32.mrf.mxu0  ;;  %12938 = vmatmul.mubr.bf16.vlgmr.msra.gmra.mxu0 %v25149_v34  ;;  %v25167_v62 = vld [vmem:[#allocation194_spill] sm:$0xff] }
 0x490   : > { %v12524_v0 = vpop.f32.mrf.mxu1  ;;  %13021 = vmatmul.mubr.bf16.vlgmr.msra.gmra.mxu1 %v25150_v5  ;;  %v12442_v25 = vadd.f32 %v12441_v10, %v23543_v57  ;;  %12947 = vmatprep.mubr.bf16.mxu0 %v25152_v24  ;;  %v12126_v57 = vadd.f32 %v25157_v11, %v12043_v31  ;;  %v10881_v29 = vadd.f32 %v25163_v4, %v10798_v52  ;;  %v17113_v5 = vld [vmem:[%s24299_s3 + $0x60] sm:$0xff]   ;;  %v25168_v24 = vld [vmem:[#allocation181_spill] sm:$0xff]  ;;  %v25173_v11 = vld [vmem:[#allocation156_spill] sm:$0xff] }
 0x491   : > { %13030 = vmatprep.mubr.bf16.mxu1 %v25153_v44  ;;  %v12443_v55 = vpop.f32.mrf.mxu0  ;;  %15262 = vmatpush3.bf16.msra.mxu0 %v17108_v6  ;;  %v11120_v10 = vadd.f32 %v25164_v17, %v11037_v15  ;;  %v25179_v4 = vld [vmem:[#allocation18_spill] sm:$0xff] }
 0x492   : > { %v12526_v42 = vpop.f32.mrf.mxu1  ;;  %v23875_v19 = vadd.f32 %v12524_v0, %v12442_v25  ;;  %v12444_v28 = vadd.f32 %v12443_v55, %v23549_v38  ;;  %15263 = vmatprep.subr.bf16.mxu0 %v17109_v9  ;;  %v25161_v38 = vld [vmem:[#allocation110_spill] sm:$0xff]  ;;  %v10486_v9 = vadd.f32 %v25162_v60, %v10403_v54  ;;  %v12209_v0 = vadd.f32 %v25165_v23, %v12126_v57 }
 0x493   : > { %v12445_v49 = vpop.f32.mrf.mxu0  ;;  %v10247_v33 = vadd.f32 %v25161_v38, %v10164_v21  ;;  %v10725_v25 = vadd.f32 %v25167_v62, %v10642_v36  ;;  %v10964_v44 = vadd.f32 %v25168_v24, %v10881_v29  ;;  %v25169_v21 = vld [vmem:[#allocation165_spill] sm:$0xff]  ;;  %v25178_v38 = vld [vmem:[#allocation218_spill] sm:$0xff] }
 0x494   : > { %v12528_v14 = vpop.f32.mrf.mxu1  ;;  %v23885_v46 = vadd.f32 %v12526_v42, %v12444_v28  ;;  %v12446_v6 = vadd.f32 %v12445_v49, %v23570_v32  ;;  %v12292_v39 = vadd.f32 %v23607_v13, %v12209_v0  ;;  %v25171_v42 = vld [vmem:[#allocation163_spill] sm:$0xff]  ;;  %v10569_v57 = vadd.f32 %v25173_v11, %v10486_v9  ;;  %v25174_v28 = vld [vmem:[#allocation145_spill] sm:$0xff]  ;;  %v25175_v13 = vld [vmem:[#allocation6_spill] sm:$0xff] }
 0x495   : > { %v12447_v47 = vpop.f32.mrf.mxu0  ;;  %15264 = vmatpush3.bf16.msra.mxu0 %v17110_v41  ;;  %v10330_v31 = vadd.f32 %v25166_v40, %v10247_v33  ;;  %v25172_v41 = vld [vmem:[#allocation168_spill] sm:$0xff]  ;;  %v11203_v36 = vadd.f32 %v25175_v13, %v11120_v10  ;;  %v11047_v33 = vadd.f32 %v25178_v38, %v10964_v44  ;;  %v25181_v10 = vld [vmem:[#allocation146_spill] sm:$0xff]  ;;  %v25182_v40 = vld [vmem:[#allocation7_spill] sm:$0xff] }
 0x496   : > { %v12530_v18 = vpop.f32.mrf.mxu1  ;;  %v23896_v34 = vadd.f32 %v12528_v14, %v12446_v6  ;;  %v12448_v32 = vadd.f32 %v12447_v47, %v12365_v20  ;;  %15265 = vmatprep.subr.bf16.mxu0 %v17111_v37  ;;  %v10808_v37 = vadd.f32 %v25174_v28, %v10725_v25  ;;  %v17115_v14 = vld [vmem:[%s24299_s3 + $0x58] sm:$0xff]   ;;  %v25177_v20 = vld [vmem:[#allocation199_spill] sm:$0xff]  ;;  %v12375_v47 = vadd.f32 %v23609_v45, %v12292_v39  ;;  %v17117_v45 = vld [vmem:[%s24299_s3 + $0x50] sm:$0xff]  }
 0x497   : > { %v12451_v43 = vpop.f32.mrf.mxu0  ;;  %12948 = vmatmul.mubr.bf16.gmra.mxu0 %v25169_v21  ;;  %v10413_v15 = vadd.f32 %v25176_v53, %v10330_v31  ;;  %v10652_v6 = vadd.f32 %v25177_v20, %v10569_v57  ;;  %v11286_v29 = vadd.f32 %v25179_v4, %v11203_v36  ;;  %v11130_v31 = vadd.f32 %v25182_v40, %v11047_v33  ;;  %v25184_v44 = vld [vmem:[#allocation223_spill] sm:$0xff]  ;;  %v25189_v28 = vld [vmem:[#allocation220_spill] sm:$0xff] }
 0x498   : > { %13031 = vmatmul.mubr.bf16.gmra.mxu1 %v25170_v12  ;;  %v12534_v8 = vpop.f32.mrf.mxu1  ;;  %v23907_v52 = vadd.f32 %v12530_v18, %v12448_v32  ;;  %v12452_v55 = vadd.f32 %v12451_v43, %v23591_v27  ;;  %12957 = vmatprep.mubr.bf16.mxu0 %v25171_v42  ;;  %v10891_v23 = vadd.f32 %v25181_v10, %v10808_v37  ;;  %v25185_v12 = vld [vmem:[#allocation169_spill] sm:$0xff]  ;;  %v25188_v57 = vld [vmem:[#allocation219_spill] sm:$0xff]  ;;  %v17119_v38 = vld [vmem:[%s24299_s3 + $0x48] sm:$0xff]  }
 0x499   : > { %13040 = vmatprep.mubr.bf16.mxu1 %v25172_v41  ;;  %v12453_v50 = vpop.f32.mrf.mxu0  ;;  %15266 = vmatpush3.bf16.msra.mxu0 %v17112_v58  ;;  %v25180_v58 = vld [vmem:[#allocation172_spill] sm:$0xff]  ;;  %v25190_v37 = vld [vmem:[#allocation173_spill] sm:$0xff] }
 0x49a   : > { %v12536_v54 = vpop.f32.mrf.mxu1  ;;  %v12454_v49 = vadd.f32 %v12453_v50, %v23597_v51  ;;  %v23919_v27 = vadd.f32 %v12534_v8, %v12452_v55  ;;  %15267 = vmatprep.subr.bf16.mxu0 %v17113_v5  ;;  %v10496_v17 = vadd.f32 %v25180_v58, %v10413_v15  ;;  %v17116_v5 = vld [vmem:[%s24299_s3 + $0x18] sm:$0xff]   ;;  %v10974_v43 = vadd.f32 %v25184_v44, %v10891_v23  ;;  %v25187_v55 = vld [vmem:[#allocation19_spill] sm:$0xff]  ;;  %v25194_v33 = vld [vmem:[#allocation204_spill] sm:$0xff] }
 0x49b   : > { %v12455_v60 = vpop.f32.mrf.mxu0  ;;  %v25186_v8 = vld [vmem:[#allocation178_spill] sm:$0xff]  ;;  %v11369_v42 = vadd.f32 %v25187_v55, %v11286_v29  ;;  %v25200_v44 = vld [vmem:[#allocation205_spill] sm:$0xff] }
 0x49c   : > { %v12538_v9 = vpop.f32.mrf.mxu1  ;;  %v12456_v51 = vadd.f32 %v12455_v60, %v23618_v1  ;;  %v23930_v18 = vadd.f32 %v12536_v54, %v12454_v49  ;;  %v25183_v1 = vld [vmem:[#allocation200_spill] sm:$0xff]  ;;  %v10579_v50 = vadd.f32 %v25190_v37, %v10496_v17  ;;  %v25191_v54 = vld [vmem:[#allocation210_spill] sm:$0xff]  ;;  %v17118_v49 = vld [vmem:[%s24299_s3 + $0x10] sm:$0xff]  }
 0x49d   : > { %v12457_v0 = vpop.f32.mrf.mxu0  ;;  %15268 = vmatpush3.bf16.msra.mxu0 %v17114_v7  ;;  %v10735_v24 = vadd.f32 %v25183_v1, %v10652_v6  ;;  %v25203_v55 = vld [vmem:[#allocation222_spill] sm:$0xff]  ;;  %v25205_v37 = vld [vmem:[#allocation225_spill] sm:$0xff] }
 0x49e   : > { %v12540_v32 = vpop.f32.mrf.mxu1  ;;  %v12458_v62 = vadd.f32 %v12457_v0, %v12375_v47  ;;  %v23938_v25 = vadd.f32 %v12538_v9, %v12456_v51  ;;  %15269 = vmatprep.subr.bf16.mxu0 %v17115_v14  ;;  %v25192_v14 = vld [vmem:[#allocation8_spill] sm:$0xff]  ;;  %v10662_v60 = vadd.f32 %v25194_v33, %v10579_v50  ;;  %v25198_v0 = vld [vmem:[#allocation10_spill] sm:$0xff] }
 0x49f   : > { %v12461_v21 = vpop.f32.mrf.mxu0  ;;  %12958 = vmatmul.mubr.bf16.gmra.mxu0 %v25185_v12  ;;  %v10818_v7 = vadd.f32 %v25191_v54, %v10735_v24  ;;  %v11213_v53 = vadd.f32 %v25192_v14, %v11130_v31  ;;  %v25195_v9 = vld [vmem:[#allocation224_spill] sm:$0xff]  ;;  %v25206_v50 = vld [vmem:[#allocation226_spill] sm:$0xff] }
 0x4a0   : > { %13041 = vmatmul.mubr.bf16.gmra.mxu1 %v25186_v8  ;;  %v12544_v39 = vpop.f32.mrf.mxu1  ;;  %v12462_v41 = vadd.f32 %v12461_v21, %v23640_v61  ;;  %v23949_v11 = vadd.f32 %v12540_v32, %v12458_v62  ;;  %12967 = vmatprep.mubr.bf16.mxu0 %v25188_v57  ;;  %v25193_v61 = vld [vmem:[#allocation30_spill] sm:$0xff]  ;;  %v11057_v4 = vadd.f32 %v25195_v9, %v10974_v43  ;;  %v25196_v51 = vld [vmem:[#allocation20_spill] sm:$0xff]  ;;  %v25199_v62 = vld [vmem:[#allocation31_spill] sm:$0xff] }
 0x4a1   : > { %13050 = vmatprep.mubr.bf16.mxu1 %v25189_v28  ;;  %v12463_v13 = vpop.f32.mrf.mxu0  ;;  %15270 = vmatpush3.bf16.msra.mxu0 %v17116_v5  ;;  %v11452_v15 = vadd.f32 %v25193_v61, %v11369_v42  ;;  %v11296_v58 = vadd.f32 %v25196_v51, %v11213_v53  ;;  %v17120_v31 = vld [vmem:[%s24299_s3 + $0x8] sm:$0xff]   ;;  %v10745_v43 = vadd.f32 %v25200_v44, %v10662_v60  ;;  %v25201_v21 = vld [vmem:[#allocation229_spill] sm:$0xff]  ;;  %v25207_v54 = vld [vmem:[#allocation162_spill] sm:$0xff] }
 0x4a2   : > { %v12546_v36 = vpop.f32.mrf.mxu1  ;;  %v12464_v20 = vadd.f32 %v12463_v13, %v23647_v35  ;;  %v23961_v6 = vadd.f32 %v12544_v39, %v12462_v41  ;;  %15271 = vmatprep.subr.bf16.mxu0 %v17117_v45  ;;  %v25197_v35 = vld [vmem:[#allocation211_spill] sm:$0xff]  ;;  %v11140_v32 = vadd.f32 %v25198_v0, %v11057_v4  ;;  %v25202_v39 = vld [vmem:[#allocation221_spill] sm:$0xff]  ;;  %v25208_v13 = vld [vmem:[#allocation12_spill] sm:$0xff] }
 0x4a3   : > { %v12465_v29 = vpop.f32.mrf.mxu0  ;;  %v10901_v23 = vadd.f32 %v25197_v35, %v10818_v7  ;;  %v11535_v45 = vadd.f32 %v25199_v62, %v11452_v15  ;;  %v25204_v41 = vld [vmem:[#allocation21_spill] sm:$0xff]  ;;  %v10828_v7 = vadd.f32 %v25207_v54, %v10745_v43  ;;  %v17122_v53 = vld [vmem:[%s24299_s3] sm:$0xff]   ;;  %v25210_v33 = vld [vmem:[#allocation230_spill] sm:$0xff] }
 0x4a4   : > { %v12548_v47 = vpop.f32.mrf.mxu1  ;;  %v12466_v17 = vadd.f32 %v12465_v29, %v23662_v30  ;;  %v23970_v10 = vadd.f32 %v12546_v36, %v12464_v20  ;;  %v17121_v30 = vld [vmem:[%s24299_s3 + $0x40] sm:$0xff]   ;;  %v11379_v57 = vadd.f32 %v25204_v41, %v11296_v58  ;;  %v11223_v36 = vadd.f32 %v25208_v13, %v11140_v32  ;;  %v25211_v29 = vld [vmem:[#allocation22_spill] sm:$0xff]  ;;  %v25212_v51 = vld [vmem:[#allocation29_spill] sm:$0xff] }
 0x4a5   : > { %v12467_v5 = vpop.f32.mrf.mxu0  ;;  %15272 = vmatpush3.bf16.msra.mxu0 %v17118_v49  ;;  %v10984_v12 = vadd.f32 %v25201_v21, %v10901_v23  ;;  %v13076_v61 = vmax.f32 %v11535_v45, 0.0  ;;  %v25209_v15 = vld [vmem:[#allocation35_spill] sm:$0xff]  ;;  %v13072_v58 = vmax.f32 %v25212_v51, 0.0  ;;  %v25214_v32 = vld [vmem:[#allocation14_spill] sm:$0xff]  ;;  %v25226_v51 = vld [vmem:[#allocation40_spill] sm:$0xff] }
 0x4a6   : > { %v12550_v40 = vpop.f32.mrf.mxu1  ;;  %v12468_v1 = vadd.f32 %v12467_v5, %v23669_v2  ;;  %v23979_v24 = vadd.f32 %v12548_v47, %v12466_v17  ;;  %15273 = vmatprep.subr.bf16.mxu0 %v17119_v38  ;;  %v11306_v47 = vadd.f32 %v25211_v29, %v11223_v36  ;;  %v25213_v23 = vld [vmem:[#allocation215_spill] sm:$0xff] }
 0x4a7   : > { %v12471_v8 = vpop.f32.mrf.mxu0  ;;  %12968 = vmatmul.mubr.bf16.gmra.mxu0 %v25202_v39  ;;  %v11067_v60 = vadd.f32 %v25210_v33, %v10984_v12  ;;  %v10911_v0 = vadd.f32 %v25213_v23, %v10828_v7  ;;  %v25216_v44 = vld [vmem:[#allocation3_spill] sm:$0xff]  ;;  %v25218_v12 = vld [vmem:[#allocation228_spill] sm:$0xff] }
 0x4a8   : > { %13051 = vmatmul.mubr.bf16.gmra.mxu1 %v25203_v55  ;;  %v12554_v42 = vpop.f32.mrf.mxu1  ;;  %v12472_v2 = vadd.f32 %v12471_v8, %v23685_v63  ;;  %v23990_v28 = vadd.f32 %v12550_v40, %v12468_v1  ;;  %12977 = vmatprep.mubr.bf16.mxu0 %v25205_v37  ;;  %v11462_v63 = vadd.f32 %v25209_v15, %v11379_v57  ;;  %v25219_v39 = vld [vmem:[#allocation23_spill] sm:$0xff]  ;;  %v25223_v15 = vld [vmem:[#allocation24_spill] sm:$0xff] }
 0x4a9   : > { %13060 = vmatprep.mubr.bf16.mxu1 %v25206_v50  ;;  %v12473_v49 = vpop.f32.mrf.mxu0  ;;  %15274 = vmatpush3.bf16.msra.mxu0 %v17120_v31  ;;  %v11150_v5 = vadd.f32 %v25214_v32, %v11067_v60  ;;  %v25215_v31 = vld [vmem:[#allocation36_spill] sm:$0xff]  ;;  %v10994_v43 = vadd.f32 %v25216_v44, %v10911_v0  ;;  %v11389_v55 = vadd.f32 %v25219_v39, %v11306_v47  ;;  %v25220_v57 = vld [vmem:[#allocation15_spill] sm:$0xff]  ;;  %v17123_v0 = vld [vmem:[%s24299_s3 + $0xf8] sm:$0xff]  }
 0x4aa   : > { %v12556_v14 = vpop.f32.mrf.mxu1  ;;  %v12474_v20 = vadd.f32 %v12473_v49, %v23691_v26  ;;  %v24001_v38 = vadd.f32 %v12554_v42, %v12472_v2  ;;  %15275 = vmatprep.subr.bf16.mxu0 %v17121_v30  ;;  %v11545_v62 = vadd.f32 %v25215_v31, %v11462_v63  ;;  %v13112_v30 = vpack.c.bf16 %v13076_v61, %v13072_v58  ;;  %v25221_v54 = vld [vmem:[#allocation39_spill] sm:$0xff]  ;;  %v25222_v49 = vld [vmem:[#allocation4_spill] sm:$0xff]  ;;  %v25224_v63 = vld [vmem:[#allocation33_spill] sm:$0xff] }
 0x4ab   : > { %v12475_v9 = vpop.f32.mrf.mxu0  ;;  %v11472_v7 = vadd.f32 %v25221_v54, %v11389_v55  ;;  %v25227_v32 = vld [vmem:[#allocation34_spill] sm:$0xff]  ;;  %15307 = vmatprep.subr.bf16.mxu1 %v17123_v0  ;;  %v25229_v31 = vld [vmem:[#allocation17_spill] sm:$0xff]  ;;  %v25233_v55 = vld [vmem:[#allocation44_spill] sm:$0xff] }
 0x4ac   : > { %v12558_v4 = vpop.f32.mrf.mxu1  ;;  %v12476_v17 = vadd.f32 %v12475_v9, %v23706_v59  ;;  %v24007_v35 = vadd.f32 %v12556_v14, %v12474_v20  ;;  %v25217_v59 = vld [vmem:[#allocation227_spill] sm:$0xff]  ;;  %v13084_v50 = vmax.f32 %v11545_v62, 0.0  ;;  %v11077_v14 = vadd.f32 %v25222_v49, %v10994_v43  ;;  %v25225_v9 = vld [vmem:[#allocation16_spill] sm:$0xff]  ;;  %v17126_v43 = vld [vmem:[%s24299_s3 + $0xb0] sm:$0xff]  }
 0x4ad   : > { %v12477_v26 = vpop.f32.mrf.mxu0  ;;  %15276 = vmatpush3.bf16.msra.mxu0 %v17122_v53  ;;  %v13080_v20 = vmax.f32 %v25224_v63, 0.0 }
 0x4ae   : > { %v12560_v40 = vpop.f32.mrf.mxu1  ;;  %v12478_v45 = vadd.f32 %v12477_v26, %v23712_v3  ;;  %v24013_v1 = vadd.f32 %v12558_v4, %v12476_v17  ;;  %v11233_v3 = vadd.f32 %v25220_v57, %v11150_v5  ;;  %v11160_v4 = vadd.f32 %v25225_v9, %v11077_v14  ;;  %v17130_v14 = vld [vmem:[%s24299_s3 + $0xa0] sm:$0xff]   ;;  %v25239_v9 = vld [vmem:[#allocation42_spill] sm:$0xff] }
 0x4af   : > { %v12481_v21 = vpop.f32.mrf.mxu0  ;;  %12978 = vmatmul.mubr.bf16.gmra.mxu0 %v25217_v59  ;;  %v13116_v23 = vpack.c.bf16 %v13084_v50, %v13080_v20  ;;  %v25231_v59 = vld [vmem:[#allocation26_spill] sm:$0xff]  ;;  %v25235_v50 = vld [vmem:[#allocation27_spill] sm:$0xff] }
 0x4b0   : > { %13061 = vmatmul.mubr.bf16.gmra.mxu1 %v25218_v12  ;;  %v12564_v8 = vpop.f32.mrf.mxu1  ;;  %v12482_v42 = vadd.f32 %v12481_v21, %v23729_v22  ;;  %v24020_v41 = vadd.f32 %v12560_v40, %v12478_v45  ;;  %13426 = vmatprep.mubr.bf16.mxu0 %v13112_v30  ;;  %v11316_v22 = vadd.f32 %v25223_v15, %v11233_v3  ;;  %v17124_v40 = vld [vmem:[%s24299_s3 + $0xb8] sm:$0xff]   ;;  %v25230_v30 = vld [vmem:[#allocation43_spill] sm:$0xff]  ;;  %v17127_v21 = vld [vmem:[%s24299_s3 + $0xe8] sm:$0xff]  }
 0x4b1   : > { %v12483_v2 = vpop.f32.mrf.mxu0  ;;  %v11243_v62 = vadd.f32 %v25229_v31, %v11160_v4  ;;  %15308 = vmatpush3.bf16.msra.mxu1 %v17124_v40  ;;  %v17128_v3 = vld [vmem:[%s24299_s3 + $0xa8] sm:$0xff]   ;;  %v17134_v31 = vld [vmem:[%s24299_s3 + $0x90] sm:$0xff]  }
 0x4b2   : > { %v12566_v37 = vpop.f32.mrf.mxu1  ;;  %v12484_v13 = vadd.f32 %v12483_v2, %v23735_v16  ;;  %v24025_v36 = vadd.f32 %v12564_v8, %v12482_v42  ;;  %v11555_v16 = vadd.f32 %v25226_v51, %v11472_v7  ;;  %v25232_v8 = vld [vmem:[#allocation37_spill] sm:$0xff]  ;;  %v25234_v2 = vld [vmem:[#allocation38_spill] sm:$0xff] }
 0x4b3   : > { %v12485_v53 = vpop.f32.mrf.mxu0  ;;  %v11326_v12 = vadd.f32 %v25231_v59, %v11243_v62  ;;  %v13088_v39 = vmax.f32 %v25232_v8, 0.0 }
 0x4b4   : > { %v12568_v61 = vpop.f32.mrf.mxu1  ;;  %v12486_v33 = vadd.f32 %v12485_v53, %v23750_v56  ;;  %v24031_v60 = vadd.f32 %v12566_v37, %v12484_v13  ;;  %v25228_v56 = vld [vmem:[#allocation25_spill] sm:$0xff]  ;;  %v13092_v45 = vmax.f32 %v11555_v16, 0.0  ;;  %v17129_v37 = vld [vmem:[%s24299_s3 + $0xe0] sm:$0xff]   ;;  %v17131_v53 = vld [vmem:[%s24299_s3 + $0xd8] sm:$0xff]  }
 0x4b5   : > { %v12487_v29 = vpop.f32.mrf.mxu0  ;;  %v11399_v5 = vadd.f32 %v25228_v56, %v11316_v22  ;;  %v11409_v54 = vadd.f32 %v25235_v50, %v11326_v12  ;;  %v25236_v13 = vld [vmem:[#allocation11_spill] sm:$0xff]  ;;  %v25238_v22 = vld [vmem:[#allocation28_spill] sm:$0xff] }
 0x4b6   : > { %v12570_v47 = vpop.f32.mrf.mxu1  ;;  %v12488_v58 = vadd.f32 %v12487_v29, %v23755_v48  ;;  %v24036_v17 = vadd.f32 %v12568_v61, %v12486_v33  ;;  %v17125_v48 = vld [vmem:[%s24299_s3 + $0xf0] sm:$0xff]   ;;  %v13120_v57 = vpack.c.bf16 %v13092_v45, %v13088_v39  ;;  %v17132_v33 = vld [vmem:[%s24299_s3 + $0x98] sm:$0xff]   ;;  %v17136_v12 = vld [vmem:[%s24299_s3 + $0x88] sm:$0xff]  }
 0x4b7   : > { %13427 = vmatmul.mubr.bf16.vlgmr.msra.gmra.mxu0 %v25227_v32  ;;  %v11482_v44 = vadd.f32 %v25230_v30, %v11399_v5  ;;  %15309 = vmatprep.subr.bf16.mxu1 %v17125_v48  ;;  %v11492_v49 = vadd.f32 %v25236_v13, %v11409_v54  ;;  %v25237_v61 = vld [vmem:[#allocation41_spill] sm:$0xff]  ;;  %v25242_v39 = vld [vmem:[#allocation62_spill] sm:$0xff]  ;;  %v17138_v50 = vld [vmem:[%s24299_s3 + $0x80] sm:$0xff]  }
 0x4b8   : > { %v24043_v26 = vadd.f32 %v12570_v47, %v12488_v58  ;;  %13434 = vmatprep.mubr.bf16.mxu0 %v13116_v23  ;;  %15310 = vmatpush3.bf16.msra.mxu1 %v17126_v43  ;;  %v13096_v15 = vmax.f32 %v25237_v61, 0.0  ;;  %v25240_v29 = vld [vmem:[#allocation61_spill] sm:$0xff] }
 0x4b9   : > { %v11565_v42 = vadd.f32 %v25233_v55, %v11482_v44  ;;  %15311 = vmatprep.subr.bf16.mxu1 %v17127_v21  ;;  %v11575_v63 = vadd.f32 %v25238_v22, %v11492_v49  ;;  %v13104_v47 = vmax.f32 %v25240_v29, 0.0  ;;  %v25241_v23 = vld [vmem:[#allocation45_spill] sm:$0xff]  ;;  %v17135_v21 = vld [vmem:[%s24299_s3 + $0xc8] sm:$0xff]  }
 0x4ba   : > { %v17133_v5 = vld [vmem:[%s24299_s3 + $0xd0] sm:$0xff]  }
 0x4bb   : > { %v13100_v7 = vmax.f32 %v11565_v42, 0.0  ;;  %v13108_v4 = vmax.f32 %v11575_v63, 0.0 }
 0x4bc   : > { %15312 = vmatpush3.bf16.msra.mxu1 %v17128_v3 }
 0x4bd   : > { %15313 = vmatprep.subr.bf16.mxu1 %v17129_v37  ;;  %v13124_v20 = vpack.c.bf16 %v13100_v7, %v13096_v15  ;;  %v13128_v51 = vpack.c.bf16 %v13108_v4, %v13104_v47 }
 0x4bf   : > { %13435 = vmatmul.mubr.bf16.gmra.mxu0 %v25234_v2 }
 0x4c0   : > { %13442 = vmatprep.mubr.bf16.mxu0 %v13120_v57  ;;  %15314 = vmatpush3.bf16.msra.mxu1 %v17130_v14 }
 0x4c1   : > { %15315 = vmatprep.subr.bf16.mxu1 %v17131_v53 }
 0x4c4   : > { %15316 = vmatpush3.bf16.msra.mxu1 %v17132_v33 }
 0x4c5   : > { %15317 = vmatprep.subr.bf16.mxu1 %v17133_v5 }
 0x4c7   : > { %13443 = vmatmul.mubr.bf16.gmra.mxu0 %v25239_v9 }
 0x4c8   : > { %13450 = vmatprep.mubr.bf16.mxu0 %v13124_v20  ;;  %15318 = vmatpush3.bf16.msra.mxu1 %v17134_v31 }
 0x4c9   : > { %15319 = vmatprep.subr.bf16.mxu1 %v17135_v21 }
 0x4cc   : > { %15320 = vmatpush3.bf16.msra.mxu1 %v17136_v12 }
 0x4cf   : > { %v12607_v16 = vpop.f32.mrf.mxu0  ;;  %13451 = vmatmul.mubr.bf16.gmra.mxu0 %v25241_v23 }
 0x4d0   : > { %v12690_v58 = vpop.f32.mrf.mxu1  ;;  %v12608_v0 = vadd.f32 %v12607_v16, %v23875_v19  ;;  %13458 = vmatprep.mubr.bf16.mxu0 %v13128_v51 }
 0x4d1   : > { %v12609_v32 = vpop.f32.mrf.mxu0 }
 0x4d2   : > { %v12692_v56 = vpop.f32.mrf.mxu1  ;;  %v24089_v40 = vadd.f32 %v12690_v58, %v12608_v0  ;;  %v12610_v48 = vadd.f32 %v12609_v32, %v23885_v46 }
 0x4d3   : > { %v12611_v62 = vpop.f32.mrf.mxu0 }
 0x4d4   : > { %v12694_v45 = vpop.f32.mrf.mxu1  ;;  %v24095_v30 = vadd.f32 %v12692_v56, %v12610_v48  ;;  %v12612_v19 = vadd.f32 %v12611_v62, %v23896_v34 }
 0x4d5   : > { %v12613_v44 = vpop.f32.mrf.mxu0 }
 0x4d6   : > { %v12696_v43 = vpop.f32.mrf.mxu1  ;;  %v24101_v59 = vadd.f32 %v12694_v45, %v12612_v19  ;;  %v12614_v46 = vadd.f32 %v12613_v44, %v23907_v52  ;;  %v17137_v52 = vld [vmem:[%s24299_s3 + $0xc0] sm:$0xff]  }
 0x4d7   : > { %v12617_v8 = vpop.f32.mrf.mxu0  ;;  %13459 = vmatmul.mubr.bf16.gmra.mxu0 %v25242_v39  ;;  %15321 = vmatprep.subr.bf16.mxu1 %v17137_v52 }
 0x4d8   : > { %v12700_v55 = vpop.f32.mrf.mxu1  ;;  %v24108_v34 = vadd.f32 %v12696_v43, %v12614_v46  ;;  %v12618_v42 = vadd.f32 %v12617_v8, %v23919_v27  ;;  %15322 = vmatpush3.bf16.msra.mxu1 %v17138_v50 }
 0x4d9   : > { %v12619_v57 = vpop.f32.mrf.mxu0 }
 0x4da   : > { %v12702_v3 = vpop.f32.mrf.mxu1  ;;  %v12620_v2 = vadd.f32 %v12619_v57, %v23930_v18  ;;  %v24115_v37 = vadd.f32 %v12700_v55, %v12618_v42 }
 0x4db   : > { %v12621_v54 = vpop.f32.mrf.mxu0 }
 0x4dc   : > { %v12704_v7 = vpop.f32.mrf.mxu1  ;;  %v12622_v27 = vadd.f32 %v12621_v54, %v23938_v25  ;;  %v24121_v13 = vadd.f32 %v12702_v3, %v12620_v2 }
 0x4dd   : > { %v12623_v49 = vpop.f32.mrf.mxu0 }
 0x4de   : > { %v12706_v14 = vpop.f32.mrf.mxu1  ;;  %v12624_v53 = vadd.f32 %v12623_v49, %v23949_v11  ;;  %v24124_v61 = vadd.f32 %v12704_v7, %v12622_v27 }
 0x4df   : > { %v12627_v18 = vpop.f32.mrf.mxu0 }
 0x4e0   : > { %v12710_v15 = vpop.f32.mrf.mxu1  ;;  %v12628_v22 = vadd.f32 %v12627_v18, %v23961_v6  ;;  %v24127_v63 = vadd.f32 %v12706_v14, %v12624_v53 }
 0x4e1   : > { %v12629_v20 = vpop.f32.mrf.mxu0 }
 0x4e2   : > { %v12712_v33 = vpop.f32.mrf.mxu1  ;;  %v12630_v9 = vadd.f32 %v12629_v20, %v23970_v10  ;;  %v24130_v25 = vadd.f32 %v12710_v15, %v12628_v22 }
 0x4e3   : > { %v12631_v4 = vpop.f32.mrf.mxu0 }
 0x4e4   : > { %v12714_v29 = vpop.f32.mrf.mxu1  ;;  %v12632_v47 = vadd.f32 %v12631_v4, %v23979_v24  ;;  %v24133_v51 = vadd.f32 %v12712_v33, %v12630_v9 }
 0x4e5   : > { %v12633_v11 = vpop.f32.mrf.mxu0 }
 0x4e6   : > { %v12716_v16 = vpop.f32.mrf.mxu1  ;;  %v12634_v58 = vadd.f32 %v12633_v11, %v23990_v28  ;;  %v24136_v23 = vadd.f32 %v12714_v29, %v12632_v47 }
 0x4e7   : > { %v12637_v6 = vpop.f32.mrf.mxu0 }
 0x4e8   : > { %v12720_v0 = vpop.f32.mrf.mxu1  ;;  %v12638_v32 = vadd.f32 %v12637_v6, %v24001_v38  ;;  %v24139_v56 = vadd.f32 %v12716_v16, %v12634_v58 }
 0x4e9   : > { %v12639_v10 = vpop.f32.mrf.mxu0 }
 0x4ea   : > { %v12722_v5 = vpop.f32.mrf.mxu1  ;;  %v12640_v48 = vadd.f32 %v12639_v10, %v24007_v35  ;;  %v24142_v31 = vadd.f32 %v12720_v0, %v12638_v32 }
 0x4eb   : > { %v12641_v24 = vpop.f32.mrf.mxu0 }
 0x4ec   : > { %v12724_v62 = vpop.f32.mrf.mxu1  ;;  %v12642_v45 = vadd.f32 %v12641_v24, %v24013_v1  ;;  %v24145_v19 = vadd.f32 %v12722_v5, %v12640_v48 }
 0x4ed   : > { %v12643_v28 = vpop.f32.mrf.mxu0 }
 0x4ee   : > { %v12726_v44 = vpop.f32.mrf.mxu1  ;;  %v12644_v43 = vadd.f32 %v12643_v28, %v24020_v41  ;;  %v24148_v21 = vadd.f32 %v12724_v62, %v12642_v45 }
 0x4ef   : > { %v12647_v38 = vpop.f32.mrf.mxu0 }
 0x4f0   : > { %v12730_v46 = vpop.f32.mrf.mxu1  ;;  %v12648_v12 = vadd.f32 %v12647_v38, %v24025_v36  ;;  %v24151_v8 = vadd.f32 %v12726_v44, %v12644_v43 }
 0x4f1   : > { %v12649_v35 = vpop.f32.mrf.mxu0 }
 0x4f2   : > { %v12732_v39 = vpop.f32.mrf.mxu1  ;;  %v12650_v55 = vadd.f32 %v12649_v35, %v24031_v60  ;;  %v24154_v42 = vadd.f32 %v12730_v46, %v12648_v12 }
 0x4f3   : > { %v12651_v1 = vpop.f32.mrf.mxu0 }
 0x4f4   : > { %v12734_v57 = vpop.f32.mrf.mxu1  ;;  %v12652_v3 = vadd.f32 %v12651_v1, %v24036_v17  ;;  %v24157_v52 = vadd.f32 %v12732_v39, %v12650_v55 }
 0x4f5   : > { %v12653_v41 = vpop.f32.mrf.mxu0 }
 0x4f6   : > { %v12736_v2 = vpop.f32.mrf.mxu1  ;;  %v12654_v50 = vadd.f32 %v12653_v41, %v24043_v26  ;;  %v24160_v54 = vadd.f32 %v12734_v57, %v12652_v3 }
 0x4f8   : > { %25243 = vst [vmem:[#allocation76_spill] sm:$0xff] %v24160_v54  ;;  %v24162_v36 = vadd.f32 %v12736_v2, %v12654_v50 }
 0x4fa   : > { %25244 = vst [vmem:[#allocation77_spill] sm:$0xff] %v24162_v36 }
 0x50f   : > { %v12773_v7 = vpop.f32.mrf.mxu0 }
 0x510   : > { %v12856_v27 = vpop.f32.mrf.mxu1  ;;  %v12774_v1 = vadd.f32 %v12773_v7, %v24089_v40 }
 0x511   : > { %v12775_v49 = vpop.f32.mrf.mxu0 }
 0x512   : > { %v12858_v60 = vpop.f32.mrf.mxu1  ;;  %v12776_v57 = vadd.f32 %v12775_v49, %v24095_v30  ;;  %v12857_v2 = vadd.f32 %v12856_v27, %v12774_v1 }
 0x513   : > { %v12777_v14 = vpop.f32.mrf.mxu0 }
 0x514   : > { %v12860_v53 = vpop.f32.mrf.mxu1  ;;  %v12778_v50 = vadd.f32 %v12777_v14, %v24101_v59  ;;  %v12859_v54 = vadd.f32 %v12858_v60, %v12776_v57 }
 0x515   : > { %v12779_v18 = vpop.f32.mrf.mxu0 }
 0x516   : > { %v12862_v15 = vpop.f32.mrf.mxu1 }
 0x517   : > { %v12783_v22 = vpop.f32.mrf.mxu0 }
 0x518   : > { %v12866_v17 = vpop.f32.mrf.mxu1  ;;  %v12784_v40 = vadd.f32 %v12783_v22, %v24115_v37 }
 0x519   : > { %v12785_v20 = vpop.f32.mrf.mxu0 }
 0x51a   : > { %v12868_v33 = vpop.f32.mrf.mxu1  ;;  %v12786_v30 = vadd.f32 %v12785_v20, %v24121_v13  ;;  %v12867_v57 = vadd.f32 %v12866_v17, %v12784_v40 }
 0x51b   : > { %v12787_v9 = vpop.f32.mrf.mxu0 }
 0x51c   : > { %v12870_v4 = vpop.f32.mrf.mxu1  ;;  %v12788_v59 = vadd.f32 %v12787_v9, %v24124_v61 }
 0x51d   : > { %v12789_v29 = vpop.f32.mrf.mxu0 }
 0x51e   : > { %v24164_v26 = vpop.f32.mrf.mxu1 }
 0x51f   : > { %v12793_v47 = vpop.f32.mrf.mxu0 }
 0x520   : > { %v24166_v11 = vpop.f32.mrf.mxu1 }
 0x521   : > { %v24168_v16 = vpop.f32.mrf.mxu0 }
 0x522   : > { %v24170_v58 = vpop.f32.mrf.mxu1 }
 0x523   : > { %v24172_v6 = vpop.f32.mrf.mxu0 }
 0x524   : > { %v24174_v0 = vpop.f32.mrf.mxu1 }
 0x525   : > { %v24176_v32 = vpop.f32.mrf.mxu0 }
 0x526   : > { %v24178_v10 = vpop.f32.mrf.mxu1 }
 0x527   : > { %v24180_v5 = vpop.f32.mrf.mxu0 }
 0x528   : > { %v24182_v48 = vpop.f32.mrf.mxu1 }
 0x529   : > { %v24184_v24 = vpop.f32.mrf.mxu0 }
 0x52a   : > { %v24186_v62 = vpop.f32.mrf.mxu1 }
 0x52b   : > { %v24188_v45 = vpop.f32.mrf.mxu0 }
 0x52c   : > { %v24190_v28 = vpop.f32.mrf.mxu1 }
 0x52d   : > { %v24192_v44 = vpop.f32.mrf.mxu0 }
 0x52e   : > { %v24194_v43 = vpop.f32.mrf.mxu1 }
 0x52f   : > { %25245 = vst [vmem:[#allocation80_spill] sm:$0xff] %v24194_v43  ;;  %v24196_v38 = vpop.f32.mrf.mxu0 }
 0x530   : > { %v24198_v46 = vpop.f32.mrf.mxu1 }
 0x531   : > { %25246 = vst [vmem:[#allocation81_spill] sm:$0xff] %v24198_v46  ;;  %v24200_v12 = vpop.f32.mrf.mxu0 }
 0x532   : > { %25247 = vst [vmem:[#allocation82_spill] sm:$0xff] %v24200_v12  ;;  %v24202_v35 = vpop.f32.mrf.mxu1 }
 0x533   : > { %25248 = vst [vmem:[#allocation83_spill] sm:$0xff] %v24202_v35  ;;  %v24204_v39 = vpop.f32.mrf.mxu0  ;;  %v12780_v35 = vadd.f32 %v12779_v18, %v24108_v34 }
 0x534   : > { %25249 = vst [vmem:[#allocation86_spill] sm:$0xff] %v24204_v39  ;;  %v24206_v55 = vpop.f32.mrf.mxu1 }
 0x535   : > { %25250 = vst [vmem:[#allocation88_spill] sm:$0xff] %v24206_v55  ;;  %v24210_v3 = vpop.f32.mrf.mxu0  ;;  %v12861_v55 = vadd.f32 %v12860_v53, %v12778_v50  ;;  %v12790_v53 = vadd.f32 %v12789_v29, %v24127_v63 }
 0x536   : > { %25251 = vst [vmem:[#allocation87_spill] sm:$0xff] %v24210_v3  ;;  %v24212_v41 = vpop.f32.mrf.mxu1 }
 0x537   : > { %25252 = vst [vmem:[#allocation89_spill] sm:$0xff] %v24212_v41  ;;  %v12863_v41 = vadd.f32 %v12862_v15, %v12780_v35  ;;  %v12871_v15 = vadd.f32 %v12870_v4, %v12788_v59  ;;  %v12873_v29 = vadd.f32 %v24164_v26, %v12790_v53  ;;  %v12798_v4 = vadd.f32 %v24172_v6, %v24136_v23 }
 0x539   : > { %v12881_v6 = vadd.f32 %v24174_v0, %v12798_v4  ;;  %v12808_v0 = vadd.f32 %v24188_v45, %v24148_v21 }
 0x53b   : > { %v12891_v45 = vadd.f32 %v24190_v28, %v12808_v0  ;;  %v25255_v28 = vld [vmem:[#allocation76_spill] sm:$0xff] }
 0x54f   : > { %v12939_v36 = vpop.f32.mrf.mxu0 }
 0x550   : > { %v13022_v46 = vpop.f32.mrf.mxu1  ;;  %v12940_v43 = vadd.f32 %v12939_v36, %v12857_v2  ;;  %v12869_v2 = vadd.f32 %v12868_v33, %v12786_v30  ;;  %v12796_v33 = vadd.f32 %v24168_v16, %v24133_v51  ;;  %v12800_v16 = vadd.f32 %v24176_v32, %v24139_v56 }
 0x551   : > { %v12941_v39 = vpop.f32.mrf.mxu0  ;;  %v12806_v56 = vadd.f32 %v24184_v24, %v24145_v19  ;;  %v12810_v24 = vadd.f32 %v24192_v44, %v24151_v8  ;;  %v25253_v8 = vld [vmem:[#allocation82_spill] sm:$0xff] }
 0x552   : > { %v13024_v12 = vpop.f32.mrf.mxu1  ;;  %v12942_v7 = vadd.f32 %v12941_v39, %v12859_v54  ;;  %v13023_v27 = vadd.f32 %v13022_v46, %v12940_v43  ;;  %v12794_v43 = vadd.f32 %v12793_v47, %v24130_v25  ;;  %v12879_v51 = vadd.f32 %v24170_v58, %v12796_v33 }
 0x553   : > { %v12943_v49 = vpop.f32.mrf.mxu0  ;;  %v12883_v53 = vadd.f32 %v24178_v10, %v12800_v16  ;;  %v12889_v19 = vadd.f32 %v24186_v62, %v12806_v56  ;;  %v12816_v44 = vadd.f32 %v25253_v8, %v24157_v52 }
 0x554   : > { %v13026_v3 = vpop.f32.mrf.mxu1  ;;  %v12944_v1 = vadd.f32 %v12943_v49, %v12861_v55  ;;  %v13025_v34 = vadd.f32 %v13024_v12, %v12942_v7  ;;  %v13073_v22 = vmax.f32 %v13023_v27, 0.0  ;;  %v12877_v40 = vadd.f32 %v24166_v11, %v12794_v43 }
 0x555   : > { %v12945_v14 = vpop.f32.mrf.mxu0  ;;  %v12804_v11 = vadd.f32 %v24180_v5, %v24142_v31 }
 0x556   : > { %v13028_v60 = vpop.f32.mrf.mxu1  ;;  %v13027_v36 = vadd.f32 %v13026_v3, %v12944_v1  ;;  %v12946_v18 = vadd.f32 %v12945_v14, %v12863_v41  ;;  %v13074_v9 = vmax.f32 %v13025_v34, 0.0 }
 0x557   : > { %v12949_v37 = vpop.f32.mrf.mxu0 }
 0x558   : > { %v13032_v54 = vpop.f32.mrf.mxu1  ;;  %v13077_v13 = vmax.f32 %v13027_v36, 0.0  ;;  %v13029_v20 = vadd.f32 %v13028_v60, %v12946_v18  ;;  %v12950_v39 = vadd.f32 %v12949_v37, %v12867_v57 }
 0x559   : > { %v12951_v46 = vpop.f32.mrf.mxu0 }
 0x55a   : > { %v13034_v61 = vpop.f32.mrf.mxu1  ;;  %v13113_v35 = vpack.c.bf16 %v13077_v13, %v13073_v22  ;;  %v13078_v17 = vmax.f32 %v13029_v20, 0.0  ;;  %v12952_v12 = vadd.f32 %v12951_v46, %v12869_v2  ;;  %v13033_v41 = vadd.f32 %v13032_v54, %v12950_v39 }
 0x55b   : > { %v12953_v55 = vpop.f32.mrf.mxu0  ;;  %v12887_v13 = vadd.f32 %v24182_v48, %v12804_v11  ;;  %v12814_v48 = vadd.f32 %v24196_v38, %v24154_v42 }
 0x55c   : > { %v13036_v63 = vpop.f32.mrf.mxu1  ;;  %v13114_v3 = vpack.c.bf16 %v13078_v17, %v13074_v9  ;;  %v12954_v50 = vadd.f32 %v12953_v55, %v12871_v15  ;;  %v13035_v7 = vadd.f32 %v13034_v61, %v12952_v12  ;;  %v13081_v1 = vmax.f32 %v13033_v41, 0.0 }
 0x55d   : > { %v12955_v25 = vpop.f32.mrf.mxu0 }
 0x55e   : > { %v13038_v47 = vpop.f32.mrf.mxu1  ;;  %v13037_v30 = vadd.f32 %v13036_v63, %v12954_v50  ;;  %v12956_v49 = vadd.f32 %v12955_v25, %v12873_v29  ;;  %13499 = vmatprep.mubr.bf16.mxu1 %v13114_v3  ;;  %v13082_v34 = vmax.f32 %v13035_v7, 0.0  ;;  %v25254_v3 = vld [vmem:[#allocation80_spill] sm:$0xff]  ;;  %v25257_v7 = vld [vmem:[#allocation81_spill] sm:$0xff] }
 0x55f   : > { %v12959_v26 = vpop.f32.mrf.mxu0  ;;  %13500 = vmatmul.mubr.bf16.vlgmr.msra.gmra.mxu1 %v13113_v35  ;;  %v12893_v41 = vadd.f32 %v25254_v3, %v12810_v24 }
 0x560   : > { %v13042_v27 = vpop.f32.mrf.mxu1  ;;  %v13085_v59 = vmax.f32 %v13037_v30, 0.0  ;;  %v13039_v14 = vadd.f32 %v13038_v47, %v12956_v49  ;;  %v12960_v23 = vadd.f32 %v12959_v26, %v12877_v40  ;;  %v25256_v47 = vld [vmem:[#allocation86_spill] sm:$0xff]  ;;  %v12897_v30 = vadd.f32 %v25257_v7, %v12814_v48  ;;  %v25258_v26 = vld [vmem:[#allocation83_spill] sm:$0xff] }
 0x561   : > { %v12961_v60 = vpop.f32.mrf.mxu0  ;;  %v12818_v40 = vadd.f32 %v25256_v47, %v25255_v28  ;;  %v12899_v52 = vadd.f32 %v25258_v26, %v12816_v44 }
 0x562   : > { %v13044_v57 = vpop.f32.mrf.mxu1  ;;  %v13117_v36 = vpack.c.bf16 %v13085_v59, %v13081_v1  ;;  %v13086_v58 = vmax.f32 %v13039_v14, 0.0  ;;  %v12962_v18 = vadd.f32 %v12961_v60, %v12879_v51  ;;  %v13043_v54 = vadd.f32 %v13042_v27, %v12960_v23  ;;  %v25259_v27 = vld [vmem:[#allocation77_spill] sm:$0xff]  ;;  %v25260_v1 = vld [vmem:[#allocation87_spill] sm:$0xff] }
 0x563   : > { %v12963_v32 = vpop.f32.mrf.mxu0  ;;  %v12820_v59 = vadd.f32 %v25260_v1, %v25259_v27 }
 0x564   : > { %v13046_v2 = vpop.f32.mrf.mxu1  ;;  %v13118_v37 = vpack.c.bf16 %v13086_v58, %v13082_v34  ;;  %v12964_v22 = vadd.f32 %v12963_v32, %v12881_v6  ;;  %v13045_v20 = vadd.f32 %v13044_v57, %v12962_v18  ;;  %v13089_v46 = vmax.f32 %v13043_v54, 0.0  ;;  %v25261_v34 = vld [vmem:[#allocation88_spill] sm:$0xff] }
 0x565   : > { %v12965_v31 = vpop.f32.mrf.mxu0 }
 0x566   : > { %v13048_v5 = vpop.f32.mrf.mxu1  ;;  %v13047_v39 = vadd.f32 %v13046_v2, %v12964_v22  ;;  %v12966_v15 = vadd.f32 %v12965_v31, %v12883_v53  ;;  %13507 = vmatprep.mubr.bf16.mxu1 %v13118_v37  ;;  %v13090_v12 = vmax.f32 %v13045_v20, 0.0  ;;  %v25262_v22 = vld [vmem:[#allocation89_spill] sm:$0xff] }
 0x567   : > { %v12969_v10 = vpop.f32.mrf.mxu0  ;;  %13508 = vmatmul.mubr.bf16.gmra.mxu1 %v13117_v36  ;;  %v12901_v36 = vadd.f32 %v25261_v34, %v12818_v40  ;;  %v12903_v0 = vadd.f32 %v25262_v22, %v12820_v59 }
 0x568   : > { %v13052_v43 = vpop.f32.mrf.mxu1  ;;  %v13093_v61 = vmax.f32 %v13047_v39, 0.0  ;;  %v13049_v9 = vadd.f32 %v13048_v5, %v12966_v15  ;;  %v12970_v21 = vadd.f32 %v12969_v10, %v12887_v13 }
 0x569   : > { %v12971_v35 = vpop.f32.mrf.mxu0 }
 0x56a   : > { %v13054_v17 = vpop.f32.mrf.mxu1  ;;  %v13121_v33 = vpack.c.bf16 %v13093_v61, %v13089_v46  ;;  %v13094_v62 = vmax.f32 %v13049_v9, 0.0  ;;  %v12972_v55 = vadd.f32 %v12971_v35, %v12889_v19  ;;  %v13053_v4 = vadd.f32 %v13052_v43, %v12970_v21 }
 0x56b   : > { %v12973_v63 = vpop.f32.mrf.mxu0 }
 0x56c   : > { %v13056_v29 = vpop.f32.mrf.mxu1  ;;  %v13122_v50 = vpack.c.bf16 %v13094_v62, %v13090_v12  ;;  %v12974_v25 = vadd.f32 %v12973_v63, %v12891_v45  ;;  %v13055_v49 = vadd.f32 %v13054_v17, %v12972_v55  ;;  %v13097_v6 = vmax.f32 %v13053_v4, 0.0 }
 0x56d   : > { %v12975_v42 = vpop.f32.mrf.mxu0 }
 0x56e   : > { %v13058_v38 = vpop.f32.mrf.mxu1  ;;  %v13057_v51 = vadd.f32 %v13056_v29, %v12974_v25  ;;  %v12976_v16 = vadd.f32 %v12975_v42, %v12893_v41  ;;  %13515 = vmatprep.mubr.bf16.mxu1 %v13122_v50  ;;  %v13098_v56 = vmax.f32 %v13055_v49, 0.0  ;;  %v24259_v41 = vld [vmem:[%s24300_s4] ss:$0 sm:$0xff] }
 0x56f   : > { %v12979_v14 = vpop.f32.mrf.mxu0  ;;  %13516 = vmatmul.mubr.bf16.gmra.mxu1 %v13121_v33 }
 0x570   : > { %v13062_v23 = vpop.f32.mrf.mxu1  ;;  %v13101_v11 = vmax.f32 %v13057_v51, 0.0  ;;  %v13059_v60 = vadd.f32 %v13058_v38, %v12976_v16  ;;  %v12980_v57 = vadd.f32 %v12979_v14, %v12897_v30 }
 0x571   : > { %v12981_v58 = vpop.f32.mrf.mxu0 }
 0x572   : > { %v13064_v18 = vpop.f32.mrf.mxu1  ;;  %v13125_v32 = vpack.c.bf16 %v13101_v11, %v13097_v6  ;;  %v13102_v2 = vmax.f32 %v13059_v60, 0.0  ;;  %v12982_v53 = vadd.f32 %v12981_v58, %v12899_v52  ;;  %v13063_v5 = vadd.f32 %v13062_v23, %v12980_v57 }
 0x573   : > { %v12983_v37 = vpop.f32.mrf.mxu0 }
 0x574   : > { %v13066_v54 = vpop.f32.mrf.mxu1  ;;  %v13126_v31 = vpack.c.bf16 %v13102_v2, %v13098_v56  ;;  %v12984_v13 = vadd.f32 %v12983_v37, %v12901_v36  ;;  %v13065_v39 = vadd.f32 %v13064_v18, %v12982_v53  ;;  %v13105_v10 = vmax.f32 %v13063_v5, 0.0 }
 0x575   : > { %v12985_v20 = vpop.f32.mrf.mxu0 }
 0x576   : > { %v13067_v15 = vadd.f32 %v13066_v54, %v12984_v13  ;;  %v12986_v19 = vadd.f32 %v12985_v20, %v12903_v0  ;;  %13523 = vmatprep.mubr.bf16.mxu1 %v13126_v31  ;;  %v13068_v24 = vpop.f32.mrf.mxu1  ;;  %v13106_v61 = vmax.f32 %v13065_v39, 0.0 }
 0x577   : > { %13524 = vmatmul.mubr.bf16.gmra.mxu1 %v13125_v32  ;;  %v15277_v48 = vpop.f32.mrf.mxu0 }
 0x578   : > { %v13109_v43 = vmax.f32 %v13067_v15, 0.0  ;;  %v13069_v46 = vadd.f32 %v13068_v24, %v12986_v19 }
 0x579   : > { %v15278_v35 = vpop.f32.mrf.mxu0 }
 0x57a   : > { %v13129_v9 = vpack.c.bf16 %v13109_v43, %v13105_v10  ;;  %v13110_v21 = vmax.f32 %v13069_v46, 0.0  ;;  %v15279_v3 = vadd.f32 %v15278_v35, %v15277_v48 }
 0x57b   : > { %v15280_v17 = vpop.f32.mrf.mxu0 }
 0x57c   : > { %v13130_v45 = vpack.c.bf16 %v13110_v21, %v13106_v61  ;;  %v13429_v28 = vadd.f32 %v15279_v3, %v24259_v41 }
 0x57d   : > { %v15281_v12 = vpop.f32.mrf.mxu0 }
 0x57e   : > { %13531 = vmatprep.mubr.bf16.mxu1 %v13130_v45  ;;  %v15282_v47 = vadd.f32 %v15281_v12, %v15280_v17 }
 0x57f   : > { %13532 = vmatmul.mubr.bf16.gmra.mxu1 %v13129_v9  ;;  %v15283_v33 = vpop.f32.mrf.mxu0 }
 0x580   : > { %v13432_v49 = vadd.f32 %v15282_v47, %v24259_v41 }
 0x581   : > { %v15284_v62 = vpop.f32.mrf.mxu0 }
 0x582   : > { %v15285_v51 = vadd.f32 %v15284_v62, %v15283_v33 }
 0x583   : > { %v15286_v55 = vpop.f32.mrf.mxu0 }
 0x584   : > { %v13437_v59 = vadd.f32 %v15285_v51, %v24259_v41 }
 0x585   : > { %v15287_v8 = vpop.f32.mrf.mxu0 }
 0x586   : > { %v15288_v14 = vadd.f32 %v15287_v8, %v15286_v55 }
 0x587   : > { %v15289_v44 = vpop.f32.mrf.mxu0 }
 0x588   : > { %v13440_v34 = vadd.f32 %v15288_v14, %v24259_v41 }
 0x589   : > { %v15290_v63 = vpop.f32.mrf.mxu0 }
 0x58a   : > { %v15291_v36 = vadd.f32 %v15290_v63, %v15289_v44 }
 0x58b   : > { %v15292_v29 = vpop.f32.mrf.mxu0 }
 0x58c   : > { %v13445_v53 = vadd.f32 %v15291_v36, %v24259_v41 }
 0x58d   : > { %v15293_v50 = vpop.f32.mrf.mxu0 }
 0x58e   : > { %v15294_v37 = vadd.f32 %v15293_v50, %v15292_v29 }
 0x58f   : > { %v15295_v42 = vpop.f32.mrf.mxu0 }
 0x590   : > { %v13448_v13 = vadd.f32 %v15294_v37, %v24259_v41 }
 0x591   : > { %v15296_v26 = vpop.f32.mrf.mxu0 }
 0x592   : > { %v15297_v20 = vadd.f32 %v15296_v26, %v15295_v42 }
 0x593   : > { %v15298_v6 = vpop.f32.mrf.mxu0 }
 0x594   : > { %v13453_v43 = vadd.f32 %v15297_v20, %v24259_v41 }
 0x595   : > { %v15299_v18 = vpop.f32.mrf.mxu0 }
 0x596   : > { %v15300_v46 = vadd.f32 %v15299_v18, %v15298_v6 }
 0x597   : > { %v15301_v22 = vpop.f32.mrf.mxu0 }
 0x598   : > { %v13456_v35 = vadd.f32 %v15300_v46, %v24259_v41 }
 0x599   : > { %v15302_v15 = vpop.f32.mrf.mxu0 }
 0x59a   : > { %v15303_v17 = vadd.f32 %v15302_v15, %v15301_v22 }
 0x59b   : > { %v15304_v9 = vpop.f32.mrf.mxu0 }
 0x59c   : > { %v13461_v44 = vadd.f32 %v15303_v17, %v24259_v41 }
 0x59d   : > { %v15305_v33 = vpop.f32.mrf.mxu0 }
 0x59e   : > { %v15306_v63 = vadd.f32 %v15305_v33, %v15304_v9 }
 0x61f   : > { %v15323_v4 = vpop.f32.mrf.mxu1 }
 0x621   : > { %v15324_v25 = vpop.f32.mrf.mxu1 }
 0x622   : > { %v15325_v40 = vadd.f32 %v15324_v25, %v15323_v4  ;;  %v13464_v25 = vadd.f32 %v15306_v63, %v24259_v41 }
 0x623   : > { %v15326_v38 = vpop.f32.mrf.mxu1 }
 0x624   : > { %v13502_v7 = vadd.f32 %v15325_v40, %v13429_v28 }
 0x625   : > { %v15327_v30 = vpop.f32.mrf.mxu1 }
 0x626   : > { %13540 = vst [vmem:[%s24266_s28] sm:$0xff] %v13502_v7  ;;  %v15328_v16 = vadd.f32 %v15327_v30, %v15326_v38 }
 0x627   : > { %v15329_v52 = vpop.f32.mrf.mxu1 }
 0x628   : > { %v13505_v27 = vadd.f32 %v15328_v16, %v13432_v49 }
 0x629   : > { %v15330_v1 = vpop.f32.mrf.mxu1 }
 0x62a   : > { %13541 = vst [vmem:[%s24266_s28 + $0x8] sm:$0xff] %v13505_v27  ;;  %v15331_v23 = vadd.f32 %v15330_v1, %v15329_v52 }
 0x62b   : > { %v15332_v11 = vpop.f32.mrf.mxu1 }
 0x62c   : > { %v13510_v60 = vadd.f32 %v15331_v23, %v13437_v59 }
 0x62d   : > { %v15333_v57 = vpop.f32.mrf.mxu1 }
 0x62e   : > { %13542 = vst [vmem:[%s24266_s28 + $0x10] sm:$0xff] %v13510_v60  ;;  %v15334_v58 = vadd.f32 %v15333_v57, %v15332_v11 }
 0x62f   : > { %v15335_v56 = vpop.f32.mrf.mxu1 }
 0x630   : > { %v13513_v32 = vadd.f32 %v15334_v58, %v13440_v34 }
 0x631   : > { %v15336_v2 = vpop.f32.mrf.mxu1 }
 0x632   : > { %13543 = vst [vmem:[%s24266_s28 + $0x18] sm:$0xff] %v13513_v32  ;;  %v15337_v54 = vadd.f32 %v15336_v2, %v15335_v56 }
 0x633   : > { %v15338_v0 = vpop.f32.mrf.mxu1 }
 0x634   : > { %v13518_v31 = vadd.f32 %v15337_v54, %v13445_v53 }
 0x635   : > { %v15339_v5 = vpop.f32.mrf.mxu1 }
 0x636   : > { %13544 = vst [vmem:[%s24266_s28 + $0x20] sm:$0xff] %v13518_v31  ;;  %v15340_v39 = vadd.f32 %v15339_v5, %v15338_v0 }
 0x637   : > { %v15341_v19 = vpop.f32.mrf.mxu1 }
 0x638   : > { %v13521_v24 = vadd.f32 %v15340_v39, %v13448_v13 }
 0x639   : > { %v15342_v10 = vpop.f32.mrf.mxu1 }
 0x63a   : > { %13545 = vst [vmem:[%s24266_s28 + $0x28] sm:$0xff] %v13521_v24  ;;  %v15343_v61 = vadd.f32 %v15342_v10, %v15341_v19 }
 0x63b   : > { %v15344_v21 = vpop.f32.mrf.mxu1 }
 0x63c   : > { %v13526_v45 = vadd.f32 %v15343_v61, %v13453_v43 }
 0x63d   : > { %v15345_v48 = vpop.f32.mrf.mxu1 }
 0x63e   : > { %13546 = vst [vmem:[%s24266_s28 + $0x30] sm:$0xff] %v13526_v45  ;;  %v15346_v12 = vadd.f32 %v15345_v48, %v15344_v21 }
 0x63f   : > { %v15347_v62 = vpop.f32.mrf.mxu1 }
 0x640   : > { %v13529_v55 = vadd.f32 %v15346_v12, %v13456_v35 }
 0x641   : > { %v15348_v8 = vpop.f32.mrf.mxu1 }
 0x642   : > { %13547 = vst [vmem:[%s24266_s28 + $0x38] sm:$0xff] %v13529_v55  ;;  %v15349_v29 = vadd.f32 %v15348_v8, %v15347_v62 }
 0x643   : > { %v15350_v3 = vpop.f32.mrf.mxu1 }
 0x644   : > { %v13534_v50 = vadd.f32 %v15349_v29, %v13461_v44 }
 0x645   : > { %v15351_v4 = vpop.f32.mrf.mxu1 }
 0x646   : > { %13548 = vst [vmem:[%s24266_s28 + $0x40] sm:$0xff] %v13534_v50  ;;  %v15352_v28 = vadd.f32 %v15351_v4, %v15350_v3 }
 0x648   : > { %v13537_v47 = vadd.f32 %v15352_v28, %v13464_v25 }
 0x64a   : > { %13549 = vst [vmem:[%s24266_s28 + $0x48] sm:$0xff] %v13537_v47 }
 0x64b PF: > { %s15_s20 = sadd.s32 1, %s17162_s20   ;;  %s25263_s18 = smov %s17158_s19 }
 0x64c   : > { %p12_p5 = scmp.ge.s32.totalorder %s15_s20, 4   ;;  %s25264_s19 = smov %s25266_s21 }
 0x64e   :  { %14 = sbr.rel (!%p12_p5) target bundleno = 2 (0x2), region = 73 }

</bundles_post_ra>
